<compile_context>
chip_gen: v5e
topology: v5e:2x2
jax: 0.10.0
libtpu: 0.0.40
codegen_flags: <defaults>
</compile_context>

<pallas_src>
import math
import functools

import jax
import jax.numpy as jnp
from jax.experimental import pallas as pl
from jax.experimental.pallas import tpu as pltpu

CP = 128  # padded channel width (lane-dense layout)


# ----------------------------------------------------------------------------
# In-kernel helpers
# ----------------------------------------------------------------------------
def _pad_hw(y, H, W, C):
    """Zero-pad a (H, W, C) bf16 image with a 1-px spatial halo -> (H+2, W+2, C)."""
    zrow = jnp.zeros((1, W, C), y.dtype)
    y = jnp.concatenate([zrow, y, zrow], axis=0)
    zcol = jnp.zeros((H + 2, 1, C), y.dtype)
    return jnp.concatenate([zcol, y, zcol], axis=1)


def _im2col_taps(yp, H, W, C):
    """yp: padded (H+2, W+2, C) bf16 -> (H*W, 9*C) bf16 K-stacked im2col taps."""
    return jnp.concatenate(
        [yp[di:di + H, dj:dj + W, :].reshape(H * W, C)
         for di in range(3) for dj in range(3)], axis=1)


# ----------------------------------------------------------------------------
# Pallas kernels
# ----------------------------------------------------------------------------
def _stem_kernel(xp_ref, w_ref, o_ref, *, H, W):
    # stem 3x3 conv (no BN/ReLU).  Input is already spatially padded (halo=1),
    # so the nine taps are plain static slices; one K=9*CP bf16 MXU dot.
    C = xp_ref.shape[-1]
    taps = _im2col_taps(xp_ref[0], H, W, C)                       # (H*W, 9C)
    out = jnp.dot(taps, w_ref[...], preferred_element_type=jnp.float32)
    o_ref[0] = out.reshape(H, W, C).astype(o_ref.dtype)


def _dense_block_kernel(x_ref, bn1s_ref, bn1b_ref, w1_ref, bn2s_ref, bn2b_ref,
                        w2_ref, o_ref, state_ref, *, H, W):
    # One whole dense block.  grid = (batch, layer); the concat-activation
    # lives in `state_ref` (bf16 VMEM) across the layer axis.
    C = x_ref.shape[-1]
    l = pl.program_id(1)

    @pl.when(l == 0)
    def _():                                   # load this image's activation once
        state_ref[...] = x_ref[0]

    x = state_ref[...].astype(jnp.float32)                        # (H, W, C)

    # 1x1 bottleneck conv:  h1 = relu(bn1(x)) @ W1
    y1 = jnp.maximum(x * bn1s_ref[0] + bn1b_ref[0], 0.0)
    y1 = y1.reshape(H * W, C).astype(jnp.bfloat16)
    h1 = jnp.dot(y1, w1_ref[0], preferred_element_type=jnp.float32)

    # 3x3 conv as ONE K-stacked MXU dot:  delta = im2col(relu(bn2(h1))) @ W2
    y2 = jnp.maximum(h1 * bn2s_ref[0] + bn2b_ref[0], 0.0).astype(jnp.bfloat16)
    taps = _im2col_taps(_pad_hw(y2.reshape(H, W, C), H, W, C), H, W, C)
    delta = jnp.dot(taps, w2_ref[0], preferred_element_type=jnp.float32)

    # DenseNet concat == add (W2 columns sit at this layer's channel offset;
    # untouched channels see delta == 0 exactly).
    state_ref[...] = (x + delta.reshape(H, W, C)).astype(jnp.bfloat16)

    @pl.when(l == pl.num_programs(1) - 1)
    def _():
        o_ref[0] = state_ref[...]


def _transition_kernel(x_ref, pool_ref, w_ref, s_ref, b_ref, o_ref, *, H, W):
    # BN+ReLU -> 2x2 avg pool -> 1x1 conv, single HBM pass.
    # The pool is a small MXU dot with a (Ho*Wo, H*W) 0/0.25 matrix; the pool
    # commutes with the linear 1x1 conv so pooling first is exact.
    C = x_ref.shape[-1]
    y = jnp.maximum(x_ref[0].astype(jnp.float32) * s_ref[...] + b_ref[...], 0.0)
    y = y.reshape(H * W, C).astype(jnp.bfloat16)
    pooled = jnp.dot(pool_ref[...], y, preferred_element_type=jnp.float32)
    o_ref[0] = jnp.dot(pooled.astype(jnp.bfloat16), w_ref[...],
                       preferred_element_type=jnp.float32).astype(o_ref.dtype)


def _head_kernel(x_ref, w_ref, s_ref, b_ref, fb_ref, o_ref):
    # final BN+ReLU -> global 8x8 average pool -> FC
    y = jnp.maximum(x_ref[...].astype(jnp.float32) * s_ref[...] + b_ref[...], 0.0)
    pooled = jnp.mean(y, axis=1)                                   # (N, C)
    o_ref[...] = (jnp.dot(pooled.astype(jnp.bfloat16), w_ref[...],
                          preferred_element_type=jnp.float32) + fb_ref[...])


# ----------------------------------------------------------------------------
# Pallas wrappers
# ----------------------------------------------------------------------------
def stem_conv(x_pad, w):
    N, Hp, Wp, C = x_pad.shape
    H, W = Hp - 2, Wp - 2
    return pl.pallas_call(
        functools.partial(_stem_kernel, H=H, W=W),
        out_shape=jax.ShapeDtypeStruct((N, H, W, C), jnp.bfloat16),
        grid=(N,),
        in_specs=[pl.BlockSpec((1, Hp, Wp, C), lambda n: (n, 0, 0, 0)),
                  pl.BlockSpec((9 * C, C), lambda n: (0, 0))],
        out_specs=pl.BlockSpec((1, H, W, C), lambda n: (n, 0, 0, 0)),
        compiler_params=pltpu.CompilerParams(dimension_semantics=("parallel",)),
    )(x_pad, w)


def dense_block(x, bp):
    N, H, W, C = x.shape
    n_layers = bp['conv1_w'].shape[0]
    return pl.pallas_call(
        functools.partial(_dense_block_kernel, H=H, W=W),
        out_shape=jax.ShapeDtypeStruct((N, H, W, C), jnp.bfloat16),
        grid=(N, n_layers),
        in_specs=[pl.BlockSpec((1, H, W, C), lambda n, l: (n, 0, 0, 0)),
                  pl.BlockSpec((1, 1, C), lambda n, l: (l, 0, 0)),      # bn1_s
                  pl.BlockSpec((1, 1, C), lambda n, l: (l, 0, 0)),      # bn1_b
                  pl.BlockSpec((1, C, C), lambda n, l: (l, 0, 0)),      # conv1_w
                  pl.BlockSpec((1, 1, C), lambda n, l: (l, 0, 0)),      # bn2_s
                  pl.BlockSpec((1, 1, C), lambda n, l: (l, 0, 0)),      # bn2_b
                  pl.BlockSpec((1, 9 * C, C), lambda n, l: (l, 0, 0))], # conv2_w
        out_specs=pl.BlockSpec((1, H, W, C), lambda n, l: (n, 0, 0, 0)),
        scratch_shapes=[pltpu.VMEM((H, W, C), jnp.bfloat16)],
        compiler_params=pltpu.CompilerParams(
            dimension_semantics=("parallel", "arbitrary")),
    )(x, bp['bn1_s'], bp['bn1_b'], bp['conv1_w'],
      bp['bn2_s'], bp['bn2_b'], bp['conv2_w'])


def _pool_matrix(H, W):
    # (Ho*Wo, H*W) matrix: row p has 0.25 on the four pixels of 2x2 window p.
    Ho, Wo = H // 2, W // 2
    q = jnp.arange(H * W)
    win = (q // W // 2) * Wo + (q % W) // 2
    P = (win[None, :] == jnp.arange(Ho * Wo)[:, None]).astype(jnp.float32) * 0.25
    return P.astype(jnp.bfloat16)


def transition(x, p):
    N, H, W, C = x.shape
    Ho, Wo = H // 2, W // 2
    Mo = Ho * Wo
    pool = _pool_matrix(H, W)
    out = pl.pallas_call(
        functools.partial(_transition_kernel, H=H, W=W),
        out_shape=jax.ShapeDtypeStruct((N, Mo, C), jnp.bfloat16),
        grid=(N,),
        in_specs=[pl.BlockSpec((1, H, W, C), lambda n: (n, 0, 0, 0)),
                  pl.BlockSpec((Mo, H * W), lambda n: (0, 0)),
                  pl.BlockSpec((C, C), lambda n: (0, 0)),
                  pl.BlockSpec((1, C), lambda n: (0, 0)),
                  pl.BlockSpec((1, C), lambda n: (0, 0))],
        out_specs=pl.BlockSpec((1, Mo, C), lambda n: (n, 0, 0)),
        compiler_params=pltpu.CompilerParams(dimension_semantics=("parallel",)),
    )(x, pool, p['conv_w'], p['bn_s'], p['bn_b'])
    return out.reshape(N, Ho, Wo, C)


def head(h, params):
    N, H, W, C = h.shape
    L = H * W
    x3 = h.reshape(N, L, C)
    out = pl.pallas_call(
        _head_kernel,
        out_shape=jax.ShapeDtypeStruct((N, C), jnp.float32),
        grid=(1,),
        in_specs=[pl.BlockSpec((N, L, C), lambda i: (0, 0, 0)),
                  pl.BlockSpec((C, C), lambda i: (0, 0)),
                  pl.BlockSpec((1, C), lambda i: (0, 0)),
                  pl.BlockSpec((1, C), lambda i: (0, 0)),
                  pl.BlockSpec((1, C), lambda i: (0, 0))],
        out_specs=pl.BlockSpec((N, C), lambda i: (0, 0)),
    )(x3, params['fc_w'], params['bn_final_s'], params['bn_final_b'],
      params['fc_b'])
    return out[:, :params['num_classes']]


# ----------------------------------------------------------------------------
# Parameter init (deterministic; matches the PyTorch module's __init__ scheme),
# packed into channel-padded (CP=128) bf16 weights / f32 folded BN scale-bias.
# ----------------------------------------------------------------------------
def _conv_init(key, cout, cin, k):
    n = k * k * cout
    return jax.random.normal(key, (cout, cin, k, k), jnp.float32) * math.sqrt(2.0 / n)


def _pack_conv3(w, c_off=0):
    # torch (cout, cin, 3, 3) -> K-stacked (9*CP, CP); K-block (3*di+dj) holds
    # w[:, :, di, dj]^T at rows [0, cin), columns [c_off, c_off+cout).
    cout, cin = w.shape[0], w.shape[1]
    assert c_off + cout <= CP and cin <= CP
    full = jnp.zeros((9 * CP, CP), jnp.float32)
    for di in range(3):
        for dj in range(3):
            blk = jnp.transpose(w[:, :, di, dj], (1, 0))          # (cin, cout)
            r = (3 * di + dj) * CP
            full = full.at[r:r + cin, c_off:c_off + cout].set(blk)
    return full.astype(jnp.bfloat16)


def _pack_conv1(w):
    cout, cin = w.shape[0], w.shape[1]
    assert cout <= CP and cin <= CP
    wm = jnp.transpose(w[:, :, 0, 0], (1, 0))                     # (cin, cout)
    full = jnp.zeros((CP, CP), jnp.float32)
    full = full.at[:cin, :cout].set(wm)
    return full.astype(jnp.bfloat16)


def _fold_bn(gamma, beta, mean, var, eps=1e-5):
    # General eval-mode BN fold: scale = gamma/sqrt(var+eps), bias = beta-mean*scale.
    # Padded lanes are forced to 0 so relu(bn(0)) == 0 (zero-padding invariant).
    c = gamma.shape[0]
    scale = gamma / jnp.sqrt(var + eps)
    bias = beta - mean * scale
    s = jnp.zeros((1, CP), jnp.float32).at[0, :c].set(scale)
    b = jnp.zeros((1, CP), jnp.float32).at[0, :c].set(bias)
    return s, b


def _bn_init(c):
    # PyTorch init: gamma=1, beta=0, running_mean=0, running_var=1.
    ones = jnp.ones((c,), jnp.float32)
    zeros = jnp.zeros((c,), jnp.float32)
    return _fold_bn(ones, zeros, zeros, ones)


def init_densenet_params(key, depth=16, num_classes=10, growth_rate=8,
                         reduction=0.5):
    n = int((depth - 4) / 3 / 2)          # bottleneck=True
    keys = iter(jax.random.split(key, 64))
    params = {}

    in_planes = 2 * growth_rate
    params['stem_w'] = _pack_conv3(_conv_init(next(keys), in_planes, 3, 3))

    blocks, trans = [], []
    for b in range(3):
        lay = {k: [] for k in ('bn1_s', 'bn1_b', 'conv1_w',
                               'bn2_s', 'bn2_b', 'conv2_w')}
        for i in range(n):
            inp = in_planes + i * growth_rate
            inter = 4 * growth_rate
            s1, b1 = _bn_init(inp)
            s2, b2 = _bn_init(inter)
            lay['bn1_s'].append(s1)
            lay['bn1_b'].append(b1)
            lay['conv1_w'].append(_pack_conv1(_conv_init(next(keys), inter, inp, 1)))
            lay['bn2_s'].append(s2)
            lay['bn2_b'].append(b2)
            # new growth channels land at channel offset `inp`
            # (DenseNet concat == in-kernel add, thanks to zero padding)
            lay['conv2_w'].append(
                _pack_conv3(_conv_init(next(keys), growth_rate, inter, 3),
                            c_off=inp))
        blocks.append({k: jnp.stack(v) for k, v in lay.items()})
        in_planes = in_planes + n * growth_rate
        if b < 2:
            out_p = int(math.floor(in_planes * reduction))
            ts, tb = _bn_init(in_planes)
            trans.append({'bn_s': ts, 'bn_b': tb,
                          'conv_w': _pack_conv1(
                              _conv_init(next(keys), out_p, in_planes, 1))})
            in_planes = out_p

    params['blocks'] = blocks
    params['trans'] = trans
    fs, fb = _bn_init(in_planes)
    params['bn_final_s'], params['bn_final_b'] = fs, fb
    bound = 1.0 / math.sqrt(in_planes)
    fc = jax.random.uniform(next(keys), (in_planes, num_classes),
                            jnp.float32, -bound, bound)
    params['fc_w'] = (jnp.zeros((CP, CP), jnp.float32)
                      .at[:in_planes, :num_classes].set(fc).astype(jnp.bfloat16))
    params['fc_b'] = jnp.zeros((1, CP), jnp.float32)
    params['num_classes'] = num_classes
    params['in_planes'] = in_planes
    return params


# ----------------------------------------------------------------------------
# Full forward
# ----------------------------------------------------------------------------
def densenet3_forward(x_nchw, params):
    # NCHW -> NHWC, channel-pad to CP=128 (lane-dense) and add a 1-px spatial
    # halo so the stem conv's im2col taps are static slices; bf16 activations.
    x = jnp.transpose(x_nchw, (0, 2, 3, 1)).astype(jnp.float32)
    c = x.shape[-1]
    x = jnp.pad(x, ((0, 0), (1, 1), (1, 1), (0, CP - c))).astype(jnp.bfloat16)

    h = stem_conv(x, params['stem_w'])
    for b in range(3):
        h = dense_block(h, params['blocks'][b])
        if b < 2:
            h = transition(h, params['trans'][b])
    return head(h, params)


# ----------------------------------------------------------------------------
if __name__ == "__main__":
    key = jax.random.PRNGKey(0)
    pkey, xkey = jax.random.split(key)

    # depth=16 -> n=2 bottleneck layers per dense block (exercises the fused
    # per-block layer loop); growth_rate=8, 10 classes.
    params = init_densenet_params(pkey, depth=16, num_classes=10,
                                  growth_rate=8, reduction=0.5)

    # CIFAR-style input: batch=2, 3 channels, 32x32 spatial (NCHW like PyTorch)
    x = jax.random.normal(xkey, (2, 3, 32, 32), jnp.float32)

    logits = densenet3_forward(x, params)
    logits = jax.block_until_ready(logits)

    assert logits.shape == (2, 10), logits.shape
    assert bool(jnp.all(jnp.isfinite(logits)))
    print("KERNEL_OK")
</pallas_src>

<mosaic_0001>
module attributes {stable_mosaic.version = 11 : i64} {
  func.func @_stem_kernel(%arg0: i32, %arg1: memref<1x34x34x128xbf16, #tpu.memory_space<vmem>>, %arg2: memref<1152x128xbf16, #tpu.memory_space<vmem>>, %arg3: memref<1x32x32x128xbf16, #tpu.memory_space<vmem>>) attributes {dimension_semantics = [#tpu.dimension_semantics<parallel>], iteration_bounds = array<i64: 2>, scalar_prefetch = 0 : i64, scratch_operands = 0 : i64, tpu.core_type = #tpu.core_type<tc>, window_params = [{transform_indices = @transform_0, window_bounds = array<i64: 1, 34, 34, 128>}, {pipeline_mode = #tpu.pipeline_mode<synchronous>, transform_indices = @transform_1, window_bounds = array<i64: 1152, 128>}, {transform_indices = @transform_2, window_bounds = array<i64: 1, 32, 32, 128>}]} {
    %c0 = arith.constant 0 : index
    %c0_0 = arith.constant 0 : index
    %c0_1 = arith.constant 0 : index
    %c0_2 = arith.constant 0 : index
    %0 = vector.load %arg1[%c0, %c0_0, %c0_1, %c0_2] : memref<1x34x34x128xbf16, #tpu.memory_space<vmem>>, vector<1x34x34x128xbf16>
    %1 = vector.shape_cast %0 : vector<1x34x34x128xbf16> to vector<34x34x128xbf16>
    %2 = vector.extract_strided_slice %1 {offsets = [0, 0, 0], sizes = [32, 32, 128], strides = [1, 1, 1]} : vector<34x34x128xbf16> to vector<32x32x128xbf16>
    %3 = vector.shape_cast %2 : vector<32x32x128xbf16> to vector<1024x128xbf16>
    %4 = vector.extract_strided_slice %1 {offsets = [0, 1, 0], sizes = [32, 32, 128], strides = [1, 1, 1]} : vector<34x34x128xbf16> to vector<32x32x128xbf16>
    %5 = vector.shape_cast %4 : vector<32x32x128xbf16> to vector<1024x128xbf16>
    %6 = vector.extract_strided_slice %1 {offsets = [0, 2, 0], sizes = [32, 32, 128], strides = [1, 1, 1]} : vector<34x34x128xbf16> to vector<32x32x128xbf16>
    %7 = vector.shape_cast %6 : vector<32x32x128xbf16> to vector<1024x128xbf16>
    %8 = vector.extract_strided_slice %1 {offsets = [1, 0, 0], sizes = [32, 32, 128], strides = [1, 1, 1]} : vector<34x34x128xbf16> to vector<32x32x128xbf16>
    %9 = vector.shape_cast %8 : vector<32x32x128xbf16> to vector<1024x128xbf16>
    %10 = vector.extract_strided_slice %1 {offsets = [1, 1, 0], sizes = [32, 32, 128], strides = [1, 1, 1]} : vector<34x34x128xbf16> to vector<32x32x128xbf16>
    %11 = vector.shape_cast %10 : vector<32x32x128xbf16> to vector<1024x128xbf16>
    %12 = vector.extract_strided_slice %1 {offsets = [1, 2, 0], sizes = [32, 32, 128], strides = [1, 1, 1]} : vector<34x34x128xbf16> to vector<32x32x128xbf16>
    %13 = vector.shape_cast %12 : vector<32x32x128xbf16> to vector<1024x128xbf16>
    %14 = vector.extract_strided_slice %1 {offsets = [2, 0, 0], sizes = [32, 32, 128], strides = [1, 1, 1]} : vector<34x34x128xbf16> to vector<32x32x128xbf16>
    %15 = vector.shape_cast %14 : vector<32x32x128xbf16> to vector<1024x128xbf16>
    %16 = vector.extract_strided_slice %1 {offsets = [2, 1, 0], sizes = [32, 32, 128], strides = [1, 1, 1]} : vector<34x34x128xbf16> to vector<32x32x128xbf16>
    %17 = vector.shape_cast %16 : vector<32x32x128xbf16> to vector<1024x128xbf16>
    %18 = vector.extract_strided_slice %1 {offsets = [2, 2, 0], sizes = [32, 32, 128], strides = [1, 1, 1]} : vector<34x34x128xbf16> to vector<32x32x128xbf16>
    %19 = vector.shape_cast %18 : vector<32x32x128xbf16> to vector<1024x128xbf16>
    %20 = tpu.concatenate %3, %5, %7, %9, %11, %13, %15, %17, %19 in 1 : vector<1024x128xbf16>, vector<1024x128xbf16>, vector<1024x128xbf16>, vector<1024x128xbf16>, vector<1024x128xbf16>, vector<1024x128xbf16>, vector<1024x128xbf16>, vector<1024x128xbf16>, vector<1024x128xbf16> -> vector<1024x1152xbf16>
    %c0_3 = arith.constant 0 : index
    %c0_4 = arith.constant 0 : index
    %21 = vector.load %arg2[%c0_3, %c0_4] : memref<1152x128xbf16, #tpu.memory_space<vmem>>, vector<1152x128xbf16>
    %cst = arith.constant dense<0.000000e+00> : vector<1024x128xf32>
    %22 = tpu.matmul %20, %21, %cst {dimension_numbers = #tpu.dot_dimension_numbers<[1], [0], [0], [1], [0, 0, 1, 1], [], []>} : vector<1024x1152xbf16>, vector<1152x128xbf16>, vector<1024x128xf32> -> vector<1024x128xf32>
    %23 = vector.shape_cast %22 : vector<1024x128xf32> to vector<32x32x128xf32>
    %24 = arith.truncf %23 : vector<32x32x128xf32> to vector<32x32x128xbf16>
    %c0_5 = arith.constant 0 : index
    %c0_6 = arith.constant 0 : index
    %c0_7 = arith.constant 0 : index
    %c0_8 = arith.constant 0 : index
    %25 = vector.load %arg3[%c0_5, %c0_6, %c0_7, %c0_8] : memref<1x32x32x128xbf16, #tpu.memory_space<vmem>>, vector<1x32x32x128xbf16>
    %26 = vector.shape_cast %25 : vector<1x32x32x128xbf16> to vector<32x32x128xbf16>
    %27 = vector.shape_cast %24 : vector<32x32x128xbf16> to vector<1x32x32x128xbf16>
    tpu.vector_store %arg3[%c0_5, %c0_6, %c0_7, %c0_8], %27 {strides = array<i32>} : memref<1x32x32x128xbf16, #tpu.memory_space<vmem>>, vector<1x32x32x128xbf16>,
    return
  }
  func.func @transform_0(%arg0: i32) -> (i32, i32, i32, i32) {
    %c0_i32 = arith.constant 0 : i32
    %c0_i32_0 = arith.constant 0 : i32
    %c0_i32_1 = arith.constant 0 : i32
    %c0_i32_2 = arith.constant 0 : i32
    return %arg0, %c0_i32, %c0_i32_0, %c0_i32_1 : i32, i32, i32, i32
  }
  func.func @transform_1(%arg0: i32) -> (i32, i32) {
    %c0_i32 = arith.constant 0 : i32
    %c0_i32_0 = arith.constant 0 : i32
    %c0_i32_1 = arith.constant 0 : i32
    return %c0_i32, %c0_i32_0 : i32, i32
  }
  func.func @transform_2(%arg0: i32) -> (i32, i32, i32, i32) {
    %c0_i32 = arith.constant 0 : i32
    %c0_i32_0 = arith.constant 0 : i32
    %c0_i32_1 = arith.constant 0 : i32
    %c0_i32_2 = arith.constant 0 : i32
    return %arg0, %c0_i32, %c0_i32_0, %c0_i32_1 : i32, i32, i32, i32
  }
}

</mosaic_0001>

<bundles_post_ra>
// kernel: tpu_custom_call.1
= control target key start
LH: loop header
LB: loop body
LE: loop exit
PB: predicated region body
PF: predicated region fallthrough
CT: control target
= control target key end

     0   :  { %7 = vsyncpa [#allocation3], 0  ;;  %s11999_s0 = inlined_call_operand.vmem [shape: bf16[2,34,34,128], index: 0, kind: input, shape index: {}]   ;;  %s12000_s1 = inlined_call_operand.vmem [shape: bf16[1152,128], index: 1, kind: input, shape index: {}]   ;;  %s12001_s2 = inlined_call_operand.hbm [shape: bf16[2,32,32,128], index: 2, kind: output, shape index: {}]  }
   0x1   :  { %9 = vsyncpa [#allocation3 + $0x1], 0  ;;  %s8511_s9 = smov 0   ;;  %s8513_s10 = smov 0  }
   0x2   :  { %s8515_s11 = smov 0   ;;  %s8517_s12 = smov 0  }
   0x3 LB: > { %s8532_s13 = sadd.s32 4294967295, %s8492_s12   ;;  %s7113_s14 = sadd.s32 4294967294, %s8492_s12   ;;  %s8492_s12 = sphi %s8517_s12, %s12759_s12   ;;  %s8488_s11 = sphi %s8515_s11, %s12758_s11   ;;  %s8484_s10 = sphi %s8513_s10, %s12757_s10   ;;  %s8480_s9 = sphi %s8511_s9, %s12756_s9  }
   0x4   : > { %s8536_s15 = sadd.s32 1, %s8492_s12   ;;  %s69_s16 = sadd.s32 1, %s8488_s11 }
   0x5   : > { %s66_s17 = ssub.s32 %s8492_s12, %s8536_s15  ;;  %p79_p0 = scmp.ne.s32.totalorder %s8488_s11, %s8484_s10 }
   0x6   : > { %p67_p1 = scmp.eq.s32.totalorder %s66_s17, 0  ;;  %p80_p2 = scmp.eq.s32.totalorder %s8532_s13, 1 }
   0x7   : > { %p85_p3 = scmp.ne.s32.totalorder %s8484_s10, %s8480_s9  ;;  %p86_p4 = scmp.eq.s32.totalorder %s7113_s14, 1 }
   0x8   : > { %s8547_s18 = scalar_select %p67_p1, %s8488_s11, %s69_s16  }
   0x9   : > { %p8549_p5 = por %p80_p2, %p79_p0  ;;  %p8553_p6 = por %p86_p4, %p85_p3 }
   0xa   : > { %p7116_p7 = scmp.ge.s32.totalorder %s8492_s12, 1  ;;  %p115_p8 = scmp.lt.s32.totalorder %s8492_s12, 3 }
   0xc   : > { %p116_p9 = pnand %p7116_p7, %p115_p8 }
   0xe   : > { %119 = sbr.rel (%p116_p9) target bundleno = 2491 (0x9bb), region = 28 }
  0x13   : > { %v7793_v0 = vld [vmem:[%s12000_s1 + $0x38] sm:$0xff]  ;;  %v7792_v1 = vld [vmem:[%s12000_s1 + $0x30] sm:$0xff]  ;;  %v7791_v2 = vld [vmem:[%s12000_s1 + $0x28] sm:$0xff]  ;;  %p137_p10 = scmp.lt.s32.totalorder %s8532_s13, 1  ;;  %vm312_vm0 = vsmask.f32 3328 }
  0x14   : > { %8242 = vmatpush.bf16.msra.mxu1 %v7793_v0  ;;  %8243 = vmatpush.bf16.msra.mxu2 %v7793_v0  ;;  %v7790_v3 = vld [vmem:[%s12000_s1 + $0x20] sm:$0xff]  ;;  %v7789_v4 = vld [vmem:[%s12000_s1 + $0x18] sm:$0xff]  ;;  %v7788_v5 = vld [vmem:[%s12000_s1 + $0x10] sm:$0xff]  ;;  %vm313_vm1 = vsmask.f32 7440  ;;  %vm1883_vm2 = vcmask 1042432  }
  0x15   : > { %8244 = vmatpush.bf16.msra.mxu3 %v7793_v0  ;;  %3818 = vmatpush.bf16.msra.mxu0 %v7793_v0  ;;  %s138_s5 = scalar_select %p137_p10, %s8532_s13, 1  ;;  %v7787_v6 = vld [vmem:[%s12000_s1 + $0x8] sm:$0xff]  ;;  %v7786_v7 = vld [vmem:[%s12000_s1] sm:$0xff]  ;;  %v7809_v8 = vld [vmem:[%s12000_s1 + $0xb8] sm:$0xff]  ;;  %vm1884_vm3 = vcmask 1046532  }
  0x16   : > { %v7817_v9 = vld [vmem:[%s12000_s1 + $0xf8] sm:$0xff]  ;;  %v7808_v16 = vld [vmem:[%s12000_s1 + $0xb0] sm:$0xff]  ;;  %v7807_v28 = vld [vmem:[%s12000_s1 + $0xa8] sm:$0xff]  ;;  %s134_s25 = sand.u32 1, %s8484_s10   ;;  %s8450_s14 = scalar_lea.hbm %s12001_s2, 1024 }
  0x17   : > { %s8266_s8 = smul.u32 680, %s138_s5  ;;  %v7801_v14 = vld [vmem:[%s12000_s1 + $0x78] sm:$0xff]  ;;  %v7816_v17 = vld [vmem:[%s12000_s1 + $0xf0] sm:$0xff]  ;;  %v7815_v29 = vld [vmem:[%s12000_s1 + $0xe8] sm:$0xff]  ;;  %s7117_s26 = sshll.u32 %s134_s25, 9 }
  0x18   : > { %8245 = vmatpush.bf16.msra.mxu1 %v7792_v1  ;;  %8246 = vmatpush.bf16.msra.mxu2 %v7792_v1  ;;  %v7825_v15 = vld [vmem:[%s12000_s1 + $0x138] sm:$0xff]  ;;  %v7800_v18 = vld [vmem:[%s12000_s1 + $0x70] sm:$0xff]  ;;  %v7799_v30 = vld [vmem:[%s12000_s1 + $0x68] sm:$0xff]  ;;  %s11513_s27 = scalar_lea.vmem [#allocation2], %s7117_s26 }
  0x19   : > { %8247 = vmatpush.bf16.msra.mxu3 %v7792_v1  ;;  %3819 = vmatpush.bf16.msra.mxu0 %v7792_v1  ;;  %s8588_s22 = scalar_lea.vmem %s11999_s0, %s8266_s8  ;;  %v7824_v19 = vld [vmem:[%s12000_s1 + $0x130] sm:$0xff]  ;;  %v7823_v31 = vld [vmem:[%s12000_s1 + $0x128] sm:$0xff]  ;;  %v7806_v40 = vld [vmem:[%s12000_s1 + $0xa0] sm:$0xff]  ;;  %s7048_s3 = sshll.u32 %s11513_s27, 4  ;;  %s7049_s3 = int_to_ptr.vmem [resolvable:$true] %s7048_s3 }
  0x1a   : > { %v7734_v10 = vld [vmem:[%s8588_s22 + $0xa0] sm:$0xff]  ;;  %v7735_v20 = vld [vmem:[%s8588_s22 + $0xa8] sm:$0xff]  ;;  %v7736_v24 = vld [vmem:[%s8588_s22 + $0xb4] sm:$0xff] }
  0x1b   : > { %v7750_v11 = vld [vmem:[%s8588_s22 + $0x140] sm:$0xff]  ;;  %v7751_v21 = vld [vmem:[%s8588_s22 + $0x148] sm:$0xff]  ;;  %v7752_v25 = vld [vmem:[%s8588_s22 + $0x154] sm:$0xff] }
  0x1c   : > { %8248 = vmatpush.bf16.msra.mxu1 %v7791_v2  ;;  %8249 = vmatpush.bf16.msra.mxu2 %v7791_v2  ;;  %v7766_v12 = vld [vmem:[%s8588_s22 + $0x1e0] sm:$0xff]  ;;  %v7767_v22 = vld [vmem:[%s8588_s22 + $0x1e8] sm:$0xff]  ;;  %v7768_v26 = vld [vmem:[%s8588_s22 + $0x1f4] sm:$0xff] }
  0x1d   : > { %8250 = vmatpush.bf16.msra.mxu3 %v7791_v2  ;;  %3820 = vmatpush.bf16.msra.mxu0 %v7791_v2  ;;  %v7718_v13 = vld [vmem:[%s8588_s22] sm:$0xff]  ;;  %v7719_v23 = vld [vmem:[%s8588_s22 + $0x8] sm:$0xff]  ;;  %v8626_v27 = vld [vmem:[%s8588_s22 + $0x14] sm:$0xff] }
  0x1e   : > { %v7737_v32 = vld [vmem:[%s8588_s22 + $0xbc] sm:$0xff]  ;;  %v7738_v36 = vld [vmem:[%s8588_s22 + $0xc8] sm:$0xff]  ;;  %v7739_v44 = vld [vmem:[%s8588_s22 + $0xd0] sm:$0xff] }
  0x1f   : > { %v7753_v33 = vld [vmem:[%s8588_s22 + $0x15c] sm:$0xff]  ;;  %v7754_v37 = vld [vmem:[%s8588_s22 + $0x168] sm:$0xff]  ;;  %v7755_v45 = vld [vmem:[%s8588_s22 + $0x170] sm:$0xff] }
  0x20   : > { %8251 = vmatpush.bf16.msra.mxu1 %v7790_v3  ;;  %8252 = vmatpush.bf16.msra.mxu2 %v7790_v3  ;;  %v7769_v34 = vld [vmem:[%s8588_s22 + $0x1fc] sm:$0xff]  ;;  %v7770_v38 = vld [vmem:[%s8588_s22 + $0x208] sm:$0xff]  ;;  %v7771_v46 = vld [vmem:[%s8588_s22 + $0x210] sm:$0xff] }
  0x21   : > { %8253 = vmatpush.bf16.msra.mxu3 %v7790_v3  ;;  %3821 = vmatpush.bf16.msra.mxu0 %v7790_v3  ;;  %v8645_v35 = vld [vmem:[%s8588_s22 + $0x1c] sm:$0xff]  ;;  %v8652_v39 = vld [vmem:[%s8588_s22 + $0x28] sm:$0xff]  ;;  %v8671_v47 = vld [vmem:[%s8588_s22 + $0x30] sm:$0xff] }
  0x22   : > { %v7814_v41 = vld [vmem:[%s12000_s1 + $0xe0] sm:$0xff]  ;;  %v7805_v52 = vld [vmem:[%s12000_s1 + $0x98] sm:$0xff]  ;;  %v7742_v60 = vld [vmem:[%s8588_s22 + $0xf0] sm:$0xff] }
  0x23   : > { %v7798_v42 = vld [vmem:[%s12000_s1 + $0x60] sm:$0xff]  ;;  %v7813_v53 = vld [vmem:[%s12000_s1 + $0xd8] sm:$0xff]  ;;  %v7758_v61 = vld [vmem:[%s8588_s22 + $0x190] sm:$0xff] }
  0x24   : > { %8254 = vmatpush.bf16.msra.mxu1 %v7789_v4  ;;  %8255 = vmatpush.bf16.msra.mxu2 %v7789_v4  ;;  %v7822_v43 = vld [vmem:[%s12000_s1 + $0x120] sm:$0xff]  ;;  %v7797_v54 = vld [vmem:[%s12000_s1 + $0x58] sm:$0xff]  ;;  %v7774_v63 = vld [vmem:[%s8588_s22 + $0x230] sm:$0xff] }
  0x25   : > { %8256 = vmatpush.bf16.msra.mxu3 %v7789_v4  ;;  %3822 = vmatpush.bf16.msra.mxu0 %v7789_v4  ;;  %v7740_v48 = vld [vmem:[%s8588_s22 + $0xdc] sm:$0xff]  ;;  %v7741_v56 = vld [vmem:[%s8588_s22 + $0xe4] sm:$0xff]  ;;  %v8706_v0 = vld [vmem:[%s8588_s22 + $0x50] sm:$0xff] }
  0x26   : > { %v7756_v49 = vld [vmem:[%s8588_s22 + $0x17c] sm:$0xff]  ;;  %v7757_v57 = vld [vmem:[%s8588_s22 + $0x184] sm:$0xff]  ;;  %v7804_v2 = vld [vmem:[%s12000_s1 + $0x90] sm:$0xff] }
  0x27   : > { %v7772_v50 = vld [vmem:[%s8588_s22 + $0x21c] sm:$0xff]  ;;  %v7773_v58 = vld [vmem:[%s8588_s22 + $0x224] sm:$0xff]  ;;  %v7812_v3 = vld [vmem:[%s12000_s1 + $0xd0] sm:$0xff] }
  0x28   : > { %8257 = vmatpush.bf16.msra.mxu1 %v7788_v5  ;;  %8258 = vmatpush.bf16.msra.mxu2 %v7788_v5  ;;  %v8678_v51 = vld [vmem:[%s8588_s22 + $0x3c] sm:$0xff]  ;;  %v8697_v59 = vld [vmem:[%s8588_s22 + $0x44] sm:$0xff]  ;;  %vm8928_vm4 = vmor %vm312_vm0, %vm313_vm1 }
  0x29   : > { %8259 = vmatpush.bf16.msra.mxu3 %v7788_v5  ;;  %3823 = vmatpush.bf16.msra.mxu0 %v7788_v5  ;;  %v7821_v55 = vld [vmem:[%s12000_s1 + $0x118] sm:$0xff]  ;;  %vm8933_vm5 = vmor %vm1883_vm2, %vm1884_vm3 }
  0x2c   : > { %8260 = vmatpush.bf16.msra.mxu1 %v7787_v6  ;;  %8261 = vmatpush.bf16.msra.mxu2 %v7787_v6 }
  0x2d   : > { %8262 = vmatpush.bf16.msra.mxu3 %v7787_v6  ;;  %3824 = vmatpush.bf16.msra.mxu0 %v7787_v6  ;;  %v7796_v6 = vld [vmem:[%s12000_s1 + $0x50] sm:$0xff] }
  0x30   : > { %8263 = vmatpush.bf16.msra.mxu1 %v7786_v7  ;;  %8264 = vmatpush.bf16.msra.mxu2 %v7786_v7 }
  0x31   : > { %8265 = vmatpush.bf16.msra.mxu3 %v7786_v7  ;;  %3825 = vmatpush.bf16.msra.mxu0 %v7786_v7 }
  0x33   : > { %3906 = vmatmul.bf16.vlgmr.msra.gmra.mxu1 %v7734_v10  ;;  %3986 = vmatmul.bf16.vlgmr.msra.gmra.mxu2 %v7750_v11 }
  0x34   : > { %4476 = vmatpush.bf16.msrb.mxu2 %v7809_v8  ;;  %4066 = vmatmul.bf16.vlgmr.msra.gmra.mxu3 %v7766_v12  ;;  %v7743_v12 = vld [vmem:[%s8588_s22 + $0xf8] sm:$0xff] }
  0x35   : > { %4805 = vmatpush.bf16.msrb.mxu3 %v7817_v9  ;;  %3826 = vmatmul.bf16.vlgmr.msra.gmra.mxu0 %v7718_v13  ;;  %v7820_v9 = vld [vmem:[%s12000_s1 + $0x110] sm:$0xff]  ;;  %v7759_v13 = vld [vmem:[%s8588_s22 + $0x198] sm:$0xff] }
  0x36   : > { %4147 = vmatpush.bf16.msrb.mxu1 %v7801_v14  ;;  %5134 = vmatpush.bf16.msrb.mxu0 %v7825_v15  ;;  %v7775_v15 = vld [vmem:[%s8588_s22 + $0x238] sm:$0xff] }
  0x38   : > { %4477 = vmatpush.bf16.msrb.mxu2 %v7808_v16  ;;  %v7727_v16 = vld [vmem:[%s8588_s22 + $0x58] sm:$0xff] }
  0x39   : > { %4806 = vmatpush.bf16.msrb.mxu3 %v7816_v17 }
  0x3a   : > { %4148 = vmatpush.bf16.msrb.mxu1 %v7800_v18  ;;  %5135 = vmatpush.bf16.msrb.mxu0 %v7824_v19 }
  0x3c   : > { %4478 = vmatpush.bf16.msrb.mxu2 %v7807_v28  ;;  %v7776_v28 = vld [vmem:[%s8588_s22 + $0x244] sm:$0xff] }
  0x3d   : > { %4807 = vmatpush.bf16.msrb.mxu3 %v7815_v29  ;;  %v7728_v29 = vld [vmem:[%s8588_s22 + $0x64] sm:$0xff] }
  0x3e   : > { %4149 = vmatpush.bf16.msrb.mxu1 %v7799_v30  ;;  %5136 = vmatpush.bf16.msrb.mxu0 %v7823_v31  ;;  %v7803_v31 = vld [vmem:[%s12000_s1 + $0x88] sm:$0xff] }
  0x40   : > { %4479 = vmatpush.bf16.msrb.mxu2 %v7806_v40  ;;  %v7819_v40 = vld [vmem:[%s12000_s1 + $0x108] sm:$0xff] }
  0x41   : > { %4808 = vmatpush.bf16.msrb.mxu3 %v7814_v41 }
  0x42   : > { %4150 = vmatpush.bf16.msrb.mxu1 %v7798_v42  ;;  %5137 = vmatpush.bf16.msrb.mxu0 %v7822_v43  ;;  %v7745_v43 = vld [vmem:[%s8588_s22 + $0x10c] sm:$0xff] }
  0x43   : > { %3911 = vmatmul.bf16.gmra.mxu1 %v7735_v20  ;;  %3991 = vmatmul.bf16.gmra.mxu2 %v7751_v21 }
  0x44   : > { %4071 = vmatmul.bf16.gmra.mxu3 %v7767_v22  ;;  %4480 = vmatpush.bf16.msrb.mxu2 %v7805_v52 }
  0x45   : > { %3831 = vmatmul.bf16.gmra.mxu0 %v7719_v23  ;;  %4809 = vmatpush.bf16.msrb.mxu3 %v7813_v53 }
  0x46   : > { %4151 = vmatpush.bf16.msrb.mxu1 %v7797_v54  ;;  %5138 = vmatpush.bf16.msrb.mxu0 %v7821_v55 }
  0x48   : > { %4481 = vmatpush.bf16.msrb.mxu2 %v7804_v2 }
  0x49   : > { %4810 = vmatpush.bf16.msrb.mxu3 %v7812_v3  ;;  %v7802_v3 = vld [vmem:[%s12000_s1 + $0x80] sm:$0xff] }
  0x4a   : > { %4152 = vmatpush.bf16.msrb.mxu1 %v7796_v6  ;;  %5139 = vmatpush.bf16.msrb.mxu0 %v7820_v9  ;;  %v7810_v6 = vld [vmem:[%s12000_s1 + $0xc0] sm:$0xff] }
  0x4c   : > { %4482 = vmatpush.bf16.msrb.mxu2 %v7803_v31  ;;  %v7763_v31 = vld [vmem:[%s8588_s22 + $0x1c0] sm:$0xff] }
  0x4e   : > { %5140 = vmatpush.bf16.msrb.mxu0 %v7819_v40  ;;  %v7731_v40 = vld [vmem:[%s8588_s22 + $0x80] sm:$0xff] }
  0x50   : > { %4483 = vmatpush.bf16.msrb.mxu2 %v7802_v3  ;;  %v7764_v3 = vld [vmem:[%s8588_s22 + $0x1cc] sm:$0xff] }
  0x53   : > { %3916 = vmatmul.bf16.gmra.mxu1 %v7736_v24  ;;  %3996 = vmatmul.bf16.gmra.mxu2 %v7752_v25  ;;  %v7744_v24 = vld [vmem:[%s8588_s22 + $0x104] sm:$0xff] }
  0x54   : > { %4076 = vmatmul.bf16.gmra.mxu3 %v7768_v26  ;;  %v7760_v25 = vld [vmem:[%s8588_s22 + $0x1a4] sm:$0xff] }
  0x55   : > { %3836 = vmatmul.bf16.gmra.mxu0 %v8626_v27 }
  0x63   : > { %3921 = vmatmul.bf16.gmra.mxu1 %v7737_v32  ;;  %4001 = vmatmul.bf16.gmra.mxu2 %v7753_v33  ;;  %v7811_v32 = vld [vmem:[%s12000_s1 + $0xc8] sm:$0xff] }
  0x64   : > { %4081 = vmatmul.bf16.gmra.mxu3 %v7769_v34 }
  0x65   : > { %3841 = vmatmul.bf16.gmra.mxu0 %v8645_v35  ;;  %4811 = vmatpush.bf16.msrb.mxu3 %v7811_v32 }
  0x69   : > { %4812 = vmatpush.bf16.msrb.mxu3 %v7810_v6 }
  0x73   : > { %3926 = vmatmul.bf16.gmra.mxu1 %v7738_v36  ;;  %4006 = vmatmul.bf16.gmra.mxu2 %v7754_v37  ;;  %v7795_v36 = vld [vmem:[%s12000_s1 + $0x48] sm:$0xff] }
  0x74   : > { %4086 = vmatmul.bf16.gmra.mxu3 %v7770_v38  ;;  %4153 = vmatpush.bf16.msrb.mxu1 %v7795_v36  ;;  %v7779_v36 = vld [vmem:[%s8588_s22 + $0x260] sm:$0xff] }
  0x75   : > { %3846 = vmatmul.bf16.gmra.mxu0 %v8652_v39 }
  0x83   : > { %3931 = vmatmul.bf16.gmra.mxu1 %v7739_v44  ;;  %4011 = vmatmul.bf16.gmra.mxu2 %v7755_v45  ;;  %v7761_v44 = vld [vmem:[%s8588_s22 + $0x1ac] sm:$0xff] }
  0x84   : > { %4091 = vmatmul.bf16.gmra.mxu3 %v7771_v46  ;;  %v7777_v46 = vld [vmem:[%s8588_s22 + $0x24c] sm:$0xff] }
  0x85   : > { %3851 = vmatmul.bf16.gmra.mxu0 %v8671_v47 }
  0x93   : > { %3936 = vmatmul.bf16.gmra.mxu1 %v7740_v48  ;;  %4016 = vmatmul.bf16.gmra.mxu2 %v7756_v49  ;;  %v7729_v48 = vld [vmem:[%s8588_s22 + $0x6c] sm:$0xff] }
  0x94   : > { %4096 = vmatmul.bf16.gmra.mxu3 %v7772_v50 }
  0x95   : > { %3856 = vmatmul.bf16.gmra.mxu0 %v8678_v51 }
  0xa3   : > { %3941 = vmatmul.bf16.gmra.mxu1 %v7741_v56  ;;  %4021 = vmatmul.bf16.gmra.mxu2 %v7757_v57  ;;  %v7746_v57 = vld [vmem:[%s8588_s22 + $0x118] sm:$0xff] }
  0xa4   : > { %4101 = vmatmul.bf16.gmra.mxu3 %v7773_v58  ;;  %v7762_v58 = vld [vmem:[%s8588_s22 + $0x1b8] sm:$0xff] }
  0xa5   : > { %3861 = vmatmul.bf16.gmra.mxu0 %v8697_v59 }
  0xb0   : > { %v8702_v62 = vpop.f32.mrf.mxu1 }
  0xb1   : > { %12142 = vst [vmem:[#allocation5_spill] sm:$0xff] %v8702_v62 }
  0xb2   : > { %v8708_v1 = vpop.f32.mrf.mxu0 }
  0xb3   : > { %3946 = vmatmul.bf16.gmra.mxu1 %v7742_v60  ;;  %4026 = vmatmul.bf16.gmra.mxu2 %v7758_v61  ;;  %v7778_v61 = vld [vmem:[%s8588_s22 + $0x258] sm:$0xff] }
  0xb4   : > { %4106 = vmatmul.bf16.gmra.mxu3 %v7774_v63  ;;  %v7730_v63 = vld [vmem:[%s8588_s22 + $0x78] sm:$0xff] }
  0xb5   : > { %3866 = vmatmul.bf16.gmra.mxu0 %v8706_v0 }
  0xb6   : > { %v8717_v4 = vpop.f32.mrf.mxu2 }
  0xb7   : > { %12143 = vst [vmem:[#allocation6_spill] sm:$0xff] %v8717_v4  ;;  %v8719_v5 = vpop.f32.mrf.mxu3 }
  0xb8   : > { %12144 = vst [vmem:[#allocation7_spill] sm:$0xff] %v8719_v5  ;;  %v8724_v7 = vpop.f32.mrf.mxu1 }
  0xb9   : > { %12145 = vst [vmem:[#allocation8_spill] sm:$0xff] %v8724_v7 }
  0xba   : > { %v8726_v8 = vpop.f32.mrf.mxu0 }
  0xbe   : > { %v8731_v10 = vpop.f32.mrf.mxu2 }
  0xbf   : > { %12146 = vst [vmem:[#allocation9_spill] sm:$0xff] %v8731_v10  ;;  %v8733_v11 = vpop.f32.mrf.mxu3 }
  0xc0   : > { %12147 = vst [vmem:[#allocation10_spill] sm:$0xff] %v8733_v11  ;;  %v8737_v14 = vpop.f32.mrf.mxu1 }
  0xc1   : > { %12148 = vst [vmem:[#allocation11_spill] sm:$0xff] %v8737_v14 }
  0xc2   : > { %v8741_v17 = vpop.f32.mrf.mxu0 }
  0xc3   : > { %3951 = vmatmul.bf16.gmra.mxu1 %v7743_v12  ;;  %4031 = vmatmul.bf16.gmra.mxu2 %v7759_v13  ;;  %v7794_v13 = vld [vmem:[%s12000_s1 + $0x40] sm:$0xff] }
  0xc4   : > { %4111 = vmatmul.bf16.gmra.mxu3 %v7775_v15  ;;  %4154 = vmatpush.bf16.msrb.mxu1 %v7794_v13  ;;  %v7780_v13 = vld [vmem:[%s8588_s22 + $0x26c] sm:$0xff] }
  0xc5   : > { %3871 = vmatmul.bf16.gmra.mxu0 %v7727_v16 }
  0xc6   : > { %v8743_v18 = vpop.f32.mrf.mxu2 }
  0xc7   : > { %12149 = vst [vmem:[#allocation12_spill] sm:$0xff] %v8743_v18  ;;  %v8745_v19 = vpop.f32.mrf.mxu3  ;;  %v7781_v18 = vld [vmem:[%s8588_s22 + $0x274] sm:$0xff] }
  0xc8   : > { %12150 = vst [vmem:[#allocation13_spill] sm:$0xff] %v8745_v19  ;;  %v8747_v20 = vpop.f32.mrf.mxu1 }
  0xc9   : > { %12151 = vst [vmem:[#allocation14_spill] sm:$0xff] %v8747_v20  ;;  %v8974_v20 = vld [vmem:[%s8588_s22 + $0x24] sm:$0x1] }
  0xca   : > { %v8749_v21 = vpop.f32.mrf.mxu0 }
  0xce   : > { %v8751_v22 = vpop.f32.mrf.mxu2 }
  0xcf   : > { %12152 = vst [vmem:[#allocation15_spill] sm:$0xff] %v8751_v22  ;;  %v8753_v23 = vpop.f32.mrf.mxu3  ;;  %v8914_v22 = vld [vmem:[%s8588_s22 + $0x1c] sm:$0xf] }
  0xd0   : > { %12153 = vst [vmem:[#allocation16_spill] sm:$0xff] %v8753_v23  ;;  %v8757_v26 = vpop.f32.mrf.mxu1 }
  0xd1   : > { %12154 = vst [vmem:[#allocation17_spill] sm:$0xff] %v8757_v26 }
  0xd2   : > { %v8761_v30 = vpop.f32.mrf.mxu0 }
  0xd3   : > { %3956 = vmatmul.bf16.gmra.mxu1 %v7744_v24  ;;  %4036 = vmatmul.bf16.gmra.mxu2 %v7760_v25  ;;  %v7818_v24 = vld [vmem:[%s12000_s1 + $0x100] sm:$0xff] }
  0xd4   : > { %4116 = vmatmul.bf16.gmra.mxu3 %v7776_v28  ;;  %5141 = vmatpush.bf16.msrb.mxu0 %v7818_v24  ;;  %v7732_v24 = vld [vmem:[%s8588_s22 + $0x8c] sm:$0xff] }
  0xd5   : > { %3876 = vmatmul.bf16.gmra.mxu0 %v7728_v29  ;;  %v7747_v29 = vld [vmem:[%s8588_s22 + $0x120] sm:$0xff] }
  0xd6   : > { %v8769_v33 = vpop.f32.mrf.mxu2 }
  0xd7   : > { %12155 = vst [vmem:[#allocation18_spill] sm:$0xff] %v8769_v33  ;;  %v8771_v34 = vpop.f32.mrf.mxu3 }
  0xd8   : > { %12156 = vst [vmem:[#allocation19_spill] sm:$0xff] %v8771_v34  ;;  %v8776_v37 = vpop.f32.mrf.mxu1 }
  0xd9   : > { %12157 = vst [vmem:[#allocation20_spill] sm:$0xff] %v8776_v37 }
  0xda   : > { %v8778_v38 = vpop.f32.mrf.mxu0 }
  0xde   : > { %v8783_v41 = vpop.f32.mrf.mxu2 }
  0xdf   : > { %12158 = vst [vmem:[#allocation21_spill] sm:$0xff] %v8783_v41  ;;  %v8785_v42 = vpop.f32.mrf.mxu3 }
  0xe0   : > { %12159 = vst [vmem:[#allocation22_spill] sm:$0xff] %v8785_v42  ;;  %v8789_v45 = vpop.f32.mrf.mxu1 }
  0xe1   : > { %12160 = vst [vmem:[#allocation23_spill] sm:$0xff] %v8789_v45 }
  0xe2   : > { %v8793_v49 = vpop.f32.mrf.mxu0 }
  0xe3   : > { %3961 = vmatmul.bf16.gmra.mxu1 %v7745_v43  ;;  %4041 = vmatmul.bf16.gmra.mxu2 %v7761_v44 }
  0xe4   : > { %4121 = vmatmul.bf16.gmra.mxu3 %v7777_v46 }
  0xe5   : > { %3881 = vmatmul.bf16.gmra.mxu0 %v7729_v48 }
  0xe6   : > { %v8795_v50 = vpop.f32.mrf.mxu2 }
  0xe7   : > { %12161 = vst [vmem:[#allocation24_spill] sm:$0xff] %v8795_v50  ;;  %v8797_v52 = vpop.f32.mrf.mxu3 }
  0xe8   : > { %12162 = vst [vmem:[#allocation25_spill] sm:$0xff] %v8797_v52  ;;  %v8799_v53 = vpop.f32.mrf.mxu1  ;;  %v7833_v52 = vld [vmem:[%s12000_s1 + $0x178] sm:$0xff] }
  0xe9   : > { %12163 = vst [vmem:[#allocation26_spill] sm:$0xff] %v8799_v53  ;;  %5463 = vmatpush.bf16.msra.mxu1 %v7833_v52 }
  0xea   : > { %v8801_v54 = vpop.f32.mrf.mxu0 }
  0xee   : > { %v8803_v55 = vpop.f32.mrf.mxu2 }
  0xef   : > { %12164 = vst [vmem:[#allocation27_spill] sm:$0xff] %v8803_v55  ;;  %v8805_v56 = vpop.f32.mrf.mxu3 }
  0xf0   : > { %12165 = vst [vmem:[#allocation28_spill] sm:$0xff] %v8805_v56  ;;  %v8809_v60 = vpop.f32.mrf.mxu1 }
  0xf1   : > { %12166 = vst [vmem:[#allocation29_spill] sm:$0xff] %v8809_v60  ;;  %v146_v60 = vld [vmem:[%s8588_s22 + $0x10] sm:$0x1] }
  0xf2   : > { %v8813_v2 = vpop.f32.mrf.mxu0 }
  0xf3   : > { %3966 = vmatmul.bf16.gmra.mxu1 %v7746_v57  ;;  %4046 = vmatmul.bf16.gmra.mxu2 %v7762_v58 }
  0xf4   : > { %4126 = vmatmul.bf16.gmra.mxu3 %v7778_v61 }
  0xf5   : > { %3886 = vmatmul.bf16.gmra.mxu0 %v7730_v63  ;;  %v7748_v63 = vld [vmem:[%s8588_s22 + $0x12c] sm:$0xff] }
  0xf6   : > { %v8821_v9 = vpop.f32.mrf.mxu2 }
  0xf7   : > { %12167 = vst [vmem:[#allocation30_spill] sm:$0xff] %v8821_v9  ;;  %v8823_v12 = vpop.f32.mrf.mxu3 }
  0xf8   : > { %12168 = vst [vmem:[#allocation31_spill] sm:$0xff] %v8823_v12  ;;  %v8828_v15 = vpop.f32.mrf.mxu1 }
  0xf9   : > { %12169 = vst [vmem:[#allocation32_spill] sm:$0xff] %v8828_v15 }
  0xfa   : > { %v8830_v16 = vpop.f32.mrf.mxu0 }
  0xfe   : > { %v8835_v25 = vpop.f32.mrf.mxu2 }
  0xff   : > { %12170 = vst [vmem:[#allocation33_spill] sm:$0xff] %v8835_v25  ;;  %v8837_v28 = vpop.f32.mrf.mxu3 }
 0x100   : > { %12171 = vst [vmem:[#allocation34_spill] sm:$0xff] %v8837_v28  ;;  %v8841_v32 = vpop.f32.mrf.mxu1 }
 0x101   : > { %12172 = vst [vmem:[#allocation35_spill] sm:$0xff] %v8841_v32 }
 0x102   : > { %v8845_v43 = vpop.f32.mrf.mxu0 }
 0x103   : > { %3971 = vmatmul.bf16.gmra.mxu1 %v7747_v29  ;;  %4051 = vmatmul.bf16.gmra.mxu2 %v7763_v31  ;;  %v8868_v31 = vld [vmem:[%s8588_s22] sm:$0xf] }
 0x104   : > { %4131 = vmatmul.bf16.gmra.mxu3 %v7779_v36  ;;  %v8871_v36 = vld [vmem:[%s8588_s22 + $0x4] sm:$0xf] }
 0x105   : > { %3891 = vmatmul.bf16.gmra.mxu0 %v7731_v40  ;;  %v7841_v40 = vld [vmem:[%s12000_s1 + $0x1b8] sm:$0xff]  ;;  %v325_v12 = vshll.u32 %v8871_v36, 16 }
 0x106   : > { %v8847_v44 = vpop.f32.mrf.mxu2  ;;  %5792 = vmatpush.bf16.msra.mxu2 %v7841_v40 }
 0x107   : > { %12173 = vst [vmem:[#allocation36_spill] sm:$0xff] %v8847_v44  ;;  %v8849_v46 = vpop.f32.mrf.mxu3  ;;  %v8908_v44 = vld [vmem:[%s8588_s22 + $0x8] sm:$0xf] }
 0x108   : > { %12174 = vst [vmem:[#allocation37_spill] sm:$0xff] %v8849_v46  ;;  %v8851_v48 = vpop.f32.mrf.mxu1  ;;  %v8880_v46 = vld [vmem:[%s8588_s22 + $0x14] sm:$0xf] }
 0x109   : > { %12175 = vst [vmem:[#allocation38_spill] sm:$0xff] %v8851_v48  ;;  %v360_v34 = vshrl.u32 %v8880_v46, 16  ;;  %v363_v23 = vshll.u32 %v8880_v46, 16 }
 0x10a   : > { %v8853_v57 = vpop.f32.mrf.mxu0 }
 0x10b   : > { %v362_v25 = vrot.slane %v360_v34, 4  ;;  %v365_v9 = vrot.slane %v363_v23, 5 }
 0x10d   : > { %v366_v23 = vor.u32 %v365_v9, %v362_v25  ;;  %v7119_v9 = vrot.slane %v8868_v31, 9 }
 0x10e   : > { %v8855_v58 = vpop.f32.mrf.mxu2 }
 0x10f   : > { %12176 = vst [vmem:[#allocation39_spill] sm:$0xff] %v8855_v58  ;;  %v8857_v61 = vpop.f32.mrf.mxu3 }
 0x110   : > { %12177 = vst [vmem:[#allocation40_spill] sm:$0xff] %v8857_v61  ;;  %v8861_v6 = vpop.f32.mrf.mxu1  ;;  %v7849_v61 = vld [vmem:[%s12000_s1 + $0x1f8] sm:$0xff] }
 0x111   : > { %12178 = vst [vmem:[#allocation41_spill] sm:$0xff] %v8861_v6  ;;  %6121 = vmatpush.bf16.msra.mxu3 %v7849_v61  ;;  %v7857_v61 = vld [vmem:[%s12000_s1 + $0x238] sm:$0xff] }
 0x112   : > { %v8865_v29 = vpop.f32.mrf.mxu0  ;;  %6450 = vmatpush.bf16.msra.mxu0 %v7857_v61  ;;  %v7733_v61 = vld [vmem:[%s8588_s22 + $0x94] sm:$0xff] }
 0x113   : > { %3976 = vmatmul.bf16.gmra.mxu1 %v7748_v63  ;;  %4056 = vmatmul.bf16.gmra.mxu2 %v7764_v3  ;;  %v316_v63 = vshrl.u32 %v8868_v31, 16  ;;  %v319_v3 = vshll.u32 %v8868_v31, 16  ;;  %v8948_v31 = vld [vmem:[%s8588_s22 + $0x20] sm:$0xf] }
 0x114   : > { %4136 = vmatmul.bf16.gmra.mxu3 %v7780_v13  ;;  %v329_v13 = vshrl.u32 %v8871_v36, 16 }
 0x115   : > { %3896 = vmatmul.bf16.gmra.mxu0 %v7732_v24  ;;  %v8889_v24 = vld [vmem:[%s8588_s22 + $0x18] sm:$0xf]  ;;  %v321_v5 = vrot.slane %v319_v3, 5 }
 0x116   : > { %v8882_v28 = vpop.f32.mrf.mxu2  ;;  %v369_v40 = vshll.u32 %v8889_v24, 16  ;;  %v373_v11 = vshrl.u32 %v8889_v24, 16  ;;  %v331_v58 = vrot.slane %v329_v13, 4  ;;  %v7765_v13 = vld [vmem:[%s8588_s22 + $0x1d4] sm:$0xff] }
 0x117   : > { %12179 = vst [vmem:[#allocation42_spill] sm:$0xff] %v8882_v28  ;;  %v8891_v56 = vpop.f32.mrf.mxu3  ;;  %v327_v28 = vrot.slane %v325_v12, 5  ;;  %v7749_v12 = vld [vmem:[%s8588_s22 + $0x134] sm:$0xff] }
 0x118   : > { %12180 = vst [vmem:[#allocation43_spill] sm:$0xff] %v8891_v56  ;;  %v8896_v42 = vpop.f32.mrf.mxu1  ;;  %v318_v56 = vrot.slane %v316_v63, 4  ;;  %v371_v55 = vrot.slane %v369_v40, 5  ;;  %v375_v52 = vrot.slane %v373_v11, 4  ;;  %v335_v63 = vshll.u32 %v8908_v44, 16 }
 0x119   : > { %12181 = vst [vmem:[#allocation44_spill] sm:$0xff] %v8896_v42  ;;  %v332_v33 = vor.u32 %v331_v58, %v327_v28  ;;  %v1888_v11 = vrot.slane %v8871_v36, 5 }
 0x11a   : > { %v8900_v19 = vpop.f32.mrf.mxu0  ;;  %v322_v41 = vor.u32 %v321_v5, %v318_v56  ;;  %v376_v5 = vor.u32 %v375_v52, %v371_v55  ;;  %v379_v56 = vshll.u32 %v8914_v22, 16  ;;  %v8939_v52 = vld [vmem:[%s8588_s22 + $0xc] sm:$0xf] }
 0x11b   : > { %v333_v40 = vrot.slane %v332_v33, 4  ;;  %v1890_v36 = vrot.slane %v1888_v11, 4  ;;  %v367_v33 = vrot.slane %v366_v23, 4  ;;  %v339_v23 = vshrl.u32 %v8908_v44, 16 }
 0x11c   : > { %v323_v58 = vrot.slane %v322_v41, 4  ;;  %v1891_v41 = vrot.slane %v8908_v44, 5  ;;  %v383_v44 = vshrl.u32 %v8914_v22, 16 }
 0x11d   : > { %v341_v48 = vrot.slane %v339_v23, 4 }
 0x11e   : > { %v8910_v50 = vpop.f32.mrf.mxu2  ;;  %v328_v4 = vsel %vm8928_vm4, %v323_v58, %v327_v28  ;;  %v1892_v28 = vsel %vm8933_vm5, %v1890_v36, %v1891_v41  ;;  %v372_v58 = vsel %vm8928_vm4, %v367_v33, %v371_v55  ;;  %v385_v53 = vrot.slane %v383_v44, 4 }
 0x11f   : > { %12182 = vst [vmem:[#allocation45_spill] sm:$0xff] %v8910_v50  ;;  %v8916_v3 = vpop.f32.mrf.mxu3  ;;  %v2939_v36 = vunpack.c.l.b16 %v1892_v28  ;;  %v2686_v55 = vunpack.c.l.b16 %v372_v58  ;;  %v355_v28 = vshll.u32 %v146_v60, 16  ;;  %v7785_v50 = vld [vmem:[%s8588_s22 + $0x29c] sm:$0xff] }
 0x120   : > { %12183 = vst [vmem:[#allocation46_spill] sm:$0xff] %v8916_v3  ;;  %v8921_v10 = vpop.f32.mrf.mxu1  ;;  %v337_v3 = vrot.slane %v335_v63, 5  ;;  %v377_v63 = vrot.slane %v376_v5, 4  ;;  %v345_v5 = vshll.u32 %v8939_v52, 16 }
 0x121   : > { %12184 = vst [vmem:[#allocation47_spill] sm:$0xff] %v8921_v10  ;;  %v1889_v10 = vsel %vm8933_vm5, %v7119_v9, %v1888_v11  ;;  %v389_v9 = vshll.u32 %v8948_v31, 16 }
 0x122   : > { %v8925_v34 = vpop.f32.mrf.mxu0  ;;  %v2938_v6 = vunpack.c.l.b16 %v1889_v10  ;;  %v347_v32 = vrot.slane %v345_v5, 5 }
 0x123   : > { %3981 = vmatmul.bf16.gmra.mxu1 %v7749_v12  ;;  %4061 = vmatmul.bf16.gmra.mxu2 %v7765_v13  ;;  %v381_v12 = vrot.slane %v379_v56, 5  ;;  %v349_v56 = vshrl.u32 %v8939_v52, 16  ;;  %v391_v45 = vrot.slane %v389_v9, 5 }
 0x124   : > { %4141 = vmatmul.bf16.gmra.mxu3 %v7781_v18  ;;  %v338_v18 = vsel %vm8928_vm4, %v333_v40, %v337_v3 }
 0x125   : > { %3901 = vmatmul.bf16.gmra.mxu0 %v7733_v61  ;;  %v382_v11 = vsel %vm8928_vm4, %v377_v63, %v381_v12  ;;  %v2683_v42 = vunpack.c.l.b16 %v338_v18  ;;  %v351_v15 = vrot.slane %v349_v56, 4  ;;  %v342_v18 = vor.u32 %v341_v48, %v337_v3 }
 0x126   : > { %v8941_v13 = vpop.f32.mrf.mxu2  ;;  %v2687_v33 = vunpack.c.l.b16 %v382_v11  ;;  %v1894_v56 = vrot.slane %v8939_v52, 5  ;;  %v1893_v3 = vrot.slane %v1891_v41, 4  ;;  %v1897_v52 = vrot.slane %v146_v60, 5 }
 0x127   : > { %12189 = vst [vmem:[#allocation48_spill] sm:$0xff] %v8941_v13  ;;  %v8950_v61 = vpop.f32.mrf.mxu3  ;;  %v352_v10 = vor.u32 %v351_v15, %v347_v32  ;;  %v357_v15 = vrot.slane %v355_v28, 5 }
 0x128   : > { %12190 = vst [vmem:[#allocation49_spill] sm:$0xff] %v8950_v61  ;;  %v8957_v13 = vpop.f32.mrf.mxu1  ;;  %v393_v61 = vshrl.u32 %v8948_v31, 16  ;;  %v8980_v5 = vpack.c.b16 %v2687_v33, %v2686_v55  ;;  %v8994_v55 = vld [vmem:[%s8588_s22 + $0x2c] sm:$0xf]  ;;  %v1895_v60 = vsel %vm8933_vm5, %v1893_v3, %v1894_v56 }
 0x129   : > { %12191 = vst [vmem:[#allocation50_spill] sm:$0xff] %v8957_v13  ;;  %v2682_v13 = vunpack.c.l.b16 %v328_v4  ;;  %v3066_v4 = vpack.c.b16 %v2939_v36, %v2938_v6  ;;  %v343_v6 = vrot.slane %v342_v18, 4  ;;  %v353_v48 = vrot.slane %v352_v10, 4 }
 0x12a   : > { %v8963_v40 = vpop.f32.mrf.mxu0  ;;  %v395_v63 = vrot.slane %v393_v61, 4  ;;  %v386_v61 = vor.u32 %v385_v53, %v381_v12  ;;  %v8989_v12 = vld [vmem:[%s8588_s22 + $0x28] sm:$0xf] }
 0x12b   : > { %v2810_v26 = vpack.c.b16 %v2683_v42, %v2682_v13  ;;  %v399_v42 = vshll.u32 %v8974_v20, 16  ;;  %v1896_v13 = vrot.slane %v1894_v56, 4  ;;  %v348_v33 = vsel %vm8928_vm4, %v343_v6, %v347_v32 }
 0x12c   : > { %v396_v11 = vor.u32 %v395_v63, %v391_v45  ;;  %v387_v44 = vrot.slane %v386_v61, 4  ;;  %v407_v18 = vshll.u32 %v8989_v12, 16  ;;  %v413_v61 = vshll.u32 %v8994_v55, 16 }
 0x12d   : > { %v401_v53 = vrot.slane %v399_v42, 5  ;;  %v1898_v63 = vsel %vm8933_vm5, %v1896_v13, %v1897_v52  ;;  %v417_v56 = vshrl.u32 %v8994_v55, 16  ;;  %v2940_v6 = vunpack.c.l.b16 %v1895_v60 }
 0x12e   : > { %v8971_v37 = vpop.f32.mrf.mxu2  ;;  %v397_v9 = vrot.slane %v396_v11, 4  ;;  %v392_v32 = vsel %vm8928_vm4, %v387_v44, %v391_v45  ;;  %v2684_v11 = vunpack.c.l.b16 %v348_v33  ;;  %v409_v52 = vrot.slane %v407_v18, 5  ;;  %v9021_v45 = vld [vmem:[%s8588_s22 + $0x30] sm:$0xf] }
 0x12f   : > { %12192 = vst [vmem:[#allocation51_spill] sm:$0xff] %v8971_v37  ;;  %v8976_v14 = vpop.f32.mrf.mxu3  ;;  %v423_v18 = vshll.u32 %v9021_v45, 16 }
 0x130   : > { %12193 = vst [vmem:[#allocation52_spill] sm:$0xff] %v8976_v14  ;;  %v8978_v23 = vpop.f32.mrf.mxu1  ;;  %v402_v28 = vsel %vm8928_vm4, %v397_v9, %v401_v53  ;;  %v419_v14 = vrot.slane %v417_v56, 4 }
 0x131   : > { %12194 = vst [vmem:[#allocation53_spill] sm:$0xff] %v8978_v23  ;;  %v2689_v3 = vunpack.c.l.b16 %v402_v28 }
 0x132   : > { %v8983_v58 = vpop.f32.mrf.mxu0 }
 0x133   : > { %4155 = vmatmul.bf16.vlgmr.msrb.gmra.mxu1 %v2810_v26  ;;  %4484 = vmatmul.bf16.vlgmr.msrb.gmra.mxu2 %v3066_v4  ;;  %v404_v4 = vshrl.u32 %v8989_v12, 16 }
 0x134   : > { %4813 = vmatmul.bf16.vlgmr.msrb.gmra.mxu3 %v8626_v27  ;;  %v358_v27 = vsel %vm8928_vm4, %v353_v48, %v357_v15  ;;  %v2941_v48 = vunpack.c.l.b16 %v1898_v63  ;;  %v2688_v15 = vunpack.c.l.b16 %v392_v32  ;;  %v7120_v32 = vrot.slane %v8880_v46, 9 }
 0x135   : > { %5142 = vmatmul.bf16.vlgmr.msrb.gmra.mxu0 %v8980_v5  ;;  %v2685_v42 = vunpack.c.l.b16 %v358_v27  ;;  %v406_v13 = vrot.slane %v404_v4, 4  ;;  %v1901_v27 = vrot.slane %v8889_v24, 5 }
 0x136   : > { %v8991_v36 = vpop.f32.mrf.mxu2  ;;  %v3067_v53 = vpack.c.b16 %v2941_v48, %v2940_v6  ;;  %v9027_v33 = vpack.c.b16 %v2689_v3, %v2688_v15  ;;  %v9040_v6 = vld [vmem:[%s8588_s22 + $0x34] sm:$0xf] }
 0x137   : > { %12195 = vst [vmem:[#allocation54_spill] sm:$0xff] %v8991_v36  ;;  %v8996_v26 = vpop.f32.mrf.mxu3  ;;  %v2811_v9 = vpack.c.b16 %v2685_v42, %v2684_v11  ;;  %v410_v60 = vor.u32 %v409_v52, %v406_v13  ;;  %v1903_v28 = vrot.slane %v1901_v27, 4  ;;  %v425_v11 = vrot.slane %v423_v18, 5 }
 0x138   : > { %12196 = vst [vmem:[#allocation55_spill] sm:$0xff] %v8996_v26  ;;  %v9002_v41 = vpop.f32.mrf.mxu1  ;;  %v415_v26 = vrot.slane %v413_v61, 5  ;;  %v1904_v61 = vrot.slane %v8914_v22, 5  ;;  %v427_v13 = vshrl.u32 %v9021_v45, 16  ;;  %v433_v52 = vshll.u32 %v9040_v6, 16 }
 0x139   : > { %12197 = vst [vmem:[#allocation56_spill] sm:$0xff] %v9002_v41  ;;  %v411_v56 = vrot.slane %v410_v60, 4  ;;  %v9203_v41 = vld [vmem:[%s8588_s22 + $0x58] sm:$0xf] }
 0x13a   : > { %v9010_v10 = vpop.f32.mrf.mxu0  ;;  %v420_v4 = vor.u32 %v419_v14, %v415_v26  ;;  %v1905_v46 = vsel %vm8933_vm5, %v1903_v28, %v1904_v61  ;;  %v429_v18 = vrot.slane %v427_v13, 4 }
 0x13b   : > { %v416_v22 = vsel %vm8928_vm4, %v411_v56, %v415_v26  ;;  %v9062_v26 = vld [vmem:[%s8588_s22 + $0x38] sm:$0x1] }
 0x13c   : > { %v421_v24 = vrot.slane %v420_v4, 4  ;;  %v2690_v60 = vunpack.c.l.b16 %v416_v22  ;;  %v430_v22 = vor.u32 %v429_v18, %v425_v11  ;;  %v443_v13 = vshll.u32 %v9062_v26, 16  ;;  %v9087_v18 = vld [vmem:[%s8588_s22 + $0x40] sm:$0xf] }
 0x13e   : > { %v9018_v36 = vpop.f32.mrf.mxu2  ;;  %v426_v3 = vsel %vm8928_vm4, %v421_v24, %v425_v11 }
 0x13f   : > { %12198 = vst [vmem:[#allocation57_spill] sm:$0xff] %v9018_v36  ;;  %v9023_v44 = vpop.f32.mrf.mxu3  ;;  %v2691_v4 = vunpack.c.l.b16 %v426_v3 }
 0x140   : > { %12199 = vst [vmem:[#allocation58_spill] sm:$0xff] %v9023_v44  ;;  %v9025_v37 = vpop.f32.mrf.mxu1 }
 0x141   : > { %12200 = vst [vmem:[#allocation59_spill] sm:$0xff] %v9025_v37 }
 0x142   : > { %v9030_v63 = vpop.f32.mrf.mxu0 }
 0x143   : > { %4160 = vmatmul.bf16.gmra.mxu1 %v2811_v9  ;;  %4489 = vmatmul.bf16.gmra.mxu2 %v3067_v53  ;;  %v437_v9 = vshrl.u32 %v9040_v6, 16 }
 0x144   : > { %4818 = vmatmul.bf16.gmra.mxu3 %v8645_v35  ;;  %v1902_v35 = vsel %vm8933_vm5, %v7120_v32, %v1901_v27  ;;  %v2943_v27 = vunpack.c.l.b16 %v1905_v46  ;;  %v435_v32 = vrot.slane %v433_v52, 5  ;;  %v1906_v52 = vrot.slane %v1904_v61, 4 }
 0x145   : > { %5147 = vmatmul.bf16.gmra.mxu0 %v9027_v33  ;;  %v2942_v53 = vunpack.c.l.b16 %v1902_v35  ;;  %v439_v28 = vrot.slane %v437_v9, 4  ;;  %v1907_v35 = vrot.slane %v8948_v31, 5  ;;  %v431_v31 = vrot.slane %v430_v22, 4 }
 0x146   : > { %v9037_v42 = vpop.f32.mrf.mxu2 }
 0x147   : > { %12201 = vst [vmem:[#allocation60_spill] sm:$0xff] %v9037_v42  ;;  %v9042_v14 = vpop.f32.mrf.mxu3  ;;  %v9066_v24 = vpack.c.b16 %v2943_v27, %v2942_v53  ;;  %v9070_v42 = vpack.c.b16 %v2691_v4, %v2690_v60  ;;  %v440_v3 = vor.u32 %v439_v28, %v435_v32  ;;  %v1909_v9 = vrot.slane %v1907_v35, 4  ;;  %v9082_v4 = vld [vmem:[%s8588_s22 + $0x3c] sm:$0xf] }
 0x148   : > { %12202 = vst [vmem:[#allocation61_spill] sm:$0xff] %v9042_v14  ;;  %v9044_v48 = vpop.f32.mrf.mxu1  ;;  %v1910_v53 = vrot.slane %v8974_v20, 5  ;;  %v445_v60 = vrot.slane %v443_v13, 5  ;;  %v448_v20 = vshrl.u32 %v9082_v4, 16  ;;  %v451_v22 = vshll.u32 %v9082_v4, 16 }
 0x149   : > { %12203 = vst [vmem:[#allocation62_spill] sm:$0xff] %v9044_v48  ;;  %v441_v27 = vrot.slane %v440_v3, 4  ;;  %v436_v13 = vsel %vm8928_vm4, %v431_v31, %v435_v32  ;;  %v9110_v48 = vld [vmem:[%s8588_s22 + $0x44] sm:$0xf] }
 0x14a   : > { %v9052_v15 = vpop.f32.mrf.mxu0  ;;  %12206 = vst [vmem:[#allocation65_spill] sm:$0xff] %v9066_v24  ;;  %v1911_v61 = vsel %vm8933_vm5, %v1909_v9, %v1910_v53  ;;  %v2692_v9 = vunpack.c.l.b16 %v436_v13 }
 0x14b   : > { %12208 = vst [vmem:[#allocation67_spill] sm:$0xff] %v9070_v42 }
 0x14e   : > { %v9059_v14 = vpop.f32.mrf.mxu2 }
 0x14f   : > { %12204 = vst [vmem:[#allocation63_spill] sm:$0xff] %v9059_v14  ;;  %v9064_v56 = vpop.f32.mrf.mxu3  ;;  %v453_v14 = vrot.slane %v451_v22, 5 }
 0x150   : > { %12205 = vst [vmem:[#allocation64_spill] sm:$0xff] %v9064_v56  ;;  %v9068_v44 = vpop.f32.mrf.mxu1  ;;  %v457_v56 = vshll.u32 %v9087_v18, 16 }
 0x151   : > { %12207 = vst [vmem:[#allocation66_spill] sm:$0xff] %v9068_v44 }
 0x152   : > { %v9073_v46 = vpop.f32.mrf.mxu0  ;;  %v459_v36 = vrot.slane %v457_v56, 5 }
 0x153   : > { %4165 = vmatmul.bf16.gmra.mxu1 %v8980_v5  ;;  %4494 = vmatmul.bf16.gmra.mxu2 %v9066_v24  ;;  %v2945_v24 = vunpack.c.l.b16 %v1911_v61 }
 0x154   : > { %4823 = vmatmul.bf16.gmra.mxu3 %v8652_v39  ;;  %v1908_v39 = vsel %vm8933_vm5, %v1906_v52, %v1907_v35  ;;  %v461_v35 = vshrl.u32 %v9087_v18, 16 }
 0x155   : > { %5152 = vmatmul.bf16.gmra.mxu0 %v9070_v42  ;;  %v2944_v52 = vunpack.c.l.b16 %v1908_v39  ;;  %v1914_v39 = vrot.slane %v8994_v55, 5  ;;  %v1917_v55 = vrot.slane %v9021_v45, 5 }
 0x156   : > { %v9084_v11 = vpop.f32.mrf.mxu2 }
 0x157   : > { %12209 = vst [vmem:[#allocation68_spill] sm:$0xff] %v9084_v11  ;;  %v9089_v5 = vpop.f32.mrf.mxu3  ;;  %v450_v11 = vrot.slane %v448_v20, 4  ;;  %v9114_v31 = vpack.c.b16 %v2945_v24, %v2944_v52  ;;  %v467_v20 = vshll.u32 %v9110_v48, 16  ;;  %v7121_v24 = vrot.slane %v8989_v12, 9 }
 0x158   : > { %12210 = vst [vmem:[#allocation69_spill] sm:$0xff] %v9089_v5  ;;  %v9091_v28 = vpop.f32.mrf.mxu1  ;;  %v446_v5 = vsel %vm8928_vm4, %v441_v27, %v445_v60  ;;  %v1916_v22 = vrot.slane %v1914_v39, 4 }
 0x159   : > { %12211 = vst [vmem:[#allocation70_spill] sm:$0xff] %v9091_v28  ;;  %v2693_v53 = vunpack.c.l.b16 %v446_v5  ;;  %v463_v28 = vrot.slane %v461_v35, 4  ;;  %v454_v5 = vor.u32 %v453_v14, %v450_v11  ;;  %v469_v11 = vrot.slane %v467_v20, 5 }
 0x15a   : > { %v9099_v3 = vpop.f32.mrf.mxu0  ;;  %12214 = vst [vmem:[#allocation73_spill] sm:$0xff] %v9114_v31  ;;  %v1918_v12 = vsel %vm8933_vm5, %v1916_v22, %v1917_v55 }
 0x15b   : > { %v9118_v60 = vpack.c.b16 %v2693_v53, %v2692_v9  ;;  %v464_v56 = vor.u32 %v463_v28, %v459_v36  ;;  %v455_v13 = vrot.slane %v454_v5, 4  ;;  %v9133_v28 = vld [vmem:[%s8588_s22 + $0x48] sm:$0xf]  ;;  %v471_v5 = vshrl.u32 %v9110_v48, 16 }
 0x15c   : > { %v481_v20 = vshrl.u32 %v9133_v28, 16 }
 0x15d   : > { %12216 = vst [vmem:[#allocation75_spill] sm:$0xff] %v9118_v60  ;;  %v465_v14 = vrot.slane %v464_v56, 4  ;;  %v460_v45 = vsel %vm8928_vm4, %v455_v13, %v459_v36  ;;  %v477_v56 = vshll.u32 %v9133_v28, 16  ;;  %v9155_v36 = vld [vmem:[%s8588_s22 + $0x4c] sm:$0x1] }
 0x15e   : > { %v9107_v44 = vpop.f32.mrf.mxu2 }
 0x15f   : > { %12212 = vst [vmem:[#allocation71_spill] sm:$0xff] %v9107_v44  ;;  %v9112_v32 = vpop.f32.mrf.mxu3  ;;  %v470_v53 = vsel %vm8928_vm4, %v465_v14, %v469_v11  ;;  %v479_v22 = vrot.slane %v477_v56, 5  ;;  %v1923_v56 = vrot.slane %v9062_v26, 5 }
 0x160   : > { %12213 = vst [vmem:[#allocation72_spill] sm:$0xff] %v9112_v32  ;;  %v9116_v27 = vpop.f32.mrf.mxu1  ;;  %v2695_v32 = vunpack.c.l.b16 %v470_v53 }
 0x161   : > { %12215 = vst [vmem:[#allocation74_spill] sm:$0xff] %v9116_v27 }
 0x162   : > { %v9121_v61 = vpop.f32.mrf.mxu0 }
 0x163   : > { %4170 = vmatmul.bf16.gmra.mxu1 %v9027_v33  ;;  %4499 = vmatmul.bf16.gmra.mxu2 %v9114_v31  ;;  %v473_v31 = vrot.slane %v471_v5, 4  ;;  %v487_v5 = vshll.u32 %v9155_v36, 16 }
 0x164   : > { %4828 = vmatmul.bf16.gmra.mxu3 %v8671_v47  ;;  %v1915_v47 = vsel %vm8933_vm5, %v7121_v24, %v1914_v39  ;;  %v2947_v39 = vunpack.c.l.b16 %v1918_v12  ;;  %v2694_v24 = vunpack.c.l.b16 %v460_v45 }
 0x165   : > { %5157 = vmatmul.bf16.gmra.mxu0 %v9118_v60  ;;  %v474_v45 = vor.u32 %v473_v31, %v469_v11  ;;  %v9180_v11 = vld [vmem:[%s8588_s22 + $0x54] sm:$0xf] }
 0x166   : > { %v9130_v35 = vpop.f32.mrf.mxu2  ;;  %v9163_v27 = vpack.c.b16 %v2695_v32, %v2694_v24  ;;  %v1919_v32 = vrot.slane %v1917_v55, 4  ;;  %v9175_v24 = vld [vmem:[%s8588_s22 + $0x50] sm:$0xf] }
 0x167   : > { %12217 = vst [vmem:[#allocation76_spill] sm:$0xff] %v9130_v35  ;;  %v9135_v52 = vpop.f32.mrf.mxu3  ;;  %v483_v35 = vrot.slane %v481_v20, 4  ;;  %v492_v26 = vshrl.u32 %v9175_v24, 16 }
 0x168   : > { %12218 = vst [vmem:[#allocation77_spill] sm:$0xff] %v9135_v52  ;;  %v9137_v33 = vpop.f32.mrf.mxu1  ;;  %v2946_v52 = vunpack.c.l.b16 %v1915_v47  ;;  %v1920_v47 = vrot.slane %v9040_v6, 5  ;;  %v475_v6 = vrot.slane %v474_v45, 4  ;;  %v495_v45 = vshll.u32 %v9175_v24, 16 }
 0x169   : > { %12219 = vst [vmem:[#allocation78_spill] sm:$0xff] %v9137_v33  ;;  %v484_v53 = vor.u32 %v483_v35, %v479_v22 }
 0x16a   : > { %v9145_v9 = vpop.f32.mrf.mxu0  ;;  %v9159_v14 = vpack.c.b16 %v2947_v39, %v2946_v52  ;;  %12224 = vst [vmem:[#allocation83_spill] sm:$0xff] %v9163_v27  ;;  %v1922_v52 = vrot.slane %v1920_v47, 4  ;;  %v489_v39 = vrot.slane %v487_v5, 5  ;;  %v480_v5 = vsel %vm8928_vm4, %v475_v6, %v479_v22 }
 0x16b   : > { %v485_v20 = vrot.slane %v484_v53, 4 }
 0x16c   : > { %12222 = vst [vmem:[#allocation81_spill] sm:$0xff] %v9159_v14  ;;  %v1924_v55 = vsel %vm8933_vm5, %v1922_v52, %v1923_v56  ;;  %v2696_v52 = vunpack.c.l.b16 %v480_v5 }
 0x16e   : > { %v9152_v44 = vpop.f32.mrf.mxu2 }
 0x16f   : > { %12220 = vst [vmem:[#allocation79_spill] sm:$0xff] %v9152_v44  ;;  %v9157_v13 = vpop.f32.mrf.mxu3  ;;  %v497_v44 = vrot.slane %v495_v45, 5 }
 0x170   : > { %12221 = vst [vmem:[#allocation80_spill] sm:$0xff] %v9157_v13  ;;  %v9161_v33 = vpop.f32.mrf.mxu1 }
 0x171   : > { %12223 = vst [vmem:[#allocation82_spill] sm:$0xff] %v9161_v33 }
 0x172   : > { %v9166_v12 = vpop.f32.mrf.mxu0 }
 0x173   : > { %4175 = vmatmul.bf16.gmra.mxu1 %v9070_v42  ;;  %4504 = vmatmul.bf16.gmra.mxu2 %v9159_v14  ;;  %v501_v14 = vshll.u32 %v9180_v11, 16  ;;  %v2949_v42 = vunpack.c.l.b16 %v1924_v55 }
 0x174   : > { %4833 = vmatmul.bf16.gmra.mxu3 %v8678_v51  ;;  %v1921_v51 = vsel %vm8933_vm5, %v1919_v32, %v1920_v47  ;;  %v505_v47 = vshrl.u32 %v9180_v11, 16 }
 0x175   : > { %5162 = vmatmul.bf16.gmra.mxu0 %v9163_v27  ;;  %v2948_v32 = vunpack.c.l.b16 %v1921_v51 }
 0x176   : > { %v9177_v31 = vpop.f32.mrf.mxu2  ;;  %v507_v33 = vrot.slane %v505_v47, 4  ;;  %v9224_v47 = vld [vmem:[%s8588_s22 + $0x5c] sm:$0xf] }
 0x177   : > { %12225 = vst [vmem:[#allocation84_spill] sm:$0xff] %v9177_v31  ;;  %v9182_v35 = vpop.f32.mrf.mxu3  ;;  %v494_v31 = vrot.slane %v492_v26, 4  ;;  %v9207_v6 = vpack.c.b16 %v2949_v42, %v2948_v32  ;;  %v511_v26 = vshll.u32 %v9203_v41, 16  ;;  %v7122_v42 = vrot.slane %v9082_v4, 9 }
 0x178   : > { %12226 = vst [vmem:[#allocation85_spill] sm:$0xff] %v9182_v35  ;;  %v9184_v13 = vpop.f32.mrf.mxu1  ;;  %v490_v35 = vsel %vm8928_vm4, %v485_v20, %v489_v39  ;;  %v1927_v20 = vrot.slane %v9087_v18, 5  ;;  %v1930_v18 = vrot.slane %v9110_v48, 5 }
 0x179   : > { %12227 = vst [vmem:[#allocation86_spill] sm:$0xff] %v9184_v13  ;;  %v2697_v56 = vunpack.c.l.b16 %v490_v35  ;;  %v503_v13 = vrot.slane %v501_v14, 5  ;;  %v498_v35 = vor.u32 %v497_v44, %v494_v31  ;;  %v513_v31 = vrot.slane %v511_v26, 5 }
 0x17a   : > { %v9192_v53 = vpop.f32.mrf.mxu0  ;;  %12230 = vst [vmem:[#allocation89_spill] sm:$0xff] %v9207_v6  ;;  %v1929_v45 = vrot.slane %v1927_v20, 4 }
 0x17b   : > { %v9212_v51 = vpack.c.b16 %v2697_v56, %v2696_v52  ;;  %v508_v14 = vor.u32 %v507_v33, %v503_v13  ;;  %v499_v5 = vrot.slane %v498_v35, 4  ;;  %v1928_v52 = vsel %vm8933_vm5, %v7122_v42, %v1927_v20 }
 0x17c   : > { %v1931_v48 = vsel %vm8933_vm5, %v1929_v45, %v1930_v18  ;;  %v515_v56 = vshrl.u32 %v9203_v41, 16  ;;  %v521_v35 = vshll.u32 %v9224_v47, 16  ;;  %v2950_v42 = vunpack.c.l.b16 %v1928_v52 }
 0x17d   : > { %12232 = vst [vmem:[#allocation91_spill] sm:$0xff] %v9212_v51  ;;  %v509_v44 = vrot.slane %v508_v14, 4  ;;  %v525_v14 = vshrl.u32 %v9224_v47, 16 }
 0x17e   : > { %v9200_v37 = vpop.f32.mrf.mxu2 }
 0x17f   : > { %12228 = vst [vmem:[#allocation87_spill] sm:$0xff] %v9200_v37  ;;  %v9205_v22 = vpop.f32.mrf.mxu3  ;;  %v514_v20 = vsel %vm8928_vm4, %v509_v44, %v513_v31  ;;  %v9246_v37 = vld [vmem:[%s8588_s22 + $0x60] sm:$0x1] }
 0x180   : > { %12229 = vst [vmem:[#allocation88_spill] sm:$0xff] %v9205_v22  ;;  %v9210_v39 = vpop.f32.mrf.mxu1  ;;  %v2699_v45 = vunpack.c.l.b16 %v514_v20 }
 0x181   : > { %12231 = vst [vmem:[#allocation90_spill] sm:$0xff] %v9210_v39  ;;  %v1933_v39 = vrot.slane %v9133_v28, 5  ;;  %v1936_v28 = vrot.slane %v9155_v36, 5 }
 0x182   : > { %v9214_v55 = vpop.f32.mrf.mxu0 }
 0x183   : > { %4180 = vmatmul.bf16.gmra.mxu1 %v9118_v60  ;;  %4509 = vmatmul.bf16.gmra.mxu2 %v9207_v6  ;;  %v517_v6 = vrot.slane %v515_v56, 4  ;;  %v523_v60 = vrot.slane %v521_v35, 5  ;;  %v1935_v35 = vrot.slane %v1933_v39, 4 }
 0x184   : > { %4838 = vmatmul.bf16.gmra.mxu3 %v8697_v59  ;;  %v504_v59 = vsel %vm8928_vm4, %v499_v5, %v503_v13 }
 0x185   : > { %5167 = vmatmul.bf16.gmra.mxu0 %v9212_v51  ;;  %v2698_v22 = vunpack.c.l.b16 %v504_v59  ;;  %v518_v52 = vor.u32 %v517_v6, %v513_v31  ;;  %v531_v59 = vshll.u32 %v9246_v37, 16 }
 0x186   : > { %v9226_v33 = vpop.f32.mrf.mxu2 }
 0x187   : > { %12233 = vst [vmem:[#allocation92_spill] sm:$0xff] %v9226_v33  ;;  %v9228_v32 = vpop.f32.mrf.mxu3  ;;  %v527_v33 = vrot.slane %v525_v14, 4  ;;  %v9257_v44 = vpack.c.b16 %v2699_v45, %v2698_v22  ;;  %v519_v22 = vrot.slane %v518_v52, 4  ;;  %v533_v31 = vrot.slane %v531_v59, 5  ;;  %v7848_v14 = vld [vmem:[%s12000_s1 + $0x1f0] sm:$0xff] }
 0x188   : > { %12234 = vst [vmem:[#allocation93_spill] sm:$0xff] %v9228_v32  ;;  %v9234_v4 = vpop.f32.mrf.mxu1  ;;  %v2951_v32 = vunpack.c.l.b16 %v1931_v48  ;;  %6122 = vmatpush.bf16.msra.mxu3 %v7848_v14  ;;  %v1937_v52 = vsel %vm8933_vm5, %v1935_v35, %v1936_v28 }
 0x189   : > { %12235 = vst [vmem:[#allocation94_spill] sm:$0xff] %v9234_v4  ;;  %v528_v48 = vor.u32 %v527_v33, %v523_v60  ;;  %v7840_v33 = vld [vmem:[%s12000_s1 + $0x1b0] sm:$0xff]  ;;  %v2953_v28 = vunpack.c.l.b16 %v1937_v52  ;;  %v1940_v52 = vrot.slane %v9180_v11, 5  ;;  %v1943_v11 = vrot.slane %v9203_v41, 5 }
 0x18a   : > { %v9241_v26 = vpop.f32.mrf.mxu0  ;;  %v9252_v4 = vpack.c.b16 %v2951_v32, %v2950_v42  ;;  %12241 = vst [vmem:[#allocation100_spill] sm:$0xff] %v9257_v44  ;;  %v1932_v32 = vrot.slane %v1930_v18, 4  ;;  %5793 = vmatpush.bf16.msra.mxu2 %v7840_v33  ;;  %v9276_v18 = vld [vmem:[%s8588_s22 + $0x64] sm:$0xf] }
 0x18b   : > { %12236 = vst [vmem:[#allocation95_spill] sm:$0xff] %v9241_v26  ;;  %v529_v6 = vrot.slane %v528_v48, 4  ;;  %v524_v48 = vsel %vm8928_vm4, %v519_v22, %v523_v60  ;;  %v536_v14 = vshrl.u32 %v9276_v18, 16  ;;  %v7856_v60 = vld [vmem:[%s12000_s1 + $0x230] sm:$0xff] }
 0x18c   : > { %12239 = vst [vmem:[#allocation98_spill] sm:$0xff] %v9252_v4  ;;  %v1934_v45 = vsel %vm8933_vm5, %v1932_v32, %v1933_v39  ;;  %v7832_v32 = vld [vmem:[%s12000_s1 + $0x170] sm:$0xff]  ;;  %6451 = vmatpush.bf16.msra.mxu0 %v7856_v60  ;;  %v2700_v22 = vunpack.c.l.b16 %v524_v48 }
 0x18d   : > { %v534_v59 = vsel %vm8928_vm4, %v529_v6, %v533_v31  ;;  %v2952_v35 = vunpack.c.l.b16 %v1934_v45  ;;  %5464 = vmatpush.bf16.msra.mxu1 %v7832_v32  ;;  %v538_v31 = vrot.slane %v536_v14, 4  ;;  %v8308_v14 = vld [vmem:[%s8588_s22 + $0x58] sm:$0xff]  ;;  %v1942_v32 = vrot.slane %v1940_v52, 4 }
 0x18e   : > { %v9248_v13 = vpop.f32.mrf.mxu2  ;;  %v2701_v6 = vunpack.c.l.b16 %v534_v59 }
 0x18f   : > { %12237 = vst [vmem:[#allocation96_spill] sm:$0xff] %v9248_v13  ;;  %v9250_v5 = vpop.f32.mrf.mxu3  ;;  %v9312_v7 = vpack.c.b16 %v2953_v28, %v2952_v35 }
 0x190   : > { %12238 = vst [vmem:[#allocation97_spill] sm:$0xff] %v9250_v5  ;;  %v9255_v23 = vpop.f32.mrf.mxu1  ;;  %v9316_v45 = vpack.c.b16 %v2701_v6, %v2700_v22 }
 0x191   : > { %12240 = vst [vmem:[#allocation99_spill] sm:$0xff] %v9255_v23 }
 0x192   : > { %v9260_v56 = vpop.f32.mrf.mxu0  ;;  %12249 = vst [vmem:[#allocation108_spill] sm:$0xff] %v9312_v7 }
 0x193   : > { %12242 = vst [vmem:[#allocation101_spill] sm:$0xff] %v9260_v56  ;;  %4185 = vmatmul.bf16.gmra.mxu1 %v9163_v27  ;;  %4514 = vmatmul.bf16.gmra.mxu2 %v9252_v4  ;;  %v9391_v56 = vld [vmem:[%s8588_s22 + $0x80] sm:$0xf] }
 0x194   : > { %4843 = vmatmul.bf16.gmra.mxu3 %v8706_v0  ;;  %v9279_v0 = vld [vmem:[%s8588_s22 + $0x68] sm:$0xf] }
 0x195   : > { %5172 = vmatmul.bf16.gmra.mxu0 %v9257_v44  ;;  %v545_v5 = vshll.u32 %v9279_v0, 16  ;;  %v549_v39 = vshrl.u32 %v9279_v0, 16 }
 0x196   : > { %v9273_v20 = vpop.f32.mrf.mxu2 }
 0x197   : > { %12243 = vst [vmem:[#allocation102_spill] sm:$0xff] %v9273_v20  ;;  %v9281_v36 = vpop.f32.mrf.mxu3  ;;  %v547_v27 = vrot.slane %v545_v5, 5  ;;  %v551_v20 = vrot.slane %v549_v39, 4  ;;  %v7123_v39 = vrot.slane %v9175_v24, 9  ;;  %v1944_v24 = vsel %vm8933_vm5, %v1942_v32, %v1943_v11 }
 0x198   : > { %12244 = vst [vmem:[#allocation103_spill] sm:$0xff] %v9281_v36  ;;  %v9283_v42 = vpop.f32.mrf.mxu1  ;;  %v539_v36 = vshll.u32 %v9276_v18, 16 }
 0x199   : > { %12245 = vst [vmem:[#allocation104_spill] sm:$0xff] %v9283_v42  ;;  %v9308_v42 = vld [vmem:[%s8588_s22 + $0x6c] sm:$0xf]  ;;  %v552_v5 = vor.u32 %v551_v20, %v547_v27  ;;  %v9331_v20 = vld [vmem:[%s8588_s22 + $0x70] sm:$0xf] }
 0x19a   : > { %v9293_v33 = vpop.f32.mrf.mxu0  ;;  %v541_v4 = vrot.slane %v539_v36, 5  ;;  %v555_v59 = vshll.u32 %v9308_v42, 16  ;;  %v559_v41 = vshrl.u32 %v9308_v42, 16 }
 0x19b   : > { %12246 = vst [vmem:[#allocation105_spill] sm:$0xff] %v9293_v33  ;;  %v553_v35 = vrot.slane %v552_v5, 4 }
 0x19c   : > { %v542_v36 = vor.u32 %v541_v4, %v538_v31  ;;  %v557_v28 = vrot.slane %v555_v59, 5  ;;  %v1941_v31 = vsel %vm8933_vm5, %v7123_v39, %v1940_v52  ;;  %v2955_v52 = vunpack.c.l.b16 %v1944_v24 }
 0x19e   : > { %v9305_v13 = vpop.f32.mrf.mxu2  ;;  %v543_v60 = vrot.slane %v542_v36, 4  ;;  %v558_v59 = vsel %vm8928_vm4, %v553_v35, %v557_v28 }
 0x19f   : > { %12247 = vst [vmem:[#allocation106_spill] sm:$0xff] %v9305_v13  ;;  %v9310_v23 = vpop.f32.mrf.mxu3 }
 0x1a0   : > { %12248 = vst [vmem:[#allocation107_spill] sm:$0xff] %v9310_v23  ;;  %v9314_v62 = vpop.f32.mrf.mxu1  ;;  %v548_v5 = vsel %vm8928_vm4, %v543_v60, %v547_v27  ;;  %v2954_v23 = vunpack.c.l.b16 %v1941_v31  ;;  %v1946_v31 = vrot.slane %v9224_v47, 5 }
 0x1a1   : > { %12250 = vst [vmem:[#allocation109_spill] sm:$0xff] %v9314_v62  ;;  %v2702_v39 = vunpack.c.l.b16 %v548_v5 }
 0x1a2   : > { %v9319_v48 = vpop.f32.mrf.mxu0  ;;  %v9357_v60 = vpack.c.b16 %v2955_v52, %v2954_v23  ;;  %v1949_v23 = vrot.slane %v9246_v37, 5  ;;  %v9370_v52 = vld [vmem:[%s8588_s22 + $0x78] sm:$0xf] }
 0x1a3   : > { %12251 = vst [vmem:[#allocation110_spill] sm:$0xff] %v9319_v48  ;;  %4190 = vmatmul.bf16.gmra.mxu1 %v9212_v51  ;;  %4519 = vmatmul.bf16.gmra.mxu2 %v9312_v7  ;;  %v2703_v7 = vunpack.c.l.b16 %v558_v59  ;;  %v561_v51 = vrot.slane %v559_v41, 4  ;;  %v1945_v59 = vrot.slane %v1943_v11, 4 }
 0x1a4   : > { %4848 = vmatmul.bf16.gmra.mxu3 %v8308_v14  ;;  %v565_v14 = vshll.u32 %v9331_v20, 16  ;;  %12258 = vst [vmem:[#allocation117_spill] sm:$0xff] %v9357_v60 }
 0x1a5   : > { %5177 = vmatmul.bf16.gmra.mxu0 %v9316_v45  ;;  %v9359_v62 = vpack.c.b16 %v2703_v7, %v2702_v39  ;;  %v562_v24 = vor.u32 %v561_v51, %v557_v28  ;;  %v1948_v7 = vrot.slane %v1946_v31, 4  ;;  %v1947_v11 = vsel %vm8933_vm5, %v1945_v59, %v1946_v31 }
 0x1a6   : > { %v9328_v4 = vpop.f32.mrf.mxu2  ;;  %v567_v32 = vrot.slane %v565_v14, 5  ;;  %v8309_v14 = vld [vmem:[%s8588_s22 + $0x64] sm:$0xff]  ;;  %v2956_v59 = vunpack.c.l.b16 %v1947_v11 }
 0x1a7   : > { %12252 = vst [vmem:[#allocation111_spill] sm:$0xff] %v9328_v4  ;;  %v9333_v22 = vpop.f32.mrf.mxu3  ;;  %v563_v47 = vrot.slane %v562_v24, 4 }
 0x1a8   : > { %12253 = vst [vmem:[#allocation112_spill] sm:$0xff] %v9333_v22  ;;  %v9335_v6 = vpop.f32.mrf.mxu1  ;;  %v569_v22 = vshrl.u32 %v9331_v20, 16 }
 0x1a9   : > { %12254 = vst [vmem:[#allocation113_spill] sm:$0xff] %v9335_v6  ;;  %v9353_v6 = vld [vmem:[%s8588_s22 + $0x74] sm:$0x1]  ;;  %v568_v37 = vsel %vm8928_vm4, %v563_v47, %v567_v32 }
 0x1aa   : > { %v9342_v36 = vpop.f32.mrf.mxu0  ;;  %v571_v4 = vrot.slane %v569_v22, 4  ;;  %v575_v22 = vshll.u32 %v9353_v6, 16 }
 0x1ab   : > { %12255 = vst [vmem:[#allocation114_spill] sm:$0xff] %v9342_v36 }
 0x1ac   : > { %v572_v41 = vor.u32 %v571_v4, %v567_v32  ;;  %v577_v4 = vrot.slane %v575_v22, 5 }
 0x1ae   : > { %v9350_v13 = vpop.f32.mrf.mxu2  ;;  %v573_v28 = vrot.slane %v572_v41, 4 }
 0x1af   : > { %12256 = vst [vmem:[#allocation115_spill] sm:$0xff] %v9350_v13  ;;  %v9355_v27 = vpop.f32.mrf.mxu3  ;;  %v1950_v13 = vsel %vm8933_vm5, %v1948_v7, %v1949_v23  ;;  %v2704_v23 = vunpack.c.l.b16 %v568_v37 }
 0x1b0   : > { %12257 = vst [vmem:[#allocation116_spill] sm:$0xff] %v9355_v27  ;;  %v4156_v35 = vpop.f32.mrf.mxu1  ;;  %v9373_v27 = vld [vmem:[%s8588_s22 + $0x7c] sm:$0xf]  ;;  %v578_v22 = vsel %vm8928_vm4, %v573_v28, %v577_v4 }
 0x1b1   : > { %v4157_v51 = vadd.f32 %v4156_v35, %v8708_v1  ;;  %v580_v1 = vshrl.u32 %v9370_v52, 16  ;;  %v583_v35 = vshll.u32 %v9370_v52, 16  ;;  %v593_v31 = vshrl.u32 %v9373_v27, 16 }
 0x1b2   : > { %v5143_v5 = vpop.f32.mrf.mxu0  ;;  %v2705_v32 = vunpack.c.l.b16 %v578_v22 }
 0x1b3   : > { %4195 = vmatmul.bf16.gmra.mxu1 %v9257_v44  ;;  %4524 = vmatmul.bf16.gmra.mxu2 %v9357_v60  ;;  %v582_v47 = vrot.slane %v580_v1, 4  ;;  %v585_v36 = vrot.slane %v583_v35, 5 }
 0x1b4   : > { %4853 = vmatmul.bf16.gmra.mxu3 %v8309_v14 }
 0x1b5   : > { %5182 = vmatmul.bf16.gmra.mxu0 %v9359_v62  ;;  %v586_v37 = vor.u32 %v585_v36, %v582_v47  ;;  %v1956_v36 = vrot.slane %v9308_v42, 5 }
 0x1b6   : > { %v4485_v39 = vpop.f32.mrf.mxu2 }
 0x1b7   : > { %v4486_v44 = vadd.f32 %v4485_v39, %v4157_v51  ;;  %v4814_v60 = vpop.f32.mrf.mxu3  ;;  %v589_v51 = vshll.u32 %v9373_v27, 16  ;;  %v2957_v39 = vunpack.c.l.b16 %v1950_v13  ;;  %v9395_v13 = vpack.c.b16 %v2705_v32, %v2704_v23  ;;  %v9409_v23 = vld [vmem:[%s8588_s22 + $0x84] sm:$0xf] }
 0x1b8   : > { %v4158_v14 = vpop.f32.mrf.mxu1  ;;  %v587_v22 = vrot.slane %v586_v37, 4  ;;  %v609_v37 = vshll.u32 %v9409_v23, 16 }
 0x1b9   : > { %v4815_v24 = vadd.f32 %v4814_v60, %v4486_v44  ;;  %v4159_v48 = vadd.f32 %v4158_v14, %v8726_v8  ;;  %v591_v44 = vrot.slane %v589_v51, 5  ;;  %v595_v60 = vrot.slane %v593_v31, 4 }
 0x1ba   : > { %v5145_v41 = vpop.f32.mrf.mxu0  ;;  %v9393_v26 = vpack.c.b16 %v2957_v39, %v2956_v59  ;;  %v599_v8 = vshll.u32 %v9391_v56, 16  ;;  %v7124_v14 = vrot.slane %v9276_v18, 9 }
 0x1bb   : > { %v9387_v7 = vadd.f32 %v5143_v5, %v4815_v24  ;;  %v1953_v5 = vrot.slane %v9279_v0, 5  ;;  %v596_v24 = vor.u32 %v595_v60, %v591_v44  ;;  %v592_v42 = vsel %vm8928_vm4, %v587_v22, %v591_v44 }
 0x1bc   : > { %v601_v59 = vrot.slane %v599_v8, 5  ;;  %v611_v22 = vrot.slane %v609_v37, 5  ;;  %v8311_v37 = vld [vmem:[%s8588_s22 + $0x78] sm:$0xff] }
 0x1bd   : > { %12259 = vst [vmem:[#allocation118_spill] sm:$0xff] %v9387_v7  ;;  %v1955_v0 = vrot.slane %v1953_v5, 4  ;;  %v597_v31 = vrot.slane %v596_v24, 4  ;;  %v1954_v60 = vsel %vm8933_vm5, %v7124_v14, %v1953_v5 }
 0x1be   : > { %v4487_v33 = vpop.f32.mrf.mxu2  ;;  %v2958_v24 = vunpack.c.l.b16 %v1954_v60 }
 0x1bf   : > { %v4488_v28 = vadd.f32 %v4487_v33, %v4159_v48  ;;  %v4816_v4 = vpop.f32.mrf.mxu3  ;;  %v8310_v48 = vld [vmem:[%s8588_s22 + $0x6c] sm:$0xff]  ;;  %v1957_v18 = vsel %vm8933_vm5, %v1955_v0, %v1956_v36 }
 0x1c0   : > { %v4161_v11 = vpop.f32.mrf.mxu1  ;;  %v2959_v5 = vunpack.c.l.b16 %v1957_v18 }
 0x1c1   : > { %v4817_v1 = vadd.f32 %v4816_v4, %v4488_v28  ;;  %v4162_v51 = vadd.f32 %v4161_v11, %v8741_v17  ;;  %v603_v28 = vshrl.u32 %v9391_v56, 16  ;;  %v602_v11 = vsel %vm8928_vm4, %v597_v31, %v601_v59 }
 0x1c2   : > { %v5148_v35 = vpop.f32.mrf.mxu0  ;;  %v2707_v14 = vunpack.c.l.b16 %v602_v11 }
 0x1c3   : > { %4200 = vmatmul.bf16.gmra.mxu1 %v9316_v45  ;;  %4529 = vmatmul.bf16.gmra.mxu2 %v9393_v26  ;;  %v9401_v33 = vadd.f32 %v5145_v41, %v4817_v1  ;;  %v613_v1 = vshrl.u32 %v9409_v23, 16  ;;  %v605_v0 = vrot.slane %v603_v28, 4 }
 0x1c4   : > { %4858 = vmatmul.bf16.gmra.mxu3 %v8310_v48  ;;  %v2706_v48 = vunpack.c.l.b16 %v592_v42 }
 0x1c5   : > { %12260 = vst [vmem:[#allocation119_spill] sm:$0xff] %v9401_v33  ;;  %5187 = vmatmul.bf16.gmra.mxu0 %v9395_v13  ;;  %v9428_v33 = vpack.c.b16 %v2959_v5, %v2958_v24  ;;  %v606_v18 = vor.u32 %v605_v0, %v601_v59  ;;  %v1962_v59 = vrot.slane %v9353_v6, 5 }
 0x1c6   : > { %v4490_v39 = vpop.f32.mrf.mxu2  ;;  %v9430_v60 = vpack.c.b16 %v2707_v14, %v2706_v48  ;;  %v9443_v14 = vld [vmem:[%s8588_s22 + $0x8c] sm:$0xf] }
 0x1c7   : > { %v4491_v32 = vadd.f32 %v4490_v39, %v4162_v51  ;;  %v4819_v41 = vpop.f32.mrf.mxu3  ;;  %v615_v51 = vrot.slane %v613_v1, 4  ;;  %v607_v1 = vrot.slane %v606_v18, 4 }
 0x1c8   : > { %v4163_v47 = vpop.f32.mrf.mxu1 }
 0x1c9   : > { %v4820_v17 = vadd.f32 %v4819_v41, %v4491_v32  ;;  %v4164_v44 = vadd.f32 %v4163_v47, %v8749_v21  ;;  %v9426_v32 = vld [vmem:[%s8588_s22 + $0x88] sm:$0x1]  ;;  %v616_v21 = vor.u32 %v615_v51, %v611_v22  ;;  %v612_v6 = vsel %vm8928_vm4, %v607_v1, %v611_v22 }
 0x1ca   : > { %v5150_v4 = vpop.f32.mrf.mxu0  ;;  %v619_v47 = vshll.u32 %v9426_v32, 16 }
 0x1cb   : > { %v9422_v8 = vadd.f32 %v5148_v35, %v4820_v17  ;;  %v1959_v35 = vrot.slane %v9331_v20, 5  ;;  %v1958_v17 = vrot.slane %v1956_v36, 4  ;;  %v617_v5 = vrot.slane %v616_v21, 4 }
 0x1cc   : > { %v621_v48 = vrot.slane %v619_v47, 5 }
 0x1cd   : > { %12261 = vst [vmem:[#allocation120_spill] sm:$0xff] %v9422_v8  ;;  %v1961_v20 = vrot.slane %v1959_v35, 4  ;;  %v1960_v51 = vsel %vm8933_vm5, %v1958_v17, %v1959_v35 }
 0x1ce   : > { %v4492_v39 = vpop.f32.mrf.mxu2  ;;  %v2960_v47 = vunpack.c.l.b16 %v1960_v51 }
 0x1cf   : > { %v4493_v31 = vadd.f32 %v4492_v39, %v4164_v44  ;;  %v4821_v41 = vpop.f32.mrf.mxu3  ;;  %v9446_v44 = vld [vmem:[%s8588_s22 + $0x90] sm:$0xf] }
 0x1d0   : > { %v4166_v7 = vpop.f32.mrf.mxu1  ;;  %v633_v21 = vshll.u32 %v9446_v44, 16  ;;  %v637_v35 = vshrl.u32 %v9446_v44, 16 }
 0x1d1   : > { %v4822_v42 = vadd.f32 %v4821_v41, %v4493_v31  ;;  %v4167_v24 = vadd.f32 %v4166_v7, %v8761_v30  ;;  %v1963_v31 = vsel %vm8933_vm5, %v1961_v20, %v1962_v59  ;;  %v624_v30 = vshrl.u32 %v9443_v14, 16 }
 0x1d2   : > { %v5153_v28 = vpop.f32.mrf.mxu0  ;;  %v627_v7 = vshll.u32 %v9443_v14, 16  ;;  %v2961_v17 = vunpack.c.l.b16 %v1963_v31  ;;  %v2708_v20 = vunpack.c.l.b16 %v612_v6 }
 0x1d3   : > { %4205 = vmatmul.bf16.gmra.mxu1 %v9359_v62  ;;  %4534 = vmatmul.bf16.gmra.mxu2 %v9428_v33  ;;  %v9436_v11 = vadd.f32 %v5150_v4, %v4822_v42  ;;  %v622_v42 = vsel %vm8928_vm4, %v617_v5, %v621_v48  ;;  %v626_v59 = vrot.slane %v624_v30, 4 }
 0x1d4   : > { %4863 = vmatmul.bf16.gmra.mxu3 %v8311_v37  ;;  %v2709_v22 = vunpack.c.l.b16 %v622_v42  ;;  %v629_v1 = vrot.slane %v627_v7, 5  ;;  %v9466_v8 = vpack.c.b16 %v2961_v17, %v2960_v47  ;;  %v8312_v42 = vld [vmem:[%s8588_s22 + $0x80] sm:$0xff] }
 0x1d5   : > { %12262 = vst [vmem:[#allocation121_spill] sm:$0xff] %v9436_v11  ;;  %5192 = vmatmul.bf16.gmra.mxu0 %v9430_v60  ;;  %v9464_v11 = vld [vmem:[%s8588_s22 + $0x94] sm:$0xf] }
 0x1d6   : > { %v4495_v0 = vpop.f32.mrf.mxu2  ;;  %v9468_v31 = vpack.c.b16 %v2709_v22, %v2708_v20  ;;  %v630_v6 = vor.u32 %v629_v1, %v626_v59  ;;  %v9482_v1 = vld [vmem:[%s8588_s22 + $0x98] sm:$0xf] }
 0x1d7   : > { %v4496_v36 = vadd.f32 %v4495_v0, %v4167_v24  ;;  %v4824_v4 = vpop.f32.mrf.mxu3  ;;  %v635_v0 = vrot.slane %v633_v21, 5  ;;  %v7125_v21 = vrot.slane %v9370_v52, 9 }
 0x1d8   : > { %v4168_v39 = vpop.f32.mrf.mxu1  ;;  %v631_v47 = vrot.slane %v630_v6, 4  ;;  %v653_v6 = vshll.u32 %v9482_v1, 16 }
 0x1d9   : > { %v4825_v41 = vadd.f32 %v4824_v4, %v4496_v36  ;;  %v4169_v24 = vadd.f32 %v4168_v39, %v8778_v38  ;;  %v639_v36 = vrot.slane %v637_v35, 4  ;;  %v643_v38 = vshll.u32 %v9464_v11, 16 }
 0x1da   : > { %v5155_v18 = vpop.f32.mrf.mxu0  ;;  %v1969_v35 = vrot.slane %v9391_v56, 5  ;;  %v636_v56 = vsel %vm8928_vm4, %v631_v47, %v635_v0  ;;  %v655_v47 = vrot.slane %v653_v6, 5  ;;  %v8313_v6 = vld [vmem:[%s8588_s22 + $0x8c] sm:$0xff] }
 0x1db   : > { %v9460_v37 = vadd.f32 %v5153_v28, %v4825_v41  ;;  %v1966_v28 = vrot.slane %v9373_v27, 5  ;;  %v640_v41 = vor.u32 %v639_v36, %v635_v0  ;;  %v645_v22 = vrot.slane %v643_v38, 5 }
 0x1dd   : > { %12263 = vst [vmem:[#allocation122_spill] sm:$0xff] %v9460_v37  ;;  %v1968_v27 = vrot.slane %v1966_v28, 4  ;;  %v641_v20 = vrot.slane %v640_v41, 4 }
 0x1de   : > { %v4497_v4 = vpop.f32.mrf.mxu2 }
 0x1df   : > { %v4498_v5 = vadd.f32 %v4497_v4, %v4169_v24  ;;  %v4826_v48 = vpop.f32.mrf.mxu3  ;;  %v1967_v4 = vsel %vm8933_vm5, %v7125_v21, %v1966_v28  ;;  %v1970_v52 = vsel %vm8933_vm5, %v1968_v27, %v1969_v35 }
 0x1e0   : > { %v4171_v51 = vpop.f32.mrf.mxu1  ;;  %v2962_v41 = vunpack.c.l.b16 %v1967_v4  ;;  %v2963_v28 = vunpack.c.l.b16 %v1970_v52 }
 0x1e1   : > { %v4827_v30 = vadd.f32 %v4826_v48, %v4498_v5  ;;  %v4172_v17 = vadd.f32 %v4171_v51, %v8793_v49  ;;  %v647_v5 = vshrl.u32 %v9464_v11, 16  ;;  %v646_v51 = vsel %vm8928_vm4, %v641_v20, %v645_v22 }
 0x1e2   : > { %v5158_v7 = vpop.f32.mrf.mxu0  ;;  %v2711_v21 = vunpack.c.l.b16 %v646_v51 }
 0x1e3   : > { %4210 = vmatmul.bf16.gmra.mxu1 %v9395_v13  ;;  %4539 = vmatmul.bf16.gmra.mxu2 %v9466_v8  ;;  %v9474_v39 = vadd.f32 %v5155_v18, %v4827_v30  ;;  %v657_v30 = vshrl.u32 %v9482_v1, 16  ;;  %v649_v27 = vrot.slane %v647_v5, 4 }
 0x1e4   : > { %4868 = vmatmul.bf16.gmra.mxu3 %v8312_v42  ;;  %v2710_v42 = vunpack.c.l.b16 %v636_v56 }
 0x1e5   : > { %12264 = vst [vmem:[#allocation123_spill] sm:$0xff] %v9474_v39  ;;  %5197 = vmatmul.bf16.gmra.mxu0 %v9468_v31  ;;  %v9501_v39 = vpack.c.b16 %v2963_v28, %v2962_v41  ;;  %v650_v52 = vor.u32 %v649_v27, %v645_v22  ;;  %v1975_v22 = vrot.slane %v9426_v32, 5 }
 0x1e6   : > { %v4500_v59 = vpop.f32.mrf.mxu2  ;;  %v9503_v4 = vpack.c.b16 %v2711_v21, %v2710_v42  ;;  %v9516_v21 = vld [vmem:[%s8588_s22 + $0xa0] sm:$0xf] }
 0x1e7   : > { %v4501_v24 = vadd.f32 %v4500_v59, %v4172_v17  ;;  %v4829_v18 = vpop.f32.mrf.mxu3  ;;  %v659_v17 = vrot.slane %v657_v30, 4  ;;  %v651_v30 = vrot.slane %v650_v52, 4 }
 0x1e8   : > { %v4173_v36 = vpop.f32.mrf.mxu1 }
 0x1e9   : > { %v4830_v49 = vadd.f32 %v4829_v18, %v4501_v24  ;;  %v4174_v0 = vadd.f32 %v4173_v36, %v8801_v54  ;;  %v9499_v24 = vld [vmem:[%s8588_s22 + $0x9c] sm:$0x1]  ;;  %v660_v54 = vor.u32 %v659_v17, %v655_v47  ;;  %v656_v32 = vsel %vm8928_vm4, %v651_v30, %v655_v47 }
 0x1ea   : > { %v5160_v48 = vpop.f32.mrf.mxu0  ;;  %v663_v36 = vshll.u32 %v9499_v24, 16 }
 0x1eb   : > { %v9495_v38 = vadd.f32 %v5158_v7, %v4830_v49  ;;  %v1972_v7 = vrot.slane %v9409_v23, 5  ;;  %v1971_v49 = vrot.slane %v1969_v35, 4  ;;  %v661_v28 = vrot.slane %v660_v54, 4 }
 0x1ec   : > { %v665_v42 = vrot.slane %v663_v36, 5 }
 0x1ed   : > { %12265 = vst [vmem:[#allocation124_spill] sm:$0xff] %v9495_v38  ;;  %v1974_v23 = vrot.slane %v1972_v7, 4  ;;  %v1973_v17 = vsel %vm8933_vm5, %v1971_v49, %v1972_v7 }
 0x1ee   : > { %v4502_v59 = vpop.f32.mrf.mxu2  ;;  %v2964_v36 = vunpack.c.l.b16 %v1973_v17 }
 0x1ef   : > { %v4503_v20 = vadd.f32 %v4502_v59, %v4174_v0  ;;  %v4831_v18 = vpop.f32.mrf.mxu3  ;;  %v9519_v0 = vld [vmem:[%s8588_s22 + $0xa4] sm:$0xf] }
 0x1f0   : > { %v4176_v37 = vpop.f32.mrf.mxu1  ;;  %v677_v54 = vshll.u32 %v9519_v0, 16  ;;  %v681_v7 = vshrl.u32 %v9519_v0, 16 }
 0x1f1   : > { %v4832_v56 = vadd.f32 %v4831_v18, %v4503_v20  ;;  %v4177_v41 = vadd.f32 %v4176_v37, %v8813_v2  ;;  %v1976_v20 = vsel %vm8933_vm5, %v1974_v23, %v1975_v22  ;;  %v668_v2 = vshrl.u32 %v9516_v21, 16 }
 0x1f2   : > { %v5163_v5 = vpop.f32.mrf.mxu0  ;;  %v671_v37 = vshll.u32 %v9516_v21, 16  ;;  %v2965_v49 = vunpack.c.l.b16 %v1976_v20  ;;  %v2712_v23 = vunpack.c.l.b16 %v656_v32 }
 0x1f3   : > { %4215 = vmatmul.bf16.gmra.mxu1 %v9430_v60  ;;  %4544 = vmatmul.bf16.gmra.mxu2 %v9501_v39  ;;  %v9509_v51 = vadd.f32 %v5160_v48, %v4832_v56  ;;  %v666_v56 = vsel %vm8928_vm4, %v661_v28, %v665_v42  ;;  %v670_v22 = vrot.slane %v668_v2, 4 }
 0x1f4   : > { %4873 = vmatmul.bf16.gmra.mxu3 %v8313_v6  ;;  %v2713_v47 = vunpack.c.l.b16 %v666_v56  ;;  %v673_v30 = vrot.slane %v671_v37, 5  ;;  %v9539_v38 = vpack.c.b16 %v2965_v49, %v2964_v36  ;;  %v8314_v56 = vld [vmem:[%s8588_s22 + $0x94] sm:$0xff] }
 0x1f5   : > { %12266 = vst [vmem:[#allocation125_spill] sm:$0xff] %v9509_v51  ;;  %5202 = vmatmul.bf16.gmra.mxu0 %v9503_v4  ;;  %v9537_v51 = vld [vmem:[%s8588_s22 + $0xa8] sm:$0xf] }
 0x1f6   : > { %v4505_v27 = vpop.f32.mrf.mxu2  ;;  %v9541_v20 = vpack.c.b16 %v2713_v47, %v2712_v23  ;;  %v674_v32 = vor.u32 %v673_v30, %v670_v22  ;;  %v9555_v30 = vld [vmem:[%s8588_s22 + $0xac] sm:$0xf] }
 0x1f7   : > { %v4506_v35 = vadd.f32 %v4505_v27, %v4177_v41  ;;  %v4834_v48 = vpop.f32.mrf.mxu3  ;;  %v679_v27 = vrot.slane %v677_v54, 5  ;;  %v7126_v54 = vrot.slane %v9443_v14, 9 }
 0x1f8   : > { %v4178_v59 = vpop.f32.mrf.mxu1  ;;  %v675_v36 = vrot.slane %v674_v32, 4  ;;  %v697_v32 = vshll.u32 %v9555_v30, 16 }
 0x1f9   : > { %v4835_v18 = vadd.f32 %v4834_v48, %v4506_v35  ;;  %v4179_v41 = vadd.f32 %v4178_v59, %v8830_v16  ;;  %v683_v35 = vrot.slane %v681_v7, 4  ;;  %v687_v16 = vshll.u32 %v9537_v51, 16 }
 0x1fa   : > { %v5165_v52 = vpop.f32.mrf.mxu0  ;;  %v1982_v7 = vrot.slane %v9464_v11, 5  ;;  %v680_v11 = vsel %vm8928_vm4, %v675_v36, %v679_v27  ;;  %v699_v36 = vrot.slane %v697_v32, 5  ;;  %v8315_v32 = vld [vmem:[%s8588_s22 + $0xa0] sm:$0xff] }
 0x1fb   : > { %v9533_v6 = vadd.f32 %v5163_v5, %v4835_v18  ;;  %v1979_v5 = vrot.slane %v9446_v44, 5  ;;  %v684_v18 = vor.u32 %v683_v35, %v679_v27  ;;  %v689_v47 = vrot.slane %v687_v16, 5 }
 0x1fd   : > { %12267 = vst [vmem:[#allocation126_spill] sm:$0xff] %v9533_v6  ;;  %v1981_v44 = vrot.slane %v1979_v5, 4  ;;  %v685_v23 = vrot.slane %v684_v18, 4 }
 0x1fe   : > { %v4507_v48 = vpop.f32.mrf.mxu2 }
 0x1ff   : > { %v4508_v28 = vadd.f32 %v4507_v48, %v4179_v41  ;;  %v4836_v42 = vpop.f32.mrf.mxu3  ;;  %v1980_v48 = vsel %vm8933_vm5, %v7126_v54, %v1979_v5  ;;  %v1983_v14 = vsel %vm8933_vm5, %v1981_v44, %v1982_v7 }
 0x200   : > { %v4181_v17 = vpop.f32.mrf.mxu1  ;;  %v2966_v18 = vunpack.c.l.b16 %v1980_v48  ;;  %v2967_v5 = vunpack.c.l.b16 %v1983_v14 }
 0x201   : > { %v4837_v2 = vadd.f32 %v4836_v42, %v4508_v28  ;;  %v4182_v49 = vadd.f32 %v4181_v17, %v8845_v43  ;;  %v691_v28 = vshrl.u32 %v9537_v51, 16  ;;  %v690_v17 = vsel %vm8928_vm4, %v685_v23, %v689_v47 }
 0x202   : > { %v5168_v37 = vpop.f32.mrf.mxu0  ;;  %v2715_v54 = vunpack.c.l.b16 %v690_v17 }
 0x203   : > { %4220 = vmatmul.bf16.gmra.mxu1 %v9468_v31  ;;  %4549 = vmatmul.bf16.gmra.mxu2 %v9539_v38  ;;  %v9547_v59 = vadd.f32 %v5165_v52, %v4837_v2  ;;  %v701_v2 = vshrl.u32 %v9555_v30, 16  ;;  %v693_v44 = vrot.slane %v691_v28, 4 }
 0x204   : > { %4878 = vmatmul.bf16.gmra.mxu3 %v8314_v56  ;;  %v2714_v56 = vunpack.c.l.b16 %v680_v11 }
 0x205   : > { %12268 = vst [vmem:[#allocation127_spill] sm:$0xff] %v9547_v59  ;;  %5207 = vmatmul.bf16.gmra.mxu0 %v9541_v20  ;;  %v9574_v59 = vpack.c.b16 %v2967_v5, %v2966_v18  ;;  %v694_v14 = vor.u32 %v693_v44, %v689_v47  ;;  %v1988_v47 = vrot.slane %v9499_v24, 5  ;;  %v7839_v18 = vld [vmem:[%s12000_s1 + $0x1a8] sm:$0xff] }
 0x206   : > { %v4510_v22 = vpop.f32.mrf.mxu2  ;;  %v9576_v48 = vpack.c.b16 %v2715_v54, %v2714_v56  ;;  %v7847_v5 = vld [vmem:[%s12000_s1 + $0x1e8] sm:$0xff]  ;;  %v9595_v54 = vld [vmem:[%s8588_s22 + $0xb4] sm:$0xf]  ;;  %5794 = vmatpush.bf16.msra.mxu2 %v7839_v18 }
 0x207   : > { %v4511_v41 = vadd.f32 %v4510_v22, %v4182_v49  ;;  %v4839_v52 = vpop.f32.mrf.mxu3  ;;  %v703_v49 = vrot.slane %v701_v2, 4  ;;  %12270 = vst [vmem:[#allocation129_spill] sm:$0xff] %v9574_v59  ;;  %v695_v2 = vrot.slane %v694_v14, 4  ;;  %6123 = vmatpush.bf16.msra.mxu3 %v7847_v5  ;;  %v715_v14 = vshll.u32 %v9595_v54, 16 }
 0x208   : > { %v4183_v35 = vpop.f32.mrf.mxu1 }
 0x209   : > { %v4840_v43 = vadd.f32 %v4839_v52, %v4511_v41  ;;  %v4184_v27 = vadd.f32 %v4183_v35, %v8853_v57  ;;  %v9572_v41 = vld [vmem:[%s8588_s22 + $0xb0] sm:$0x1]  ;;  %v1984_v35 = vrot.slane %v1982_v7, 4 }
 0x20a   : > { %v5170_v42 = vpop.f32.mrf.mxu0  ;;  %v707_v57 = vshll.u32 %v9572_v41, 16 }
 0x20b   : > { %v9568_v16 = vadd.f32 %v5168_v37, %v4840_v43  ;;  %v1985_v37 = vrot.slane %v9482_v1, 5  ;;  %v704_v43 = vor.u32 %v703_v49, %v699_v36 }
 0x20c   : > { %v709_v56 = vrot.slane %v707_v57, 5 }
 0x20d   : > { %12269 = vst [vmem:[#allocation128_spill] sm:$0xff] %v9568_v16  ;;  %v1987_v1 = vrot.slane %v1985_v37, 4 }
 0x20e   : > { %v4512_v22 = vpop.f32.mrf.mxu2 }
 0x20f   : > { %v4513_v23 = vadd.f32 %v4512_v22, %v4184_v27  ;;  %v4841_v52 = vpop.f32.mrf.mxu3  ;;  %v9598_v27 = vld [vmem:[%s8588_s22 + $0xb8] sm:$0xf]  ;;  %v1986_v22 = vsel %vm8933_vm5, %v1984_v35, %v1985_v37  ;;  %v7831_v35 = vld [vmem:[%s12000_s1 + $0x168] sm:$0xff] }
 0x210   : > { %v4186_v6 = vpop.f32.mrf.mxu1  ;;  %v725_v37 = vshrl.u32 %v9598_v27, 16  ;;  %5465 = vmatpush.bf16.msra.mxu1 %v7831_v35 }
 0x211   : > { %v4842_v11 = vadd.f32 %v4841_v52, %v4513_v23  ;;  %v4187_v7 = vadd.f32 %v4186_v6, %v8865_v29  ;;  %v1989_v52 = vsel %vm8933_vm5, %v1987_v1, %v1988_v47  ;;  %v700_v29 = vsel %vm8928_vm4, %v695_v2, %v699_v36  ;;  %v7855_v36 = vld [vmem:[%s12000_s1 + $0x228] sm:$0xff] }
 0x212   : > { %v5173_v28 = vpop.f32.mrf.mxu0  ;;  %v712_v6 = vshrl.u32 %v9595_v54, 16  ;;  %v2968_v1 = vunpack.c.l.b16 %v1986_v22  ;;  %v2969_v47 = vunpack.c.l.b16 %v1989_v52  ;;  %6452 = vmatpush.bf16.msra.mxu0 %v7855_v36  ;;  %v2716_v18 = vunpack.c.l.b16 %v700_v29 }
 0x213   : > { %4225 = vmatmul.bf16.gmra.mxu1 %v9503_v4  ;;  %4554 = vmatmul.bf16.gmra.mxu2 %v9574_v59  ;;  %v9582_v17 = vadd.f32 %v5170_v42, %v4842_v11  ;;  %v705_v42 = vrot.slane %v704_v43, 4 }
 0x214   : > { %4883 = vmatmul.bf16.gmra.mxu3 %v8315_v32  ;;  %v721_v32 = vshll.u32 %v9598_v27, 16  ;;  %v9624_v22 = vpack.c.b16 %v2969_v47, %v2968_v1 }
 0x215   : > { %12271 = vst [vmem:[#allocation130_spill] sm:$0xff] %v9582_v17  ;;  %5212 = vmatmul.bf16.gmra.mxu0 %v9576_v48  ;;  %v710_v57 = vsel %vm8928_vm4, %v705_v42, %v709_v56  ;;  %v717_v42 = vrot.slane %v715_v14, 5  ;;  %v9622_v17 = vld [vmem:[%s8588_s22 + $0xbc] sm:$0xf] }
 0x216   : > { %v4515_v44 = vpop.f32.mrf.mxu2  ;;  %v2717_v5 = vunpack.c.l.b16 %v710_v57  ;;  %v8316_v57 = vld [vmem:[%s8588_s22 + $0xa8] sm:$0xff] }
 0x217   : > { %v4516_v24 = vadd.f32 %v4515_v44, %v4187_v7  ;;  %v4844_v49 = vpop.f32.mrf.mxu3  ;;  %v714_v7 = vrot.slane %v712_v6, 4  ;;  %v723_v44 = vrot.slane %v721_v32, 5  ;;  %v7127_v32 = vrot.slane %v9516_v21, 9 }
 0x218   : > { %v4188_v23 = vpop.f32.mrf.mxu1  ;;  %v9626_v35 = vpack.c.b16 %v2717_v5, %v2716_v18  ;;  %v9640_v18 = vld [vmem:[%s8588_s22 + $0xc0] sm:$0xf] }
 0x219   : > { %v4845_v11 = vadd.f32 %v4844_v49, %v4516_v24  ;;  %v4189_v56 = vadd.f32 %v4188_v23, %v8900_v19  ;;  %v727_v24 = vrot.slane %v725_v37, 4  ;;  %v718_v29 = vor.u32 %v717_v42, %v714_v7 }
 0x21a   : > { %v5175_v43 = vpop.f32.mrf.mxu0  ;;  %v731_v19 = vshll.u32 %v9622_v17, 16 }
 0x21b   : > { %v9618_v2 = vadd.f32 %v5173_v28, %v4845_v11  ;;  %v1992_v28 = vrot.slane %v9519_v0, 5  ;;  %v728_v11 = vor.u32 %v727_v24, %v723_v44 }
 0x21c   : > { %v733_v1 = vrot.slane %v731_v19, 5 }
 0x21d   : > { %v1994_v0 = vrot.slane %v1992_v28, 4  ;;  %v729_v36 = vrot.slane %v728_v11, 4  ;;  %v1993_v42 = vsel %vm8933_vm5, %v7127_v32, %v1992_v28 }
 0x21e   : > { %v4517_v49 = vpop.f32.mrf.mxu2 }
 0x21f   : > { %v4518_v16 = vadd.f32 %v4517_v49, %v4189_v56  ;;  %v4846_v59 = vpop.f32.mrf.mxu3  ;;  %v735_v56 = vshrl.u32 %v9622_v17, 16  ;;  %v734_v49 = vsel %vm8928_vm4, %v729_v36, %v733_v1 }
 0x220   : > { %v4191_v52 = vpop.f32.mrf.mxu1 }
 0x221   : > { %v4847_v6 = vadd.f32 %v4846_v59, %v4518_v16  ;;  %v1995_v59 = vrot.slane %v9537_v51, 5  ;;  %v719_v16 = vrot.slane %v718_v29, 4  ;;  %v4192_v37 = vadd.f32 %v4191_v52, %v8925_v34 }
 0x222   : > { %v5178_v14 = vpop.f32.mrf.mxu0  ;;  %v741_v52 = vshll.u32 %v9640_v18, 16  ;;  %v745_v29 = vshrl.u32 %v9640_v18, 16  ;;  %v737_v32 = vrot.slane %v735_v56, 4 }
 0x223   : > { %4230 = vmatmul.bf16.gmra.mxu1 %v9541_v20  ;;  %4559 = vmatmul.bf16.gmra.mxu2 %v9624_v22  ;;  %v9632_v23 = vadd.f32 %v5175_v43, %v4847_v6  ;;  %v1996_v21 = vsel %vm8933_vm5, %v1994_v0, %v1995_v59  ;;  %v724_v51 = vsel %vm8928_vm4, %v719_v16, %v723_v44  ;;  %v2970_v6 = vunpack.c.l.b16 %v1993_v42 }
 0x224   : > { %4888 = vmatmul.bf16.gmra.mxu3 %v8316_v57  ;;  %v2971_v28 = vunpack.c.l.b16 %v1996_v21  ;;  %v2718_v19 = vunpack.c.l.b16 %v724_v51  ;;  %v2719_v57 = vunpack.c.l.b16 %v734_v49  ;;  %v743_v0 = vrot.slane %v741_v52, 5  ;;  %v8317_v52 = vld [vmem:[%s8588_s22 + $0xb4] sm:$0xff] }
 0x225   : > { %12272 = vst [vmem:[#allocation131_spill] sm:$0xff] %v9632_v23  ;;  %5217 = vmatmul.bf16.gmra.mxu0 %v9626_v35  ;;  %v747_v16 = vrot.slane %v745_v29, 4  ;;  %v738_v21 = vor.u32 %v737_v32, %v733_v1  ;;  %v2001_v1 = vrot.slane %v9572_v41, 5 }
 0x226   : > { %v4520_v47 = vpop.f32.mrf.mxu2  ;;  %v9661_v42 = vpack.c.b16 %v2719_v57, %v2718_v19  ;;  %v9674_v57 = vld [vmem:[%s8588_s22 + $0xc8] sm:$0xf] }
 0x227   : > { %v4521_v5 = vadd.f32 %v4520_v47, %v4192_v37  ;;  %v4849_v43 = vpop.f32.mrf.mxu3  ;;  %v9657_v47 = vld [vmem:[%s8588_s22 + $0xc4] sm:$0x1]  ;;  %v739_v29 = vrot.slane %v738_v21, 4 }
 0x228   : > { %v4193_v7 = vpop.f32.mrf.mxu1 }
 0x229   : > { %v4850_v34 = vadd.f32 %v4849_v43, %v4521_v5  ;;  %v4194_v44 = vadd.f32 %v4193_v7, %v8963_v40  ;;  %v9659_v43 = vpack.c.b16 %v2971_v28, %v2970_v6  ;;  %v748_v40 = vor.u32 %v747_v16, %v743_v0 }
 0x22a   : > { %v5180_v24 = vpop.f32.mrf.mxu0  ;;  %v751_v7 = vshll.u32 %v9657_v47, 16  ;;  %v744_v41 = vsel %vm8928_vm4, %v739_v29, %v743_v0 }
 0x22b   : > { %v9653_v11 = vadd.f32 %v5178_v14, %v4850_v34  ;;  %v1998_v14 = vrot.slane %v9555_v30, 5  ;;  %v1997_v34 = vrot.slane %v1995_v59, 4  ;;  %v749_v28 = vrot.slane %v748_v40, 4 }
 0x22c   : > { %v753_v19 = vrot.slane %v751_v7, 5 }
 0x22d   : > { %12273 = vst [vmem:[#allocation132_spill] sm:$0xff] %v9653_v11  ;;  %v2000_v30 = vrot.slane %v1998_v14, 4  ;;  %v1999_v16 = vsel %vm8933_vm5, %v1997_v34, %v1998_v14 }
 0x22e   : > { %v4522_v37 = vpop.f32.mrf.mxu2  ;;  %v2972_v7 = vunpack.c.l.b16 %v1999_v16 }
 0x22f   : > { %v4523_v36 = vadd.f32 %v4522_v37, %v4194_v44  ;;  %v4851_v5 = vpop.f32.mrf.mxu3  ;;  %v9677_v44 = vld [vmem:[%s8588_s22 + $0xcc] sm:$0xf] }
 0x230   : > { %v4196_v23 = vpop.f32.mrf.mxu1  ;;  %v765_v40 = vshll.u32 %v9677_v44, 16  ;;  %v769_v14 = vshrl.u32 %v9677_v44, 16 }
 0x231   : > { %v4852_v51 = vadd.f32 %v4851_v5, %v4523_v36  ;;  %v4197_v6 = vadd.f32 %v4196_v23, %v8983_v58  ;;  %v2002_v36 = vsel %vm8933_vm5, %v2000_v30, %v2001_v1  ;;  %v756_v58 = vshrl.u32 %v9674_v57, 16 }
 0x232   : > { %v5183_v56 = vpop.f32.mrf.mxu0  ;;  %v759_v23 = vshll.u32 %v9674_v57, 16  ;;  %v2973_v34 = vunpack.c.l.b16 %v2002_v36  ;;  %v2720_v30 = vunpack.c.l.b16 %v744_v41 }
 0x233   : > { %4235 = vmatmul.bf16.gmra.mxu1 %v9576_v48  ;;  %4564 = vmatmul.bf16.gmra.mxu2 %v9659_v43  ;;  %v9667_v49 = vadd.f32 %v5180_v24, %v4852_v51  ;;  %v754_v51 = vsel %vm8928_vm4, %v749_v28, %v753_v19  ;;  %v758_v1 = vrot.slane %v756_v58, 4 }
 0x234   : > { %4893 = vmatmul.bf16.gmra.mxu3 %v8317_v52  ;;  %v2721_v0 = vunpack.c.l.b16 %v754_v51  ;;  %v761_v29 = vrot.slane %v759_v23, 5  ;;  %v9697_v11 = vpack.c.b16 %v2973_v34, %v2972_v7  ;;  %v8318_v51 = vld [vmem:[%s8588_s22 + $0xbc] sm:$0xff] }
 0x235   : > { %12274 = vst [vmem:[#allocation133_spill] sm:$0xff] %v9667_v49  ;;  %5222 = vmatmul.bf16.gmra.mxu0 %v9661_v42  ;;  %v9695_v49 = vld [vmem:[%s8588_s22 + $0xd0] sm:$0xf] }
 0x236   : > { %v4525_v32 = vpop.f32.mrf.mxu2  ;;  %v9699_v36 = vpack.c.b16 %v2721_v0, %v2720_v30  ;;  %v762_v41 = vor.u32 %v761_v29, %v758_v1  ;;  %v9713_v29 = vld [vmem:[%s8588_s22 + $0xd4] sm:$0xf] }
 0x237   : > { %v4526_v59 = vadd.f32 %v4525_v32, %v4197_v6  ;;  %v4854_v24 = vpop.f32.mrf.mxu3  ;;  %v767_v32 = vrot.slane %v765_v40, 5  ;;  %v7128_v40 = vrot.slane %v9595_v54, 9 }
 0x238   : > { %v4198_v37 = vpop.f32.mrf.mxu1  ;;  %v763_v7 = vrot.slane %v762_v41, 4  ;;  %v785_v41 = vshll.u32 %v9713_v29, 16 }
 0x239   : > { %v4855_v5 = vadd.f32 %v4854_v24, %v4526_v59  ;;  %v4199_v6 = vadd.f32 %v4198_v37, %v9010_v10  ;;  %v771_v59 = vrot.slane %v769_v14, 4  ;;  %v775_v10 = vshll.u32 %v9695_v49, 16 }
 0x23a   : > { %v5185_v21 = vpop.f32.mrf.mxu0  ;;  %v2008_v14 = vrot.slane %v9622_v17, 5  ;;  %v768_v17 = vsel %vm8928_vm4, %v763_v7, %v767_v32  ;;  %v787_v7 = vrot.slane %v785_v41, 5  ;;  %v8319_v41 = vld [vmem:[%s8588_s22 + $0xc8] sm:$0xff] }
 0x23b   : > { %v9691_v52 = vadd.f32 %v5183_v56, %v4855_v5  ;;  %v2005_v56 = vrot.slane %v9598_v27, 5  ;;  %v772_v5 = vor.u32 %v771_v59, %v767_v32  ;;  %v777_v0 = vrot.slane %v775_v10, 5 }
 0x23d   : > { %12275 = vst [vmem:[#allocation134_spill] sm:$0xff] %v9691_v52  ;;  %v2007_v27 = vrot.slane %v2005_v56, 4  ;;  %v773_v30 = vrot.slane %v772_v5, 4 }
 0x23e   : > { %v4527_v24 = vpop.f32.mrf.mxu2 }
 0x23f   : > { %v4528_v28 = vadd.f32 %v4527_v24, %v4199_v6  ;;  %v4856_v19 = vpop.f32.mrf.mxu3  ;;  %v2006_v24 = vsel %vm8933_vm5, %v7128_v40, %v2005_v56  ;;  %v2009_v54 = vsel %vm8933_vm5, %v2007_v27, %v2008_v14 }
 0x240   : > { %v4201_v16 = vpop.f32.mrf.mxu1  ;;  %v2974_v5 = vunpack.c.l.b16 %v2006_v24  ;;  %v2975_v56 = vunpack.c.l.b16 %v2009_v54 }
 0x241   : > { %v4857_v58 = vadd.f32 %v4856_v19, %v4528_v28  ;;  %v4202_v34 = vadd.f32 %v4201_v16, %v9030_v63  ;;  %v779_v28 = vshrl.u32 %v9695_v49, 16  ;;  %v778_v16 = vsel %vm8928_vm4, %v773_v30, %v777_v0 }
 0x242   : > { %v5188_v23 = vpop.f32.mrf.mxu0  ;;  %v2723_v40 = vunpack.c.l.b16 %v778_v16 }
 0x243   : > { %4240 = vmatmul.bf16.gmra.mxu1 %v9626_v35  ;;  %4569 = vmatmul.bf16.gmra.mxu2 %v9697_v11  ;;  %v9705_v37 = vadd.f32 %v5185_v21, %v4857_v58  ;;  %v789_v58 = vshrl.u32 %v9713_v29, 16  ;;  %v781_v27 = vrot.slane %v779_v28, 4 }
 0x244   : > { %4898 = vmatmul.bf16.gmra.mxu3 %v8318_v51  ;;  %v2722_v51 = vunpack.c.l.b16 %v768_v17 }
 0x245   : > { %12276 = vst [vmem:[#allocation135_spill] sm:$0xff] %v9705_v37  ;;  %5227 = vmatmul.bf16.gmra.mxu0 %v9699_v36  ;;  %v9732_v37 = vpack.c.b16 %v2975_v56, %v2974_v5  ;;  %v782_v54 = vor.u32 %v781_v27, %v777_v0  ;;  %v2014_v0 = vrot.slane %v9657_v47, 5 }
 0x246   : > { %v4530_v1 = vpop.f32.mrf.mxu2  ;;  %v9734_v24 = vpack.c.b16 %v2723_v40, %v2722_v51  ;;  %v9747_v40 = vld [vmem:[%s8588_s22 + $0xdc] sm:$0xf] }
 0x247   : > { %v4531_v6 = vadd.f32 %v4530_v1, %v4202_v34  ;;  %v4859_v21 = vpop.f32.mrf.mxu3  ;;  %v791_v34 = vrot.slane %v789_v58, 4  ;;  %v783_v58 = vrot.slane %v782_v54, 4 }
 0x248   : > { %v4203_v59 = vpop.f32.mrf.mxu1 }
 0x249   : > { %v4860_v63 = vadd.f32 %v4859_v21, %v4531_v6  ;;  %v4204_v32 = vadd.f32 %v4203_v59, %v9052_v15  ;;  %v9730_v6 = vld [vmem:[%s8588_s22 + $0xd8] sm:$0x1]  ;;  %v792_v15 = vor.u32 %v791_v34, %v787_v7  ;;  %v788_v47 = vsel %vm8928_vm4, %v783_v58, %v787_v7 }
 0x24a   : > { %v5190_v19 = vpop.f32.mrf.mxu0  ;;  %v795_v59 = vshll.u32 %v9730_v6, 16 }
 0x24b   : > { %v9726_v10 = vadd.f32 %v5188_v23, %v4860_v63  ;;  %v2011_v23 = vrot.slane %v9640_v18, 5  ;;  %v2010_v63 = vrot.slane %v2008_v14, 4  ;;  %v793_v56 = vrot.slane %v792_v15, 4 }
 0x24c   : > { %v797_v51 = vrot.slane %v795_v59, 5 }
 0x24d   : > { %12277 = vst [vmem:[#allocation136_spill] sm:$0xff] %v9726_v10  ;;  %v2013_v18 = vrot.slane %v2011_v23, 4  ;;  %v2012_v34 = vsel %vm8933_vm5, %v2010_v63, %v2011_v23 }
 0x24e   : > { %v4532_v1 = vpop.f32.mrf.mxu2  ;;  %v2976_v59 = vunpack.c.l.b16 %v2012_v34 }
 0x24f   : > { %v4533_v30 = vadd.f32 %v4532_v1, %v4204_v32  ;;  %v4861_v21 = vpop.f32.mrf.mxu3  ;;  %v9750_v32 = vld [vmem:[%s8588_s22 + $0xe0] sm:$0xf] }
 0x250   : > { %v4206_v52 = vpop.f32.mrf.mxu1  ;;  %v809_v15 = vshll.u32 %v9750_v32, 16  ;;  %v813_v23 = vshrl.u32 %v9750_v32, 16 }
 0x251   : > { %v4862_v17 = vadd.f32 %v4861_v21, %v4533_v30  ;;  %v4207_v5 = vadd.f32 %v4206_v52, %v9073_v46  ;;  %v2015_v30 = vsel %vm8933_vm5, %v2013_v18, %v2014_v0  ;;  %v800_v46 = vshrl.u32 %v9747_v40, 16 }
 0x252   : > { %v5193_v28 = vpop.f32.mrf.mxu0  ;;  %v803_v52 = vshll.u32 %v9747_v40, 16  ;;  %v2977_v63 = vunpack.c.l.b16 %v2015_v30  ;;  %v2724_v18 = vunpack.c.l.b16 %v788_v47 }
 0x253   : > { %4245 = vmatmul.bf16.gmra.mxu1 %v9661_v42  ;;  %4574 = vmatmul.bf16.gmra.mxu2 %v9732_v37  ;;  %v9740_v16 = vadd.f32 %v5190_v19, %v4862_v17  ;;  %v798_v17 = vsel %vm8928_vm4, %v793_v56, %v797_v51  ;;  %v802_v0 = vrot.slane %v800_v46, 4 }
 0x254   : > { %4903 = vmatmul.bf16.gmra.mxu3 %v8319_v41  ;;  %v2725_v7 = vunpack.c.l.b16 %v798_v17  ;;  %v805_v58 = vrot.slane %v803_v52, 5  ;;  %v9770_v10 = vpack.c.b16 %v2977_v63, %v2976_v59  ;;  %v8320_v17 = vld [vmem:[%s8588_s22 + $0xd0] sm:$0xff] }
 0x255   : > { %12278 = vst [vmem:[#allocation137_spill] sm:$0xff] %v9740_v16  ;;  %5232 = vmatmul.bf16.gmra.mxu0 %v9734_v24  ;;  %v9768_v16 = vld [vmem:[%s8588_s22 + $0xe4] sm:$0xf] }
 0x256   : > { %v4535_v27 = vpop.f32.mrf.mxu2  ;;  %v9772_v30 = vpack.c.b16 %v2725_v7, %v2724_v18  ;;  %v806_v47 = vor.u32 %v805_v58, %v802_v0  ;;  %v9786_v58 = vld [vmem:[%s8588_s22 + $0xe8] sm:$0xf] }
 0x257   : > { %v4536_v14 = vadd.f32 %v4535_v27, %v4207_v5  ;;  %v4864_v19 = vpop.f32.mrf.mxu3  ;;  %v811_v27 = vrot.slane %v809_v15, 5  ;;  %v7129_v15 = vrot.slane %v9674_v57, 9 }
 0x258   : > { %v4208_v1 = vpop.f32.mrf.mxu1  ;;  %12280 = vst [vmem:[#allocation139_spill] sm:$0xff] %v9772_v30  ;;  %v807_v59 = vrot.slane %v806_v47, 4  ;;  %v829_v47 = vshll.u32 %v9786_v58, 16 }
 0x259   : > { %v4865_v21 = vadd.f32 %v4864_v19, %v4536_v14  ;;  %v4209_v5 = vadd.f32 %v4208_v1, %v9099_v3  ;;  %v815_v14 = vrot.slane %v813_v23, 4  ;;  %v819_v3 = vshll.u32 %v9768_v16, 16 }
 0x25a   : > { %v5195_v54 = vpop.f32.mrf.mxu0  ;;  %v2021_v23 = vrot.slane %v9695_v49, 5  ;;  %v812_v49 = vsel %vm8928_vm4, %v807_v59, %v811_v27  ;;  %v831_v59 = vrot.slane %v829_v47, 5  ;;  %v8321_v47 = vld [vmem:[%s8588_s22 + $0xdc] sm:$0xff] }
 0x25b   : > { %v9764_v41 = vadd.f32 %v5193_v28, %v4865_v21  ;;  %v2018_v28 = vrot.slane %v9677_v44, 5  ;;  %v816_v21 = vor.u32 %v815_v14, %v811_v27  ;;  %v821_v7 = vrot.slane %v819_v3, 5 }
 0x25d   : > { %12279 = vst [vmem:[#allocation138_spill] sm:$0xff] %v9764_v41  ;;  %v2020_v44 = vrot.slane %v2018_v28, 4  ;;  %v817_v18 = vrot.slane %v816_v21, 4 }
 0x25e   : > { %v4537_v19 = vpop.f32.mrf.mxu2 }
 0x25f   : > { %v4538_v56 = vadd.f32 %v4537_v19, %v4209_v5  ;;  %v4866_v51 = vpop.f32.mrf.mxu3  ;;  %v2019_v19 = vsel %vm8933_vm5, %v7129_v15, %v2018_v28  ;;  %v2022_v57 = vsel %vm8933_vm5, %v2020_v44, %v2021_v23 }
 0x260   : > { %v4211_v34 = vpop.f32.mrf.mxu1  ;;  %v2978_v21 = vunpack.c.l.b16 %v2019_v19  ;;  %v2979_v28 = vunpack.c.l.b16 %v2022_v57 }
 0x261   : > { %v4867_v46 = vadd.f32 %v4866_v51, %v4538_v56  ;;  %v4212_v63 = vadd.f32 %v4211_v34, %v9121_v61  ;;  %v823_v56 = vshrl.u32 %v9768_v16, 16  ;;  %v822_v34 = vsel %vm8928_vm4, %v817_v18, %v821_v7 }
 0x262   : > { %v5198_v52 = vpop.f32.mrf.mxu0  ;;  %v2727_v15 = vunpack.c.l.b16 %v822_v34 }
 0x263   : > { %4250 = vmatmul.bf16.gmra.mxu1 %v9699_v36  ;;  %4579 = vmatmul.bf16.gmra.mxu2 %v9770_v10  ;;  %v9778_v1 = vadd.f32 %v5195_v54, %v4867_v46  ;;  %v833_v46 = vshrl.u32 %v9786_v58, 16  ;;  %v825_v44 = vrot.slane %v823_v56, 4 }
 0x264   : > { %4908 = vmatmul.bf16.gmra.mxu3 %v8320_v17  ;;  %v2726_v17 = vunpack.c.l.b16 %v812_v49 }
 0x265   : > { %12281 = vst [vmem:[#allocation140_spill] sm:$0xff] %v9778_v1  ;;  %5237 = vmatmul.bf16.gmra.mxu0 %v9772_v30  ;;  %v9805_v1 = vpack.c.b16 %v2979_v28, %v2978_v21  ;;  %v826_v57 = vor.u32 %v825_v44, %v821_v7  ;;  %v2027_v7 = vrot.slane %v9730_v6, 5 }
 0x266   : > { %v4540_v0 = vpop.f32.mrf.mxu2  ;;  %v9807_v19 = vpack.c.b16 %v2727_v15, %v2726_v17  ;;  %v9820_v15 = vld [vmem:[%s8588_s22 + $0xf0] sm:$0xf] }
 0x267   : > { %v4541_v5 = vadd.f32 %v4540_v0, %v4212_v63  ;;  %v4869_v54 = vpop.f32.mrf.mxu3  ;;  %v835_v63 = vrot.slane %v833_v46, 4  ;;  %v827_v46 = vrot.slane %v826_v57, 4 }
 0x268   : > { %v4213_v14 = vpop.f32.mrf.mxu1  ;;  %12283 = vst [vmem:[#allocation142_spill] sm:$0xff] %v9807_v19 }
 0x269   : > { %v4870_v61 = vadd.f32 %v4869_v54, %v4541_v5  ;;  %v4214_v27 = vadd.f32 %v4213_v14, %v9145_v9  ;;  %v9803_v5 = vld [vmem:[%s8588_s22 + $0xec] sm:$0x1]  ;;  %v836_v9 = vor.u32 %v835_v63, %v831_v59  ;;  %v832_v6 = vsel %vm8928_vm4, %v827_v46, %v831_v59 }
 0x26a   : > { %v5200_v51 = vpop.f32.mrf.mxu0  ;;  %v839_v14 = vshll.u32 %v9803_v5, 16 }
 0x26b   : > { %v9799_v3 = vadd.f32 %v5198_v52, %v4870_v61  ;;  %v2024_v52 = vrot.slane %v9713_v29, 5  ;;  %v2023_v61 = vrot.slane %v2021_v23, 4  ;;  %v837_v28 = vrot.slane %v836_v9, 4 }
 0x26c   : > { %v841_v17 = vrot.slane %v839_v14, 5 }
 0x26d   : > { %12282 = vst [vmem:[#allocation141_spill] sm:$0xff] %v9799_v3  ;;  %v2026_v29 = vrot.slane %v2024_v52, 4  ;;  %v2025_v63 = vsel %vm8933_vm5, %v2023_v61, %v2024_v52 }
 0x26e   : > { %v4542_v0 = vpop.f32.mrf.mxu2  ;;  %v2980_v14 = vunpack.c.l.b16 %v2025_v63 }
 0x26f   : > { %v4543_v18 = vadd.f32 %v4542_v0, %v4214_v27  ;;  %v4871_v54 = vpop.f32.mrf.mxu3  ;;  %v9823_v27 = vld [vmem:[%s8588_s22 + $0xf4] sm:$0xf] }
 0x270   : > { %v4216_v41 = vpop.f32.mrf.mxu1  ;;  %v853_v9 = vshll.u32 %v9823_v27, 16  ;;  %v857_v52 = vshrl.u32 %v9823_v27, 16 }
 0x271   : > { %v4872_v49 = vadd.f32 %v4871_v54, %v4543_v18  ;;  %v4217_v21 = vadd.f32 %v4216_v41, %v9166_v12  ;;  %v2028_v18 = vsel %vm8933_vm5, %v2026_v29, %v2027_v7  ;;  %v844_v12 = vshrl.u32 %v9820_v15, 16 }
 0x272   : > { %v5203_v56 = vpop.f32.mrf.mxu0  ;;  %v847_v41 = vshll.u32 %v9820_v15, 16  ;;  %v2981_v61 = vunpack.c.l.b16 %v2028_v18  ;;  %v2728_v29 = vunpack.c.l.b16 %v832_v6 }
 0x273   : > { %4255 = vmatmul.bf16.gmra.mxu1 %v9734_v24  ;;  %4584 = vmatmul.bf16.gmra.mxu2 %v9805_v1  ;;  %v9813_v34 = vadd.f32 %v5200_v51, %v4872_v49  ;;  %v842_v49 = vsel %vm8928_vm4, %v837_v28, %v841_v17  ;;  %v846_v7 = vrot.slane %v844_v12, 4 }
 0x274   : > { %4913 = vmatmul.bf16.gmra.mxu3 %v8321_v47  ;;  %v2729_v59 = vunpack.c.l.b16 %v842_v49  ;;  %v849_v46 = vrot.slane %v847_v41, 5  ;;  %v9843_v3 = vpack.c.b16 %v2981_v61, %v2980_v14  ;;  %v8322_v49 = vld [vmem:[%s8588_s22 + $0xe4] sm:$0xff] }
 0x275   : > { %12284 = vst [vmem:[#allocation143_spill] sm:$0xff] %v9813_v34  ;;  %5242 = vmatmul.bf16.gmra.mxu0 %v9807_v19  ;;  %v9841_v34 = vld [vmem:[%s8588_s22 + $0xf8] sm:$0xf] }
 0x276   : > { %v4545_v44 = vpop.f32.mrf.mxu2  ;;  %12286 = vst [vmem:[#allocation145_spill] sm:$0xff] %v9843_v3  ;;  %v9845_v18 = vpack.c.b16 %v2729_v59, %v2728_v29  ;;  %v850_v6 = vor.u32 %v849_v46, %v846_v7  ;;  %v9859_v46 = vld [vmem:[%s8588_s22 + $0xfc] sm:$0xf] }
 0x277   : > { %v4546_v23 = vadd.f32 %v4545_v44, %v4217_v21  ;;  %v4874_v51 = vpop.f32.mrf.mxu3  ;;  %v855_v44 = vrot.slane %v853_v9, 5  ;;  %v7130_v9 = vrot.slane %v9747_v40, 9 }
 0x278   : > { %v4218_v0 = vpop.f32.mrf.mxu1  ;;  %12287 = vst [vmem:[#allocation146_spill] sm:$0xff] %v9845_v18  ;;  %v851_v14 = vrot.slane %v850_v6, 4  ;;  %v873_v6 = vshll.u32 %v9859_v46, 16 }
 0x279   : > { %v4875_v54 = vadd.f32 %v4874_v51, %v4546_v23  ;;  %v4219_v21 = vadd.f32 %v4218_v0, %v9192_v53  ;;  %v859_v23 = vrot.slane %v857_v52, 4  ;;  %v863_v53 = vshll.u32 %v9841_v34, 16 }
 0x27a   : > { %v5205_v57 = vpop.f32.mrf.mxu0  ;;  %v2034_v52 = vrot.slane %v9768_v16, 5  ;;  %v856_v16 = vsel %vm8928_vm4, %v851_v14, %v855_v44 }
 0x27b   : > { %v9837_v47 = vadd.f32 %v5203_v56, %v4875_v54  ;;  %v2031_v56 = vrot.slane %v9750_v32, 5  ;;  %v860_v54 = vor.u32 %v859_v23, %v855_v44  ;;  %v865_v59 = vrot.slane %v863_v53, 5  ;;  %v12290_v44 = vld [vmem:[#allocation95_spill] sm:$0xff] }
 0x27d   : > { %12285 = vst [vmem:[#allocation144_spill] sm:$0xff] %v9837_v47  ;;  %v2033_v32 = vrot.slane %v2031_v56, 4  ;;  %v861_v29 = vrot.slane %v860_v54, 4 }
 0x27e   : > { %v4547_v51 = vpop.f32.mrf.mxu2 }
 0x27f   : > { %v4548_v28 = vadd.f32 %v4547_v51, %v4219_v21  ;;  %v4876_v17 = vpop.f32.mrf.mxu3  ;;  %v2032_v51 = vsel %vm8933_vm5, %v7130_v9, %v2031_v56  ;;  %v2035_v40 = vsel %vm8933_vm5, %v2033_v32, %v2034_v52 }
 0x280   : > { %v4221_v63 = vpop.f32.mrf.mxu1  ;;  %v2982_v54 = vunpack.c.l.b16 %v2032_v51  ;;  %v2983_v56 = vunpack.c.l.b16 %v2035_v40 }
 0x281   : > { %v4877_v12 = vadd.f32 %v4876_v17, %v4548_v28  ;;  %v4222_v61 = vadd.f32 %v4221_v63, %v9214_v55  ;;  %v867_v28 = vshrl.u32 %v9841_v34, 16  ;;  %v866_v63 = vsel %vm8928_vm4, %v861_v29, %v865_v59 }
 0x282   : > { %v5208_v41 = vpop.f32.mrf.mxu0  ;;  %v2731_v9 = vunpack.c.l.b16 %v866_v63  ;;  %v9878_v47 = vpack.c.b16 %v2983_v56, %v2982_v54  ;;  %v2036_v63 = vrot.slane %v2034_v52, 4  ;;  %v7838_v54 = vld [vmem:[%s12000_s1 + $0x1a0] sm:$0xff] }
 0x283   : > { %4260 = vmatmul.bf16.gmra.mxu1 %v9772_v30  ;;  %4589 = vmatmul.bf16.gmra.mxu2 %v9843_v3  ;;  %v9851_v0 = vadd.f32 %v5205_v57, %v4877_v12  ;;  %v877_v12 = vshrl.u32 %v9859_v46, 16  ;;  %v869_v32 = vrot.slane %v867_v28, 4  ;;  %v7846_v56 = vld [vmem:[%s12000_s1 + $0x1e0] sm:$0xff] }
 0x284   : > { %4918 = vmatmul.bf16.gmra.mxu3 %v8322_v49  ;;  %v2730_v49 = vunpack.c.l.b16 %v856_v16  ;;  %12291 = vst [vmem:[#allocation95_spill] sm:$0xff] %v9878_v47  ;;  %v12294_v52 = vld [vmem:[#allocation101_spill] sm:$0xff]  ;;  %5795 = vmatpush.bf16.msra.mxu2 %v7838_v54 }
 0x285   : > { %12288 = vst [vmem:[#allocation147_spill] sm:$0xff] %v9851_v0  ;;  %5247 = vmatmul.bf16.gmra.mxu0 %v9845_v18  ;;  %v870_v40 = vor.u32 %v869_v32, %v865_v59  ;;  %v9899_v32 = vld [vmem:[%s8588_s22 + $0x104] sm:$0xf]  ;;  %6124 = vmatpush.bf16.msra.mxu3 %v7846_v56 }
 0x286   : > { %v4550_v7 = vpop.f32.mrf.mxu2  ;;  %v9880_v51 = vpack.c.b16 %v2731_v9, %v2730_v49 }
 0x287   : > { %v4551_v21 = vadd.f32 %v4550_v7, %v4222_v61  ;;  %v4879_v57 = vpop.f32.mrf.mxu3  ;;  %v875_v61 = vrot.slane %v873_v6, 5  ;;  %v879_v7 = vrot.slane %v877_v12, 4  ;;  %v8323_v12 = vld [vmem:[%s8588_s22 + $0xf0] sm:$0xff]  ;;  %v871_v59 = vrot.slane %v870_v40, 4 }
 0x288   : > { %v4223_v23 = vpop.f32.mrf.mxu1  ;;  %12292 = vst [vmem:[#allocation149_spill] sm:$0xff] %v9880_v51 }
 0x289   : > { %v4880_v55 = vadd.f32 %v4879_v57, %v4551_v21  ;;  %v4224_v14 = vadd.f32 %v4223_v23, %v12290_v44  ;;  %v9876_v57 = vld [vmem:[%s8588_s22 + $0x100] sm:$0x1] }
 0x28a   : > { %v5210_v17 = vpop.f32.mrf.mxu0  ;;  %v883_v23 = vshll.u32 %v9876_v57, 16 }
 0x28b   : > { %v9872_v53 = vadd.f32 %v5208_v41, %v4880_v55  ;;  %v2037_v41 = vrot.slane %v9786_v58, 5  ;;  %v880_v55 = vor.u32 %v879_v7, %v875_v61 }
 0x28c   : > { %v885_v9 = vrot.slane %v883_v23, 5 }
 0x28d   : > { %12289 = vst [vmem:[#allocation148_spill] sm:$0xff] %v9872_v53  ;;  %v2039_v58 = vrot.slane %v2037_v41, 4 }
 0x28e   : > { %v4552_v21 = vpop.f32.mrf.mxu2 }
 0x28f   : > { %v4553_v29 = vadd.f32 %v4552_v21, %v4224_v14  ;;  %v4881_v0 = vpop.f32.mrf.mxu3  ;;  %v9902_v14 = vld [vmem:[%s8588_s22 + $0x108] sm:$0xf]  ;;  %v2038_v21 = vsel %vm8933_vm5, %v2036_v63, %v2037_v41  ;;  %v7830_v63 = vld [vmem:[%s12000_s1 + $0x160] sm:$0xff] }
 0x290   : > { %v4226_v3 = vpop.f32.mrf.mxu1  ;;  %v897_v56 = vshll.u32 %v9902_v14, 16  ;;  %v901_v41 = vshrl.u32 %v9902_v14, 16  ;;  %5466 = vmatpush.bf16.msra.mxu1 %v7830_v63 }
 0x291   : > { %v4882_v16 = vadd.f32 %v4881_v0, %v4553_v29  ;;  %v2040_v0 = vrot.slane %v9803_v5, 5  ;;  %v4227_v49 = vadd.f32 %v4226_v3, %v12294_v52  ;;  %v876_v3 = vsel %vm8928_vm4, %v871_v59, %v875_v61  ;;  %v7854_v61 = vld [vmem:[%s12000_s1 + $0x220] sm:$0xff] }
 0x292   : > { %v5213_v28 = vpop.f32.mrf.mxu0  ;;  %6453 = vmatpush.bf16.msra.mxu0 %v7854_v61  ;;  %v2732_v52 = vunpack.c.l.b16 %v876_v3 }
 0x293   : > { %4265 = vmatmul.bf16.gmra.mxu1 %v9807_v19  ;;  %4594 = vmatmul.bf16.gmra.mxu2 %v9878_v47  ;;  %v9886_v6 = vadd.f32 %v5210_v17, %v4882_v16  ;;  %v881_v17 = vrot.slane %v880_v55, 4  ;;  %v2041_v40 = vsel %vm8933_vm5, %v2039_v58, %v2040_v0  ;;  %v888_v16 = vshrl.u32 %v9899_v32, 16  ;;  %v9926_v47 = vld [vmem:[%s8588_s22 + $0x10c] sm:$0xf] }
 0x294   : > { %4923 = vmatmul.bf16.gmra.mxu3 %v8323_v12  ;;  %v891_v55 = vshll.u32 %v9899_v32, 16  ;;  %v2984_v58 = vunpack.c.l.b16 %v2038_v21  ;;  %v2985_v0 = vunpack.c.l.b16 %v2041_v40 }
 0x295   : > { %12293 = vst [vmem:[#allocation150_spill] sm:$0xff] %v9886_v6  ;;  %5252 = vmatmul.bf16.gmra.mxu0 %v9880_v51  ;;  %v886_v54 = vsel %vm8928_vm4, %v881_v17, %v885_v9  ;;  %v890_v17 = vrot.slane %v888_v16, 4  ;;  %v903_v6 = vrot.slane %v901_v41, 4 }
 0x296   : > { %v4555_v44 = vpop.f32.mrf.mxu2  ;;  %v893_v9 = vrot.slane %v891_v55, 5  ;;  %v9928_v21 = vpack.c.b16 %v2985_v0, %v2984_v58 }
 0x297   : > { %v4556_v5 = vadd.f32 %v4555_v44, %v4227_v49  ;;  %v4884_v7 = vpop.f32.mrf.mxu3  ;;  %v2733_v49 = vunpack.c.l.b16 %v886_v54  ;;  %v12296_v44 = vld [vmem:[#allocation105_spill] sm:$0xff]  ;;  %v8324_v54 = vld [vmem:[%s8588_s22 + $0xf8] sm:$0xff] }
 0x298   : > { %v4228_v29 = vpop.f32.mrf.mxu1  ;;  %12297 = vst [vmem:[#allocation105_spill] sm:$0xff] %v9928_v21  ;;  %v894_v3 = vor.u32 %v893_v9, %v890_v17 }
 0x299   : > { %v4885_v23 = vadd.f32 %v4884_v7, %v4556_v5  ;;  %v4229_v5 = vadd.f32 %v4228_v29, %v12296_v44  ;;  %v899_v7 = vrot.slane %v897_v56, 5  ;;  %v9930_v63 = vpack.c.b16 %v2733_v49, %v2732_v52  ;;  %v9944_v52 = vld [vmem:[%s8588_s22 + $0x110] sm:$0xf] }
 0x29a   : > { %v5215_v12 = vpop.f32.mrf.mxu0  ;;  %v907_v29 = vshll.u32 %v9926_v47, 16  ;;  %v7131_v56 = vrot.slane %v9820_v15, 9  ;;  %v911_v44 = vshrl.u32 %v9926_v47, 16 }
 0x29b   : > { %v9922_v59 = vadd.f32 %v5213_v28, %v4885_v23  ;;  %12298 = vst [vmem:[#allocation151_spill] sm:$0xff] %v9930_v63  ;;  %v2044_v28 = vrot.slane %v9823_v27, 5  ;;  %v904_v23 = vor.u32 %v903_v6, %v899_v7  ;;  %v12300_v6 = vld [vmem:[#allocation110_spill] sm:$0xff] }
 0x29c   : > { %v909_v58 = vrot.slane %v907_v29, 5 }
 0x29d   : > { %12295 = vst [vmem:[#allocation101_spill] sm:$0xff] %v9922_v59  ;;  %v2046_v27 = vrot.slane %v2044_v28, 4  ;;  %v905_v61 = vrot.slane %v904_v23, 4  ;;  %v2045_v9 = vsel %vm8933_vm5, %v7131_v56, %v2044_v28  ;;  %v921_v23 = vshrl.u32 %v9944_v52, 16 }
 0x29e   : > { %v4557_v53 = vpop.f32.mrf.mxu2  ;;  %v2986_v29 = vunpack.c.l.b16 %v2045_v9 }
 0x29f   : > { %v4558_v19 = vadd.f32 %v4557_v53, %v4229_v5  ;;  %v4886_v30 = vpop.f32.mrf.mxu3 }
 0x2a0   : > { %v4231_v40 = vpop.f32.mrf.mxu1 }
 0x2a1   : > { %v4887_v16 = vadd.f32 %v4886_v30, %v4558_v19  ;;  %v2047_v30 = vrot.slane %v9841_v34, 5  ;;  %v895_v19 = vrot.slane %v894_v3, 4  ;;  %v4232_v41 = vadd.f32 %v4231_v40, %v12300_v6 }
 0x2a2   : > { %v5218_v55 = vpop.f32.mrf.mxu0  ;;  %v910_v3 = vsel %vm8928_vm4, %v905_v61, %v909_v58  ;;  %v913_v6 = vrot.slane %v911_v44, 4 }
 0x2a3   : > { %4270 = vmatmul.bf16.gmra.mxu1 %v9845_v18  ;;  %4599 = vmatmul.bf16.gmra.mxu2 %v9928_v21  ;;  %v9936_v53 = vadd.f32 %v5215_v12, %v4887_v16  ;;  %v2048_v15 = vsel %vm8933_vm5, %v2046_v27, %v2047_v30  ;;  %v900_v34 = vsel %vm8928_vm4, %v895_v19, %v899_v7  ;;  %v917_v16 = vshll.u32 %v9944_v52, 16  ;;  %v12302_v7 = vld [vmem:[#allocation114_spill] sm:$0xff] }
 0x2a4   : > { %4928 = vmatmul.bf16.gmra.mxu3 %v8324_v54  ;;  %v2987_v28 = vunpack.c.l.b16 %v2048_v15  ;;  %v2734_v56 = vunpack.c.l.b16 %v900_v34  ;;  %v2735_v27 = vunpack.c.l.b16 %v910_v3  ;;  %v914_v15 = vor.u32 %v913_v6, %v909_v58  ;;  %v9978_v6 = vld [vmem:[%s8588_s22 + $0x118] sm:$0xf] }
 0x2a5   : > { %12299 = vst [vmem:[#allocation152_spill] sm:$0xff] %v9936_v53  ;;  %5257 = vmatmul.bf16.gmra.mxu0 %v9930_v63  ;;  %v2049_v3 = vrot.slane %v2047_v30, 4 }
 0x2a6   : > { %v4560_v0 = vpop.f32.mrf.mxu2  ;;  %v9963_v59 = vpack.c.b16 %v2987_v28, %v2986_v29  ;;  %v9965_v9 = vpack.c.b16 %v2735_v27, %v2734_v56  ;;  %v915_v58 = vrot.slane %v914_v15, 4  ;;  %v12306_v29 = vld [vmem:[#allocation5_spill] sm:$0xff]  ;;  %v935_v15 = vshll.u32 %v9978_v6, 16 }
 0x2a7   : > { %v4561_v49 = vadd.f32 %v4560_v0, %v4232_v41  ;;  %v4889_v12 = vpop.f32.mrf.mxu3  ;;  %v919_v41 = vrot.slane %v917_v16, 5  ;;  %v923_v0 = vrot.slane %v921_v23, 4  ;;  %v8325_v23 = vld [vmem:[%s8588_s22 + $0x104] sm:$0xff] }
 0x2a8   : > { %v4233_v17 = vpop.f32.mrf.mxu1  ;;  %12303 = vst [vmem:[#allocation114_spill] sm:$0xff] %v9963_v59 }
 0x2a9   : > { %v4890_v5 = vadd.f32 %v4889_v12, %v4561_v49  ;;  %v4234_v19 = vadd.f32 %v4233_v17, %v12302_v7  ;;  %v9961_v12 = vld [vmem:[%s8588_s22 + $0x114] sm:$0x1]  ;;  %12304 = vst [vmem:[#allocation153_spill] sm:$0xff] %v9965_v9  ;;  %v924_v17 = vor.u32 %v923_v0, %v919_v41 }
 0x2aa   : > { %v5220_v40 = vpop.f32.mrf.mxu0 }
 0x2ab   : > { %v9957_v54 = vadd.f32 %v5218_v55, %v4890_v5  ;;  %v2050_v55 = vrot.slane %v9859_v46, 5  ;;  %v927_v5 = vshll.u32 %v9961_v12, 16  ;;  %v925_v56 = vrot.slane %v924_v17, 4 }
 0x2ad   : > { %12301 = vst [vmem:[#allocation110_spill] sm:$0xff] %v9957_v54  ;;  %v2052_v46 = vrot.slane %v2050_v55, 4  ;;  %v929_v27 = vrot.slane %v927_v5, 5  ;;  %v2051_v0 = vsel %vm8933_vm5, %v2049_v3, %v2050_v55 }
 0x2ae   : > { %v4562_v49 = vpop.f32.mrf.mxu2  ;;  %v2988_v3 = vunpack.c.l.b16 %v2051_v0 }
 0x2af   : > { %v4563_v61 = vadd.f32 %v4562_v49, %v4234_v19  ;;  %v4891_v53 = vpop.f32.mrf.mxu3  ;;  %v9981_v19 = vld [vmem:[%s8588_s22 + $0x11c] sm:$0xf]  ;;  %v930_v5 = vsel %vm8928_vm4, %v925_v56, %v929_v27 }
 0x2b0   : > { %v4236_v21 = vpop.f32.mrf.mxu1  ;;  %v945_v55 = vshrl.u32 %v9981_v19, 16 }
 0x2b1   : > { %v4892_v34 = vadd.f32 %v4891_v53, %v4563_v61  ;;  %v2053_v53 = vrot.slane %v9876_v57, 5  ;;  %v4237_v28 = vadd.f32 %v4236_v21, %v12306_v29  ;;  %v920_v57 = vsel %vm8928_vm4, %v915_v58, %v919_v41 }
 0x2b2   : > { %v5223_v44 = vpop.f32.mrf.mxu0  ;;  %v932_v21 = vshrl.u32 %v9978_v6, 16  ;;  %v2737_v41 = vunpack.c.l.b16 %v930_v5  ;;  %v7132_v5 = vrot.slane %v9899_v32, 9 }
 0x2b3   : > { %4275 = vmatmul.bf16.gmra.mxu1 %v9880_v51  ;;  %4604 = vmatmul.bf16.gmra.mxu2 %v9963_v59  ;;  %v9971_v16 = vadd.f32 %v5220_v40, %v4892_v34  ;;  %v2054_v61 = vsel %vm8933_vm5, %v2052_v46, %v2053_v53  ;;  %v2736_v53 = vunpack.c.l.b16 %v920_v57  ;;  %v9999_v59 = vld [vmem:[%s8588_s22 + $0x120] sm:$0xf] }
 0x2b4   : > { %4933 = vmatmul.bf16.gmra.mxu3 %v8325_v23  ;;  %v941_v23 = vshll.u32 %v9981_v19, 16  ;;  %v2989_v29 = vunpack.c.l.b16 %v2054_v61  ;;  %v934_v58 = vrot.slane %v932_v21, 4 }
 0x2b5   : > { %12305 = vst [vmem:[#allocation154_spill] sm:$0xff] %v9971_v16  ;;  %5262 = vmatmul.bf16.gmra.mxu0 %v9965_v9  ;;  %v10003_v61 = vpack.c.b16 %v2737_v41, %v2736_v53 }
 0x2b6   : > { %v4565_v7 = vpop.f32.mrf.mxu2  ;;  %v10001_v51 = vpack.c.b16 %v2989_v29, %v2988_v3  ;;  %v12312_v3 = vld [vmem:[#allocation11_spill] sm:$0xff] }
 0x2b7   : > { %v4566_v30 = vadd.f32 %v4565_v7, %v4237_v28  ;;  %v4894_v40 = vpop.f32.mrf.mxu3  ;;  %v937_v28 = vrot.slane %v935_v15, 5  ;;  %v12308_v7 = vld [vmem:[#allocation8_spill] sm:$0xff]  ;;  %12310 = vst [vmem:[#allocation155_spill] sm:$0xff] %v10003_v61 }
 0x2b8   : > { %v4238_v49 = vpop.f32.mrf.mxu1  ;;  %12309 = vst [vmem:[#allocation8_spill] sm:$0xff] %v10001_v51 }
 0x2b9   : > { %v4895_v34 = vadd.f32 %v4894_v40, %v4566_v30  ;;  %v4239_v16 = vadd.f32 %v4238_v49, %v12308_v7  ;;  %v943_v30 = vrot.slane %v941_v23, 5  ;;  %v947_v40 = vrot.slane %v945_v55, 4 }
 0x2ba   : > { %v5225_v17 = vpop.f32.mrf.mxu0  ;;  %v938_v57 = vor.u32 %v937_v28, %v934_v58  ;;  %v951_v49 = vshll.u32 %v9999_v59, 16  ;;  %v2060_v23 = vrot.slane %v9926_v47, 5  ;;  %v10017_v28 = vld [vmem:[%s8588_s22 + $0x124] sm:$0xf] }
 0x2bb   : > { %v9995_v46 = vadd.f32 %v5223_v44, %v4895_v34  ;;  %v2057_v44 = vrot.slane %v9902_v14, 5  ;;  %v948_v34 = vor.u32 %v947_v40, %v943_v30 }
 0x2bc   : > { %v939_v55 = vrot.slane %v938_v57, 4  ;;  %v953_v41 = vrot.slane %v951_v49, 5  ;;  %v965_v49 = vshrl.u32 %v10017_v28, 16 }
 0x2bd   : > { %12307 = vst [vmem:[#allocation5_spill] sm:$0xff] %v9995_v46  ;;  %v2059_v14 = vrot.slane %v2057_v44, 4  ;;  %v949_v53 = vrot.slane %v948_v34, 4  ;;  %v961_v34 = vshll.u32 %v10017_v28, 16 }
 0x2be   : > { %v4567_v54 = vpop.f32.mrf.mxu2  ;;  %v944_v47 = vsel %vm8928_vm4, %v939_v55, %v943_v30  ;;  %v12314_v30 = vld [vmem:[#allocation14_spill] sm:$0xff] }
 0x2bf   : > { %v4568_v56 = vadd.f32 %v4567_v54, %v4239_v16  ;;  %v4896_v27 = vpop.f32.mrf.mxu3  ;;  %v8326_v16 = vld [vmem:[%s8588_s22 + $0x10c] sm:$0xff]  ;;  %v2061_v32 = vsel %vm8933_vm5, %v2059_v14, %v2060_v23  ;;  %v2738_v14 = vunpack.c.l.b16 %v944_v47 }
 0x2c0   : > { %v4241_v0 = vpop.f32.mrf.mxu1 }
 0x2c1   : > { %v4897_v21 = vadd.f32 %v4896_v27, %v4568_v56  ;;  %v4242_v29 = vadd.f32 %v4241_v0, %v12312_v3  ;;  %v2058_v56 = vsel %vm8933_vm5, %v7132_v5, %v2057_v44  ;;  %v955_v27 = vshrl.u32 %v9999_v59, 16 }
 0x2c2   : > { %v5228_v15 = vpop.f32.mrf.mxu0  ;;  %v2991_v44 = vunpack.c.l.b16 %v2061_v32 }
 0x2c3   : > { %4280 = vmatmul.bf16.gmra.mxu1 %v9930_v63  ;;  %4609 = vmatmul.bf16.gmra.mxu2 %v10001_v51  ;;  %v10009_v54 = vadd.f32 %v5225_v17, %v4897_v21  ;;  %v954_v21 = vsel %vm8928_vm4, %v949_v53, %v953_v41 }
 0x2c4   : > { %4938 = vmatmul.bf16.gmra.mxu3 %v8326_v16  ;;  %v2990_v16 = vunpack.c.l.b16 %v2058_v56  ;;  %v2739_v3 = vunpack.c.l.b16 %v954_v21  ;;  %v2062_v21 = vrot.slane %v2060_v23, 4 }
 0x2c5   : > { %12311 = vst [vmem:[#allocation156_spill] sm:$0xff] %v10009_v54  ;;  %5267 = vmatmul.bf16.gmra.mxu0 %v10003_v61  ;;  %v967_v54 = vrot.slane %v965_v49, 4  ;;  %v8327_v49 = vld [vmem:[%s8588_s22 + $0x118] sm:$0xff] }
 0x2c6   : > { %v4570_v58 = vpop.f32.mrf.mxu2  ;;  %v10036_v51 = vpack.c.b16 %v2991_v44, %v2990_v16  ;;  %v10038_v56 = vpack.c.b16 %v2739_v3, %v2738_v14  ;;  %v12318_v16 = vld [vmem:[#allocation17_spill] sm:$0xff]  ;;  %v10051_v3 = vld [vmem:[%s8588_s22 + $0x12c] sm:$0xf] }
 0x2c7   : > { %v4571_v7 = vadd.f32 %v4570_v58, %v4242_v29  ;;  %v4899_v17 = vpop.f32.mrf.mxu3  ;;  %v957_v29 = vrot.slane %v955_v27, 4  ;;  %v963_v58 = vrot.slane %v961_v34, 5 }
 0x2c8   : > { %v4243_v40 = vpop.f32.mrf.mxu1  ;;  %12315 = vst [vmem:[#allocation14_spill] sm:$0xff] %v10036_v51 }
 0x2c9   : > { %v4900_v0 = vadd.f32 %v4899_v17, %v4571_v7  ;;  %v4244_v55 = vadd.f32 %v4243_v40, %v12314_v30  ;;  %v10034_v17 = vld [vmem:[%s8588_s22 + $0x128] sm:$0x1]  ;;  %12316 = vst [vmem:[#allocation157_spill] sm:$0xff] %v10038_v56  ;;  %v958_v32 = vor.u32 %v957_v29, %v953_v41  ;;  %v968_v40 = vor.u32 %v967_v54, %v963_v58  ;;  %v10054_v30 = vld [vmem:[%s8588_s22 + $0x130] sm:$0xf] }
 0x2ca   : > { %v5230_v57 = vpop.f32.mrf.mxu0 }
 0x2cb   : > { %v10030_v5 = vadd.f32 %v5228_v15, %v4900_v0  ;;  %v2063_v15 = vrot.slane %v9944_v52, 5  ;;  %v971_v0 = vshll.u32 %v10034_v17, 16  ;;  %v959_v41 = vrot.slane %v958_v32, 4 }
 0x2cc   : > { %v969_v44 = vrot.slane %v968_v40, 4  ;;  %v979_v32 = vshll.u32 %v10051_v3, 16 }
 0x2cd   : > { %12313 = vst [vmem:[#allocation11_spill] sm:$0xff] %v10030_v5  ;;  %v2065_v52 = vrot.slane %v2063_v15, 4  ;;  %v973_v14 = vrot.slane %v971_v0, 5 }
 0x2ce   : > { %v4572_v7 = vpop.f32.mrf.mxu2 }
 0x2cf   : > { %v4573_v53 = vadd.f32 %v4572_v7, %v4244_v55  ;;  %v4901_v46 = vpop.f32.mrf.mxu3  ;;  %v2064_v55 = vsel %vm8933_vm5, %v2062_v21, %v2063_v15  ;;  %v974_v0 = vsel %vm8928_vm4, %v969_v44, %v973_v14  ;;  %v989_v15 = vshrl.u32 %v10054_v30, 16 }
 0x2d0   : > { %v4246_v63 = vpop.f32.mrf.mxu1  ;;  %v2992_v21 = vunpack.c.l.b16 %v2064_v55 }
 0x2d1   : > { %v4902_v47 = vadd.f32 %v4901_v46, %v4573_v53  ;;  %v2066_v46 = vrot.slane %v9961_v12, 5  ;;  %v4247_v54 = vadd.f32 %v4246_v63, %v12318_v16  ;;  %v964_v12 = vsel %vm8928_vm4, %v959_v41, %v963_v58 }
 0x2d2   : > { %v5233_v27 = vpop.f32.mrf.mxu0  ;;  %v976_v63 = vshrl.u32 %v10051_v3, 16  ;;  %v2741_v58 = vunpack.c.l.b16 %v974_v0  ;;  %v7133_v0 = vrot.slane %v9978_v6, 9 }
 0x2d3   : > { %4285 = vmatmul.bf16.gmra.mxu1 %v9965_v9  ;;  %4614 = vmatmul.bf16.gmra.mxu2 %v10036_v51  ;;  %v10044_v34 = vadd.f32 %v5230_v57, %v4902_v47  ;;  %v2067_v53 = vsel %vm8933_vm5, %v2065_v52, %v2066_v46  ;;  %v2740_v46 = vunpack.c.l.b16 %v964_v12  ;;  %v10072_v51 = vld [vmem:[%s8588_s22 + $0x134] sm:$0xf] }
 0x2d4   : > { %4943 = vmatmul.bf16.gmra.mxu3 %v8327_v49  ;;  %v985_v49 = vshll.u32 %v10054_v30, 16  ;;  %v2993_v16 = vunpack.c.l.b16 %v2067_v53  ;;  %v978_v41 = vrot.slane %v976_v63, 4 }
 0x2d5   : > { %12317 = vst [vmem:[#allocation158_spill] sm:$0xff] %v10044_v34  ;;  %5272 = vmatmul.bf16.gmra.mxu0 %v10038_v56  ;;  %v10076_v53 = vpack.c.b16 %v2741_v58, %v2740_v46 }
 0x2d6   : > { %v4575_v29 = vpop.f32.mrf.mxu2  ;;  %v10074_v9 = vpack.c.b16 %v2993_v16, %v2992_v21  ;;  %v12324_v21 = vld [vmem:[#allocation23_spill] sm:$0xff] }
 0x2d7   : > { %v4576_v23 = vadd.f32 %v4575_v29, %v4247_v54  ;;  %v4904_v57 = vpop.f32.mrf.mxu3  ;;  %v981_v54 = vrot.slane %v979_v32, 5  ;;  %v12320_v29 = vld [vmem:[#allocation20_spill] sm:$0xff]  ;;  %12322 = vst [vmem:[#allocation159_spill] sm:$0xff] %v10076_v53 }
 0x2d8   : > { %v4248_v7 = vpop.f32.mrf.mxu1  ;;  %12321 = vst [vmem:[#allocation20_spill] sm:$0xff] %v10074_v9 }
 0x2d9   : > { %v4905_v47 = vadd.f32 %v4904_v57, %v4576_v23  ;;  %v4249_v34 = vadd.f32 %v4248_v7, %v12320_v29  ;;  %v987_v23 = vrot.slane %v985_v49, 5  ;;  %v991_v57 = vrot.slane %v989_v15, 4 }
 0x2da   : > { %v5235_v40 = vpop.f32.mrf.mxu0  ;;  %v982_v12 = vor.u32 %v981_v54, %v978_v41  ;;  %v995_v7 = vshll.u32 %v10072_v51, 16  ;;  %v2073_v49 = vrot.slane %v9999_v59, 5  ;;  %v10090_v54 = vld [vmem:[%s8588_s22 + $0x138] sm:$0xf] }
 0x2db   : > { %v10068_v52 = vadd.f32 %v5233_v27, %v4905_v47  ;;  %v2070_v27 = vrot.slane %v9981_v19, 5  ;;  %v992_v47 = vor.u32 %v991_v57, %v987_v23 }
 0x2dc   : > { %v983_v15 = vrot.slane %v982_v12, 4  ;;  %v997_v58 = vrot.slane %v995_v7, 5  ;;  %v1009_v7 = vshrl.u32 %v10090_v54, 16 }
 0x2dd   : > { %12319 = vst [vmem:[#allocation17_spill] sm:$0xff] %v10068_v52  ;;  %v2072_v19 = vrot.slane %v2070_v27, 4  ;;  %v993_v46 = vrot.slane %v992_v47, 4  ;;  %v1005_v47 = vshll.u32 %v10090_v54, 16 }
 0x2de   : > { %v4577_v5 = vpop.f32.mrf.mxu2  ;;  %v988_v59 = vsel %vm8928_vm4, %v983_v15, %v987_v23  ;;  %v12326_v23 = vld [vmem:[#allocation26_spill] sm:$0xff] }
 0x2df   : > { %v4578_v44 = vadd.f32 %v4577_v5, %v4249_v34  ;;  %v4906_v14 = vpop.f32.mrf.mxu3  ;;  %v8328_v34 = vld [vmem:[%s8588_s22 + $0x120] sm:$0xff]  ;;  %v2074_v6 = vsel %vm8933_vm5, %v2072_v19, %v2073_v49  ;;  %v2742_v19 = vunpack.c.l.b16 %v988_v59 }
 0x2e0   : > { %v4251_v55 = vpop.f32.mrf.mxu1 }
 0x2e1   : > { %v4907_v63 = vadd.f32 %v4906_v14, %v4578_v44  ;;  %v4252_v16 = vadd.f32 %v4251_v55, %v12324_v21  ;;  %v2071_v44 = vsel %vm8933_vm5, %v7133_v0, %v2070_v27  ;;  %v999_v14 = vshrl.u32 %v10072_v51, 16 }
 0x2e2   : > { %v5238_v32 = vpop.f32.mrf.mxu0  ;;  %v2995_v27 = vunpack.c.l.b16 %v2074_v6 }
 0x2e3   : > { %4290 = vmatmul.bf16.gmra.mxu1 %v10003_v61  ;;  %4619 = vmatmul.bf16.gmra.mxu2 %v10074_v9  ;;  %v10082_v5 = vadd.f32 %v5235_v40, %v4907_v63  ;;  %v998_v63 = vsel %vm8928_vm4, %v993_v46, %v997_v58 }
 0x2e4   : > { %4948 = vmatmul.bf16.gmra.mxu3 %v8328_v34  ;;  %v2994_v34 = vunpack.c.l.b16 %v2071_v44  ;;  %v2743_v21 = vunpack.c.l.b16 %v998_v63  ;;  %v2075_v63 = vrot.slane %v2073_v49, 4 }
 0x2e5   : > { %12323 = vst [vmem:[#allocation160_spill] sm:$0xff] %v10082_v5  ;;  %5277 = vmatmul.bf16.gmra.mxu0 %v10076_v53  ;;  %v1011_v5 = vrot.slane %v1009_v7, 4  ;;  %v8329_v7 = vld [vmem:[%s8588_s22 + $0x12c] sm:$0xff] }
 0x2e6   : > { %v4580_v41 = vpop.f32.mrf.mxu2  ;;  %v10109_v9 = vpack.c.b16 %v2995_v27, %v2994_v34  ;;  %v10111_v44 = vpack.c.b16 %v2743_v21, %v2742_v19  ;;  %v12330_v34 = vld [vmem:[#allocation29_spill] sm:$0xff] }
 0x2e7   : > { %v4581_v29 = vadd.f32 %v4580_v41, %v4252_v16  ;;  %v4909_v40 = vpop.f32.mrf.mxu3  ;;  %v1001_v16 = vrot.slane %v999_v14, 4  ;;  %v1007_v41 = vrot.slane %v1005_v47, 5  ;;  %v10124_v21 = vld [vmem:[%s8588_s22 + $0x140] sm:$0xf] }
 0x2e8   : > { %v4253_v57 = vpop.f32.mrf.mxu1  ;;  %12327 = vst [vmem:[#allocation26_spill] sm:$0xff] %v10109_v9 }
 0x2e9   : > { %v4910_v55 = vadd.f32 %v4909_v40, %v4581_v29  ;;  %v4254_v15 = vadd.f32 %v4253_v57, %v12326_v23  ;;  %v10107_v40 = vld [vmem:[%s8588_s22 + $0x13c] sm:$0x1]  ;;  %12328 = vst [vmem:[#allocation161_spill] sm:$0xff] %v10111_v44  ;;  %v1002_v6 = vor.u32 %v1001_v16, %v997_v58  ;;  %v1012_v57 = vor.u32 %v1011_v5, %v1007_v41  ;;  %v10127_v23 = vld [vmem:[%s8588_s22 + $0x144] sm:$0xf] }
 0x2ea   : > { %v5240_v12 = vpop.f32.mrf.mxu0 }
 0x2eb   : > { %v10103_v0 = vadd.f32 %v5238_v32, %v4910_v55  ;;  %v2076_v32 = vrot.slane %v10017_v28, 5  ;;  %v1015_v55 = vshll.u32 %v10107_v40, 16  ;;  %v1003_v58 = vrot.slane %v1002_v6, 4 }
 0x2ec   : > { %v1013_v27 = vrot.slane %v1012_v57, 4  ;;  %v1023_v6 = vshll.u32 %v10124_v21, 16 }
 0x2ed   : > { %12325 = vst [vmem:[#allocation23_spill] sm:$0xff] %v10103_v0  ;;  %v2078_v28 = vrot.slane %v2076_v32, 4  ;;  %v1017_v19 = vrot.slane %v1015_v55, 5 }
 0x2ee   : > { %v4582_v29 = vpop.f32.mrf.mxu2 }
 0x2ef   : > { %v4583_v46 = vadd.f32 %v4582_v29, %v4254_v15  ;;  %v4911_v52 = vpop.f32.mrf.mxu3  ;;  %v2077_v15 = vsel %vm8933_vm5, %v2075_v63, %v2076_v32  ;;  %v1018_v55 = vsel %vm8928_vm4, %v1013_v27, %v1017_v19  ;;  %v1033_v32 = vshrl.u32 %v10127_v23, 16 }
 0x2f0   : > { %v4256_v61 = vpop.f32.mrf.mxu1  ;;  %v2996_v63 = vunpack.c.l.b16 %v2077_v15 }
 0x2f1   : > { %v4912_v59 = vadd.f32 %v4911_v52, %v4583_v46  ;;  %v2079_v52 = vrot.slane %v10034_v17, 5  ;;  %v4257_v5 = vadd.f32 %v4256_v61, %v12330_v34  ;;  %v1008_v17 = vsel %vm8928_vm4, %v1003_v58, %v1007_v41 }
 0x2f2   : > { %v5243_v14 = vpop.f32.mrf.mxu0  ;;  %v1020_v61 = vshrl.u32 %v10124_v21, 16  ;;  %v2745_v41 = vunpack.c.l.b16 %v1018_v55  ;;  %v7134_v55 = vrot.slane %v10051_v3, 9 }
 0x2f3   : > { %4295 = vmatmul.bf16.gmra.mxu1 %v10038_v56  ;;  %4624 = vmatmul.bf16.gmra.mxu2 %v10109_v9  ;;  %v10117_v47 = vadd.f32 %v5240_v12, %v4912_v59  ;;  %v2080_v46 = vsel %vm8933_vm5, %v2078_v28, %v2079_v52  ;;  %v2744_v52 = vunpack.c.l.b16 %v1008_v17  ;;  %v10145_v9 = vld [vmem:[%s8588_s22 + $0x148] sm:$0xf] }
 0x2f4   : > { %4953 = vmatmul.bf16.gmra.mxu3 %v8329_v7  ;;  %v1029_v7 = vshll.u32 %v10127_v23, 16  ;;  %v2997_v34 = vunpack.c.l.b16 %v2080_v46  ;;  %v1022_v58 = vrot.slane %v1020_v61, 4 }
 0x2f5   : > { %12329 = vst [vmem:[#allocation162_spill] sm:$0xff] %v10117_v47  ;;  %5282 = vmatmul.bf16.gmra.mxu0 %v10111_v44  ;;  %v10149_v46 = vpack.c.b16 %v2745_v41, %v2744_v52 }
 0x2f6   : > { %v4585_v16 = vpop.f32.mrf.mxu2  ;;  %v10147_v56 = vpack.c.b16 %v2997_v34, %v2996_v63  ;;  %v12336_v63 = vld [vmem:[#allocation35_spill] sm:$0xff] }
 0x2f7   : > { %v4586_v49 = vadd.f32 %v4585_v16, %v4257_v5  ;;  %v4914_v12 = vpop.f32.mrf.mxu3  ;;  %v1025_v5 = vrot.slane %v1023_v6, 5  ;;  %v12332_v16 = vld [vmem:[#allocation32_spill] sm:$0xff]  ;;  %12334 = vst [vmem:[#allocation163_spill] sm:$0xff] %v10149_v46 }
 0x2f8   : > { %v4258_v29 = vpop.f32.mrf.mxu1  ;;  %12333 = vst [vmem:[#allocation32_spill] sm:$0xff] %v10147_v56 }
 0x2f9   : > { %v4915_v59 = vadd.f32 %v4914_v12, %v4586_v49  ;;  %v4259_v47 = vadd.f32 %v4258_v29, %v12332_v16  ;;  %v1031_v49 = vrot.slane %v1029_v7, 5  ;;  %v1035_v12 = vrot.slane %v1033_v32, 4 }
 0x2fa   : > { %v5245_v57 = vpop.f32.mrf.mxu0  ;;  %v1026_v17 = vor.u32 %v1025_v5, %v1022_v58  ;;  %v1039_v29 = vshll.u32 %v10145_v9, 16  ;;  %v2086_v7 = vrot.slane %v10072_v51, 5  ;;  %v10163_v5 = vld [vmem:[%s8588_s22 + $0x14c] sm:$0xf] }
 0x2fb   : > { %v10141_v28 = vadd.f32 %v5243_v14, %v4915_v59  ;;  %v2083_v14 = vrot.slane %v10054_v30, 5  ;;  %v1036_v59 = vor.u32 %v1035_v12, %v1031_v49 }
 0x2fc   : > { %v1027_v32 = vrot.slane %v1026_v17, 4  ;;  %v1041_v41 = vrot.slane %v1039_v29, 5  ;;  %v1053_v29 = vshrl.u32 %v10163_v5, 16 }
 0x2fd   : > { %12331 = vst [vmem:[#allocation29_spill] sm:$0xff] %v10141_v28  ;;  %v2085_v30 = vrot.slane %v2083_v14, 4  ;;  %v1037_v52 = vrot.slane %v1036_v59, 4  ;;  %v1049_v59 = vshll.u32 %v10163_v5, 16 }
 0x2fe   : > { %v4587_v0 = vpop.f32.mrf.mxu2  ;;  %v1032_v51 = vsel %vm8928_vm4, %v1027_v32, %v1031_v49  ;;  %v12338_v49 = vld [vmem:[#allocation38_spill] sm:$0xff] }
 0x2ff   : > { %v4588_v27 = vadd.f32 %v4587_v0, %v4259_v47  ;;  %v4916_v19 = vpop.f32.mrf.mxu3  ;;  %v8330_v47 = vld [vmem:[%s8588_s22 + $0x134] sm:$0xff]  ;;  %v2087_v3 = vsel %vm8933_vm5, %v2085_v30, %v2086_v7  ;;  %v2746_v30 = vunpack.c.l.b16 %v1032_v51 }
 0x300   : > { %v4261_v15 = vpop.f32.mrf.mxu1 }
 0x301   : > { %v4917_v61 = vadd.f32 %v4916_v19, %v4588_v27  ;;  %v4262_v34 = vadd.f32 %v4261_v15, %v12336_v63  ;;  %v2084_v27 = vsel %vm8933_vm5, %v7134_v55, %v2083_v14  ;;  %v1043_v19 = vshrl.u32 %v10145_v9, 16 }
 0x302   : > { %v5248_v6 = vpop.f32.mrf.mxu0  ;;  %v2999_v14 = vunpack.c.l.b16 %v2087_v3 }
 0x303   : > { %4300 = vmatmul.bf16.gmra.mxu1 %v10076_v53  ;;  %4629 = vmatmul.bf16.gmra.mxu2 %v10147_v56  ;;  %v10155_v0 = vadd.f32 %v5245_v57, %v4917_v61  ;;  %v1042_v61 = vsel %vm8928_vm4, %v1037_v52, %v1041_v41 }
 0x304   : > { %4958 = vmatmul.bf16.gmra.mxu3 %v8330_v47  ;;  %v2998_v47 = vunpack.c.l.b16 %v2084_v27  ;;  %v2747_v63 = vunpack.c.l.b16 %v1042_v61  ;;  %v2088_v61 = vrot.slane %v2086_v7, 4  ;;  %v12342_v7 = vld [vmem:[#allocation41_spill] sm:$0xff] }
 0x305   : > { %12335 = vst [vmem:[#allocation164_spill] sm:$0xff] %v10155_v0  ;;  %5287 = vmatmul.bf16.gmra.mxu0 %v10149_v46  ;;  %v1055_v0 = vrot.slane %v1053_v29, 4  ;;  %v8331_v29 = vld [vmem:[%s8588_s22 + $0x140] sm:$0xff] }
 0x306   : > { %v4590_v58 = vpop.f32.mrf.mxu2  ;;  %v10182_v56 = vpack.c.b16 %v2999_v14, %v2998_v47  ;;  %v10184_v27 = vpack.c.b16 %v2747_v63, %v2746_v30  ;;  %v7845_v47 = vld [vmem:[%s12000_s1 + $0x1d8] sm:$0xff]  ;;  %v10203_v63 = vld [vmem:[%s8588_s22 + $0x154] sm:$0xf] }
 0x307   : > { %v4591_v16 = vadd.f32 %v4590_v58, %v4262_v34  ;;  %v4919_v57 = vpop.f32.mrf.mxu3  ;;  %v1045_v34 = vrot.slane %v1043_v19, 4  ;;  %v1051_v58 = vrot.slane %v1049_v59, 5  ;;  %6125 = vmatpush.bf16.msra.mxu3 %v7845_v47 }
 0x308   : > { %v4263_v12 = vpop.f32.mrf.mxu1  ;;  %12339 = vst [vmem:[#allocation38_spill] sm:$0xff] %v10182_v56 }
 0x309   : > { %v4920_v15 = vadd.f32 %v4919_v57, %v4591_v16  ;;  %v4264_v32 = vadd.f32 %v4263_v12, %v12338_v49  ;;  %v10180_v57 = vld [vmem:[%s8588_s22 + $0x150] sm:$0x1]  ;;  %12340 = vst [vmem:[#allocation165_spill] sm:$0xff] %v10184_v27  ;;  %v1046_v3 = vor.u32 %v1045_v34, %v1041_v41  ;;  %v10206_v49 = vld [vmem:[%s8588_s22 + $0x158] sm:$0xf] }
 0x30a   : > { %v5250_v17 = vpop.f32.mrf.mxu0  ;;  %v1059_v12 = vshll.u32 %v10180_v57, 16  ;;  %v1073_v47 = vshll.u32 %v10206_v49, 16 }
 0x30b   : > { %v10176_v55 = vadd.f32 %v5248_v6, %v4920_v15  ;;  %v2089_v6 = vrot.slane %v10090_v54, 5  ;;  %v1056_v15 = vor.u32 %v1055_v0, %v1051_v58  ;;  %v1047_v41 = vrot.slane %v1046_v3, 4  ;;  %v7837_v0 = vld [vmem:[%s12000_s1 + $0x198] sm:$0xff] }
 0x30c   : > { %v1061_v30 = vrot.slane %v1059_v12, 5  ;;  %5796 = vmatpush.bf16.msra.mxu2 %v7837_v0 }
 0x30d   : > { %12337 = vst [vmem:[#allocation35_spill] sm:$0xff] %v10176_v55  ;;  %v2091_v54 = vrot.slane %v2089_v6, 4 }
 0x30e   : > { %v4592_v16 = vpop.f32.mrf.mxu2 }
 0x30f   : > { %v4593_v52 = vadd.f32 %v4592_v16, %v4264_v32  ;;  %v4921_v28 = vpop.f32.mrf.mxu3  ;;  %v2090_v16 = vsel %vm8933_vm5, %v2088_v61, %v2089_v6  ;;  %v1077_v6 = vshrl.u32 %v10206_v49, 16  ;;  %v7829_v61 = vld [vmem:[%s12000_s1 + $0x158] sm:$0xff] }
 0x310   : > { %v4266_v53 = vpop.f32.mrf.mxu1  ;;  %5467 = vmatpush.bf16.msra.mxu1 %v7829_v61 }
 0x311   : > { %v4922_v51 = vadd.f32 %v4921_v28, %v4593_v52  ;;  %v2092_v28 = vrot.slane %v10107_v40, 5  ;;  %v4267_v14 = vadd.f32 %v4266_v53, %v12342_v7  ;;  %v1052_v53 = vsel %vm8928_vm4, %v1047_v41, %v1051_v58  ;;  %v7853_v58 = vld [vmem:[%s12000_s1 + $0x218] sm:$0xff] }
 0x312   : > { %v5253_v19 = vpop.f32.mrf.mxu0  ;;  %6454 = vmatpush.bf16.msra.mxu0 %v7853_v58  ;;  %v2748_v7 = vunpack.c.l.b16 %v1052_v53 }
 0x313   : > { %4305 = vmatmul.bf16.gmra.mxu1 %v10111_v44  ;;  %4634 = vmatmul.bf16.gmra.mxu2 %v10182_v56  ;;  %v10190_v59 = vadd.f32 %v5250_v17, %v4922_v51  ;;  %v1057_v17 = vrot.slane %v1056_v15, 4  ;;  %v2093_v3 = vsel %vm8933_vm5, %v2091_v54, %v2092_v28  ;;  %v1064_v51 = vshrl.u32 %v10203_v63, 16  ;;  %v10230_v56 = vld [vmem:[%s8588_s22 + $0x15c] sm:$0xf] }
 0x314   : > { %4963 = vmatmul.bf16.gmra.mxu3 %v8331_v29  ;;  %v1067_v15 = vshll.u32 %v10203_v63, 16  ;;  %v3000_v54 = vunpack.c.l.b16 %v2090_v16  ;;  %v3001_v28 = vunpack.c.l.b16 %v2093_v3 }
 0x315   : > { %12341 = vst [vmem:[#allocation166_spill] sm:$0xff] %v10190_v59  ;;  %5292 = vmatmul.bf16.gmra.mxu0 %v10184_v27  ;;  %v1062_v0 = vsel %vm8928_vm4, %v1057_v17, %v1061_v30  ;;  %v1066_v17 = vrot.slane %v1064_v51, 4  ;;  %v1079_v59 = vrot.slane %v1077_v6, 4 }
 0x316   : > { %v4595_v34 = vpop.f32.mrf.mxu2  ;;  %v1069_v30 = vrot.slane %v1067_v15, 5  ;;  %v10232_v16 = vpack.c.b16 %v3001_v28, %v3000_v54 }
 0x317   : > { %v4596_v40 = vadd.f32 %v4595_v34, %v4267_v14  ;;  %v4924_v32 = vpop.f32.mrf.mxu3  ;;  %v2749_v14 = vunpack.c.l.b16 %v1062_v0  ;;  %v12344_v34 = vld [vmem:[#allocation44_spill] sm:$0xff]  ;;  %v8332_v0 = vld [vmem:[%s8588_s22 + $0x148] sm:$0xff] }
 0x318   : > { %v4268_v52 = vpop.f32.mrf.mxu1  ;;  %12345 = vst [vmem:[#allocation44_spill] sm:$0xff] %v10232_v16  ;;  %v1070_v53 = vor.u32 %v1069_v30, %v1066_v17 }
 0x319   : > { %v4925_v12 = vadd.f32 %v4924_v32, %v4596_v40  ;;  %v4269_v40 = vadd.f32 %v4268_v52, %v12344_v34  ;;  %v1075_v32 = vrot.slane %v1073_v47, 5  ;;  %v10234_v61 = vpack.c.b16 %v2749_v14, %v2748_v7  ;;  %v10248_v7 = vld [vmem:[%s8588_s22 + $0x160] sm:$0xf] }
 0x31a   : > { %v5255_v29 = vpop.f32.mrf.mxu0  ;;  %v1083_v52 = vshll.u32 %v10230_v56, 16  ;;  %v7135_v47 = vrot.slane %v10124_v21, 9  ;;  %v1087_v34 = vshrl.u32 %v10230_v56, 16 }
 0x31b   : > { %v10226_v41 = vadd.f32 %v5253_v19, %v4925_v12  ;;  %12346 = vst [vmem:[#allocation167_spill] sm:$0xff] %v10234_v61  ;;  %v2096_v19 = vrot.slane %v10127_v23, 5  ;;  %v1080_v12 = vor.u32 %v1079_v59, %v1075_v32  ;;  %v12348_v59 = vld [vmem:[#allocation47_spill] sm:$0xff] }
 0x31c   : > { %v1085_v54 = vrot.slane %v1083_v52, 5 }
 0x31d   : > { %12343 = vst [vmem:[#allocation41_spill] sm:$0xff] %v10226_v41  ;;  %v2098_v23 = vrot.slane %v2096_v19, 4  ;;  %v1081_v58 = vrot.slane %v1080_v12, 4  ;;  %v2097_v30 = vsel %vm8933_vm5, %v7135_v47, %v2096_v19  ;;  %v1097_v12 = vshrl.u32 %v10248_v7, 16 }
 0x31e   : > { %v4597_v55 = vpop.f32.mrf.mxu2  ;;  %v3002_v52 = vunpack.c.l.b16 %v2097_v30 }
 0x31f   : > { %v4598_v44 = vadd.f32 %v4597_v55, %v4269_v40  ;;  %v4926_v18 = vpop.f32.mrf.mxu3 }
 0x320   : > { %v4271_v3 = vpop.f32.mrf.mxu1 }
 0x321   : > { %v4927_v51 = vadd.f32 %v4926_v18, %v4598_v44  ;;  %v2099_v18 = vrot.slane %v10145_v9, 5  ;;  %v1071_v44 = vrot.slane %v1070_v53, 4  ;;  %v4272_v6 = vadd.f32 %v4271_v3, %v12348_v59 }
 0x322   : > { %v5258_v15 = vpop.f32.mrf.mxu0  ;;  %v1086_v53 = vsel %vm8928_vm4, %v1081_v58, %v1085_v54  ;;  %v1089_v59 = vrot.slane %v1087_v34, 4 }
 0x323   : > { %4310 = vmatmul.bf16.gmra.mxu1 %v10149_v46  ;;  %4639 = vmatmul.bf16.gmra.mxu2 %v10232_v16  ;;  %v10240_v55 = vadd.f32 %v5255_v29, %v4927_v51  ;;  %v2100_v21 = vsel %vm8933_vm5, %v2098_v23, %v2099_v18  ;;  %v1076_v9 = vsel %vm8928_vm4, %v1071_v44, %v1075_v32  ;;  %v1093_v51 = vshll.u32 %v10248_v7, 16  ;;  %v12350_v32 = vld [vmem:[#allocation50_spill] sm:$0xff] }
 0x324   : > { %4968 = vmatmul.bf16.gmra.mxu3 %v8332_v0  ;;  %v3003_v19 = vunpack.c.l.b16 %v2100_v21  ;;  %v2750_v47 = vunpack.c.l.b16 %v1076_v9  ;;  %v2751_v23 = vunpack.c.l.b16 %v1086_v53  ;;  %v1090_v21 = vor.u32 %v1089_v59, %v1085_v54  ;;  %v10282_v59 = vld [vmem:[%s8588_s22 + $0x168] sm:$0xf] }
 0x325   : > { %12347 = vst [vmem:[#allocation168_spill] sm:$0xff] %v10240_v55  ;;  %5297 = vmatmul.bf16.gmra.mxu0 %v10234_v61  ;;  %v2101_v53 = vrot.slane %v2099_v18, 4 }
 0x326   : > { %v4600_v28 = vpop.f32.mrf.mxu2  ;;  %v10267_v41 = vpack.c.b16 %v3003_v19, %v3002_v52  ;;  %v10269_v30 = vpack.c.b16 %v2751_v23, %v2750_v47  ;;  %v1091_v54 = vrot.slane %v1090_v21, 4  ;;  %v12354_v52 = vld [vmem:[#allocation53_spill] sm:$0xff]  ;;  %v1111_v21 = vshll.u32 %v10282_v59, 16 }
 0x327   : > { %v4601_v14 = vadd.f32 %v4600_v28, %v4272_v6  ;;  %v4929_v29 = vpop.f32.mrf.mxu3  ;;  %v1095_v6 = vrot.slane %v1093_v51, 5  ;;  %v1099_v28 = vrot.slane %v1097_v12, 4  ;;  %v8333_v12 = vld [vmem:[%s8588_s22 + $0x154] sm:$0xff] }
 0x328   : > { %v4273_v17 = vpop.f32.mrf.mxu1  ;;  %12351 = vst [vmem:[#allocation50_spill] sm:$0xff] %v10267_v41 }
 0x329   : > { %v4930_v40 = vadd.f32 %v4929_v29, %v4601_v14  ;;  %v4274_v44 = vadd.f32 %v4273_v17, %v12350_v32  ;;  %v10265_v29 = vld [vmem:[%s8588_s22 + $0x164] sm:$0x1]  ;;  %12352 = vst [vmem:[#allocation169_spill] sm:$0xff] %v10269_v30  ;;  %v1100_v17 = vor.u32 %v1099_v28, %v1095_v6 }
 0x32a   : > { %v5260_v3 = vpop.f32.mrf.mxu0 }
 0x32b   : > { %v10261_v0 = vadd.f32 %v5258_v15, %v4930_v40  ;;  %v2102_v15 = vrot.slane %v10163_v5, 5  ;;  %v1103_v40 = vshll.u32 %v10265_v29, 16  ;;  %v1101_v47 = vrot.slane %v1100_v17, 4 }
 0x32d   : > { %12349 = vst [vmem:[#allocation47_spill] sm:$0xff] %v10261_v0  ;;  %v2104_v5 = vrot.slane %v2102_v15, 4  ;;  %v1105_v23 = vrot.slane %v1103_v40, 5  ;;  %v2103_v28 = vsel %vm8933_vm5, %v2101_v53, %v2102_v15 }
 0x32e   : > { %v4602_v14 = vpop.f32.mrf.mxu2  ;;  %v3004_v53 = vunpack.c.l.b16 %v2103_v28 }
 0x32f   : > { %v4603_v58 = vadd.f32 %v4602_v14, %v4274_v44  ;;  %v4931_v55 = vpop.f32.mrf.mxu3  ;;  %v10285_v44 = vld [vmem:[%s8588_s22 + $0x16c] sm:$0xf]  ;;  %v1106_v40 = vsel %vm8928_vm4, %v1101_v47, %v1105_v23 }
 0x330   : > { %v4276_v16 = vpop.f32.mrf.mxu1  ;;  %v1121_v15 = vshrl.u32 %v10285_v44, 16 }
 0x331   : > { %v4932_v9 = vadd.f32 %v4931_v55, %v4603_v58  ;;  %v2105_v55 = vrot.slane %v10180_v57, 5  ;;  %v4277_v19 = vadd.f32 %v4276_v16, %v12354_v52  ;;  %v1096_v57 = vsel %vm8928_vm4, %v1091_v54, %v1095_v6 }
 0x332   : > { %v5263_v34 = vpop.f32.mrf.mxu0  ;;  %v1108_v16 = vshrl.u32 %v10282_v59, 16  ;;  %v2753_v6 = vunpack.c.l.b16 %v1106_v40  ;;  %v7136_v40 = vrot.slane %v10203_v63, 9 }
 0x333   : > { %4315 = vmatmul.bf16.gmra.mxu1 %v10184_v27  ;;  %4644 = vmatmul.bf16.gmra.mxu2 %v10267_v41  ;;  %v10275_v51 = vadd.f32 %v5260_v3, %v4932_v9  ;;  %v2106_v58 = vsel %vm8933_vm5, %v2104_v5, %v2105_v55  ;;  %v2752_v55 = vunpack.c.l.b16 %v1096_v57  ;;  %v10303_v41 = vld [vmem:[%s8588_s22 + $0x170] sm:$0xf] }
 0x334   : > { %4973 = vmatmul.bf16.gmra.mxu3 %v8333_v12  ;;  %v1117_v12 = vshll.u32 %v10285_v44, 16  ;;  %v3005_v52 = vunpack.c.l.b16 %v2106_v58  ;;  %v1110_v54 = vrot.slane %v1108_v16, 4 }
 0x335   : > { %12353 = vst [vmem:[#allocation170_spill] sm:$0xff] %v10275_v51  ;;  %5302 = vmatmul.bf16.gmra.mxu0 %v10269_v30  ;;  %v10307_v58 = vpack.c.b16 %v2753_v6, %v2752_v55 }
 0x336   : > { %v4605_v32 = vpop.f32.mrf.mxu2  ;;  %v10305_v27 = vpack.c.b16 %v3005_v52, %v3004_v53  ;;  %v12360_v53 = vld [vmem:[#allocation59_spill] sm:$0xff] }
 0x337   : > { %v4606_v18 = vadd.f32 %v4605_v32, %v4277_v19  ;;  %v4934_v3 = vpop.f32.mrf.mxu3  ;;  %v1113_v19 = vrot.slane %v1111_v21, 5  ;;  %v12356_v32 = vld [vmem:[#allocation56_spill] sm:$0xff]  ;;  %12358 = vst [vmem:[#allocation171_spill] sm:$0xff] %v10307_v58 }
 0x338   : > { %v4278_v14 = vpop.f32.mrf.mxu1  ;;  %12357 = vst [vmem:[#allocation56_spill] sm:$0xff] %v10305_v27 }
 0x339   : > { %v4935_v9 = vadd.f32 %v4934_v3, %v4606_v18  ;;  %v4279_v51 = vadd.f32 %v4278_v14, %v12356_v32  ;;  %v1119_v18 = vrot.slane %v1117_v12, 5  ;;  %v1123_v3 = vrot.slane %v1121_v15, 4 }
 0x33a   : > { %v5265_v17 = vpop.f32.mrf.mxu0  ;;  %v1114_v57 = vor.u32 %v1113_v19, %v1110_v54  ;;  %v1127_v14 = vshll.u32 %v10303_v41, 16  ;;  %v2112_v12 = vrot.slane %v10230_v56, 5  ;;  %v10321_v19 = vld [vmem:[%s8588_s22 + $0x174] sm:$0xf] }
 0x33b   : > { %v10299_v5 = vadd.f32 %v5263_v34, %v4935_v9  ;;  %v2109_v34 = vrot.slane %v10206_v49, 5  ;;  %v1124_v9 = vor.u32 %v1123_v3, %v1119_v18 }
 0x33c   : > { %v1115_v15 = vrot.slane %v1114_v57, 4  ;;  %v1129_v6 = vrot.slane %v1127_v14, 5  ;;  %v1141_v14 = vshrl.u32 %v10321_v19, 16 }
 0x33d   : > { %12355 = vst [vmem:[#allocation53_spill] sm:$0xff] %v10299_v5  ;;  %v2111_v49 = vrot.slane %v2109_v34, 4  ;;  %v1125_v55 = vrot.slane %v1124_v9, 4  ;;  %v1137_v9 = vshll.u32 %v10321_v19, 16 }
 0x33e   : > { %v4607_v0 = vpop.f32.mrf.mxu2  ;;  %v1120_v56 = vsel %vm8928_vm4, %v1115_v15, %v1119_v18  ;;  %v12362_v18 = vld [vmem:[#allocation62_spill] sm:$0xff] }
 0x33f   : > { %v4608_v47 = vadd.f32 %v4607_v0, %v4279_v51  ;;  %v4936_v23 = vpop.f32.mrf.mxu3  ;;  %v8334_v51 = vld [vmem:[%s8588_s22 + $0x15c] sm:$0xff]  ;;  %v2113_v63 = vsel %vm8933_vm5, %v2111_v49, %v2112_v12  ;;  %v2754_v49 = vunpack.c.l.b16 %v1120_v56 }
 0x340   : > { %v4281_v28 = vpop.f32.mrf.mxu1 }
 0x341   : > { %v4937_v16 = vadd.f32 %v4936_v23, %v4608_v47  ;;  %v4282_v52 = vadd.f32 %v4281_v28, %v12360_v53  ;;  %v2110_v47 = vsel %vm8933_vm5, %v7136_v40, %v2109_v34  ;;  %v1131_v23 = vshrl.u32 %v10303_v41, 16 }
 0x342   : > { %v5268_v21 = vpop.f32.mrf.mxu0  ;;  %v3007_v34 = vunpack.c.l.b16 %v2113_v63 }
 0x343   : > { %4320 = vmatmul.bf16.gmra.mxu1 %v10234_v61  ;;  %4649 = vmatmul.bf16.gmra.mxu2 %v10305_v27  ;;  %v10313_v0 = vadd.f32 %v5265_v17, %v4937_v16  ;;  %v1130_v16 = vsel %vm8928_vm4, %v1125_v55, %v1129_v6 }
 0x344   : > { %4978 = vmatmul.bf16.gmra.mxu3 %v8334_v51  ;;  %v3006_v51 = vunpack.c.l.b16 %v2110_v47  ;;  %v2755_v53 = vunpack.c.l.b16 %v1130_v16  ;;  %v2114_v16 = vrot.slane %v2112_v12, 4 }
 0x345   : > { %12359 = vst [vmem:[#allocation172_spill] sm:$0xff] %v10313_v0  ;;  %5307 = vmatmul.bf16.gmra.mxu0 %v10307_v58  ;;  %v1143_v0 = vrot.slane %v1141_v14, 4  ;;  %v8335_v14 = vld [vmem:[%s8588_s22 + $0x168] sm:$0xff] }
 0x346   : > { %v4610_v54 = vpop.f32.mrf.mxu2  ;;  %v10340_v27 = vpack.c.b16 %v3007_v34, %v3006_v51  ;;  %v10342_v47 = vpack.c.b16 %v2755_v53, %v2754_v49  ;;  %v12366_v51 = vld [vmem:[#allocation66_spill] sm:$0xff]  ;;  %v10355_v53 = vld [vmem:[%s8588_s22 + $0x17c] sm:$0xf] }
 0x347   : > { %v4611_v32 = vadd.f32 %v4610_v54, %v4282_v52  ;;  %v4939_v17 = vpop.f32.mrf.mxu3  ;;  %v1133_v52 = vrot.slane %v1131_v23, 4  ;;  %v1139_v54 = vrot.slane %v1137_v9, 5 }
 0x348   : > { %v4283_v3 = vpop.f32.mrf.mxu1  ;;  %12363 = vst [vmem:[#allocation62_spill] sm:$0xff] %v10340_v27 }
 0x349   : > { %v4940_v28 = vadd.f32 %v4939_v17, %v4611_v32  ;;  %v4284_v15 = vadd.f32 %v4283_v3, %v12362_v18  ;;  %v10338_v17 = vld [vmem:[%s8588_s22 + $0x178] sm:$0x1]  ;;  %12364 = vst [vmem:[#allocation173_spill] sm:$0xff] %v10342_v47  ;;  %v1134_v63 = vor.u32 %v1133_v52, %v1129_v6  ;;  %v1144_v3 = vor.u32 %v1143_v0, %v1139_v54  ;;  %v10358_v18 = vld [vmem:[%s8588_s22 + $0x180] sm:$0xf] }
 0x34a   : > { %v5270_v57 = vpop.f32.mrf.mxu0 }
 0x34b   : > { %v10334_v40 = vadd.f32 %v5268_v21, %v4940_v28  ;;  %v2115_v21 = vrot.slane %v10248_v7, 5  ;;  %v1147_v28 = vshll.u32 %v10338_v17, 16  ;;  %v1135_v6 = vrot.slane %v1134_v63, 4 }
 0x34c   : > { %v1145_v34 = vrot.slane %v1144_v3, 4  ;;  %v1155_v63 = vshll.u32 %v10355_v53, 16 }
 0x34d   : > { %12361 = vst [vmem:[#allocation59_spill] sm:$0xff] %v10334_v40  ;;  %v2117_v7 = vrot.slane %v2115_v21, 4  ;;  %v1149_v49 = vrot.slane %v1147_v28, 5 }
 0x34e   : > { %v4612_v32 = vpop.f32.mrf.mxu2 }
 0x34f   : > { %v4613_v55 = vadd.f32 %v4612_v32, %v4284_v15  ;;  %v4941_v5 = vpop.f32.mrf.mxu3  ;;  %v2116_v15 = vsel %vm8933_vm5, %v2114_v16, %v2115_v21  ;;  %v1150_v28 = vsel %vm8928_vm4, %v1145_v34, %v1149_v49  ;;  %v1165_v21 = vshrl.u32 %v10358_v18, 16 }
 0x350   : > { %v4286_v61 = vpop.f32.mrf.mxu1  ;;  %v3008_v16 = vunpack.c.l.b16 %v2116_v15 }
 0x351   : > { %v4942_v56 = vadd.f32 %v4941_v5, %v4613_v55  ;;  %v2118_v5 = vrot.slane %v10265_v29, 5  ;;  %v4287_v0 = vadd.f32 %v4286_v61, %v12366_v51  ;;  %v1140_v29 = vsel %vm8928_vm4, %v1135_v6, %v1139_v54 }
 0x352   : > { %v5273_v23 = vpop.f32.mrf.mxu0  ;;  %v1152_v61 = vshrl.u32 %v10355_v53, 16  ;;  %v2757_v54 = vunpack.c.l.b16 %v1150_v28  ;;  %v7137_v28 = vrot.slane %v10282_v59, 9 }
 0x353   : > { %4325 = vmatmul.bf16.gmra.mxu1 %v10269_v30  ;;  %4654 = vmatmul.bf16.gmra.mxu2 %v10340_v27  ;;  %v10348_v9 = vadd.f32 %v5270_v57, %v4942_v56  ;;  %v2119_v55 = vsel %vm8933_vm5, %v2117_v7, %v2118_v5  ;;  %v2756_v5 = vunpack.c.l.b16 %v1140_v29  ;;  %v10376_v27 = vld [vmem:[%s8588_s22 + $0x184] sm:$0xf] }
 0x354   : > { %4983 = vmatmul.bf16.gmra.mxu3 %v8335_v14  ;;  %v1161_v14 = vshll.u32 %v10358_v18, 16  ;;  %v3009_v51 = vunpack.c.l.b16 %v2119_v55  ;;  %v1154_v6 = vrot.slane %v1152_v61, 4 }
 0x355   : > { %12365 = vst [vmem:[#allocation174_spill] sm:$0xff] %v10348_v9  ;;  %5312 = vmatmul.bf16.gmra.mxu0 %v10342_v47  ;;  %v10380_v55 = vpack.c.b16 %v2757_v54, %v2756_v5 }
 0x356   : > { %v4615_v52 = vpop.f32.mrf.mxu2  ;;  %v10378_v30 = vpack.c.b16 %v3009_v51, %v3008_v16  ;;  %v12372_v16 = vld [vmem:[#allocation74_spill] sm:$0xff] }
 0x357   : > { %v4616_v12 = vadd.f32 %v4615_v52, %v4287_v0  ;;  %v4944_v57 = vpop.f32.mrf.mxu3  ;;  %v1157_v0 = vrot.slane %v1155_v63, 5  ;;  %v12368_v52 = vld [vmem:[#allocation70_spill] sm:$0xff]  ;;  %12370 = vst [vmem:[#allocation175_spill] sm:$0xff] %v10380_v55 }
 0x358   : > { %v4288_v32 = vpop.f32.mrf.mxu1  ;;  %12369 = vst [vmem:[#allocation70_spill] sm:$0xff] %v10378_v30 }
 0x359   : > { %v4945_v56 = vadd.f32 %v4944_v57, %v4616_v12  ;;  %v4289_v9 = vadd.f32 %v4288_v32, %v12368_v52  ;;  %v1163_v12 = vrot.slane %v1161_v14, 5  ;;  %v1167_v57 = vrot.slane %v1165_v21, 4 }
 0x35a   : > { %v5275_v3 = vpop.f32.mrf.mxu0  ;;  %v1158_v29 = vor.u32 %v1157_v0, %v1154_v6  ;;  %v1171_v32 = vshll.u32 %v10376_v27, 16  ;;  %v2125_v14 = vrot.slane %v10303_v41, 5  ;;  %v10394_v0 = vld [vmem:[%s8588_s22 + $0x188] sm:$0xf] }
 0x35b   : > { %v10372_v7 = vadd.f32 %v5273_v23, %v4945_v56  ;;  %v2122_v23 = vrot.slane %v10285_v44, 5  ;;  %v1168_v56 = vor.u32 %v1167_v57, %v1163_v12 }
 0x35c   : > { %v1159_v21 = vrot.slane %v1158_v29, 4  ;;  %v1173_v54 = vrot.slane %v1171_v32, 5  ;;  %v1185_v32 = vshrl.u32 %v10394_v0, 16 }
 0x35d   : > { %12367 = vst [vmem:[#allocation66_spill] sm:$0xff] %v10372_v7  ;;  %v2124_v44 = vrot.slane %v2122_v23, 4  ;;  %v1169_v5 = vrot.slane %v1168_v56, 4  ;;  %v1181_v56 = vshll.u32 %v10394_v0, 16 }
 0x35e   : > { %v4617_v40 = vpop.f32.mrf.mxu2  ;;  %v1164_v41 = vsel %vm8928_vm4, %v1159_v21, %v1163_v12  ;;  %v12374_v12 = vld [vmem:[#allocation78_spill] sm:$0xff] }
 0x35f   : > { %v4618_v34 = vadd.f32 %v4617_v40, %v4289_v9  ;;  %v4946_v49 = vpop.f32.mrf.mxu3  ;;  %v8336_v9 = vld [vmem:[%s8588_s22 + $0x170] sm:$0xff]  ;;  %v2126_v59 = vsel %vm8933_vm5, %v2124_v44, %v2125_v14  ;;  %v2758_v44 = vunpack.c.l.b16 %v1164_v41 }
 0x360   : > { %v4291_v15 = vpop.f32.mrf.mxu1 }
 0x361   : > { %v4947_v61 = vadd.f32 %v4946_v49, %v4618_v34  ;;  %v4292_v51 = vadd.f32 %v4291_v15, %v12372_v16  ;;  %v2123_v34 = vsel %vm8933_vm5, %v7137_v28, %v2122_v23  ;;  %v1175_v49 = vshrl.u32 %v10376_v27, 16 }
 0x362   : > { %v5278_v63 = vpop.f32.mrf.mxu0  ;;  %v3011_v23 = vunpack.c.l.b16 %v2126_v59 }
 0x363   : > { %4330 = vmatmul.bf16.gmra.mxu1 %v10307_v58  ;;  %4659 = vmatmul.bf16.gmra.mxu2 %v10378_v30  ;;  %v10386_v40 = vadd.f32 %v5275_v3, %v4947_v61  ;;  %v1174_v61 = vsel %vm8928_vm4, %v1169_v5, %v1173_v54 }
 0x364   : > { %4988 = vmatmul.bf16.gmra.mxu3 %v8336_v9  ;;  %v3010_v9 = vunpack.c.l.b16 %v2123_v34  ;;  %v2759_v16 = vunpack.c.l.b16 %v1174_v61  ;;  %v2127_v61 = vrot.slane %v2125_v14, 4 }
 0x365   : > { %12371 = vst [vmem:[#allocation176_spill] sm:$0xff] %v10386_v40  ;;  %5317 = vmatmul.bf16.gmra.mxu0 %v10380_v55  ;;  %v1187_v40 = vrot.slane %v1185_v32, 4  ;;  %v8337_v32 = vld [vmem:[%s8588_s22 + $0x17c] sm:$0xff] }
 0x366   : > { %v4620_v6 = vpop.f32.mrf.mxu2  ;;  %v10413_v30 = vpack.c.b16 %v3011_v23, %v3010_v9  ;;  %v10415_v34 = vpack.c.b16 %v2759_v16, %v2758_v44  ;;  %v12378_v9 = vld [vmem:[#allocation82_spill] sm:$0xff]  ;;  %v10428_v16 = vld [vmem:[%s8588_s22 + $0x190] sm:$0xf] }
 0x367   : > { %v4621_v52 = vadd.f32 %v4620_v6, %v4292_v51  ;;  %v4949_v3 = vpop.f32.mrf.mxu3  ;;  %v1177_v51 = vrot.slane %v1175_v49, 4  ;;  %v1183_v6 = vrot.slane %v1181_v56, 5 }
 0x368   : > { %v4293_v57 = vpop.f32.mrf.mxu1  ;;  %12375 = vst [vmem:[#allocation78_spill] sm:$0xff] %v10413_v30 }
 0x369   : > { %v4950_v15 = vadd.f32 %v4949_v3, %v4621_v52  ;;  %v4294_v21 = vadd.f32 %v4293_v57, %v12374_v12  ;;  %v10411_v3 = vld [vmem:[%s8588_s22 + $0x18c] sm:$0x1]  ;;  %12376 = vst [vmem:[#allocation177_spill] sm:$0xff] %v10415_v34  ;;  %v1178_v59 = vor.u32 %v1177_v51, %v1173_v54  ;;  %v1188_v57 = vor.u32 %v1187_v40, %v1183_v6  ;;  %v10431_v12 = vld [vmem:[%s8588_s22 + $0x194] sm:$0xf] }
 0x36a   : > { %v5280_v29 = vpop.f32.mrf.mxu0 }
 0x36b   : > { %v10407_v28 = vadd.f32 %v5278_v63, %v4950_v15  ;;  %v2128_v63 = vrot.slane %v10321_v19, 5  ;;  %v1191_v15 = vshll.u32 %v10411_v3, 16  ;;  %v1179_v54 = vrot.slane %v1178_v59, 4 }
 0x36c   : > { %v1189_v23 = vrot.slane %v1188_v57, 4  ;;  %v1199_v59 = vshll.u32 %v10428_v16, 16 }
 0x36d   : > { %12373 = vst [vmem:[#allocation74_spill] sm:$0xff] %v10407_v28  ;;  %v2130_v19 = vrot.slane %v2128_v63, 4  ;;  %v1193_v44 = vrot.slane %v1191_v15, 5 }
 0x36e   : > { %v4622_v52 = vpop.f32.mrf.mxu2 }
 0x36f   : > { %v4623_v5 = vadd.f32 %v4622_v52, %v4294_v21  ;;  %v4951_v7 = vpop.f32.mrf.mxu3  ;;  %v2129_v21 = vsel %vm8933_vm5, %v2127_v61, %v2128_v63  ;;  %v1194_v15 = vsel %vm8928_vm4, %v1189_v23, %v1193_v44  ;;  %v1209_v63 = vshrl.u32 %v10431_v12, 16 }
 0x370   : > { %v4296_v58 = vpop.f32.mrf.mxu1  ;;  %v3012_v61 = vunpack.c.l.b16 %v2129_v21 }
 0x371   : > { %v4952_v41 = vadd.f32 %v4951_v7, %v4623_v5  ;;  %v2131_v7 = vrot.slane %v10338_v17, 5  ;;  %v4297_v40 = vadd.f32 %v4296_v58, %v12378_v9  ;;  %v1184_v17 = vsel %vm8928_vm4, %v1179_v54, %v1183_v6 }
 0x372   : > { %v5283_v49 = vpop.f32.mrf.mxu0  ;;  %v1196_v58 = vshrl.u32 %v10428_v16, 16  ;;  %v2761_v6 = vunpack.c.l.b16 %v1194_v15  ;;  %v7138_v15 = vrot.slane %v10355_v53, 9 }
 0x373   : > { %4335 = vmatmul.bf16.gmra.mxu1 %v10342_v47  ;;  %4664 = vmatmul.bf16.gmra.mxu2 %v10413_v30  ;;  %v10421_v56 = vadd.f32 %v5280_v29, %v4952_v41  ;;  %v2132_v5 = vsel %vm8933_vm5, %v2130_v19, %v2131_v7  ;;  %v2760_v7 = vunpack.c.l.b16 %v1184_v17  ;;  %v10449_v30 = vld [vmem:[%s8588_s22 + $0x198] sm:$0xf] }
 0x374   : > { %4993 = vmatmul.bf16.gmra.mxu3 %v8337_v32  ;;  %v1205_v32 = vshll.u32 %v10431_v12, 16  ;;  %v3013_v9 = vunpack.c.l.b16 %v2132_v5  ;;  %v1198_v54 = vrot.slane %v1196_v58, 4 }
 0x375   : > { %12377 = vst [vmem:[#allocation178_spill] sm:$0xff] %v10421_v56  ;;  %5322 = vmatmul.bf16.gmra.mxu0 %v10415_v34  ;;  %v10453_v5 = vpack.c.b16 %v2761_v6, %v2760_v7 }
 0x376   : > { %v4625_v51 = vpop.f32.mrf.mxu2  ;;  %v10451_v47 = vpack.c.b16 %v3013_v9, %v3012_v61  ;;  %v12384_v61 = vld [vmem:[#allocation90_spill] sm:$0xff] }
 0x377   : > { %v4626_v14 = vadd.f32 %v4625_v51, %v4297_v40  ;;  %v4954_v29 = vpop.f32.mrf.mxu3  ;;  %v1201_v40 = vrot.slane %v1199_v59, 5  ;;  %v12380_v51 = vld [vmem:[#allocation86_spill] sm:$0xff]  ;;  %12382 = vst [vmem:[#allocation179_spill] sm:$0xff] %v10453_v5 }
 0x378   : > { %v4298_v52 = vpop.f32.mrf.mxu1  ;;  %12381 = vst [vmem:[#allocation86_spill] sm:$0xff] %v10451_v47 }
 0x379   : > { %v4955_v41 = vadd.f32 %v4954_v29, %v4626_v14  ;;  %v4299_v56 = vadd.f32 %v4298_v52, %v12380_v51  ;;  %v1207_v14 = vrot.slane %v1205_v32, 5  ;;  %v1211_v29 = vrot.slane %v1209_v63, 4 }
 0x37a   : > { %v5285_v57 = vpop.f32.mrf.mxu0  ;;  %v1202_v17 = vor.u32 %v1201_v40, %v1198_v54  ;;  %v1215_v52 = vshll.u32 %v10449_v30, 16  ;;  %v2138_v32 = vrot.slane %v10376_v27, 5  ;;  %v10467_v40 = vld [vmem:[%s8588_s22 + $0x19c] sm:$0xf] }
 0x37b   : > { %v10445_v19 = vadd.f32 %v5283_v49, %v4955_v41  ;;  %v2135_v49 = vrot.slane %v10358_v18, 5  ;;  %v1212_v41 = vor.u32 %v1211_v29, %v1207_v14 }
 0x37c   : > { %v1203_v63 = vrot.slane %v1202_v17, 4  ;;  %v1217_v6 = vrot.slane %v1215_v52, 5  ;;  %v1229_v52 = vshrl.u32 %v10467_v40, 16 }
 0x37d   : > { %12379 = vst [vmem:[#allocation82_spill] sm:$0xff] %v10445_v19  ;;  %v2137_v18 = vrot.slane %v2135_v49, 4  ;;  %v1213_v7 = vrot.slane %v1212_v41, 4  ;;  %v1225_v41 = vshll.u32 %v10467_v40, 16 }
 0x37e   : > { %v4627_v28 = vpop.f32.mrf.mxu2  ;;  %v1208_v27 = vsel %vm8928_vm4, %v1203_v63, %v1207_v14  ;;  %v12386_v14 = vld [vmem:[#allocation94_spill] sm:$0xff] }
 0x37f   : > { %v4628_v23 = vadd.f32 %v4627_v28, %v4299_v56  ;;  %v4956_v44 = vpop.f32.mrf.mxu3  ;;  %v8338_v56 = vld [vmem:[%s8588_s22 + $0x184] sm:$0xff]  ;;  %v2139_v53 = vsel %vm8933_vm5, %v2137_v18, %v2138_v32  ;;  %v2762_v18 = vunpack.c.l.b16 %v1208_v27 }
 0x380   : > { %v4301_v21 = vpop.f32.mrf.mxu1 }
 0x381   : > { %v4957_v58 = vadd.f32 %v4956_v44, %v4628_v23  ;;  %v4302_v9 = vadd.f32 %v4301_v21, %v12384_v61  ;;  %v2136_v23 = vsel %vm8933_vm5, %v7138_v15, %v2135_v49  ;;  %v1219_v44 = vshrl.u32 %v10449_v30, 16 }
 0x382   : > { %v5288_v59 = vpop.f32.mrf.mxu0  ;;  %v3015_v49 = vunpack.c.l.b16 %v2139_v53 }
 0x383   : > { %4340 = vmatmul.bf16.gmra.mxu1 %v10380_v55  ;;  %4669 = vmatmul.bf16.gmra.mxu2 %v10451_v47  ;;  %v10459_v28 = vadd.f32 %v5285_v57, %v4957_v58  ;;  %v1218_v58 = vsel %vm8928_vm4, %v1213_v7, %v1217_v6 }
 0x384   : > { %4998 = vmatmul.bf16.gmra.mxu3 %v8338_v56  ;;  %v3014_v56 = vunpack.c.l.b16 %v2136_v23  ;;  %v2763_v61 = vunpack.c.l.b16 %v1218_v58  ;;  %v2140_v58 = vrot.slane %v2138_v32, 4  ;;  %v12390_v32 = vld [vmem:[#allocation99_spill] sm:$0xff] }
 0x385   : > { %12383 = vst [vmem:[#allocation180_spill] sm:$0xff] %v10459_v28  ;;  %5327 = vmatmul.bf16.gmra.mxu0 %v10453_v5  ;;  %v1231_v28 = vrot.slane %v1229_v52, 4  ;;  %v8339_v52 = vld [vmem:[%s8588_s22 + $0x190] sm:$0xff] }
 0x386   : > { %v4630_v54 = vpop.f32.mrf.mxu2  ;;  %v10486_v47 = vpack.c.b16 %v3015_v49, %v3014_v56  ;;  %v10488_v23 = vpack.c.b16 %v2763_v61, %v2762_v18  ;;  %v7844_v56 = vld [vmem:[%s12000_s1 + $0x1d0] sm:$0xff]  ;;  %v10507_v61 = vld [vmem:[%s8588_s22 + $0x1a4] sm:$0xf] }
 0x387   : > { %v4631_v51 = vadd.f32 %v4630_v54, %v4302_v9  ;;  %v4959_v57 = vpop.f32.mrf.mxu3  ;;  %v1221_v9 = vrot.slane %v1219_v44, 4  ;;  %v1227_v54 = vrot.slane %v1225_v41, 5  ;;  %6126 = vmatpush.bf16.msra.mxu3 %v7844_v56 }
 0x388   : > { %v4303_v29 = vpop.f32.mrf.mxu1  ;;  %12387 = vst [vmem:[#allocation94_spill] sm:$0xff] %v10486_v47 }
 0x389   : > { %v4960_v21 = vadd.f32 %v4959_v57, %v4631_v51  ;;  %v4304_v63 = vadd.f32 %v4303_v29, %v12386_v14  ;;  %v10484_v57 = vld [vmem:[%s8588_s22 + $0x1a0] sm:$0x1]  ;;  %12388 = vst [vmem:[#allocation181_spill] sm:$0xff] %v10488_v23  ;;  %v1222_v53 = vor.u32 %v1221_v9, %v1217_v6  ;;  %v10510_v14 = vld [vmem:[%s8588_s22 + $0x1a8] sm:$0xf] }
 0x38a   : > { %v5290_v17 = vpop.f32.mrf.mxu0  ;;  %v1235_v29 = vshll.u32 %v10484_v57, 16  ;;  %v1249_v56 = vshll.u32 %v10510_v14, 16 }
 0x38b   : > { %v10480_v15 = vadd.f32 %v5288_v59, %v4960_v21  ;;  %v2141_v59 = vrot.slane %v10394_v0, 5  ;;  %v1232_v21 = vor.u32 %v1231_v28, %v1227_v54  ;;  %v1223_v6 = vrot.slane %v1222_v53, 4  ;;  %v7836_v28 = vld [vmem:[%s12000_s1 + $0x190] sm:$0xff] }
 0x38c   : > { %v1237_v18 = vrot.slane %v1235_v29, 5  ;;  %5797 = vmatpush.bf16.msra.mxu2 %v7836_v28 }
 0x38d   : > { %12385 = vst [vmem:[#allocation90_spill] sm:$0xff] %v10480_v15  ;;  %v2143_v0 = vrot.slane %v2141_v59, 4 }
 0x38e   : > { %v4632_v51 = vpop.f32.mrf.mxu2 }
 0x38f   : > { %v4633_v7 = vadd.f32 %v4632_v51, %v4304_v63  ;;  %v4961_v19 = vpop.f32.mrf.mxu3  ;;  %v2142_v51 = vsel %vm8933_vm5, %v2140_v58, %v2141_v59  ;;  %v1253_v59 = vshrl.u32 %v10510_v14, 16  ;;  %v7828_v58 = vld [vmem:[%s12000_s1 + $0x150] sm:$0xff] }
 0x390   : > { %v4306_v55 = vpop.f32.mrf.mxu1  ;;  %5468 = vmatpush.bf16.msra.mxu1 %v7828_v58 }
 0x391   : > { %v4962_v27 = vadd.f32 %v4961_v19, %v4633_v7  ;;  %v2144_v19 = vrot.slane %v10411_v3, 5  ;;  %v4307_v49 = vadd.f32 %v4306_v55, %v12390_v32  ;;  %v1228_v55 = vsel %vm8928_vm4, %v1223_v6, %v1227_v54  ;;  %v7852_v54 = vld [vmem:[%s12000_s1 + $0x210] sm:$0xff] }
 0x392   : > { %v5293_v44 = vpop.f32.mrf.mxu0  ;;  %6455 = vmatpush.bf16.msra.mxu0 %v7852_v54  ;;  %v2764_v32 = vunpack.c.l.b16 %v1228_v55 }
 0x393   : > { %4345 = vmatmul.bf16.gmra.mxu1 %v10415_v34  ;;  %4674 = vmatmul.bf16.gmra.mxu2 %v10486_v47  ;;  %v10494_v41 = vadd.f32 %v5290_v17, %v4962_v27  ;;  %v1233_v17 = vrot.slane %v1232_v21, 4  ;;  %v2145_v53 = vsel %vm8933_vm5, %v2143_v0, %v2144_v19  ;;  %v1240_v27 = vshrl.u32 %v10507_v61, 16  ;;  %v10534_v47 = vld [vmem:[%s8588_s22 + $0x1ac] sm:$0xf] }
 0x394   : > { %5003 = vmatmul.bf16.gmra.mxu3 %v8339_v52  ;;  %v1243_v21 = vshll.u32 %v10507_v61, 16  ;;  %v3016_v0 = vunpack.c.l.b16 %v2142_v51  ;;  %v3017_v19 = vunpack.c.l.b16 %v2145_v53 }
 0x395   : > { %12389 = vst [vmem:[#allocation182_spill] sm:$0xff] %v10494_v41  ;;  %5332 = vmatmul.bf16.gmra.mxu0 %v10488_v23  ;;  %v1238_v28 = vsel %vm8928_vm4, %v1233_v17, %v1237_v18  ;;  %v1242_v17 = vrot.slane %v1240_v27, 4  ;;  %v1255_v41 = vrot.slane %v1253_v59, 4 }
 0x396   : > { %v4635_v9 = vpop.f32.mrf.mxu2  ;;  %v1245_v18 = vrot.slane %v1243_v21, 5  ;;  %v10536_v51 = vpack.c.b16 %v3017_v19, %v3016_v0 }
 0x397   : > { %v4636_v3 = vadd.f32 %v4635_v9, %v4307_v49  ;;  %v4964_v63 = vpop.f32.mrf.mxu3  ;;  %v2765_v49 = vunpack.c.l.b16 %v1238_v28  ;;  %v12392_v9 = vld [vmem:[#allocation104_spill] sm:$0xff] }
 0x398   : > { %v4308_v7 = vpop.f32.mrf.mxu1  ;;  %12393 = vst [vmem:[#allocation104_spill] sm:$0xff] %v10536_v51  ;;  %v1246_v55 = vor.u32 %v1245_v18, %v1242_v17  ;;  %v8340_v28 = vld [vmem:[%s8588_s22 + $0x198] sm:$0xff] }
 0x399   : > { %v4965_v29 = vadd.f32 %v4964_v63, %v4636_v3  ;;  %v4309_v3 = vadd.f32 %v4308_v7, %v12392_v9  ;;  %v1251_v63 = vrot.slane %v1249_v56, 5  ;;  %v10538_v58 = vpack.c.b16 %v2765_v49, %v2764_v32  ;;  %v10552_v32 = vld [vmem:[%s8588_s22 + $0x1b0] sm:$0xf] }
 0x39a   : > { %v5295_v52 = vpop.f32.mrf.mxu0  ;;  %v1259_v7 = vshll.u32 %v10534_v47, 16  ;;  %v7139_v56 = vrot.slane %v10428_v16, 9  ;;  %v1263_v9 = vshrl.u32 %v10534_v47, 16 }
 0x39b   : > { %v10530_v6 = vadd.f32 %v5293_v44, %v4965_v29  ;;  %12394 = vst [vmem:[#allocation183_spill] sm:$0xff] %v10538_v58  ;;  %v2148_v44 = vrot.slane %v10431_v12, 5  ;;  %v1256_v29 = vor.u32 %v1255_v41, %v1251_v63  ;;  %v12396_v41 = vld [vmem:[#allocation109_spill] sm:$0xff] }
 0x39c   : > { %v1261_v0 = vrot.slane %v1259_v7, 5 }
 0x39d   : > { %12391 = vst [vmem:[#allocation99_spill] sm:$0xff] %v10530_v6  ;;  %v2150_v12 = vrot.slane %v2148_v44, 4  ;;  %v1257_v54 = vrot.slane %v1256_v29, 4  ;;  %v2149_v18 = vsel %vm8933_vm5, %v7139_v56, %v2148_v44  ;;  %v1273_v29 = vshrl.u32 %v10552_v32, 16 }
 0x39e   : > { %v4637_v15 = vpop.f32.mrf.mxu2  ;;  %v3018_v7 = vunpack.c.l.b16 %v2149_v18 }
 0x39f   : > { %v4638_v34 = vadd.f32 %v4637_v15, %v4309_v3  ;;  %v4966_v46 = vpop.f32.mrf.mxu3 }
 0x3a0   : > { %v4311_v53 = vpop.f32.mrf.mxu1 }
 0x3a1   : > { %v4967_v27 = vadd.f32 %v4966_v46, %v4638_v34  ;;  %v2151_v46 = vrot.slane %v10449_v30, 5  ;;  %v1247_v34 = vrot.slane %v1246_v55, 4  ;;  %v4312_v59 = vadd.f32 %v4311_v53, %v12396_v41 }
 0x3a2   : > { %v5298_v21 = vpop.f32.mrf.mxu0  ;;  %v1262_v55 = vsel %vm8928_vm4, %v1257_v54, %v1261_v0  ;;  %v1265_v41 = vrot.slane %v1263_v9, 4 }
 0x3a3   : > { %4350 = vmatmul.bf16.gmra.mxu1 %v10453_v5  ;;  %4679 = vmatmul.bf16.gmra.mxu2 %v10536_v51  ;;  %v10544_v15 = vadd.f32 %v5295_v52, %v4967_v27  ;;  %v2152_v16 = vsel %vm8933_vm5, %v2150_v12, %v2151_v46  ;;  %v1252_v30 = vsel %vm8928_vm4, %v1247_v34, %v1251_v63  ;;  %v1269_v27 = vshll.u32 %v10552_v32, 16  ;;  %v12398_v63 = vld [vmem:[#allocation113_spill] sm:$0xff] }
 0x3a4   : > { %5008 = vmatmul.bf16.gmra.mxu3 %v8340_v28  ;;  %v3019_v44 = vunpack.c.l.b16 %v2152_v16  ;;  %v2766_v56 = vunpack.c.l.b16 %v1252_v30  ;;  %v2767_v12 = vunpack.c.l.b16 %v1262_v55  ;;  %v1266_v16 = vor.u32 %v1265_v41, %v1261_v0  ;;  %v10586_v41 = vld [vmem:[%s8588_s22 + $0x1b8] sm:$0xf] }
 0x3a5   : > { %12395 = vst [vmem:[#allocation184_spill] sm:$0xff] %v10544_v15  ;;  %5337 = vmatmul.bf16.gmra.mxu0 %v10538_v58  ;;  %v2153_v55 = vrot.slane %v2151_v46, 4 }
 0x3a6   : > { %v4640_v19 = vpop.f32.mrf.mxu2  ;;  %v10571_v6 = vpack.c.b16 %v3019_v44, %v3018_v7  ;;  %v10573_v18 = vpack.c.b16 %v2767_v12, %v2766_v56  ;;  %v1267_v0 = vrot.slane %v1266_v16, 4  ;;  %v12402_v7 = vld [vmem:[#allocation6_spill] sm:$0xff]  ;;  %v1287_v16 = vshll.u32 %v10586_v41, 16 }
 0x3a7   : > { %v4641_v49 = vadd.f32 %v4640_v19, %v4312_v59  ;;  %v4969_v52 = vpop.f32.mrf.mxu3  ;;  %v1271_v59 = vrot.slane %v1269_v27, 5  ;;  %v1275_v19 = vrot.slane %v1273_v29, 4  ;;  %v8341_v29 = vld [vmem:[%s8588_s22 + $0x1a4] sm:$0xff] }
 0x3a8   : > { %v4313_v17 = vpop.f32.mrf.mxu1  ;;  %12399 = vst [vmem:[#allocation113_spill] sm:$0xff] %v10571_v6 }
 0x3a9   : > { %v4970_v3 = vadd.f32 %v4969_v52, %v4641_v49  ;;  %v4314_v34 = vadd.f32 %v4313_v17, %v12398_v63  ;;  %v10569_v52 = vld [vmem:[%s8588_s22 + $0x1b4] sm:$0x1]  ;;  %12400 = vst [vmem:[#allocation185_spill] sm:$0xff] %v10573_v18  ;;  %v1276_v17 = vor.u32 %v1275_v19, %v1271_v59 }
 0x3aa   : > { %v5300_v53 = vpop.f32.mrf.mxu0 }
 0x3ab   : > { %v10565_v28 = vadd.f32 %v5298_v21, %v4970_v3  ;;  %v2154_v21 = vrot.slane %v10467_v40, 5  ;;  %v1279_v3 = vshll.u32 %v10569_v52, 16  ;;  %v1277_v56 = vrot.slane %v1276_v17, 4 }
 0x3ad   : > { %12397 = vst [vmem:[#allocation109_spill] sm:$0xff] %v10565_v28  ;;  %v2156_v40 = vrot.slane %v2154_v21, 4  ;;  %v1281_v12 = vrot.slane %v1279_v3, 5  ;;  %v2155_v19 = vsel %vm8933_vm5, %v2153_v55, %v2154_v21 }
 0x3ae   : > { %v4642_v49 = vpop.f32.mrf.mxu2  ;;  %v3020_v55 = vunpack.c.l.b16 %v2155_v19 }
 0x3af   : > { %v4643_v54 = vadd.f32 %v4642_v49, %v4314_v34  ;;  %v4971_v15 = vpop.f32.mrf.mxu3  ;;  %v10589_v34 = vld [vmem:[%s8588_s22 + $0x1bc] sm:$0xf]  ;;  %v1282_v3 = vsel %vm8928_vm4, %v1277_v56, %v1281_v12 }
 0x3b0   : > { %v4316_v51 = vpop.f32.mrf.mxu1  ;;  %v1297_v21 = vshrl.u32 %v10589_v34, 16 }
 0x3b1   : > { %v4972_v30 = vadd.f32 %v4971_v15, %v4643_v54  ;;  %v2157_v15 = vrot.slane %v10484_v57, 5  ;;  %v4317_v44 = vadd.f32 %v4316_v51, %v12402_v7  ;;  %v1272_v57 = vsel %vm8928_vm4, %v1267_v0, %v1271_v59 }
 0x3b2   : > { %v5303_v9 = vpop.f32.mrf.mxu0  ;;  %v1284_v51 = vshrl.u32 %v10586_v41, 16  ;;  %v2769_v59 = vunpack.c.l.b16 %v1282_v3  ;;  %v7140_v3 = vrot.slane %v10507_v61, 9 }
 0x3b3   : > { %4355 = vmatmul.bf16.gmra.mxu1 %v10488_v23  ;;  %4684 = vmatmul.bf16.gmra.mxu2 %v10571_v6  ;;  %v10579_v27 = vadd.f32 %v5300_v53, %v4972_v30  ;;  %v2158_v54 = vsel %vm8933_vm5, %v2156_v40, %v2157_v15  ;;  %v2768_v15 = vunpack.c.l.b16 %v1272_v57  ;;  %v10607_v6 = vld [vmem:[%s8588_s22 + $0x1c0] sm:$0xf] }
 0x3b4   : > { %5013 = vmatmul.bf16.gmra.mxu3 %v8341_v29  ;;  %v1293_v29 = vshll.u32 %v10589_v34, 16  ;;  %v3021_v7 = vunpack.c.l.b16 %v2158_v54  ;;  %v1286_v0 = vrot.slane %v1284_v51, 4 }
 0x3b5   : > { %12401 = vst [vmem:[#allocation186_spill] sm:$0xff] %v10579_v27  ;;  %5342 = vmatmul.bf16.gmra.mxu0 %v10573_v18  ;;  %v10611_v54 = vpack.c.b16 %v2769_v59, %v2768_v15 }
 0x3b6   : > { %v4645_v63 = vpop.f32.mrf.mxu2  ;;  %v10609_v23 = vpack.c.b16 %v3021_v7, %v3020_v55  ;;  %v12408_v55 = vld [vmem:[#allocation12_spill] sm:$0xff] }
 0x3b7   : > { %v4646_v46 = vadd.f32 %v4645_v63, %v4317_v44  ;;  %v4974_v53 = vpop.f32.mrf.mxu3  ;;  %v1289_v44 = vrot.slane %v1287_v16, 5  ;;  %v12404_v63 = vld [vmem:[#allocation9_spill] sm:$0xff]  ;;  %12406 = vst [vmem:[#allocation187_spill] sm:$0xff] %v10611_v54 }
 0x3b8   : > { %v4318_v49 = vpop.f32.mrf.mxu1  ;;  %12405 = vst [vmem:[#allocation9_spill] sm:$0xff] %v10609_v23 }
 0x3b9   : > { %v4975_v30 = vadd.f32 %v4974_v53, %v4646_v46  ;;  %v4319_v27 = vadd.f32 %v4318_v49, %v12404_v63  ;;  %v1295_v46 = vrot.slane %v1293_v29, 5  ;;  %v1299_v53 = vrot.slane %v1297_v21, 4 }
 0x3ba   : > { %v5305_v17 = vpop.f32.mrf.mxu0  ;;  %v1290_v57 = vor.u32 %v1289_v44, %v1286_v0  ;;  %v1303_v49 = vshll.u32 %v10607_v6, 16  ;;  %v2164_v29 = vrot.slane %v10534_v47, 5  ;;  %v10625_v44 = vld [vmem:[%s8588_s22 + $0x1c4] sm:$0xf] }
 0x3bb   : > { %v10603_v40 = vadd.f32 %v5303_v9, %v4975_v30  ;;  %v2161_v9 = vrot.slane %v10510_v14, 5  ;;  %v1300_v30 = vor.u32 %v1299_v53, %v1295_v46 }
 0x3bc   : > { %v1291_v21 = vrot.slane %v1290_v57, 4  ;;  %v1305_v59 = vrot.slane %v1303_v49, 5  ;;  %v1317_v49 = vshrl.u32 %v10625_v44, 16 }
 0x3bd   : > { %12403 = vst [vmem:[#allocation6_spill] sm:$0xff] %v10603_v40  ;;  %v2163_v14 = vrot.slane %v2161_v9, 4  ;;  %v1301_v15 = vrot.slane %v1300_v30, 4  ;;  %v1313_v30 = vshll.u32 %v10625_v44, 16 }
 0x3be   : > { %v4647_v28 = vpop.f32.mrf.mxu2  ;;  %v1296_v47 = vsel %vm8928_vm4, %v1291_v21, %v1295_v46  ;;  %v12410_v46 = vld [vmem:[#allocation15_spill] sm:$0xff] }
 0x3bf   : > { %v4648_v56 = vadd.f32 %v4647_v28, %v4319_v27  ;;  %v4976_v12 = vpop.f32.mrf.mxu3  ;;  %v8342_v27 = vld [vmem:[%s8588_s22 + $0x1ac] sm:$0xff]  ;;  %v2165_v61 = vsel %vm8933_vm5, %v2163_v14, %v2164_v29  ;;  %v2770_v14 = vunpack.c.l.b16 %v1296_v47 }
 0x3c0   : > { %v4321_v19 = vpop.f32.mrf.mxu1 }
 0x3c1   : > { %v4977_v51 = vadd.f32 %v4976_v12, %v4648_v56  ;;  %v4322_v7 = vadd.f32 %v4321_v19, %v12408_v55  ;;  %v2162_v56 = vsel %vm8933_vm5, %v7140_v3, %v2161_v9  ;;  %v1307_v12 = vshrl.u32 %v10607_v6, 16 }
 0x3c2   : > { %v5308_v16 = vpop.f32.mrf.mxu0  ;;  %v3023_v9 = vunpack.c.l.b16 %v2165_v61 }
 0x3c3   : > { %4360 = vmatmul.bf16.gmra.mxu1 %v10538_v58  ;;  %4689 = vmatmul.bf16.gmra.mxu2 %v10609_v23  ;;  %v10617_v28 = vadd.f32 %v5305_v17, %v4977_v51  ;;  %v1306_v51 = vsel %vm8928_vm4, %v1301_v15, %v1305_v59 }
 0x3c4   : > { %5018 = vmatmul.bf16.gmra.mxu3 %v8342_v27  ;;  %v3022_v27 = vunpack.c.l.b16 %v2162_v56  ;;  %v2771_v55 = vunpack.c.l.b16 %v1306_v51  ;;  %v2166_v51 = vrot.slane %v2164_v29, 4 }
 0x3c5   : > { %12407 = vst [vmem:[#allocation188_spill] sm:$0xff] %v10617_v28  ;;  %5347 = vmatmul.bf16.gmra.mxu0 %v10611_v54  ;;  %v1319_v28 = vrot.slane %v1317_v49, 4  ;;  %v8343_v49 = vld [vmem:[%s8588_s22 + $0x1b8] sm:$0xff] }
 0x3c6   : > { %v4650_v0 = vpop.f32.mrf.mxu2  ;;  %v10644_v23 = vpack.c.b16 %v3023_v9, %v3022_v27  ;;  %v10646_v56 = vpack.c.b16 %v2771_v55, %v2770_v14  ;;  %v12414_v27 = vld [vmem:[#allocation18_spill] sm:$0xff] }
 0x3c7   : > { %v4651_v63 = vadd.f32 %v4650_v0, %v4322_v7  ;;  %v4979_v17 = vpop.f32.mrf.mxu3  ;;  %v1309_v7 = vrot.slane %v1307_v12, 4  ;;  %v1315_v0 = vrot.slane %v1313_v30, 5  ;;  %v10659_v55 = vld [vmem:[%s8588_s22 + $0x1cc] sm:$0xf] }
 0x3c8   : > { %v4323_v53 = vpop.f32.mrf.mxu1  ;;  %12411 = vst [vmem:[#allocation15_spill] sm:$0xff] %v10644_v23 }
 0x3c9   : > { %v4980_v19 = vadd.f32 %v4979_v17, %v4651_v63  ;;  %v4324_v21 = vadd.f32 %v4323_v53, %v12410_v46  ;;  %v10642_v17 = vld [vmem:[%s8588_s22 + $0x1c8] sm:$0x1]  ;;  %12412 = vst [vmem:[#allocation189_spill] sm:$0xff] %v10646_v56  ;;  %v1310_v61 = vor.u32 %v1309_v7, %v1305_v59  ;;  %v1320_v53 = vor.u32 %v1319_v28, %v1315_v0  ;;  %v10662_v46 = vld [vmem:[%s8588_s22 + $0x1d0] sm:$0xf] }
 0x3ca   : > { %v5310_v57 = vpop.f32.mrf.mxu0 }
 0x3cb   : > { %v10638_v3 = vadd.f32 %v5308_v16, %v4980_v19  ;;  %v2167_v16 = vrot.slane %v10552_v32, 5  ;;  %v1323_v19 = vshll.u32 %v10642_v17, 16  ;;  %v1311_v59 = vrot.slane %v1310_v61, 4 }
 0x3cc   : > { %v1321_v9 = vrot.slane %v1320_v53, 4  ;;  %v1331_v61 = vshll.u32 %v10659_v55, 16 }
 0x3cd   : > { %12409 = vst [vmem:[#allocation12_spill] sm:$0xff] %v10638_v3  ;;  %v2169_v32 = vrot.slane %v2167_v16, 4  ;;  %v1325_v14 = vrot.slane %v1323_v19, 5 }
 0x3ce   : > { %v4652_v63 = vpop.f32.mrf.mxu2 }
 0x3cf   : > { %v4653_v15 = vadd.f32 %v4652_v63, %v4324_v21  ;;  %v4981_v40 = vpop.f32.mrf.mxu3  ;;  %v2168_v21 = vsel %vm8933_vm5, %v2166_v51, %v2167_v16  ;;  %v1326_v19 = vsel %vm8928_vm4, %v1321_v9, %v1325_v14  ;;  %v1341_v16 = vshrl.u32 %v10662_v46, 16 }
 0x3d0   : > { %v4326_v58 = vpop.f32.mrf.mxu1  ;;  %v3024_v51 = vunpack.c.l.b16 %v2168_v21 }
 0x3d1   : > { %v4982_v47 = vadd.f32 %v4981_v40, %v4653_v15  ;;  %v2170_v40 = vrot.slane %v10569_v52, 5  ;;  %v4327_v28 = vadd.f32 %v4326_v58, %v12414_v27  ;;  %v1316_v52 = vsel %vm8928_vm4, %v1311_v59, %v1315_v0 }
 0x3d2   : > { %v5313_v12 = vpop.f32.mrf.mxu0  ;;  %v1328_v58 = vshrl.u32 %v10659_v55, 16  ;;  %v2773_v0 = vunpack.c.l.b16 %v1326_v19  ;;  %v7141_v19 = vrot.slane %v10586_v41, 9 }
 0x3d3   : > { %4365 = vmatmul.bf16.gmra.mxu1 %v10573_v18  ;;  %4694 = vmatmul.bf16.gmra.mxu2 %v10644_v23  ;;  %v10652_v30 = vadd.f32 %v5310_v57, %v4982_v47  ;;  %v2171_v15 = vsel %vm8933_vm5, %v2169_v32, %v2170_v40  ;;  %v2772_v40 = vunpack.c.l.b16 %v1316_v52  ;;  %v10680_v23 = vld [vmem:[%s8588_s22 + $0x1d4] sm:$0xf] }
 0x3d4   : > { %5023 = vmatmul.bf16.gmra.mxu3 %v8343_v49  ;;  %v1337_v49 = vshll.u32 %v10662_v46, 16  ;;  %v3025_v27 = vunpack.c.l.b16 %v2171_v15  ;;  %v1330_v59 = vrot.slane %v1328_v58, 4 }
 0x3d5   : > { %12413 = vst [vmem:[#allocation190_spill] sm:$0xff] %v10652_v30  ;;  %5352 = vmatmul.bf16.gmra.mxu0 %v10646_v56  ;;  %v10684_v15 = vpack.c.b16 %v2773_v0, %v2772_v40 }
 0x3d6   : > { %v4655_v7 = vpop.f32.mrf.mxu2  ;;  %v10682_v18 = vpack.c.b16 %v3025_v27, %v3024_v51  ;;  %v12420_v51 = vld [vmem:[#allocation24_spill] sm:$0xff] }
 0x3d7   : > { %v4656_v29 = vadd.f32 %v4655_v7, %v4327_v28  ;;  %v4984_v57 = vpop.f32.mrf.mxu3  ;;  %v1333_v28 = vrot.slane %v1331_v61, 5  ;;  %v12416_v7 = vld [vmem:[#allocation21_spill] sm:$0xff]  ;;  %12418 = vst [vmem:[#allocation191_spill] sm:$0xff] %v10684_v15 }
 0x3d8   : > { %v4328_v63 = vpop.f32.mrf.mxu1  ;;  %12417 = vst [vmem:[#allocation21_spill] sm:$0xff] %v10682_v18 }
 0x3d9   : > { %v4985_v47 = vadd.f32 %v4984_v57, %v4656_v29  ;;  %v4329_v30 = vadd.f32 %v4328_v63, %v12416_v7  ;;  %v1339_v29 = vrot.slane %v1337_v49, 5  ;;  %v1343_v57 = vrot.slane %v1341_v16, 4 }
 0x3da   : > { %v5315_v53 = vpop.f32.mrf.mxu0  ;;  %v1334_v52 = vor.u32 %v1333_v28, %v1330_v59  ;;  %v1347_v63 = vshll.u32 %v10680_v23, 16  ;;  %v2177_v49 = vrot.slane %v10607_v6, 5  ;;  %v10698_v28 = vld [vmem:[%s8588_s22 + $0x1d8] sm:$0xf] }
 0x3db   : > { %v10676_v32 = vadd.f32 %v5313_v12, %v4985_v47  ;;  %v2174_v12 = vrot.slane %v10589_v34, 5  ;;  %v1344_v47 = vor.u32 %v1343_v57, %v1339_v29 }
 0x3dc   : > { %v1335_v16 = vrot.slane %v1334_v52, 4  ;;  %v1349_v0 = vrot.slane %v1347_v63, 5  ;;  %v1361_v63 = vshrl.u32 %v10698_v28, 16 }
 0x3dd   : > { %12415 = vst [vmem:[#allocation18_spill] sm:$0xff] %v10676_v32  ;;  %v2176_v34 = vrot.slane %v2174_v12, 4  ;;  %v1345_v40 = vrot.slane %v1344_v47, 4  ;;  %v1357_v47 = vshll.u32 %v10698_v28, 16 }
 0x3de   : > { %v4657_v3 = vpop.f32.mrf.mxu2  ;;  %v1340_v6 = vsel %vm8928_vm4, %v1335_v16, %v1339_v29  ;;  %v12422_v29 = vld [vmem:[#allocation27_spill] sm:$0xff] }
 0x3df   : > { %v4658_v9 = vadd.f32 %v4657_v3, %v4329_v30  ;;  %v4986_v14 = vpop.f32.mrf.mxu3  ;;  %v8344_v30 = vld [vmem:[%s8588_s22 + $0x1c0] sm:$0xff]  ;;  %v2178_v41 = vsel %vm8933_vm5, %v2176_v34, %v2177_v49  ;;  %v2774_v34 = vunpack.c.l.b16 %v1340_v6 }
 0x3e0   : > { %v4331_v21 = vpop.f32.mrf.mxu1 }
 0x3e1   : > { %v4987_v58 = vadd.f32 %v4986_v14, %v4658_v9  ;;  %v4332_v27 = vadd.f32 %v4331_v21, %v12420_v51  ;;  %v2175_v9 = vsel %vm8933_vm5, %v7141_v19, %v2174_v12  ;;  %v1351_v14 = vshrl.u32 %v10680_v23, 16 }
 0x3e2   : > { %v5318_v61 = vpop.f32.mrf.mxu0  ;;  %v3027_v12 = vunpack.c.l.b16 %v2178_v41 }
 0x3e3   : > { %4370 = vmatmul.bf16.gmra.mxu1 %v10611_v54  ;;  %4699 = vmatmul.bf16.gmra.mxu2 %v10682_v18  ;;  %v10690_v3 = vadd.f32 %v5315_v53, %v4987_v58  ;;  %v1350_v58 = vsel %vm8928_vm4, %v1345_v40, %v1349_v0 }
 0x3e4   : > { %5028 = vmatmul.bf16.gmra.mxu3 %v8344_v30  ;;  %v3026_v30 = vunpack.c.l.b16 %v2175_v9  ;;  %v2775_v51 = vunpack.c.l.b16 %v1350_v58  ;;  %v2179_v58 = vrot.slane %v2177_v49, 4 }
 0x3e5   : > { %12419 = vst [vmem:[#allocation192_spill] sm:$0xff] %v10690_v3  ;;  %5357 = vmatmul.bf16.gmra.mxu0 %v10684_v15  ;;  %v1363_v3 = vrot.slane %v1361_v63, 4  ;;  %v8345_v63 = vld [vmem:[%s8588_s22 + $0x1cc] sm:$0xff] }
 0x3e6   : > { %v4660_v59 = vpop.f32.mrf.mxu2  ;;  %v10717_v18 = vpack.c.b16 %v3027_v12, %v3026_v30  ;;  %v10719_v9 = vpack.c.b16 %v2775_v51, %v2774_v34  ;;  %v12426_v30 = vld [vmem:[#allocation30_spill] sm:$0xff]  ;;  %v10732_v51 = vld [vmem:[%s8588_s22 + $0x1e0] sm:$0xf] }
 0x3e7   : > { %v4661_v7 = vadd.f32 %v4660_v59, %v4332_v27  ;;  %v4989_v53 = vpop.f32.mrf.mxu3  ;;  %v1353_v27 = vrot.slane %v1351_v14, 4  ;;  %v1359_v59 = vrot.slane %v1357_v47, 5 }
 0x3e8   : > { %v4333_v57 = vpop.f32.mrf.mxu1  ;;  %12423 = vst [vmem:[#allocation27_spill] sm:$0xff] %v10717_v18 }
 0x3e9   : > { %v4990_v21 = vadd.f32 %v4989_v53, %v4661_v7  ;;  %v4334_v16 = vadd.f32 %v4333_v57, %v12422_v29  ;;  %v10715_v53 = vld [vmem:[%s8588_s22 + $0x1dc] sm:$0x1]  ;;  %12424 = vst [vmem:[#allocation193_spill] sm:$0xff] %v10719_v9  ;;  %v1354_v41 = vor.u32 %v1353_v27, %v1349_v0  ;;  %v1364_v57 = vor.u32 %v1363_v3, %v1359_v59  ;;  %v10735_v29 = vld [vmem:[%s8588_s22 + $0x1e4] sm:$0xf] }
 0x3ea   : > { %v5320_v52 = vpop.f32.mrf.mxu0 }
 0x3eb   : > { %v10711_v19 = vadd.f32 %v5318_v61, %v4990_v21  ;;  %v2180_v61 = vrot.slane %v10625_v44, 5  ;;  %v1367_v21 = vshll.u32 %v10715_v53, 16  ;;  %v1355_v0 = vrot.slane %v1354_v41, 4 }
 0x3ec   : > { %v1365_v12 = vrot.slane %v1364_v57, 4  ;;  %v1375_v41 = vshll.u32 %v10732_v51, 16 }
 0x3ed   : > { %12421 = vst [vmem:[#allocation24_spill] sm:$0xff] %v10711_v19  ;;  %v2182_v44 = vrot.slane %v2180_v61, 4  ;;  %v1369_v34 = vrot.slane %v1367_v21, 5 }
 0x3ee   : > { %v4662_v7 = vpop.f32.mrf.mxu2 }
 0x3ef   : > { %v4663_v40 = vadd.f32 %v4662_v7, %v4334_v16  ;;  %v4991_v32 = vpop.f32.mrf.mxu3  ;;  %v2181_v16 = vsel %vm8933_vm5, %v2179_v58, %v2180_v61  ;;  %v1370_v21 = vsel %vm8928_vm4, %v1365_v12, %v1369_v34  ;;  %v1385_v61 = vshrl.u32 %v10735_v29, 16 }
 0x3f0   : > { %v4336_v54 = vpop.f32.mrf.mxu1  ;;  %v3028_v58 = vunpack.c.l.b16 %v2181_v16 }
 0x3f1   : > { %v4992_v6 = vadd.f32 %v4991_v32, %v4663_v40  ;;  %v2183_v32 = vrot.slane %v10642_v17, 5  ;;  %v4337_v3 = vadd.f32 %v4336_v54, %v12426_v30  ;;  %v1360_v17 = vsel %vm8928_vm4, %v1355_v0, %v1359_v59 }
 0x3f2   : > { %v5323_v14 = vpop.f32.mrf.mxu0  ;;  %v1372_v54 = vshrl.u32 %v10732_v51, 16  ;;  %v2777_v59 = vunpack.c.l.b16 %v1370_v21  ;;  %v7142_v21 = vrot.slane %v10659_v55, 9 }
 0x3f3   : > { %4375 = vmatmul.bf16.gmra.mxu1 %v10646_v56  ;;  %4704 = vmatmul.bf16.gmra.mxu2 %v10717_v18  ;;  %v10725_v47 = vadd.f32 %v5320_v52, %v4992_v6  ;;  %v2184_v40 = vsel %vm8933_vm5, %v2182_v44, %v2183_v32  ;;  %v2776_v32 = vunpack.c.l.b16 %v1360_v17  ;;  %v10753_v18 = vld [vmem:[%s8588_s22 + $0x1e8] sm:$0xf] }
 0x3f4   : > { %5033 = vmatmul.bf16.gmra.mxu3 %v8345_v63  ;;  %v1381_v63 = vshll.u32 %v10735_v29, 16  ;;  %v3029_v30 = vunpack.c.l.b16 %v2184_v40  ;;  %v1374_v0 = vrot.slane %v1372_v54, 4 }
 0x3f5   : > { %12425 = vst [vmem:[#allocation194_spill] sm:$0xff] %v10725_v47  ;;  %5362 = vmatmul.bf16.gmra.mxu0 %v10719_v9  ;;  %v10757_v40 = vpack.c.b16 %v2777_v59, %v2776_v32 }
 0x3f6   : > { %v4665_v27 = vpop.f32.mrf.mxu2  ;;  %v10755_v56 = vpack.c.b16 %v3029_v30, %v3028_v58  ;;  %v12432_v58 = vld [vmem:[#allocation36_spill] sm:$0xff] }
 0x3f7   : > { %v4666_v49 = vadd.f32 %v4665_v27, %v4337_v3  ;;  %v4994_v52 = vpop.f32.mrf.mxu3  ;;  %v1377_v3 = vrot.slane %v1375_v41, 5  ;;  %v12428_v27 = vld [vmem:[#allocation33_spill] sm:$0xff]  ;;  %12430 = vst [vmem:[#allocation195_spill] sm:$0xff] %v10757_v40 }
 0x3f8   : > { %v4338_v7 = vpop.f32.mrf.mxu1  ;;  %12429 = vst [vmem:[#allocation33_spill] sm:$0xff] %v10755_v56 }
 0x3f9   : > { %v4995_v6 = vadd.f32 %v4994_v52, %v4666_v49  ;;  %v4339_v47 = vadd.f32 %v4338_v7, %v12428_v27  ;;  %v1383_v49 = vrot.slane %v1381_v63, 5  ;;  %v1387_v52 = vrot.slane %v1385_v61, 4 }
 0x3fa   : > { %v5325_v57 = vpop.f32.mrf.mxu0  ;;  %v1378_v17 = vor.u32 %v1377_v3, %v1374_v0  ;;  %v1391_v7 = vshll.u32 %v10753_v18, 16  ;;  %v2190_v63 = vrot.slane %v10680_v23, 5  ;;  %v10771_v3 = vld [vmem:[%s8588_s22 + $0x1ec] sm:$0xf] }
 0x3fb   : > { %v10749_v44 = vadd.f32 %v5323_v14, %v4995_v6  ;;  %v2187_v14 = vrot.slane %v10662_v46, 5  ;;  %v1388_v6 = vor.u32 %v1387_v52, %v1383_v49 }
 0x3fc   : > { %v1379_v61 = vrot.slane %v1378_v17, 4  ;;  %v1393_v59 = vrot.slane %v1391_v7, 5  ;;  %v1405_v7 = vshrl.u32 %v10771_v3, 16 }
 0x3fd   : > { %12427 = vst [vmem:[#allocation30_spill] sm:$0xff] %v10749_v44  ;;  %v2189_v46 = vrot.slane %v2187_v14, 4  ;;  %v1389_v32 = vrot.slane %v1388_v6, 4  ;;  %v1401_v6 = vshll.u32 %v10771_v3, 16 }
 0x3fe   : > { %v4667_v19 = vpop.f32.mrf.mxu2  ;;  %v1384_v23 = vsel %vm8928_vm4, %v1379_v61, %v1383_v49  ;;  %v12434_v49 = vld [vmem:[#allocation39_spill] sm:$0xff] }
 0x3ff   : > { %v4668_v12 = vadd.f32 %v4667_v19, %v4339_v47  ;;  %v4996_v34 = vpop.f32.mrf.mxu3  ;;  %v8346_v47 = vld [vmem:[%s8588_s22 + $0x1d4] sm:$0xff]  ;;  %v2191_v55 = vsel %vm8933_vm5, %v2189_v46, %v2190_v63  ;;  %v2778_v46 = vunpack.c.l.b16 %v1384_v23 }
 0x400   : > { %v4341_v16 = vpop.f32.mrf.mxu1 }
 0x401   : > { %v4997_v54 = vadd.f32 %v4996_v34, %v4668_v12  ;;  %v4342_v30 = vadd.f32 %v4341_v16, %v12432_v58  ;;  %v2188_v12 = vsel %vm8933_vm5, %v7142_v21, %v2187_v14  ;;  %v1395_v34 = vshrl.u32 %v10753_v18, 16 }
 0x402   : > { %v5328_v41 = vpop.f32.mrf.mxu0  ;;  %v3031_v14 = vunpack.c.l.b16 %v2191_v55 }
 0x403   : > { %4380 = vmatmul.bf16.gmra.mxu1 %v10684_v15  ;;  %4709 = vmatmul.bf16.gmra.mxu2 %v10755_v56  ;;  %v10763_v19 = vadd.f32 %v5325_v57, %v4997_v54  ;;  %v1394_v54 = vsel %vm8928_vm4, %v1389_v32, %v1393_v59 }
 0x404   : > { %5038 = vmatmul.bf16.gmra.mxu3 %v8346_v47  ;;  %v3030_v47 = vunpack.c.l.b16 %v2188_v12  ;;  %v2779_v58 = vunpack.c.l.b16 %v1394_v54  ;;  %v2192_v54 = vrot.slane %v2190_v63, 4  ;;  %v12438_v63 = vld [vmem:[#allocation42_spill] sm:$0xff] }
 0x405   : > { %12431 = vst [vmem:[#allocation196_spill] sm:$0xff] %v10763_v19  ;;  %5367 = vmatmul.bf16.gmra.mxu0 %v10757_v40  ;;  %v1407_v19 = vrot.slane %v1405_v7, 4  ;;  %v8347_v7 = vld [vmem:[%s8588_s22 + $0x1e0] sm:$0xff] }
 0x406   : > { %v4670_v0 = vpop.f32.mrf.mxu2  ;;  %v10790_v56 = vpack.c.b16 %v3031_v14, %v3030_v47  ;;  %v10792_v12 = vpack.c.b16 %v2779_v58, %v2778_v46  ;;  %v7843_v47 = vld [vmem:[%s12000_s1 + $0x1c8] sm:$0xff]  ;;  %v10811_v58 = vld [vmem:[%s8588_s22 + $0x1f4] sm:$0xf] }
 0x407   : > { %v4671_v27 = vadd.f32 %v4670_v0, %v4342_v30  ;;  %v4999_v57 = vpop.f32.mrf.mxu3  ;;  %v1397_v30 = vrot.slane %v1395_v34, 4  ;;  %v1403_v0 = vrot.slane %v1401_v6, 5  ;;  %6127 = vmatpush.bf16.msra.mxu3 %v7843_v47 }
 0x408   : > { %v4343_v52 = vpop.f32.mrf.mxu1  ;;  %12435 = vst [vmem:[#allocation39_spill] sm:$0xff] %v10790_v56 }
 0x409   : > { %v5000_v16 = vadd.f32 %v4999_v57, %v4671_v27  ;;  %v4344_v61 = vadd.f32 %v4343_v52, %v12434_v49  ;;  %v10788_v57 = vld [vmem:[%s8588_s22 + $0x1f0] sm:$0x1]  ;;  %12436 = vst [vmem:[#allocation197_spill] sm:$0xff] %v10792_v12  ;;  %v1398_v55 = vor.u32 %v1397_v30, %v1393_v59  ;;  %v10814_v49 = vld [vmem:[%s8588_s22 + $0x1f8] sm:$0xf] }
 0x40a   : > { %v5330_v17 = vpop.f32.mrf.mxu0  ;;  %v1411_v52 = vshll.u32 %v10788_v57, 16  ;;  %v1425_v47 = vshll.u32 %v10814_v49, 16 }
 0x40b   : > { %v10784_v21 = vadd.f32 %v5328_v41, %v5000_v16  ;;  %v2193_v41 = vrot.slane %v10698_v28, 5  ;;  %v1408_v16 = vor.u32 %v1407_v19, %v1403_v0  ;;  %v1399_v59 = vrot.slane %v1398_v55, 4  ;;  %v7835_v19 = vld [vmem:[%s12000_s1 + $0x188] sm:$0xff] }
 0x40c   : > { %v1413_v46 = vrot.slane %v1411_v52, 5  ;;  %5798 = vmatpush.bf16.msra.mxu2 %v7835_v19 }
 0x40d   : > { %12433 = vst [vmem:[#allocation36_spill] sm:$0xff] %v10784_v21  ;;  %v2195_v28 = vrot.slane %v2193_v41, 4 }
 0x40e   : > { %v4672_v27 = vpop.f32.mrf.mxu2 }
 0x40f   : > { %v4673_v32 = vadd.f32 %v4672_v27, %v4344_v61  ;;  %v5001_v44 = vpop.f32.mrf.mxu3  ;;  %v2194_v27 = vsel %vm8933_vm5, %v2192_v54, %v2193_v41  ;;  %v1429_v41 = vshrl.u32 %v10814_v49, 16  ;;  %v7827_v54 = vld [vmem:[%s12000_s1 + $0x148] sm:$0xff] }
 0x410   : > { %v4346_v15 = vpop.f32.mrf.mxu1  ;;  %5469 = vmatpush.bf16.msra.mxu1 %v7827_v54 }
 0x411   : > { %v5002_v23 = vadd.f32 %v5001_v44, %v4673_v32  ;;  %v2196_v44 = vrot.slane %v10715_v53, 5  ;;  %v4347_v14 = vadd.f32 %v4346_v15, %v12438_v63  ;;  %v1404_v15 = vsel %vm8928_vm4, %v1399_v59, %v1403_v0  ;;  %v7851_v0 = vld [vmem:[%s12000_s1 + $0x208] sm:$0xff] }
 0x412   : > { %v5333_v34 = vpop.f32.mrf.mxu0  ;;  %6456 = vmatpush.bf16.msra.mxu0 %v7851_v0  ;;  %v2780_v63 = vunpack.c.l.b16 %v1404_v15 }
 0x413   : > { %4385 = vmatmul.bf16.gmra.mxu1 %v10719_v9  ;;  %4714 = vmatmul.bf16.gmra.mxu2 %v10790_v56  ;;  %v10798_v6 = vadd.f32 %v5330_v17, %v5002_v23  ;;  %v1409_v17 = vrot.slane %v1408_v16, 4  ;;  %v2197_v55 = vsel %vm8933_vm5, %v2195_v28, %v2196_v44  ;;  %v1416_v23 = vshrl.u32 %v10811_v58, 16  ;;  %v10838_v56 = vld [vmem:[%s8588_s22 + $0x1fc] sm:$0xf] }
 0x414   : > { %5043 = vmatmul.bf16.gmra.mxu3 %v8347_v7  ;;  %v1419_v16 = vshll.u32 %v10811_v58, 16  ;;  %v3032_v28 = vunpack.c.l.b16 %v2194_v27  ;;  %v3033_v44 = vunpack.c.l.b16 %v2197_v55 }
 0x415   : > { %12437 = vst [vmem:[#allocation198_spill] sm:$0xff] %v10798_v6  ;;  %5372 = vmatmul.bf16.gmra.mxu0 %v10792_v12  ;;  %v1414_v19 = vsel %vm8928_vm4, %v1409_v17, %v1413_v46  ;;  %v1418_v17 = vrot.slane %v1416_v23, 4  ;;  %v1431_v6 = vrot.slane %v1429_v41, 4 }
 0x416   : > { %v4675_v30 = vpop.f32.mrf.mxu2  ;;  %v1421_v46 = vrot.slane %v1419_v16, 5  ;;  %v10840_v27 = vpack.c.b16 %v3033_v44, %v3032_v28 }
 0x417   : > { %v4676_v53 = vadd.f32 %v4675_v30, %v4347_v14  ;;  %v5004_v61 = vpop.f32.mrf.mxu3  ;;  %v2781_v14 = vunpack.c.l.b16 %v1414_v19  ;;  %v12440_v30 = vld [vmem:[#allocation45_spill] sm:$0xff]  ;;  %v8348_v19 = vld [vmem:[%s8588_s22 + $0x1e8] sm:$0xff] }
 0x418   : > { %v4348_v32 = vpop.f32.mrf.mxu1  ;;  %12441 = vst [vmem:[#allocation45_spill] sm:$0xff] %v10840_v27  ;;  %v1422_v15 = vor.u32 %v1421_v46, %v1418_v17 }
 0x419   : > { %v5005_v52 = vadd.f32 %v5004_v61, %v4676_v53  ;;  %v4349_v53 = vadd.f32 %v4348_v32, %v12440_v30  ;;  %v1427_v61 = vrot.slane %v1425_v47, 5  ;;  %v10842_v54 = vpack.c.b16 %v2781_v14, %v2780_v63  ;;  %v10856_v63 = vld [vmem:[%s8588_s22 + $0x200] sm:$0xf] }
 0x41a   : > { %v5335_v7 = vpop.f32.mrf.mxu0  ;;  %v1435_v32 = vshll.u32 %v10838_v56, 16  ;;  %v7143_v47 = vrot.slane %v10732_v51, 9  ;;  %v1439_v30 = vshrl.u32 %v10838_v56, 16 }
 0x41b   : > { %v10834_v59 = vadd.f32 %v5333_v34, %v5005_v52  ;;  %12442 = vst [vmem:[#allocation199_spill] sm:$0xff] %v10842_v54  ;;  %v2200_v34 = vrot.slane %v10735_v29, 5  ;;  %v1432_v52 = vor.u32 %v1431_v6, %v1427_v61  ;;  %v12444_v6 = vld [vmem:[#allocation48_spill] sm:$0xff] }
 0x41c   : > { %v1437_v28 = vrot.slane %v1435_v32, 5 }
 0x41d   : > { %12439 = vst [vmem:[#allocation42_spill] sm:$0xff] %v10834_v59  ;;  %v2202_v29 = vrot.slane %v2200_v34, 4  ;;  %v1433_v0 = vrot.slane %v1432_v52, 4  ;;  %v2201_v46 = vsel %vm8933_vm5, %v7143_v47, %v2200_v34  ;;  %v1449_v52 = vshrl.u32 %v10856_v63, 16 }
 0x41e   : > { %v4677_v21 = vpop.f32.mrf.mxu2  ;;  %v3034_v32 = vunpack.c.l.b16 %v2201_v46 }
 0x41f   : > { %v4678_v9 = vadd.f32 %v4677_v21, %v4349_v53  ;;  %v5006_v5 = vpop.f32.mrf.mxu3 }
 0x420   : > { %v4351_v55 = vpop.f32.mrf.mxu1 }
 0x421   : > { %v5007_v23 = vadd.f32 %v5006_v5, %v4678_v9  ;;  %v2203_v5 = vrot.slane %v10753_v18, 5  ;;  %v1423_v9 = vrot.slane %v1422_v15, 4  ;;  %v4352_v41 = vadd.f32 %v4351_v55, %v12444_v6 }
 0x422   : > { %v5338_v16 = vpop.f32.mrf.mxu0  ;;  %v1438_v15 = vsel %vm8928_vm4, %v1433_v0, %v1437_v28  ;;  %v1441_v6 = vrot.slane %v1439_v30, 4 }
 0x423   : > { %4390 = vmatmul.bf16.gmra.mxu1 %v10757_v40  ;;  %4719 = vmatmul.bf16.gmra.mxu2 %v10840_v27  ;;  %v10848_v21 = vadd.f32 %v5335_v7, %v5007_v23  ;;  %v2204_v51 = vsel %vm8933_vm5, %v2202_v29, %v2203_v5  ;;  %v1428_v18 = vsel %vm8928_vm4, %v1423_v9, %v1427_v61  ;;  %v1445_v23 = vshll.u32 %v10856_v63, 16  ;;  %v12446_v61 = vld [vmem:[#allocation51_spill] sm:$0xff] }
 0x424   : > { %5048 = vmatmul.bf16.gmra.mxu3 %v8348_v19  ;;  %v3035_v34 = vunpack.c.l.b16 %v2204_v51  ;;  %v2782_v47 = vunpack.c.l.b16 %v1428_v18  ;;  %v2783_v29 = vunpack.c.l.b16 %v1438_v15  ;;  %v1442_v51 = vor.u32 %v1441_v6, %v1437_v28  ;;  %v10890_v6 = vld [vmem:[%s8588_s22 + $0x208] sm:$0xf] }
 0x425   : > { %12443 = vst [vmem:[#allocation200_spill] sm:$0xff] %v10848_v21  ;;  %5377 = vmatmul.bf16.gmra.mxu0 %v10842_v54  ;;  %v2205_v15 = vrot.slane %v2203_v5, 4 }
 0x426   : > { %v4680_v44 = vpop.f32.mrf.mxu2  ;;  %v10875_v59 = vpack.c.b16 %v3035_v34, %v3034_v32  ;;  %v10877_v46 = vpack.c.b16 %v2783_v29, %v2782_v47  ;;  %v1443_v28 = vrot.slane %v1442_v51, 4  ;;  %v12450_v32 = vld [vmem:[#allocation54_spill] sm:$0xff]  ;;  %v1463_v51 = vshll.u32 %v10890_v6, 16 }
 0x427   : > { %v4681_v14 = vadd.f32 %v4680_v44, %v4352_v41  ;;  %v5009_v7 = vpop.f32.mrf.mxu3  ;;  %v1447_v41 = vrot.slane %v1445_v23, 5  ;;  %v1451_v44 = vrot.slane %v1449_v52, 4  ;;  %v8349_v52 = vld [vmem:[%s8588_s22 + $0x1f4] sm:$0xff] }
 0x428   : > { %v4353_v17 = vpop.f32.mrf.mxu1  ;;  %12447 = vst [vmem:[#allocation51_spill] sm:$0xff] %v10875_v59 }
 0x429   : > { %v5010_v53 = vadd.f32 %v5009_v7, %v4681_v14  ;;  %v4354_v9 = vadd.f32 %v4353_v17, %v12446_v61  ;;  %v10873_v7 = vld [vmem:[%s8588_s22 + $0x204] sm:$0x1]  ;;  %12448 = vst [vmem:[#allocation201_spill] sm:$0xff] %v10877_v46  ;;  %v1452_v17 = vor.u32 %v1451_v44, %v1447_v41 }
 0x42a   : > { %v5340_v55 = vpop.f32.mrf.mxu0 }
 0x42b   : > { %v10869_v19 = vadd.f32 %v5338_v16, %v5010_v53  ;;  %v2206_v16 = vrot.slane %v10771_v3, 5  ;;  %v1455_v53 = vshll.u32 %v10873_v7, 16  ;;  %v1453_v47 = vrot.slane %v1452_v17, 4 }
 0x42d   : > { %12445 = vst [vmem:[#allocation48_spill] sm:$0xff] %v10869_v19  ;;  %v2208_v3 = vrot.slane %v2206_v16, 4  ;;  %v1457_v29 = vrot.slane %v1455_v53, 5  ;;  %v2207_v44 = vsel %vm8933_vm5, %v2205_v15, %v2206_v16 }
 0x42e   : > { %v4682_v14 = vpop.f32.mrf.mxu2  ;;  %v3036_v15 = vunpack.c.l.b16 %v2207_v44 }
 0x42f   : > { %v4683_v0 = vadd.f32 %v4682_v14, %v4354_v9  ;;  %v5011_v21 = vpop.f32.mrf.mxu3  ;;  %v10893_v9 = vld [vmem:[%s8588_s22 + $0x20c] sm:$0xf]  ;;  %v1458_v53 = vsel %vm8928_vm4, %v1453_v47, %v1457_v29 }
 0x430   : > { %v4356_v27 = vpop.f32.mrf.mxu1  ;;  %v1473_v16 = vshrl.u32 %v10893_v9, 16 }
 0x431   : > { %v5012_v18 = vadd.f32 %v5011_v21, %v4683_v0  ;;  %v2209_v21 = vrot.slane %v10788_v57, 5  ;;  %v4357_v34 = vadd.f32 %v4356_v27, %v12450_v32  ;;  %v1448_v57 = vsel %vm8928_vm4, %v1443_v28, %v1447_v41 }
 0x432   : > { %v5343_v30 = vpop.f32.mrf.mxu0  ;;  %v1460_v27 = vshrl.u32 %v10890_v6, 16  ;;  %v2785_v41 = vunpack.c.l.b16 %v1458_v53  ;;  %v7144_v53 = vrot.slane %v10811_v58, 9 }
 0x433   : > { %4395 = vmatmul.bf16.gmra.mxu1 %v10792_v12  ;;  %4724 = vmatmul.bf16.gmra.mxu2 %v10875_v59  ;;  %v10883_v23 = vadd.f32 %v5340_v55, %v5012_v18  ;;  %v2210_v0 = vsel %vm8933_vm5, %v2208_v3, %v2209_v21  ;;  %v2784_v21 = vunpack.c.l.b16 %v1448_v57  ;;  %v10911_v59 = vld [vmem:[%s8588_s22 + $0x210] sm:$0xf] }
 0x434   : > { %5053 = vmatmul.bf16.gmra.mxu3 %v8349_v52  ;;  %v1469_v52 = vshll.u32 %v10893_v9, 16  ;;  %v3037_v32 = vunpack.c.l.b16 %v2210_v0  ;;  %v1462_v28 = vrot.slane %v1460_v27, 4 }
 0x435   : > { %12449 = vst [vmem:[#allocation202_spill] sm:$0xff] %v10883_v23  ;;  %5382 = vmatmul.bf16.gmra.mxu0 %v10877_v46  ;;  %v10915_v0 = vpack.c.b16 %v2785_v41, %v2784_v21 }
 0x436   : > { %v4685_v61 = vpop.f32.mrf.mxu2  ;;  %v10913_v12 = vpack.c.b16 %v3037_v32, %v3036_v15  ;;  %v12456_v15 = vld [vmem:[#allocation60_spill] sm:$0xff] }
 0x437   : > { %v4686_v5 = vadd.f32 %v4685_v61, %v4357_v34  ;;  %v5014_v55 = vpop.f32.mrf.mxu3  ;;  %v1465_v34 = vrot.slane %v1463_v51, 5  ;;  %v12452_v61 = vld [vmem:[#allocation57_spill] sm:$0xff]  ;;  %12454 = vst [vmem:[#allocation203_spill] sm:$0xff] %v10915_v0 }
 0x438   : > { %v4358_v14 = vpop.f32.mrf.mxu1  ;;  %12453 = vst [vmem:[#allocation57_spill] sm:$0xff] %v10913_v12 }
 0x439   : > { %v5015_v18 = vadd.f32 %v5014_v55, %v4686_v5  ;;  %v4359_v23 = vadd.f32 %v4358_v14, %v12452_v61  ;;  %v1471_v5 = vrot.slane %v1469_v52, 5  ;;  %v1475_v55 = vrot.slane %v1473_v16, 4 }
 0x43a   : > { %v5345_v17 = vpop.f32.mrf.mxu0  ;;  %v1466_v57 = vor.u32 %v1465_v34, %v1462_v28  ;;  %v1479_v14 = vshll.u32 %v10911_v59, 16  ;;  %v2216_v52 = vrot.slane %v10838_v56, 5  ;;  %v10929_v34 = vld [vmem:[%s8588_s22 + $0x214] sm:$0xf] }
 0x43b   : > { %v10907_v3 = vadd.f32 %v5343_v30, %v5015_v18  ;;  %v2213_v30 = vrot.slane %v10814_v49, 5  ;;  %v1476_v18 = vor.u32 %v1475_v55, %v1471_v5 }
 0x43c   : > { %v1467_v16 = vrot.slane %v1466_v57, 4  ;;  %v1481_v41 = vrot.slane %v1479_v14, 5  ;;  %v1493_v14 = vshrl.u32 %v10929_v34, 16 }
 0x43d   : > { %12451 = vst [vmem:[#allocation54_spill] sm:$0xff] %v10907_v3  ;;  %v2215_v49 = vrot.slane %v2213_v30, 4  ;;  %v1477_v21 = vrot.slane %v1476_v18, 4  ;;  %v1489_v18 = vshll.u32 %v10929_v34, 16 }
 0x43e   : > { %v4687_v19 = vpop.f32.mrf.mxu2  ;;  %v1472_v56 = vsel %vm8928_vm4, %v1467_v16, %v1471_v5  ;;  %v12458_v5 = vld [vmem:[#allocation63_spill] sm:$0xff] }
 0x43f   : > { %v4688_v47 = vadd.f32 %v4687_v19, %v4359_v23  ;;  %v5016_v29 = vpop.f32.mrf.mxu3  ;;  %v8350_v23 = vld [vmem:[%s8588_s22 + $0x1fc] sm:$0xff]  ;;  %v2217_v58 = vsel %vm8933_vm5, %v2215_v49, %v2216_v52  ;;  %v2786_v49 = vunpack.c.l.b16 %v1472_v56 }
 0x440   : > { %v4361_v44 = vpop.f32.mrf.mxu1 }
 0x441   : > { %v5017_v27 = vadd.f32 %v5016_v29, %v4688_v47  ;;  %v4362_v32 = vadd.f32 %v4361_v44, %v12456_v15  ;;  %v2214_v47 = vsel %vm8933_vm5, %v7144_v53, %v2213_v30  ;;  %v1483_v29 = vshrl.u32 %v10911_v59, 16 }
 0x442   : > { %v5348_v51 = vpop.f32.mrf.mxu0  ;;  %v3039_v30 = vunpack.c.l.b16 %v2217_v58 }
 0x443   : > { %4400 = vmatmul.bf16.gmra.mxu1 %v10842_v54  ;;  %4729 = vmatmul.bf16.gmra.mxu2 %v10913_v12  ;;  %v10921_v19 = vadd.f32 %v5345_v17, %v5017_v27  ;;  %v1482_v27 = vsel %vm8928_vm4, %v1477_v21, %v1481_v41 }
 0x444   : > { %5058 = vmatmul.bf16.gmra.mxu3 %v8350_v23  ;;  %v3038_v23 = vunpack.c.l.b16 %v2214_v47  ;;  %v2787_v15 = vunpack.c.l.b16 %v1482_v27  ;;  %v2218_v27 = vrot.slane %v2216_v52, 4 }
 0x445   : > { %12455 = vst [vmem:[#allocation204_spill] sm:$0xff] %v10921_v19  ;;  %5387 = vmatmul.bf16.gmra.mxu0 %v10915_v0  ;;  %v1495_v19 = vrot.slane %v1493_v14, 4  ;;  %v8351_v14 = vld [vmem:[%s8588_s22 + $0x208] sm:$0xff] }
 0x446   : > { %v4690_v28 = vpop.f32.mrf.mxu2  ;;  %v10948_v12 = vpack.c.b16 %v3039_v30, %v3038_v23  ;;  %v10950_v47 = vpack.c.b16 %v2787_v15, %v2786_v49  ;;  %v12462_v23 = vld [vmem:[#allocation68_spill] sm:$0xff] }
 0x447   : > { %v4691_v61 = vadd.f32 %v4690_v28, %v4362_v32  ;;  %v5019_v17 = vpop.f32.mrf.mxu3  ;;  %v1485_v32 = vrot.slane %v1483_v29, 4  ;;  %v1491_v28 = vrot.slane %v1489_v18, 5  ;;  %v10963_v15 = vld [vmem:[%s8588_s22 + $0x21c] sm:$0xf] }
 0x448   : > { %v4363_v55 = vpop.f32.mrf.mxu1  ;;  %12459 = vst [vmem:[#allocation63_spill] sm:$0xff] %v10948_v12 }
 0x449   : > { %v5020_v44 = vadd.f32 %v5019_v17, %v4691_v61  ;;  %v4364_v16 = vadd.f32 %v4363_v55, %v12458_v5  ;;  %v10946_v17 = vld [vmem:[%s8588_s22 + $0x218] sm:$0x1]  ;;  %12460 = vst [vmem:[#allocation205_spill] sm:$0xff] %v10950_v47  ;;  %v1486_v58 = vor.u32 %v1485_v32, %v1481_v41  ;;  %v1496_v55 = vor.u32 %v1495_v19, %v1491_v28  ;;  %v10966_v5 = vld [vmem:[%s8588_s22 + $0x220] sm:$0xf] }
 0x44a   : > { %v5350_v57 = vpop.f32.mrf.mxu0 }
 0x44b   : > { %v10942_v53 = vadd.f32 %v5348_v51, %v5020_v44  ;;  %v2219_v51 = vrot.slane %v10856_v63, 5  ;;  %v1499_v44 = vshll.u32 %v10946_v17, 16  ;;  %v1487_v41 = vrot.slane %v1486_v58, 4 }
 0x44c   : > { %v1497_v30 = vrot.slane %v1496_v55, 4  ;;  %v1507_v58 = vshll.u32 %v10963_v15, 16 }
 0x44d   : > { %12457 = vst [vmem:[#allocation60_spill] sm:$0xff] %v10942_v53  ;;  %v2221_v63 = vrot.slane %v2219_v51, 4  ;;  %v1501_v49 = vrot.slane %v1499_v44, 5 }
 0x44e   : > { %v4692_v61 = vpop.f32.mrf.mxu2 }
 0x44f   : > { %v4693_v21 = vadd.f32 %v4692_v61, %v4364_v16  ;;  %v5021_v3 = vpop.f32.mrf.mxu3  ;;  %v2220_v16 = vsel %vm8933_vm5, %v2218_v27, %v2219_v51  ;;  %v1502_v44 = vsel %vm8928_vm4, %v1497_v30, %v1501_v49  ;;  %v1517_v51 = vshrl.u32 %v10966_v5, 16 }
 0x450   : > { %v4366_v54 = vpop.f32.mrf.mxu1  ;;  %v3040_v27 = vunpack.c.l.b16 %v2220_v16 }
 0x451   : > { %v5022_v56 = vadd.f32 %v5021_v3, %v4693_v21  ;;  %v2222_v3 = vrot.slane %v10873_v7, 5  ;;  %v4367_v19 = vadd.f32 %v4366_v54, %v12462_v23  ;;  %v1492_v7 = vsel %vm8928_vm4, %v1487_v41, %v1491_v28 }
 0x452   : > { %v5353_v29 = vpop.f32.mrf.mxu0  ;;  %v1504_v54 = vshrl.u32 %v10963_v15, 16  ;;  %v2789_v28 = vunpack.c.l.b16 %v1502_v44  ;;  %v7145_v44 = vrot.slane %v10890_v6, 9 }
 0x453   : > { %4405 = vmatmul.bf16.gmra.mxu1 %v10877_v46  ;;  %4734 = vmatmul.bf16.gmra.mxu2 %v10948_v12  ;;  %v10956_v18 = vadd.f32 %v5350_v57, %v5022_v56  ;;  %v2223_v21 = vsel %vm8933_vm5, %v2221_v63, %v2222_v3  ;;  %v2788_v3 = vunpack.c.l.b16 %v1492_v7  ;;  %v10984_v12 = vld [vmem:[%s8588_s22 + $0x224] sm:$0xf] }
 0x454   : > { %5063 = vmatmul.bf16.gmra.mxu3 %v8351_v14  ;;  %v1513_v14 = vshll.u32 %v10966_v5, 16  ;;  %v3041_v23 = vunpack.c.l.b16 %v2223_v21  ;;  %v1506_v41 = vrot.slane %v1504_v54, 4 }
 0x455   : > { %12461 = vst [vmem:[#allocation206_spill] sm:$0xff] %v10956_v18  ;;  %5392 = vmatmul.bf16.gmra.mxu0 %v10950_v47  ;;  %v10988_v21 = vpack.c.b16 %v2789_v28, %v2788_v3 }
 0x456   : > { %v4695_v32 = vpop.f32.mrf.mxu2  ;;  %v10986_v46 = vpack.c.b16 %v3041_v23, %v3040_v27  ;;  %v12468_v27 = vld [vmem:[#allocation76_spill] sm:$0xff] }
 0x457   : > { %v4696_v52 = vadd.f32 %v4695_v32, %v4367_v19  ;;  %v5024_v57 = vpop.f32.mrf.mxu3  ;;  %v1509_v19 = vrot.slane %v1507_v58, 5  ;;  %v12464_v32 = vld [vmem:[#allocation71_spill] sm:$0xff]  ;;  %12466 = vst [vmem:[#allocation207_spill] sm:$0xff] %v10988_v21 }
 0x458   : > { %v4368_v61 = vpop.f32.mrf.mxu1  ;;  %12465 = vst [vmem:[#allocation71_spill] sm:$0xff] %v10986_v46 }
 0x459   : > { %v5025_v56 = vadd.f32 %v5024_v57, %v4696_v52  ;;  %v4369_v18 = vadd.f32 %v4368_v61, %v12464_v32  ;;  %v1515_v52 = vrot.slane %v1513_v14, 5  ;;  %v1519_v57 = vrot.slane %v1517_v51, 4 }
 0x45a   : > { %v5355_v55 = vpop.f32.mrf.mxu0  ;;  %v1510_v7 = vor.u32 %v1509_v19, %v1506_v41  ;;  %v1523_v61 = vshll.u32 %v10984_v12, 16  ;;  %v2229_v14 = vrot.slane %v10911_v59, 5  ;;  %v11002_v19 = vld [vmem:[%s8588_s22 + $0x228] sm:$0xf] }
 0x45b   : > { %v10980_v63 = vadd.f32 %v5353_v29, %v5025_v56  ;;  %v2226_v29 = vrot.slane %v10893_v9, 5  ;;  %v1520_v56 = vor.u32 %v1519_v57, %v1515_v52 }
 0x45c   : > { %v1511_v51 = vrot.slane %v1510_v7, 4  ;;  %v1525_v28 = vrot.slane %v1523_v61, 5  ;;  %v1537_v61 = vshrl.u32 %v11002_v19, 16 }
 0x45d   : > { %12463 = vst [vmem:[#allocation68_spill] sm:$0xff] %v10980_v63  ;;  %v2228_v9 = vrot.slane %v2226_v29, 4  ;;  %v1521_v3 = vrot.slane %v1520_v56, 4  ;;  %v1533_v56 = vshll.u32 %v11002_v19, 16 }
 0x45e   : > { %v4697_v53 = vpop.f32.mrf.mxu2  ;;  %v1516_v59 = vsel %vm8928_vm4, %v1511_v51, %v1515_v52  ;;  %v12470_v52 = vld [vmem:[#allocation79_spill] sm:$0xff] }
 0x45f   : > { %v4698_v30 = vadd.f32 %v4697_v53, %v4369_v18  ;;  %v5026_v49 = vpop.f32.mrf.mxu3  ;;  %v8352_v18 = vld [vmem:[%s8588_s22 + $0x210] sm:$0xff]  ;;  %v2230_v6 = vsel %vm8933_vm5, %v2228_v9, %v2229_v14  ;;  %v2790_v9 = vunpack.c.l.b16 %v1516_v59 }
 0x460   : > { %v4371_v16 = vpop.f32.mrf.mxu1 }
 0x461   : > { %v5027_v54 = vadd.f32 %v5026_v49, %v4698_v30  ;;  %v4372_v23 = vadd.f32 %v4371_v16, %v12468_v27  ;;  %v2227_v30 = vsel %vm8933_vm5, %v7145_v44, %v2226_v29  ;;  %v1527_v49 = vshrl.u32 %v10984_v12, 16 }
 0x462   : > { %v5358_v58 = vpop.f32.mrf.mxu0  ;;  %v3043_v29 = vunpack.c.l.b16 %v2230_v6 }
 0x463   : > { %4410 = vmatmul.bf16.gmra.mxu1 %v10915_v0  ;;  %4739 = vmatmul.bf16.gmra.mxu2 %v10986_v46  ;;  %v10994_v53 = vadd.f32 %v5355_v55, %v5027_v54  ;;  %v1526_v54 = vsel %vm8928_vm4, %v1521_v3, %v1525_v28 }
 0x464   : > { %5068 = vmatmul.bf16.gmra.mxu3 %v8352_v18  ;;  %v3042_v18 = vunpack.c.l.b16 %v2227_v30  ;;  %v2791_v27 = vunpack.c.l.b16 %v1526_v54  ;;  %v2231_v54 = vrot.slane %v2229_v14, 4 }
 0x465   : > { %12467 = vst [vmem:[#allocation208_spill] sm:$0xff] %v10994_v53  ;;  %5397 = vmatmul.bf16.gmra.mxu0 %v10988_v21  ;;  %v1539_v53 = vrot.slane %v1537_v61, 4  ;;  %v8353_v61 = vld [vmem:[%s8588_s22 + $0x21c] sm:$0xff] }
 0x466   : > { %v4700_v41 = vpop.f32.mrf.mxu2  ;;  %v11021_v46 = vpack.c.b16 %v3043_v29, %v3042_v18  ;;  %v11023_v30 = vpack.c.b16 %v2791_v27, %v2790_v9  ;;  %v12474_v18 = vld [vmem:[#allocation84_spill] sm:$0xff]  ;;  %v11036_v27 = vld [vmem:[%s8588_s22 + $0x230] sm:$0xf] }
 0x467   : > { %v4701_v32 = vadd.f32 %v4700_v41, %v4372_v23  ;;  %v5029_v55 = vpop.f32.mrf.mxu3  ;;  %v1529_v23 = vrot.slane %v1527_v49, 4  ;;  %v1535_v41 = vrot.slane %v1533_v56, 5 }
 0x468   : > { %v4373_v57 = vpop.f32.mrf.mxu1  ;;  %12471 = vst [vmem:[#allocation79_spill] sm:$0xff] %v11021_v46 }
 0x469   : > { %v5030_v16 = vadd.f32 %v5029_v55, %v4701_v32  ;;  %v4374_v51 = vadd.f32 %v4373_v57, %v12470_v52  ;;  %v11019_v55 = vld [vmem:[%s8588_s22 + $0x22c] sm:$0x1]  ;;  %12472 = vst [vmem:[#allocation209_spill] sm:$0xff] %v11023_v30  ;;  %v1530_v6 = vor.u32 %v1529_v23, %v1525_v28  ;;  %v1540_v57 = vor.u32 %v1539_v53, %v1535_v41  ;;  %v11039_v52 = vld [vmem:[%s8588_s22 + $0x234] sm:$0xf] }
 0x46a   : > { %v5360_v7 = vpop.f32.mrf.mxu0 }
 0x46b   : > { %v11015_v44 = vadd.f32 %v5358_v58, %v5030_v16  ;;  %v2232_v58 = vrot.slane %v10929_v34, 5  ;;  %v1543_v16 = vshll.u32 %v11019_v55, 16  ;;  %v1531_v28 = vrot.slane %v1530_v6, 4 }
 0x46c   : > { %v1541_v29 = vrot.slane %v1540_v57, 4  ;;  %v1551_v6 = vshll.u32 %v11036_v27, 16 }
 0x46d   : > { %12469 = vst [vmem:[#allocation76_spill] sm:$0xff] %v11015_v44  ;;  %v2234_v34 = vrot.slane %v2232_v58, 4  ;;  %v1545_v9 = vrot.slane %v1543_v16, 5 }
 0x46e   : > { %v4702_v32 = vpop.f32.mrf.mxu2 }
 0x46f   : > { %v4703_v3 = vadd.f32 %v4702_v32, %v4374_v51  ;;  %v5031_v63 = vpop.f32.mrf.mxu3  ;;  %v2233_v51 = vsel %vm8933_vm5, %v2231_v54, %v2232_v58  ;;  %v1546_v16 = vsel %vm8928_vm4, %v1541_v29, %v1545_v9  ;;  %v1561_v58 = vshrl.u32 %v11039_v52, 16 }
 0x470   : > { %v4376_v0 = vpop.f32.mrf.mxu1  ;;  %v3044_v54 = vunpack.c.l.b16 %v2233_v51 }
 0x471   : > { %v5032_v59 = vadd.f32 %v5031_v63, %v4703_v3  ;;  %v2235_v63 = vrot.slane %v10946_v17, 5  ;;  %v4377_v53 = vadd.f32 %v4376_v0, %v12474_v18  ;;  %v1536_v17 = vsel %vm8928_vm4, %v1531_v28, %v1535_v41 }
 0x472   : > { %v5363_v49 = vpop.f32.mrf.mxu0  ;;  %v1548_v0 = vshrl.u32 %v11036_v27, 16  ;;  %v2793_v41 = vunpack.c.l.b16 %v1546_v16  ;;  %v7146_v16 = vrot.slane %v10963_v15, 9 }
 0x473   : > { %4415 = vmatmul.bf16.gmra.mxu1 %v10950_v47  ;;  %4744 = vmatmul.bf16.gmra.mxu2 %v11021_v46  ;;  %v11029_v56 = vadd.f32 %v5360_v7, %v5032_v59  ;;  %v2236_v3 = vsel %vm8933_vm5, %v2234_v34, %v2235_v63  ;;  %v2792_v63 = vunpack.c.l.b16 %v1536_v17  ;;  %v11057_v46 = vld [vmem:[%s8588_s22 + $0x238] sm:$0xf] }
 0x474   : > { %5073 = vmatmul.bf16.gmra.mxu3 %v8353_v61  ;;  %v1557_v61 = vshll.u32 %v11039_v52, 16  ;;  %v3045_v18 = vunpack.c.l.b16 %v2236_v3  ;;  %v1550_v28 = vrot.slane %v1548_v0, 4 }
 0x475   : > { %12473 = vst [vmem:[#allocation210_spill] sm:$0xff] %v11029_v56  ;;  %5402 = vmatmul.bf16.gmra.mxu0 %v11023_v30  ;;  %v11061_v3 = vpack.c.b16 %v2793_v41, %v2792_v63 }
 0x476   : > { %v4705_v23 = vpop.f32.mrf.mxu2  ;;  %v11059_v47 = vpack.c.b16 %v3045_v18, %v3044_v54  ;;  %v12479_v54 = vld [vmem:[#allocation92_spill] sm:$0xff] }
 0x477   : > { %v4706_v14 = vadd.f32 %v4705_v23, %v4377_v53  ;;  %v5034_v7 = vpop.f32.mrf.mxu3  ;;  %v1553_v53 = vrot.slane %v1551_v6, 5  ;;  %v12476_v23 = vld [vmem:[#allocation87_spill] sm:$0xff] }
 0x478   : > { %v4378_v32 = vpop.f32.mrf.mxu1  ;;  %12477 = vst [vmem:[#allocation87_spill] sm:$0xff] %v11059_v47 }
 0x479   : > { %v5035_v59 = vadd.f32 %v5034_v7, %v4706_v14  ;;  %v4379_v56 = vadd.f32 %v4378_v32, %v12476_v23  ;;  %v1559_v14 = vrot.slane %v1557_v61, 5  ;;  %v1563_v7 = vrot.slane %v1561_v58, 4 }
 0x47a   : > { %v5365_v57 = vpop.f32.mrf.mxu0  ;;  %v1554_v17 = vor.u32 %v1553_v53, %v1550_v28  ;;  %v1567_v32 = vshll.u32 %v11057_v46, 16  ;;  %v2242_v61 = vrot.slane %v10984_v12, 5  ;;  %v11075_v53 = vld [vmem:[%s8588_s22 + $0x23c] sm:$0xf] }
 0x47b   : > { %v11053_v34 = vadd.f32 %v5363_v49, %v5035_v59  ;;  %v2239_v49 = vrot.slane %v10966_v5, 5  ;;  %v1564_v59 = vor.u32 %v1563_v7, %v1559_v14 }
 0x47c   : > { %v1555_v58 = vrot.slane %v1554_v17, 4  ;;  %v1569_v41 = vrot.slane %v1567_v32, 5  ;;  %v1581_v32 = vshrl.u32 %v11075_v53, 16 }
 0x47d   : > { %12475 = vst [vmem:[#allocation84_spill] sm:$0xff] %v11053_v34  ;;  %v2241_v5 = vrot.slane %v2239_v49, 4  ;;  %v1565_v63 = vrot.slane %v1564_v59, 4  ;;  %v1577_v59 = vshll.u32 %v11075_v53, 16 }
 0x47e   : > { %v4707_v44 = vpop.f32.mrf.mxu2  ;;  %v1560_v12 = vsel %vm8928_vm4, %v1555_v58, %v1559_v14  ;;  %v12481_v14 = vld [vmem:[#allocation96_spill] sm:$0xff] }
 0x47f   : > { %v4708_v29 = vadd.f32 %v4707_v44, %v4379_v56  ;;  %v5036_v9 = vpop.f32.mrf.mxu3  ;;  %v8354_v56 = vld [vmem:[%s8588_s22 + $0x224] sm:$0xff]  ;;  %v2243_v15 = vsel %vm8933_vm5, %v2241_v5, %v2242_v61  ;;  %v2794_v5 = vunpack.c.l.b16 %v1560_v12 }
 0x480   : > { %v4381_v51 = vpop.f32.mrf.mxu1 }
 0x481   : > { %v5037_v0 = vadd.f32 %v5036_v9, %v4708_v29  ;;  %v4382_v18 = vadd.f32 %v4381_v51, %v12479_v54  ;;  %v2240_v29 = vsel %vm8933_vm5, %v7146_v16, %v2239_v49  ;;  %v1571_v9 = vshrl.u32 %v11057_v46, 16 }
 0x482   : > { %v5368_v6 = vpop.f32.mrf.mxu0  ;;  %v3047_v49 = vunpack.c.l.b16 %v2243_v15 }
 0x483   : > { %4420 = vmatmul.bf16.gmra.mxu1 %v10988_v21  ;;  %4749 = vmatmul.bf16.gmra.mxu2 %v11059_v47  ;;  %v11067_v44 = vadd.f32 %v5365_v57, %v5037_v0  ;;  %v1570_v0 = vsel %vm8928_vm4, %v1565_v63, %v1569_v41 }
 0x484   : > { %5078 = vmatmul.bf16.gmra.mxu3 %v8354_v56  ;;  %v3046_v56 = vunpack.c.l.b16 %v2240_v29  ;;  %v2795_v54 = vunpack.c.l.b16 %v1570_v0  ;;  %v2244_v0 = vrot.slane %v2242_v61, 4  ;;  %v12485_v61 = vld [vmem:[#allocation102_spill] sm:$0xff] }
 0x485   : > { %12478 = vst [vmem:[#allocation211_spill] sm:$0xff] %v11067_v44  ;;  %5407 = vmatmul.bf16.gmra.mxu0 %v11061_v3  ;;  %v1583_v44 = vrot.slane %v1581_v32, 4  ;;  %v8355_v32 = vld [vmem:[%s8588_s22 + $0x230] sm:$0xff] }
 0x486   : > { %v4710_v28 = vpop.f32.mrf.mxu2  ;;  %v11094_v47 = vpack.c.b16 %v3047_v49, %v3046_v56  ;;  %v11096_v29 = vpack.c.b16 %v2795_v54, %v2794_v5  ;;  %v7842_v56 = vld [vmem:[%s12000_s1 + $0x1c0] sm:$0xff] }
 0x487   : > { %v4711_v23 = vadd.f32 %v4710_v28, %v4382_v18  ;;  %v5039_v57 = vpop.f32.mrf.mxu3  ;;  %v1573_v18 = vrot.slane %v1571_v9, 4  ;;  %v1579_v28 = vrot.slane %v1577_v59, 5  ;;  %v11115_v54 = vld [vmem:[%s8588_s22 + $0x244] sm:$0xf]  ;;  %6128 = vmatpush.bf16.msra.mxu3 %v7842_v56 }
 0x488   : > { %v4383_v7 = vpop.f32.mrf.mxu1  ;;  %12482 = vst [vmem:[#allocation96_spill] sm:$0xff] %v11094_v47 }
 0x489   : > { %v5040_v51 = vadd.f32 %v5039_v57, %v4711_v23  ;;  %v4384_v58 = vadd.f32 %v4383_v7, %v12481_v14  ;;  %v11092_v57 = vld [vmem:[%s8588_s22 + $0x240] sm:$0x1]  ;;  %12483 = vst [vmem:[#allocation212_spill] sm:$0xff] %v11096_v29  ;;  %v1574_v15 = vor.u32 %v1573_v18, %v1569_v41  ;;  %v11118_v14 = vld [vmem:[%s8588_s22 + $0x248] sm:$0xf] }
 0x48a   : > { %v5370_v17 = vpop.f32.mrf.mxu0  ;;  %v1587_v7 = vshll.u32 %v11092_v57, 16  ;;  %v1601_v56 = vshll.u32 %v11118_v14, 16 }
 0x48b   : > { %v11088_v16 = vadd.f32 %v5368_v6, %v5040_v51  ;;  %v2245_v6 = vrot.slane %v11002_v19, 5  ;;  %v1584_v51 = vor.u32 %v1583_v44, %v1579_v28  ;;  %v1575_v41 = vrot.slane %v1574_v15, 4  ;;  %v7834_v44 = vld [vmem:[%s12000_s1 + $0x180] sm:$0xff] }
 0x48c   : > { %v1589_v5 = vrot.slane %v1587_v7, 5  ;;  %5799 = vmatpush.bf16.msra.mxu2 %v7834_v44 }
 0x48d   : > { %12480 = vst [vmem:[#allocation92_spill] sm:$0xff] %v11088_v16  ;;  %v2247_v19 = vrot.slane %v2245_v6, 4 }
 0x48e   : > { %v4712_v23 = vpop.f32.mrf.mxu2 }
 0x48f   : > { %v4713_v63 = vadd.f32 %v4712_v23, %v4384_v58  ;;  %v5041_v34 = vpop.f32.mrf.mxu3  ;;  %v2246_v23 = vsel %vm8933_vm5, %v2244_v0, %v2245_v6  ;;  %v1605_v6 = vshrl.u32 %v11118_v14, 16  ;;  %v7826_v0 = vld [vmem:[%s12000_s1 + $0x140] sm:$0xff] }
 0x490   : > { %v4386_v21 = vpop.f32.mrf.mxu1  ;;  %5470 = vmatpush.bf16.msra.mxu1 %v7826_v0 }
 0x491   : > { %v5042_v12 = vadd.f32 %v5041_v34, %v4713_v63  ;;  %v2248_v34 = vrot.slane %v11019_v55, 5  ;;  %v4387_v49 = vadd.f32 %v4386_v21, %v12485_v61  ;;  %v1580_v21 = vsel %vm8928_vm4, %v1575_v41, %v1579_v28  ;;  %v7850_v28 = vld [vmem:[%s12000_s1 + $0x200] sm:$0xff] }
 0x492   : > { %v5373_v9 = vpop.f32.mrf.mxu0  ;;  %6457 = vmatpush.bf16.msra.mxu0 %v7850_v28  ;;  %v2796_v61 = vunpack.c.l.b16 %v1580_v21 }
 0x493   : > { %4425 = vmatmul.bf16.gmra.mxu1 %v11023_v30  ;;  %4754 = vmatmul.bf16.gmra.mxu2 %v11094_v47  ;;  %v11102_v59 = vadd.f32 %v5370_v17, %v5042_v12  ;;  %v1585_v17 = vrot.slane %v1584_v51, 4  ;;  %v2249_v15 = vsel %vm8933_vm5, %v2247_v19, %v2248_v34  ;;  %v1592_v12 = vshrl.u32 %v11115_v54, 16  ;;  %v11142_v47 = vld [vmem:[%s8588_s22 + $0x24c] sm:$0xf] }
 0x494   : > { %5083 = vmatmul.bf16.gmra.mxu3 %v8355_v32  ;;  %v1595_v51 = vshll.u32 %v11115_v54, 16  ;;  %v3048_v19 = vunpack.c.l.b16 %v2246_v23  ;;  %v3049_v34 = vunpack.c.l.b16 %v2249_v15 }
 0x495   : > { %12484 = vst [vmem:[#allocation213_spill] sm:$0xff] %v11102_v59  ;;  %5412 = vmatmul.bf16.gmra.mxu0 %v11096_v29  ;;  %v1590_v44 = vsel %vm8928_vm4, %v1585_v17, %v1589_v5  ;;  %v1594_v17 = vrot.slane %v1592_v12, 4  ;;  %v1607_v59 = vrot.slane %v1605_v6, 4 }
 0x496   : > { %v4715_v18 = vpop.f32.mrf.mxu2  ;;  %v1597_v5 = vrot.slane %v1595_v51, 5  ;;  %v11144_v23 = vpack.c.b16 %v3049_v34, %v3048_v19 }
 0x497   : > { %v4716_v55 = vadd.f32 %v4715_v18, %v4387_v49  ;;  %v5044_v58 = vpop.f32.mrf.mxu3  ;;  %v2797_v49 = vunpack.c.l.b16 %v1590_v44  ;;  %v12487_v18 = vld [vmem:[#allocation106_spill] sm:$0xff]  ;;  %v8356_v44 = vld [vmem:[%s8588_s22 + $0x238] sm:$0xff] }
 0x498   : > { %v4388_v63 = vpop.f32.mrf.mxu1  ;;  %12488 = vst [vmem:[#allocation106_spill] sm:$0xff] %v11144_v23  ;;  %v1598_v21 = vor.u32 %v1597_v5, %v1594_v17 }
 0x499   : > { %v5045_v7 = vadd.f32 %v5044_v58, %v4716_v55  ;;  %v4389_v55 = vadd.f32 %v4388_v63, %v12487_v18  ;;  %v1603_v58 = vrot.slane %v1601_v56, 5  ;;  %v11146_v0 = vpack.c.b16 %v2797_v49, %v2796_v61  ;;  %v11160_v61 = vld [vmem:[%s8588_s22 + $0x250] sm:$0xf] }
 0x49a   : > { %v5375_v32 = vpop.f32.mrf.mxu0  ;;  %v1611_v63 = vshll.u32 %v11142_v47, 16  ;;  %v7147_v56 = vrot.slane %v11036_v27, 9  ;;  %v1615_v18 = vshrl.u32 %v11142_v47, 16 }
 0x49b   : > { %v11138_v41 = vadd.f32 %v5373_v9, %v5045_v7  ;;  %12489 = vst [vmem:[#allocation214_spill] sm:$0xff] %v11146_v0  ;;  %v2252_v9 = vrot.slane %v11039_v52, 5  ;;  %v1608_v7 = vor.u32 %v1607_v59, %v1603_v58  ;;  %v12491_v59 = vld [vmem:[#allocation111_spill] sm:$0xff] }
 0x49c   : > { %v1613_v19 = vrot.slane %v1611_v63, 5 }
 0x49d   : > { %12486 = vst [vmem:[#allocation102_spill] sm:$0xff] %v11138_v41  ;;  %v2254_v52 = vrot.slane %v2252_v9, 4  ;;  %v1609_v28 = vrot.slane %v1608_v7, 4  ;;  %v2253_v5 = vsel %vm8933_vm5, %v7147_v56, %v2252_v9  ;;  %v1625_v7 = vshrl.u32 %v11160_v61, 16 }
 0x49e   : > { %v4717_v16 = vpop.f32.mrf.mxu2  ;;  %v3050_v63 = vunpack.c.l.b16 %v2253_v5 }
 0x49f   : > { %v4718_v30 = vadd.f32 %v4717_v16, %v4389_v55  ;;  %v5046_v40 = vpop.f32.mrf.mxu3 }
 0x4a0   : > { %v4391_v15 = vpop.f32.mrf.mxu1 }
 0x4a1   : > { %v5047_v12 = vadd.f32 %v5046_v40, %v4718_v30  ;;  %v2255_v40 = vrot.slane %v11057_v46, 5  ;;  %v1599_v30 = vrot.slane %v1598_v21, 4  ;;  %v4392_v6 = vadd.f32 %v4391_v15, %v12491_v59 }
 0x4a2   : > { %v5378_v51 = vpop.f32.mrf.mxu0  ;;  %v1614_v21 = vsel %vm8928_vm4, %v1609_v28, %v1613_v19  ;;  %v1617_v59 = vrot.slane %v1615_v18, 4 }
 0x4a3   : > { %4430 = vmatmul.bf16.gmra.mxu1 %v11061_v3  ;;  %4759 = vmatmul.bf16.gmra.mxu2 %v11144_v23  ;;  %v11152_v16 = vadd.f32 %v5375_v32, %v5047_v12  ;;  %v2256_v27 = vsel %vm8933_vm5, %v2254_v52, %v2255_v40  ;;  %v1604_v46 = vsel %vm8928_vm4, %v1599_v30, %v1603_v58  ;;  %v1621_v12 = vshll.u32 %v11160_v61, 16  ;;  %v12493_v58 = vld [vmem:[#allocation115_spill] sm:$0xff] }
 0x4a4   : > { %5088 = vmatmul.bf16.gmra.mxu3 %v8356_v44  ;;  %v3051_v9 = vunpack.c.l.b16 %v2256_v27  ;;  %v2798_v56 = vunpack.c.l.b16 %v1604_v46  ;;  %v2799_v52 = vunpack.c.l.b16 %v1614_v21  ;;  %v1618_v27 = vor.u32 %v1617_v59, %v1613_v19  ;;  %v11194_v59 = vld [vmem:[%s8588_s22 + $0x258] sm:$0xf] }
 0x4a5   : > { %12490 = vst [vmem:[#allocation215_spill] sm:$0xff] %v11152_v16  ;;  %5417 = vmatmul.bf16.gmra.mxu0 %v11146_v0  ;;  %v2257_v21 = vrot.slane %v2255_v40, 4 }
 0x4a6   : > { %v4720_v34 = vpop.f32.mrf.mxu2  ;;  %v11179_v41 = vpack.c.b16 %v3051_v9, %v3050_v63  ;;  %v11181_v5 = vpack.c.b16 %v2799_v52, %v2798_v56  ;;  %v1619_v19 = vrot.slane %v1618_v27, 4  ;;  %v12497_v63 = vld [vmem:[#allocation7_spill] sm:$0xff]  ;;  %v1639_v27 = vshll.u32 %v11194_v59, 16 }
 0x4a7   : > { %v4721_v49 = vadd.f32 %v4720_v34, %v4392_v6  ;;  %v5049_v32 = vpop.f32.mrf.mxu3  ;;  %v1623_v6 = vrot.slane %v1621_v12, 5  ;;  %v1627_v34 = vrot.slane %v1625_v7, 4  ;;  %v8357_v7 = vld [vmem:[%s8588_s22 + $0x244] sm:$0xff] }
 0x4a8   : > { %v4393_v17 = vpop.f32.mrf.mxu1  ;;  %12494 = vst [vmem:[#allocation115_spill] sm:$0xff] %v11179_v41 }
 0x4a9   : > { %v5050_v55 = vadd.f32 %v5049_v32, %v4721_v49  ;;  %v4394_v30 = vadd.f32 %v4393_v17, %v12493_v58  ;;  %v11177_v32 = vld [vmem:[%s8588_s22 + $0x254] sm:$0x1]  ;;  %12495 = vst [vmem:[#allocation216_spill] sm:$0xff] %v11181_v5  ;;  %v1628_v17 = vor.u32 %v1627_v34, %v1623_v6 }
 0x4aa   : > { %v5380_v15 = vpop.f32.mrf.mxu0 }
 0x4ab   : > { %v11173_v44 = vadd.f32 %v5378_v51, %v5050_v55  ;;  %v2258_v51 = vrot.slane %v11075_v53, 5  ;;  %v1631_v55 = vshll.u32 %v11177_v32, 16  ;;  %v1629_v56 = vrot.slane %v1628_v17, 4 }
 0x4ad   : > { %12492 = vst [vmem:[#allocation111_spill] sm:$0xff] %v11173_v44  ;;  %v2260_v53 = vrot.slane %v2258_v51, 4  ;;  %v1633_v52 = vrot.slane %v1631_v55, 5  ;;  %v2259_v34 = vsel %vm8933_vm5, %v2257_v21, %v2258_v51 }
 0x4ae   : > { %v4722_v49 = vpop.f32.mrf.mxu2  ;;  %v3052_v21 = vunpack.c.l.b16 %v2259_v34  ;;  %v2265_v34 = vrot.slane %v11118_v14, 5 }
 0x4af   : > { %v4723_v28 = vadd.f32 %v4722_v49, %v4394_v30  ;;  %v5051_v16 = vpop.f32.mrf.mxu3  ;;  %v11197_v30 = vld [vmem:[%s8588_s22 + $0x25c] sm:$0xf]  ;;  %v1634_v55 = vsel %vm8928_vm4, %v1629_v56, %v1633_v52 }
 0x4b0   : > { %v4396_v23 = vpop.f32.mrf.mxu1  ;;  %v1649_v51 = vshrl.u32 %v11197_v30, 16 }
 0x4b1   : > { %v5052_v46 = vadd.f32 %v5051_v16, %v4723_v28  ;;  %v2261_v16 = vrot.slane %v11092_v57, 5  ;;  %v4397_v9 = vadd.f32 %v4396_v23, %v12497_v63  ;;  %v1624_v57 = vsel %vm8928_vm4, %v1619_v19, %v1623_v6 }
 0x4b2   : > { %v5383_v18 = vpop.f32.mrf.mxu0  ;;  %v1636_v23 = vshrl.u32 %v11194_v59, 16  ;;  %v2801_v6 = vunpack.c.l.b16 %v1634_v55  ;;  %v2268_v55 = vrot.slane %v11142_v47, 5 }
 0x4b3   : > { %4435 = vmatmul.bf16.gmra.mxu1 %v11096_v29  ;;  %4764 = vmatmul.bf16.gmra.mxu2 %v11179_v41  ;;  %v11187_v12 = vadd.f32 %v5380_v15, %v5052_v46  ;;  %v2262_v28 = vsel %vm8933_vm5, %v2260_v53, %v2261_v16  ;;  %v2800_v16 = vunpack.c.l.b16 %v1624_v57  ;;  %v11215_v41 = vld [vmem:[%s8588_s22 + $0x260] sm:$0xf] }
 0x4b4   : > { %5093 = vmatmul.bf16.gmra.mxu3 %v8357_v7  ;;  %v1645_v7 = vshll.u32 %v11197_v30, 16  ;;  %v3053_v63 = vunpack.c.l.b16 %v2262_v28  ;;  %v1638_v19 = vrot.slane %v1636_v23, 4 }
 0x4b5   : > { %12496 = vst [vmem:[#allocation217_spill] sm:$0xff] %v11187_v12  ;;  %5422 = vmatmul.bf16.gmra.mxu0 %v11181_v5  ;;  %v11220_v28 = vpack.c.b16 %v2801_v6, %v2800_v16 }
 0x4b6   : > { %v4725_v58 = vpop.f32.mrf.mxu2  ;;  %v11217_v29 = vpack.c.b16 %v3053_v63, %v3052_v21  ;;  %v12503_v21 = vld [vmem:[#allocation13_spill] sm:$0xff] }
 0x4b7   : > { %v4726_v40 = vadd.f32 %v4725_v58, %v4397_v9  ;;  %v5054_v15 = vpop.f32.mrf.mxu3  ;;  %v1641_v9 = vrot.slane %v1639_v27, 5  ;;  %v12499_v58 = vld [vmem:[#allocation10_spill] sm:$0xff]  ;;  %12501 = vst [vmem:[#allocation218_spill] sm:$0xff] %v11220_v28 }
 0x4b8   : > { %v4398_v49 = vpop.f32.mrf.mxu1  ;;  %12500 = vst [vmem:[#allocation10_spill] sm:$0xff] %v11217_v29 }
 0x4b9   : > { %v5055_v46 = vadd.f32 %v5054_v15, %v4726_v40  ;;  %v4399_v12 = vadd.f32 %v4398_v49, %v12499_v58  ;;  %v1647_v40 = vrot.slane %v1645_v7, 5  ;;  %v1651_v15 = vrot.slane %v1649_v51, 4  ;;  %v8358_v7 = vld [vmem:[%s8588_s22 + $0x24c] sm:$0xff] }
 0x4ba   : > { %v5385_v17 = vpop.f32.mrf.mxu0  ;;  %v1642_v57 = vor.u32 %v1641_v9, %v1638_v19  ;;  %v11233_v19 = vld [vmem:[%s8588_s22 + $0x264] sm:$0xf] }
 0x4bb   : > { %v11211_v53 = vadd.f32 %v5383_v18, %v5055_v46  ;;  %v1652_v49 = vor.u32 %v1651_v15, %v1647_v40  ;;  %v1655_v46 = vshll.u32 %v11215_v41, 16 }
 0x4bc   : > { %v1643_v51 = vrot.slane %v1642_v57, 4  ;;  %v1669_v57 = vshrl.u32 %v11233_v19, 16 }
 0x4bd   : > { %12498 = vst [vmem:[#allocation7_spill] sm:$0xff] %v11211_v53  ;;  %v1653_v16 = vrot.slane %v1652_v49, 4  ;;  %v1657_v6 = vrot.slane %v1655_v46, 5  ;;  %v11250_v53 = vld [vmem:[%s8588_s22 + $0x268] sm:$0x1] }
 0x4be   : > { %v4727_v44 = vpop.f32.mrf.mxu2 }
 0x4bf   : > { %v4728_v56 = vadd.f32 %v4727_v44, %v4399_v12  ;;  %v5056_v52 = vpop.f32.mrf.mxu3  ;;  %v7148_v44 = vrot.slane %v11115_v54, 9  ;;  %v2267_v12 = vrot.slane %v2265_v34, 4  ;;  %v1658_v46 = vsel %vm8928_vm4, %v1653_v16, %v1657_v6 }
 0x4c0   : > { %v4401_v18 = vpop.f32.mrf.mxu1  ;;  %v2271_v16 = vrot.slane %v11160_v61, 5  ;;  %v8359_v61 = vld [vmem:[%s8588_s22 + $0x258] sm:$0xff] }
 0x4c1   : > { %v5057_v23 = vadd.f32 %v5056_v52, %v4728_v56  ;;  %v4402_v63 = vadd.f32 %v4401_v18, %v12503_v21  ;;  %v2266_v54 = vsel %vm8933_vm5, %v7148_v44, %v2265_v34  ;;  %v2269_v47 = vsel %vm8933_vm5, %v2267_v12, %v2268_v55 }
 0x4c2   : > { %v5388_v27 = vpop.f32.mrf.mxu0  ;;  %v1648_v56 = vsel %vm8928_vm4, %v1643_v51, %v1647_v40  ;;  %v1659_v52 = vshrl.u32 %v11215_v41, 16  ;;  %v1665_v18 = vshll.u32 %v11233_v19, 16  ;;  %v3054_v34 = vunpack.c.l.b16 %v2266_v54 }
 0x4c3   : > { %4440 = vmatmul.bf16.gmra.mxu1 %v11146_v0  ;;  %4769 = vmatmul.bf16.gmra.mxu2 %v11217_v29  ;;  %v11227_v14 = vadd.f32 %v5385_v17, %v5057_v23  ;;  %v3055_v44 = vunpack.c.l.b16 %v2269_v47  ;;  %v2803_v21 = vunpack.c.l.b16 %v1658_v46  ;;  %v1671_v51 = vrot.slane %v1669_v57, 4 }
 0x4c4   : > { %5098 = vmatmul.bf16.gmra.mxu3 %v8358_v7  ;;  %v2802_v7 = vunpack.c.l.b16 %v1648_v56  ;;  %v1667_v40 = vrot.slane %v1665_v18, 5 }
 0x4c5   : > { %12502 = vst [vmem:[#allocation219_spill] sm:$0xff] %v11227_v14  ;;  %5427 = vmatmul.bf16.gmra.mxu0 %v11220_v28 }
 0x4c6   : > { %v4730_v9 = vpop.f32.mrf.mxu2  ;;  %v11255_v47 = vpack.c.b16 %v2803_v21, %v2802_v7  ;;  %v1672_v56 = vor.u32 %v1671_v51, %v1667_v40  ;;  %v11267_v7 = vld [vmem:[%s8588_s22 + $0x26c] sm:$0xf] }
 0x4c7   : > { %v4731_v58 = vadd.f32 %v4730_v9, %v4402_v63  ;;  %v5059_v15 = vpop.f32.mrf.mxu3  ;;  %v1661_v63 = vrot.slane %v1659_v52, 4  ;;  %v12505_v9 = vld [vmem:[#allocation16_spill] sm:$0xff]  ;;  %v1675_v52 = vshll.u32 %v11250_v53, 16 }
 0x4c8   : > { %v4403_v17 = vpop.f32.mrf.mxu1  ;;  %12507 = vst [vmem:[#allocation220_spill] sm:$0xff] %v11255_v47  ;;  %v1673_v46 = vrot.slane %v1672_v56, 4 }
 0x4c9   : > { %v5060_v23 = vadd.f32 %v5059_v15, %v4731_v58  ;;  %v4404_v14 = vadd.f32 %v4403_v17, %v12505_v9  ;;  %v11252_v15 = vpack.c.b16 %v3055_v44, %v3054_v34  ;;  %v1677_v34 = vrot.slane %v1675_v52, 5 }
 0x4ca   : > { %v5390_v49 = vpop.f32.mrf.mxu0 }
 0x4cb   : > { %v11246_v12 = vadd.f32 %v5388_v27, %v5060_v23  ;;  %12506 = vst [vmem:[#allocation16_spill] sm:$0xff] %v11252_v15  ;;  %v1662_v27 = vor.u32 %v1661_v63, %v1657_v6  ;;  %v2274_v6 = vrot.slane %v11177_v32, 5  ;;  %v11270_v63 = vld [vmem:[%s8588_s22 + $0x270] sm:$0xf] }
 0x4cd   : > { %12504 = vst [vmem:[#allocation13_spill] sm:$0xff] %v11246_v12  ;;  %v1663_v23 = vrot.slane %v1662_v27, 4  ;;  %v1680_v27 = vshrl.u32 %v11267_v7, 16  ;;  %v11289_v12 = vld [vmem:[%s8588_s22 + $0x274] sm:$0xf] }
 0x4ce   : > { %v4732_v29 = vpop.f32.mrf.mxu2 }
 0x4cf   : > { %v4733_v0 = vadd.f32 %v4732_v29, %v4404_v14  ;;  %v5061_v58 = vpop.f32.mrf.mxu3  ;;  %v2270_v29 = vrot.slane %v2268_v55, 4  ;;  %v2273_v14 = vrot.slane %v2271_v16, 4  ;;  %v1668_v32 = vsel %vm8928_vm4, %v1663_v23, %v1667_v40 }
 0x4d0   : > { %v4406_v54 = vpop.f32.mrf.mxu1  ;;  %v1682_v23 = vrot.slane %v1680_v27, 4 }
 0x4d1   : > { %v5062_v18 = vadd.f32 %v5061_v58, %v4733_v0  ;;  %v12509_v0 = vld [vmem:[#allocation19_spill] sm:$0xff]  ;;  %v2275_v58 = vsel %vm8933_vm5, %v2273_v14, %v2274_v6  ;;  %v2804_v6 = vunpack.c.l.b16 %v1668_v32 }
 0x4d2   : > { %v5393_v17 = vpop.f32.mrf.mxu0  ;;  %v4407_v44 = vadd.f32 %v4406_v54, %v12509_v0  ;;  %v1678_v54 = vsel %vm8928_vm4, %v1673_v46, %v1677_v34  ;;  %v3057_v0 = vunpack.c.l.b16 %v2275_v58 }
 0x4d3   : > { %4445 = vmatmul.bf16.gmra.mxu1 %v11181_v5  ;;  %4774 = vmatmul.bf16.gmra.mxu2 %v11252_v15  ;;  %v11260_v57 = vadd.f32 %v5390_v49, %v5062_v18  ;;  %v2272_v49 = vsel %vm8933_vm5, %v2270_v29, %v2271_v16  ;;  %v1683_v18 = vshll.u32 %v11267_v7, 16  ;;  %v1693_v16 = vshrl.u32 %v11270_v63, 16 }
 0x4d4   : > { %5103 = vmatmul.bf16.gmra.mxu3 %v8359_v61  ;;  %v1689_v61 = vshll.u32 %v11270_v63, 16  ;;  %v3056_v29 = vunpack.c.l.b16 %v2272_v49  ;;  %v2805_v40 = vunpack.c.l.b16 %v1678_v54 }
 0x4d5   : > { %12508 = vst [vmem:[#allocation221_spill] sm:$0xff] %v11260_v57  ;;  %5432 = vmatmul.bf16.gmra.mxu0 %v11255_v47  ;;  %v1685_v34 = vrot.slane %v1683_v18, 5  ;;  %v2278_v57 = vrot.slane %v11197_v30, 5  ;;  %v7149_v18 = vrot.slane %v11194_v59, 9 }
 0x4d6   : > { %v4735_v21 = vpop.f32.mrf.mxu2  ;;  %v11291_v49 = vpack.c.b16 %v3057_v0, %v3056_v29  ;;  %v11293_v58 = vpack.c.b16 %v2805_v40, %v2804_v6  ;;  %v8360_v29 = vld [vmem:[%s8588_s22 + $0x260] sm:$0xff] }
 0x4d7   : > { %v4736_v55 = vadd.f32 %v4735_v21, %v4407_v44  ;;  %v5064_v51 = vpop.f32.mrf.mxu3  ;;  %v12511_v44 = vld [vmem:[#allocation22_spill] sm:$0xff]  ;;  %v1691_v21 = vrot.slane %v1689_v61, 5  ;;  %v2280_v30 = vrot.slane %v2278_v57, 4  ;;  %v2281_v61 = vrot.slane %v11215_v41, 5 }
 0x4d8   : > { %v4408_v9 = vpop.f32.mrf.mxu1  ;;  %12512 = vst [vmem:[#allocation22_spill] sm:$0xff] %v11291_v49  ;;  %v2279_v41 = vsel %vm8933_vm5, %v7149_v18, %v2278_v57 }
 0x4d9   : > { %v5065_v56 = vadd.f32 %v5064_v51, %v4736_v55  ;;  %v4409_v46 = vadd.f32 %v4408_v9, %v12511_v44  ;;  %v1695_v55 = vrot.slane %v1693_v16, 4  ;;  %v1686_v9 = vor.u32 %v1685_v34, %v1682_v23 }
 0x4da   : > { %v5395_v52 = vpop.f32.mrf.mxu0  ;;  %v2282_v44 = vsel %vm8933_vm5, %v2280_v30, %v2281_v61  ;;  %v1703_v34 = vshrl.u32 %v11289_v12, 16 }
 0x4db   : > { %v11284_v14 = vadd.f32 %v5393_v17, %v5065_v56  ;;  %v1696_v27 = vor.u32 %v1695_v55, %v1691_v21  ;;  %v1699_v56 = vshll.u32 %v11289_v12, 16  ;;  %v1687_v6 = vrot.slane %v1686_v9, 4 }
 0x4dc   : > { %v3059_v18 = vunpack.c.l.b16 %v2282_v44  ;;  %v1705_v30 = vrot.slane %v1703_v34, 4 }
 0x4dd   : > { %12510 = vst [vmem:[#allocation19_spill] sm:$0xff] %v11284_v14  ;;  %v1697_v40 = vrot.slane %v1696_v27, 4  ;;  %v1701_v59 = vrot.slane %v1699_v56, 5  ;;  %v1692_v27 = vsel %vm8928_vm4, %v1687_v6, %v1691_v21  ;;  %v3058_v56 = vunpack.c.l.b16 %v2279_v41  ;;  %v11322_v14 = vld [vmem:[%s8588_s22 + $0x27c] sm:$0x1] }
 0x4de   : > { %v4737_v51 = vpop.f32.mrf.mxu2  ;;  %v2284_v21 = vrot.slane %v11233_v19, 5  ;;  %v1719_v34 = vshll.u32 %v11322_v14, 16 }
 0x4df   : > { %v4738_v15 = vadd.f32 %v4737_v51, %v4409_v46  ;;  %v5066_v5 = vpop.f32.mrf.mxu3  ;;  %v1702_v57 = vsel %vm8928_vm4, %v1697_v40, %v1701_v59  ;;  %v1706_v41 = vor.u32 %v1705_v30, %v1701_v59 }
 0x4e0   : > { %v4411_v17 = vpop.f32.mrf.mxu1 }
 0x4e1   : > { %v5067_v32 = vadd.f32 %v5066_v5, %v4738_v15  ;;  %v11305_v5 = vld [vmem:[%s8588_s22 + $0x278] sm:$0xf]  ;;  %v12514_v15 = vld [vmem:[#allocation25_spill] sm:$0xff]  ;;  %v1707_v19 = vrot.slane %v1706_v41, 4 }
 0x4e2   : > { %v5398_v54 = vpop.f32.mrf.mxu0  ;;  %v4412_v0 = vadd.f32 %v4411_v17, %v12514_v15  ;;  %v1709_v55 = vshll.u32 %v11305_v5, 16  ;;  %v1713_v51 = vshrl.u32 %v11305_v5, 16 }
 0x4e3   : > { %4450 = vmatmul.bf16.gmra.mxu1 %v11220_v28  ;;  %4779 = vmatmul.bf16.gmra.mxu2 %v11291_v49  ;;  %v11300_v16 = vadd.f32 %v5395_v52, %v5067_v32  ;;  %v12516_v49 = vld [vmem:[#allocation28_spill] sm:$0xff]  ;;  %v11325_v28 = vpack.c.b16 %v3059_v18, %v3058_v56  ;;  %v8361_v18 = vld [vmem:[%s8588_s22 + $0x26c] sm:$0xff] }
 0x4e4   : > { %5108 = vmatmul.bf16.gmra.mxu3 %v8360_v29  ;;  %v1711_v29 = vrot.slane %v1709_v55, 5  ;;  %v1715_v15 = vrot.slane %v1713_v51, 4 }
 0x4e5   : > { %12513 = vst [vmem:[#allocation222_spill] sm:$0xff] %v11300_v16  ;;  %5437 = vmatmul.bf16.gmra.mxu0 %v11293_v58  ;;  %v2807_v16 = vunpack.c.l.b16 %v1702_v57  ;;  %v1721_v57 = vrot.slane %v1719_v34, 5 }
 0x4e6   : > { %v4740_v23 = vpop.f32.mrf.mxu2  ;;  %12517 = vst [vmem:[#allocation28_spill] sm:$0xff] %v11325_v28  ;;  %v1716_v44 = vor.u32 %v1715_v15, %v1711_v29  ;;  %v302_v15 = vld [vmem:[%s8588_s22 + $0x280] sm:$0xf] }
 0x4e7   : > { %v4741_v52 = vadd.f32 %v4740_v23, %v4412_v0  ;;  %v5069_v46 = vpop.f32.mrf.mxu3  ;;  %v2806_v23 = vunpack.c.l.b16 %v1692_v27  ;;  %v2287_v27 = vrot.slane %v11250_v53, 5  ;;  %v2306_v34 = vshll.u32 %v302_v15, 16 }
 0x4e8   : > { %v4413_v17 = vpop.f32.mrf.mxu1  ;;  %v1717_v59 = vrot.slane %v1716_v44, 4  ;;  %v2303_v44 = vshrl.u32 %v302_v15, 16 }
 0x4e9   : > { %v5070_v32 = vadd.f32 %v5069_v46, %v4741_v52  ;;  %v4414_v52 = vadd.f32 %v4413_v17, %v12516_v49  ;;  %v11329_v55 = vpack.c.b16 %v2807_v16, %v2806_v23  ;;  %v2283_v49 = vrot.slane %v2281_v61, 4  ;;  %v12519_v16 = vld [vmem:[#allocation31_spill] sm:$0xff]  ;;  %v303_v61 = vld [vmem:[%s8588_s22 + $0x284] sm:$0xf] }
 0x4ea   : > { %v5400_v9 = vpop.f32.mrf.mxu0  ;;  %v2286_v17 = vrot.slane %v2284_v21, 4 }
 0x4eb   : > { %v11319_v0 = vadd.f32 %v5398_v54, %v5070_v32  ;;  %v2285_v53 = vsel %vm8933_vm5, %v2283_v49, %v2284_v21 }
 0x4ec   : > { %v3060_v21 = vunpack.c.l.b16 %v2285_v53  ;;  %v2291_v53 = vrot.slane %v11270_v63, 5  ;;  %v2294_v63 = vrot.slane %v11289_v12, 5 }
 0x4ed   : > { %12515 = vst [vmem:[#allocation25_spill] sm:$0xff] %v11319_v0  ;;  %v12521_v0 = vld [vmem:[#allocation34_spill] sm:$0xff] }
 0x4ee   : > { %v4742_v46 = vpop.f32.mrf.mxu2 }
 0x4ef   : > { %v4743_v6 = vadd.f32 %v4742_v46, %v4414_v52  ;;  %v5071_v40 = vpop.f32.mrf.mxu3 }
 0x4f0   : > { %v4416_v54 = vpop.f32.mrf.mxu1 }
 0x4f1   : > { %v5072_v51 = vadd.f32 %v5071_v40, %v4743_v6  ;;  %v4417_v30 = vadd.f32 %v4416_v54, %v12519_v16  ;;  %v2288_v6 = vsel %vm8933_vm5, %v2286_v17, %v2287_v27  ;;  %v1722_v40 = vsel %vm8928_vm4, %v1717_v59, %v1721_v57  ;;  %v304_v57 = vld [vmem:[%s8588_s22 + $0x288] sm:$0xf] }
 0x4f2   : > { %v5403_v32 = vpop.f32.mrf.mxu0  ;;  %v2312_v54 = vshll.u32 %v303_v61, 16  ;;  %v3061_v49 = vunpack.c.l.b16 %v2288_v6  ;;  %v2305_v17 = vrot.slane %v2303_v44, 4  ;;  %v2308_v27 = vrot.slane %v2306_v34, 5  ;;  %v8362_v34 = vld [vmem:[%s8588_s22 + $0x274] sm:$0xff] }
 0x4f3   : > { %4455 = vmatmul.bf16.gmra.mxu1 %v11255_v47  ;;  %4784 = vmatmul.bf16.gmra.mxu2 %v11325_v28  ;;  %v11334_v56 = vadd.f32 %v5400_v9, %v5072_v51  ;;  %v1712_v9 = vsel %vm8928_vm4, %v1707_v19, %v1711_v29  ;;  %v2316_v51 = vshrl.u32 %v303_v61, 16 }
 0x4f4   : > { %5113 = vmatmul.bf16.gmra.mxu3 %v8361_v18  ;;  %v2314_v29 = vrot.slane %v2312_v54, 5  ;;  %v11353_v61 = vpack.c.b16 %v3061_v49, %v3060_v21 }
 0x4f5   : > { %12518 = vst [vmem:[#allocation223_spill] sm:$0xff] %v11334_v56  ;;  %5442 = vmatmul.bf16.gmra.mxu0 %v11329_v55  ;;  %v2318_v19 = vrot.slane %v2316_v51, 4 }
 0x4f6   : > { %v4745_v23 = vpop.f32.mrf.mxu2 }
 0x4f7   : > { %v4746_v52 = vadd.f32 %v4745_v23, %v4417_v30  ;;  %v5074_v46 = vpop.f32.mrf.mxu3  ;;  %v2808_v30 = vunpack.c.l.b16 %v1712_v9  ;;  %v2809_v23 = vunpack.c.l.b16 %v1722_v40  ;;  %v2319_v6 = vor.u32 %v2318_v19, %v2314_v29 }
 0x4f8   : > { %v4418_v41 = vpop.f32.mrf.mxu1  ;;  %v2322_v9 = vshll.u32 %v304_v57, 16 }
 0x4f9   : > { %v5075_v18 = vadd.f32 %v5074_v46, %v4746_v52  ;;  %v4419_v59 = vadd.f32 %v4418_v41, %v12521_v0  ;;  %v11356_v46 = vpack.c.b16 %v2809_v23, %v2808_v30  ;;  %v2293_v0 = vrot.slane %v2291_v53, 4  ;;  %v305_v30 = vld [vmem:[%s8588_s22 + $0x28c] sm:$0xf] }
 0x4fa   : > { %v5405_v16 = vpop.f32.mrf.mxu0  ;;  %v2320_v51 = vrot.slane %v2319_v6, 4  ;;  %v2336_v6 = vshrl.u32 %v305_v30, 16 }
 0x4fb   : > { %v11349_v56 = vadd.f32 %v5403_v32, %v5075_v18  ;;  %v2309_v32 = vor.u32 %v2308_v27, %v2305_v17  ;;  %v12523_v18 = vld [vmem:[#allocation37_spill] sm:$0xff] }
 0x4fd   : > { %12520 = vst [vmem:[#allocation31_spill] sm:$0xff] %v11349_v56  ;;  %v2310_v54 = vrot.slane %v2309_v32, 4  ;;  %v2332_v32 = vshll.u32 %v305_v30, 16  ;;  %v7782_v30 = vld [vmem:[%s8588_s22 + $0x280] sm:$0xff] }
 0x4fe   : > { %v4747_v28 = vpop.f32.mrf.mxu2 }
 0x4ff   : > { %v4748_v47 = vadd.f32 %v4747_v28, %v4419_v59  ;;  %v5076_v15 = vpop.f32.mrf.mxu3  ;;  %v7150_v28 = vrot.slane %v11267_v7, 9  ;;  %v2315_v19 = vsel %vm8928_vm4, %v2310_v54, %v2314_v29  ;;  %v2334_v29 = vrot.slane %v2332_v32, 5 }
 0x500   : > { %v4421_v52 = vpop.f32.mrf.mxu1  ;;  %v2338_v54 = vrot.slane %v2336_v6, 4  ;;  %v2300_v6 = vrot.slane %v11322_v14, 5 }
 0x501   : > { %v5077_v40 = vadd.f32 %v5076_v15, %v4748_v47  ;;  %v2324_v47 = vrot.slane %v2322_v9, 5  ;;  %v4422_v21 = vadd.f32 %v4421_v52, %v12523_v18  ;;  %v2292_v7 = vsel %vm8933_vm5, %v7150_v28, %v2291_v53 }
 0x502   : > { %v5408_v44 = vpop.f32.mrf.mxu0  ;;  %v2326_v52 = vshrl.u32 %v304_v57, 16  ;;  %v3062_v9 = vunpack.c.l.b16 %v2292_v7  ;;  %v3202_v53 = vunpack.c.l.b16 %v2315_v19 }
 0x503   : > { %4460 = vmatmul.bf16.gmra.mxu1 %v11293_v58  ;;  %4789 = vmatmul.bf16.gmra.mxu2 %v11353_v61  ;;  %v11361_v41 = vadd.f32 %v5405_v16, %v5077_v40  ;;  %v2295_v16 = vsel %vm8933_vm5, %v2293_v0, %v2294_v63  ;;  %v2325_v12 = vsel %vm8928_vm4, %v2320_v51, %v2324_v47  ;;  %v12524_v0 = vld [vmem:[#allocation40_spill] sm:$0xff]  ;;  %v306_v51 = vld [vmem:[%s8588_s22 + $0x290] sm:$0x1] }
 0x504   : > { %5118 = vmatmul.bf16.gmra.mxu3 %v8362_v34  ;;  %v3063_v40 = vunpack.c.l.b16 %v2295_v16  ;;  %v3203_v28 = vunpack.c.l.b16 %v2325_v12  ;;  %v2339_v12 = vor.u32 %v2338_v54, %v2334_v29 }
 0x505   : > { %12522 = vst [vmem:[#allocation34_spill] sm:$0xff] %v11361_v41  ;;  %5447 = vmatmul.bf16.gmra.mxu0 %v11356_v46 }
 0x506   : > { %v4750_v49 = vpop.f32.mrf.mxu2  ;;  %v11383_v56 = vpack.c.b16 %v3203_v28, %v3202_v53 }
 0x507   : > { %v4751_v23 = vadd.f32 %v4750_v49, %v4422_v21  ;;  %v5079_v17 = vpop.f32.mrf.mxu3  ;;  %v2328_v21 = vrot.slane %v2326_v52, 4  ;;  %v2296_v52 = vrot.slane %v2294_v63, 4 }
 0x508   : > { %v4423_v27 = vpop.f32.mrf.mxu1 }
 0x509   : > { %v5080_v59 = vadd.f32 %v5079_v17, %v4751_v23  ;;  %v4424_v18 = vadd.f32 %v4423_v27, %v12524_v0  ;;  %v11380_v17 = vpack.c.b16 %v3063_v40, %v3062_v9  ;;  %v2329_v19 = vor.u32 %v2328_v21, %v2324_v47  ;;  %v12525_v9 = vld [vmem:[#allocation43_spill] sm:$0xff] }
 0x50a   : > { %v5410_v15 = vpop.f32.mrf.mxu0  ;;  %v2342_v27 = vshll.u32 %v306_v51, 16  ;;  %v2340_v40 = vrot.slane %v2339_v12, 4 }
 0x50b   : > { %v11376_v34 = vadd.f32 %v5408_v44, %v5080_v59  ;;  %v2297_v44 = vrot.slane %v11305_v5, 5 }
 0x50c   : > { %v2344_v47 = vrot.slane %v2342_v27, 5 }
 0x50d   : > { %v2299_v32 = vrot.slane %v2297_v44, 4 }
 0x50e   : > { %v4752_v49 = vpop.f32.mrf.mxu2 }
 0x50f   : > { %v4753_v41 = vadd.f32 %v4752_v49, %v4424_v18  ;;  %v5081_v23 = vpop.f32.mrf.mxu3  ;;  %v2301_v21 = vsel %vm8933_vm5, %v2299_v32, %v2300_v6  ;;  %v2345_v49 = vsel %vm8928_vm4, %v2340_v40, %v2344_v47  ;;  %v12527_v40 = vld [vmem:[#allocation49_spill] sm:$0xff] }
 0x510   : > { %v4426_v57 = vpop.f32.mrf.mxu1 }
 0x511   : > { %v5082_v7 = vadd.f32 %v5081_v23, %v4753_v41  ;;  %v4427_v5 = vadd.f32 %v4426_v57, %v12525_v9  ;;  %v2330_v41 = vrot.slane %v2329_v19, 4  ;;  %v3065_v23 = vunpack.c.l.b16 %v2301_v21  ;;  %v12526_v19 = vld [vmem:[#allocation46_spill] sm:$0xff] }
 0x512   : > { %v5413_v16 = vpop.f32.mrf.mxu0  ;;  %v7783_v9 = vld [vmem:[%s8588_s22 + $0x288] sm:$0xff] }
 0x513   : > { %4465 = vmatmul.bf16.gmra.mxu1 %v11329_v55  ;;  %4794 = vmatmul.bf16.gmra.mxu2 %v11380_v17  ;;  %v11388_v59 = vadd.f32 %v5410_v15, %v5082_v7  ;;  %v2298_v15 = vsel %vm8933_vm5, %v2296_v52, %v2297_v44  ;;  %v2335_v14 = vsel %vm8928_vm4, %v2330_v41, %v2334_v29  ;;  %v3205_v7 = vunpack.c.l.b16 %v2345_v49 }
 0x514   : > { %5123 = vmatmul.bf16.gmra.mxu3 %v7782_v30  ;;  %v3064_v51 = vunpack.c.l.b16 %v2298_v15  ;;  %v3204_v30 = vunpack.c.l.b16 %v2335_v14  ;;  %v12528_v14 = vld [vmem:[#allocation52_spill] sm:$0xff] }
 0x515   : > { %5452 = vmatmul.bf16.gmra.mxu0 %v11383_v56 }
 0x516   : > { %v4755_v53 = vpop.f32.mrf.mxu2  ;;  %v11404_v32 = vpack.c.b16 %v3065_v23, %v3064_v51 }
 0x517   : > { %v4756_v28 = vadd.f32 %v4755_v53, %v4427_v5  ;;  %v5084_v0 = vpop.f32.mrf.mxu3  ;;  %v11407_v5 = vpack.c.b16 %v3205_v7, %v3204_v30 }
 0x518   : > { %v4428_v18 = vpop.f32.mrf.mxu1 }
 0x519   : > { %v5085_v63 = vadd.f32 %v5084_v0, %v4756_v28  ;;  %v4429_v44 = vadd.f32 %v4428_v18, %v12526_v19 }
 0x51a   : > { %v5415_v54 = vpop.f32.mrf.mxu0 }
 0x51b   : > { %v11401_v57 = vadd.f32 %v5413_v16, %v5085_v63 }
 0x51e   : > { %v4757_v12 = vpop.f32.mrf.mxu2 }
 0x51f   : > { %v4758_v27 = vadd.f32 %v4757_v12, %v4429_v44  ;;  %v5086_v52 = vpop.f32.mrf.mxu3  ;;  %v12529_v44 = vld [vmem:[#allocation65_spill] sm:$0xff]  ;;  %v8363_v12 = vld [vmem:[%s8588_s22 + $0x28] sm:$0xff] }
 0x520   : > { %v4431_v6 = vpop.f32.mrf.mxu1 }
 0x521   : > { %v5087_v29 = vadd.f32 %v5086_v52, %v4758_v27  ;;  %v4432_v47 = vadd.f32 %v4431_v6, %v12527_v40  ;;  %v12530_v52 = vld [vmem:[#allocation67_spill] sm:$0xff]  ;;  %v12531_v6 = vld [vmem:[#allocation81_spill] sm:$0xff] }
 0x522   : > { %v5418_v41 = vpop.f32.mrf.mxu0 }
 0x523   : > { %4470 = vmatmul.bf16.gmra.mxu1 %v11356_v46  ;;  %4799 = vmatmul.bf16.gmra.mxu2 %v11404_v32  ;;  %v11411_v16 = vadd.f32 %v5415_v54, %v5087_v29 }
 0x524   : > { %5128 = vmatmul.bf16.gmra.mxu3 %v7783_v9  ;;  %v12532_v9 = vld [vmem:[#allocation55_spill] sm:$0xff] }
 0x525   : > { %5457 = vmatmul.bf16.gmra.mxu0 %v11407_v5 }
 0x526   : > { %v4760_v53 = vpop.f32.mrf.mxu2 }
 0x527   : > { %v4761_v28 = vadd.f32 %v4760_v53, %v4432_v47  ;;  %v5089_v0 = vpop.f32.mrf.mxu3 }
 0x528   : > { %v4433_v18 = vpop.f32.mrf.mxu1 }
 0x529   : > { %v5090_v15 = vadd.f32 %v5089_v0, %v4761_v28  ;;  %v4434_v49 = vadd.f32 %v4433_v18, %v12528_v14 }
 0x52a   : > { %v5420_v21 = vpop.f32.mrf.mxu0 }
 0x52b   : > { %v11415_v63 = vadd.f32 %v5418_v41, %v5090_v15  ;;  %v12533_v15 = vld [vmem:[#allocation58_spill] sm:$0xff] }
 0x52e   : > { %v4762_v51 = vpop.f32.mrf.mxu2 }
 0x52f   : > { %v4763_v23 = vadd.f32 %v4762_v51, %v4434_v49  ;;  %v5091_v54 = vpop.f32.mrf.mxu3 }
 0x530   : > { %v4436_v30 = vpop.f32.mrf.mxu1 }
 0x531   : > { %v5092_v7 = vadd.f32 %v5091_v54, %v4763_v23  ;;  %v4437_v29 = vadd.f32 %v4436_v30, %v12532_v9  ;;  %v8364_v30 = vld [vmem:[%s8588_s22 + $0x30] sm:$0xff]  ;;  %v12536_v9 = vld [vmem:[#allocation89_spill] sm:$0xff] }
 0x532   : > { %v5423_v19 = vpop.f32.mrf.mxu0 }
 0x533   : > { %5471 = vmatmul.bf16.vlgmr.msra.gmra.mxu1 %v12529_v44  ;;  %5800 = vmatmul.bf16.vlgmr.msra.gmra.mxu2 %v8363_v12  ;;  %v11420_v27 = vadd.f32 %v5420_v21, %v5092_v7  ;;  %v12534_v44 = vld [vmem:[#allocation73_spill] sm:$0xff] }
 0x534   : > { %6129 = vmatmul.bf16.vlgmr.msra.gmra.mxu3 %v12530_v52  ;;  %v12535_v52 = vld [vmem:[#allocation75_spill] sm:$0xff] }
 0x535   : > { %6458 = vmatmul.bf16.vlgmr.msra.gmra.mxu0 %v12531_v6 }
 0x536   : > { %v4765_v41 = vpop.f32.mrf.mxu2 }
 0x537   : > { %v4766_v40 = vadd.f32 %v4765_v41, %v4437_v29  ;;  %v5094_v47 = vpop.f32.mrf.mxu3 }
 0x538   : > { %v4438_v53 = vpop.f32.mrf.mxu1 }
 0x539   : > { %v5095_v28 = vadd.f32 %v5094_v47, %v4766_v40  ;;  %v4439_v14 = vadd.f32 %v4438_v53, %v12533_v15 }
 0x53a   : > { %v5425_v0 = vpop.f32.mrf.mxu0 }
 0x53b   : > { %v11425_v18 = vadd.f32 %v5423_v19, %v5095_v28  ;;  %v12537_v19 = vld [vmem:[#allocation61_spill] sm:$0xff] }
 0x53e   : > { %v4767_v49 = vpop.f32.mrf.mxu2 }
 0x53f   : > { %v4768_v21 = vadd.f32 %v4767_v49, %v4439_v14  ;;  %v5096_v51 = vpop.f32.mrf.mxu3  ;;  %v12539_v49 = vld [vmem:[#allocation64_spill] sm:$0xff] }
 0x540   : > { %v4441_v23 = vpop.f32.mrf.mxu1 }
 0x541   : > { %v5097_v54 = vadd.f32 %v5096_v51, %v4768_v21  ;;  %v4442_v29 = vadd.f32 %v4441_v23, %v12537_v19  ;;  %v8365_v23 = vld [vmem:[%s8588_s22 + $0x3c] sm:$0xff] }
 0x542   : > { %v5428_v7 = vpop.f32.mrf.mxu0 }
 0x543   : > { %5476 = vmatmul.bf16.gmra.mxu1 %v12534_v44  ;;  %5805 = vmatmul.bf16.gmra.mxu2 %v8364_v30  ;;  %v11430_v12 = vadd.f32 %v5425_v0, %v5097_v54 }
 0x544   : > { %6134 = vmatmul.bf16.gmra.mxu3 %v12535_v52 }
 0x545   : > { %6463 = vmatmul.bf16.gmra.mxu0 %v12536_v9 }
 0x546   : > { %v4770_v41 = vpop.f32.mrf.mxu2 }
 0x547   : > { %v4771_v40 = vadd.f32 %v4770_v41, %v4442_v29  ;;  %v5099_v47 = vpop.f32.mrf.mxu3  ;;  %v12541_v29 = vld [vmem:[#allocation83_spill] sm:$0xff]  ;;  %v12542_v41 = vld [vmem:[#allocation98_spill] sm:$0xff] }
 0x548   : > { %v4443_v53 = vpop.f32.mrf.mxu1 }
 0x549   : > { %v5100_v28 = vadd.f32 %v5099_v47, %v4771_v40  ;;  %v4444_v21 = vadd.f32 %v4443_v53, %v12539_v49 }
 0x54a   : > { %v5430_v15 = vpop.f32.mrf.mxu0 }
 0x54b   : > { %v11435_v14 = vadd.f32 %v5428_v7, %v5100_v28  ;;  %v12543_v7 = vld [vmem:[#allocation69_spill] sm:$0xff] }
 0x54d   : > { %12538 = vst [vmem:[#allocation37_spill] sm:$0xff] %v11435_v14 }
 0x54e   : > { %v4772_v51 = vpop.f32.mrf.mxu2 }
 0x54f   : > { %v4773_v0 = vadd.f32 %v4772_v51, %v4444_v21  ;;  %v5101_v54 = vpop.f32.mrf.mxu3 }
 0x550   : > { %v4446_v44 = vpop.f32.mrf.mxu1 }
 0x551   : > { %v5102_v30 = vadd.f32 %v5101_v54, %v4773_v0  ;;  %v4447_v40 = vadd.f32 %v4446_v44, %v12543_v7  ;;  %v8366_v44 = vld [vmem:[%s8588_s22 + $0x44] sm:$0xff] }
 0x552   : > { %v5433_v52 = vpop.f32.mrf.mxu0 }
 0x553   : > { %5481 = vmatmul.bf16.gmra.mxu1 %v12531_v6  ;;  %5810 = vmatmul.bf16.gmra.mxu2 %v8365_v23  ;;  %v11440_v19 = vadd.f32 %v5430_v15, %v5102_v30  ;;  %v12545_v6 = vld [vmem:[#allocation72_spill] sm:$0xff] }
 0x554   : > { %6139 = vmatmul.bf16.gmra.mxu3 %v12541_v29 }
 0x555   : > { %12540 = vst [vmem:[#allocation40_spill] sm:$0xff] %v11440_v19  ;;  %6468 = vmatmul.bf16.gmra.mxu0 %v12542_v41 }
 0x556   : > { %v4775_v47 = vpop.f32.mrf.mxu2 }
 0x557   : > { %v4776_v53 = vadd.f32 %v4775_v47, %v4447_v40  ;;  %v5104_v28 = vpop.f32.mrf.mxu3  ;;  %v12547_v40 = vld [vmem:[#allocation91_spill] sm:$0xff]  ;;  %v12548_v47 = vld [vmem:[#allocation108_spill] sm:$0xff] }
 0x558   : > { %v4448_v49 = vpop.f32.mrf.mxu1 }
 0x559   : > { %v5105_v21 = vadd.f32 %v5104_v28, %v4776_v53  ;;  %v4449_v54 = vadd.f32 %v4448_v49, %v12545_v6 }
 0x55a   : > { %v5435_v51 = vpop.f32.mrf.mxu0 }
 0x55b   : > { %v11445_v0 = vadd.f32 %v5433_v52, %v5105_v21  ;;  %v12549_v52 = vld [vmem:[#allocation77_spill] sm:$0xff] }
 0x55d   : > { %12544 = vst [vmem:[#allocation43_spill] sm:$0xff] %v11445_v0 }
 0x55e   : > { %v4777_v23 = vpop.f32.mrf.mxu2 }
 0x55f   : > { %v4778_v15 = vadd.f32 %v4777_v23, %v4449_v54  ;;  %v5106_v30 = vpop.f32.mrf.mxu3 }
 0x560   : > { %v4451_v19 = vpop.f32.mrf.mxu1 }
 0x561   : > { %v5107_v29 = vadd.f32 %v5106_v30, %v4778_v15  ;;  %v4452_v53 = vadd.f32 %v4451_v19, %v12549_v52  ;;  %v8367_v19 = vld [vmem:[%s8588_s22 + $0x50] sm:$0xff] }
 0x562   : > { %v5438_v14 = vpop.f32.mrf.mxu0 }
 0x563   : > { %5486 = vmatmul.bf16.gmra.mxu1 %v12536_v9  ;;  %5815 = vmatmul.bf16.gmra.mxu2 %v8366_v44  ;;  %v11450_v7 = vadd.f32 %v5435_v51, %v5107_v29  ;;  %v12551_v9 = vld [vmem:[#allocation80_spill] sm:$0xff] }
 0x564   : > { %6144 = vmatmul.bf16.gmra.mxu3 %v12547_v40 }
 0x565   : > { %12546 = vst [vmem:[#allocation46_spill] sm:$0xff] %v11450_v7  ;;  %6473 = vmatmul.bf16.gmra.mxu0 %v12548_v47 }
 0x566   : > { %v4780_v28 = vpop.f32.mrf.mxu2 }
 0x567   : > { %v4781_v49 = vadd.f32 %v4780_v28, %v4452_v53  ;;  %v5109_v21 = vpop.f32.mrf.mxu3  ;;  %v12553_v53 = vld [vmem:[#allocation100_spill] sm:$0xff]  ;;  %v12554_v28 = vld [vmem:[#allocation117_spill] sm:$0xff] }
 0x568   : > { %v4453_v6 = vpop.f32.mrf.mxu1 }
 0x569   : > { %v5110_v54 = vadd.f32 %v5109_v21, %v4781_v49  ;;  %v4454_v30 = vadd.f32 %v4453_v6, %v12551_v9 }
 0x56a   : > { %v5440_v23 = vpop.f32.mrf.mxu0 }
 0x56b   : > { %v11455_v15 = vadd.f32 %v5438_v14, %v5110_v54  ;;  %v12555_v14 = vld [vmem:[#allocation85_spill] sm:$0xff] }
 0x56d   : > { %12550 = vst [vmem:[#allocation49_spill] sm:$0xff] %v11455_v15 }
 0x56e   : > { %v4782_v44 = vpop.f32.mrf.mxu2 }
 0x56f   : > { %v4783_v51 = vadd.f32 %v4782_v44, %v4454_v30  ;;  %v5111_v29 = vpop.f32.mrf.mxu3 }
 0x570   : > { %v4456_v7 = vpop.f32.mrf.mxu1 }
 0x571   : > { %v5112_v40 = vadd.f32 %v5111_v29, %v4783_v51  ;;  %v4457_v49 = vadd.f32 %v4456_v7, %v12555_v14  ;;  %v8368_v7 = vld [vmem:[%s8588_s22 + $0x58] sm:$0xff] }
 0x572   : > { %v5443_v0 = vpop.f32.mrf.mxu0 }
 0x573   : > { %5491 = vmatmul.bf16.gmra.mxu1 %v12542_v41  ;;  %5820 = vmatmul.bf16.gmra.mxu2 %v8367_v19  ;;  %v11460_v52 = vadd.f32 %v5440_v23, %v5112_v40  ;;  %v12556_v41 = vld [vmem:[#allocation88_spill] sm:$0xff] }
 0x574   : > { %6149 = vmatmul.bf16.gmra.mxu3 %v12553_v53 }
 0x575   : > { %12552 = vst [vmem:[#allocation52_spill] sm:$0xff] %v11460_v52  ;;  %6478 = vmatmul.bf16.gmra.mxu0 %v12554_v28 }
 0x576   : > { %v4785_v21 = vpop.f32.mrf.mxu2 }
 0x577   : > { %v4786_v6 = vadd.f32 %v4785_v21, %v4457_v49  ;;  %v5114_v54 = vpop.f32.mrf.mxu3 }
 0x578   : > { %v4458_v9 = vpop.f32.mrf.mxu1 }
 0x579   : > { %v5115_v30 = vadd.f32 %v5114_v54, %v4786_v6  ;;  %v4459_v29 = vadd.f32 %v4458_v9, %v12556_v41 }
 0x57a   : > { %v5445_v44 = vpop.f32.mrf.mxu0 }
 0x57b   : > { %v11465_v51 = vadd.f32 %v5443_v0, %v5115_v30  ;;  %v12557_v0 = vld [vmem:[#allocation93_spill] sm:$0xff] }
 0x57e   : > { %v4787_v19 = vpop.f32.mrf.mxu2 }
 0x57f   : > { %v4788_v23 = vadd.f32 %v4787_v19, %v4459_v29  ;;  %v5116_v40 = vpop.f32.mrf.mxu3 }
 0x580   : > { %v4461_v52 = vpop.f32.mrf.mxu1 }
 0x581   : > { %v5117_v53 = vadd.f32 %v5116_v40, %v4788_v23  ;;  %v4462_v49 = vadd.f32 %v4461_v52, %v12557_v0  ;;  %v8369_v52 = vld [vmem:[%s8588_s22 + $0x64] sm:$0xff] }
 0x582   : > { %v5448_v15 = vpop.f32.mrf.mxu0 }
 0x583   : > { %5496 = vmatmul.bf16.gmra.mxu1 %v12548_v47  ;;  %5825 = vmatmul.bf16.gmra.mxu2 %v8368_v7  ;;  %v11470_v14 = vadd.f32 %v5445_v44, %v5117_v53  ;;  %v12558_v47 = vld [vmem:[#allocation97_spill] sm:$0xff] }
 0x584   : > { %6154 = vmatmul.bf16.gmra.mxu3 %v9316_v45 }
 0x585   : > { %6483 = vmatmul.bf16.gmra.mxu0 %v9393_v26 }
 0x586   : > { %v4790_v21 = vpop.f32.mrf.mxu2 }
 0x587   : > { %v4791_v6 = vadd.f32 %v4790_v21, %v4462_v49  ;;  %v5119_v54 = vpop.f32.mrf.mxu3 }
 0x588   : > { %v4463_v9 = vpop.f32.mrf.mxu1 }
 0x589   : > { %v5120_v30 = vadd.f32 %v5119_v54, %v4791_v6  ;;  %v4464_v19 = vadd.f32 %v4463_v9, %v12558_v47 }
 0x58a   : > { %v5450_v41 = vpop.f32.mrf.mxu0 }
 0x58b   : > { %v11475_v29 = vadd.f32 %v5448_v15, %v5120_v30  ;;  %v12559_v15 = vld [vmem:[#allocation103_spill] sm:$0xff] }
 0x58e   : > { %v4792_v23 = vpop.f32.mrf.mxu2 }
 0x58f   : > { %v4793_v44 = vadd.f32 %v4792_v23, %v4464_v19  ;;  %v5121_v40 = vpop.f32.mrf.mxu3 }
 0x590   : > { %v4466_v53 = vpop.f32.mrf.mxu1 }
 0x591   : > { %v5122_v45 = vadd.f32 %v5121_v40, %v4793_v44  ;;  %v4467_v49 = vadd.f32 %v4466_v53, %v12559_v15  ;;  %v8370_v53 = vld [vmem:[%s8588_s22 + $0x6c] sm:$0xff] }
 0x592   : > { %v5453_v7 = vpop.f32.mrf.mxu0 }
 0x593   : > { %5501 = vmatmul.bf16.gmra.mxu1 %v12554_v28  ;;  %5830 = vmatmul.bf16.gmra.mxu2 %v8369_v52  ;;  %v11480_v0 = vadd.f32 %v5450_v41, %v5122_v45  ;;  %v12560_v28 = vld [vmem:[#allocation107_spill] sm:$0xff] }
 0x594   : > { %6159 = vmatmul.bf16.gmra.mxu3 %v9359_v62 }
 0x595   : > { %6488 = vmatmul.bf16.gmra.mxu0 %v9428_v33 }
 0x596   : > { %v4795_v21 = vpop.f32.mrf.mxu2 }
 0x597   : > { %v4796_v6 = vadd.f32 %v4795_v21, %v4467_v49  ;;  %v5124_v54 = vpop.f32.mrf.mxu3 }
 0x598   : > { %v4468_v9 = vpop.f32.mrf.mxu1 }
 0x599   : > { %v5125_v30 = vadd.f32 %v5124_v54, %v4796_v6  ;;  %v4469_v23 = vadd.f32 %v4468_v9, %v12560_v28 }
 0x59a   : > { %v5455_v47 = vpop.f32.mrf.mxu0 }
 0x59b   : > { %v11485_v19 = vadd.f32 %v5453_v7, %v5125_v30  ;;  %v12561_v7 = vld [vmem:[#allocation112_spill] sm:$0xff] }
 0x59e   : > { %v4797_v44 = vpop.f32.mrf.mxu2 }
 0x59f   : > { %v4798_v41 = vadd.f32 %v4797_v44, %v4469_v23  ;;  %v5126_v40 = vpop.f32.mrf.mxu3 }
 0x5a0   : > { %v4471_v45 = vpop.f32.mrf.mxu1 }
 0x5a1   : > { %v5127_v62 = vadd.f32 %v5126_v40, %v4798_v41  ;;  %v4472_v49 = vadd.f32 %v4471_v45, %v12561_v7  ;;  %v8371_v45 = vld [vmem:[%s8588_s22 + $0x78] sm:$0xff] }
 0x5a2   : > { %v5458_v52 = vpop.f32.mrf.mxu0 }
 0x5a3   : > { %5506 = vmatmul.bf16.gmra.mxu1 %v9393_v26  ;;  %5835 = vmatmul.bf16.gmra.mxu2 %v8370_v53  ;;  %v11490_v15 = vadd.f32 %v5455_v47, %v5127_v62  ;;  %v12562_v26 = vld [vmem:[#allocation116_spill] sm:$0xff] }
 0x5a4   : > { %6164 = vmatmul.bf16.gmra.mxu3 %v9395_v13 }
 0x5a5   : > { %6493 = vmatmul.bf16.gmra.mxu0 %v9466_v8 }
 0x5a6   : > { %v4800_v21 = vpop.f32.mrf.mxu2 }
 0x5a7   : > { %v4801_v6 = vadd.f32 %v4800_v21, %v4472_v49  ;;  %v5129_v54 = vpop.f32.mrf.mxu3 }
 0x5a8   : > { %v4473_v9 = vpop.f32.mrf.mxu1 }
 0x5a9   : > { %v5130_v30 = vadd.f32 %v5129_v54, %v4801_v6  ;;  %v4474_v44 = vadd.f32 %v4473_v9, %v12562_v26  ;;  %v12564_v6 = vld [vmem:[#allocation118_spill] sm:$0xff]  ;;  %v12565_v26 = vld [vmem:[#allocation119_spill] sm:$0xff] }
 0x5aa   : > { %v5460_v28 = vpop.f32.mrf.mxu0 }
 0x5ab   : > { %v11495_v23 = vadd.f32 %v5458_v52, %v5130_v30 }
 0x5ae   : > { %v4802_v41 = vpop.f32.mrf.mxu2 }
 0x5af   : > { %v4803_v47 = vadd.f32 %v4802_v41, %v4474_v44  ;;  %v5131_v40 = vpop.f32.mrf.mxu3 }
 0x5b0   : > { %v5472_v62 = vpop.f32.mrf.mxu1 }
 0x5b1   : > { %v5132_v13 = vadd.f32 %v5131_v40, %v4803_v47  ;;  %v5473_v54 = vadd.f32 %v5472_v62, %v12564_v6  ;;  %v8372_v62 = vld [vmem:[%s8588_s22 + $0x80] sm:$0xff] }
 0x5b2   : > { %v6459_v53 = vpop.f32.mrf.mxu0 }
 0x5b3   : > { %5511 = vmatmul.bf16.gmra.mxu1 %v9428_v33  ;;  %5840 = vmatmul.bf16.gmra.mxu2 %v8371_v45  ;;  %v11500_v7 = vadd.f32 %v5460_v28, %v5132_v13 }
 0x5b4   : > { %6169 = vmatmul.bf16.gmra.mxu3 %v9430_v60 }
 0x5b5   : > { %12563 = vst [vmem:[#allocation65_spill] sm:$0xff] %v11500_v7  ;;  %6498 = vmatmul.bf16.gmra.mxu0 %v9501_v39 }
 0x5b6   : > { %v5801_v52 = vpop.f32.mrf.mxu2 }
 0x5b7   : > { %v6130_v49 = vpop.f32.mrf.mxu3  ;;  %v5802_v30 = vadd.f32 %v5801_v52, %v5473_v54  ;;  %v12566_v54 = vld [vmem:[#allocation120_spill] sm:$0xff] }
 0x5b8   : > { %v5474_v21 = vpop.f32.mrf.mxu1 }
 0x5b9   : > { %v5475_v44 = vadd.f32 %v5474_v21, %v12565_v26  ;;  %v6131_v41 = vadd.f32 %v6130_v49, %v5802_v30 }
 0x5ba   : > { %v6461_v9 = vpop.f32.mrf.mxu0 }
 0x5bb   : > { %v6460_v45 = vadd.f32 %v6459_v53, %v6131_v41 }
 0x5be   : > { %v5803_v33 = vpop.f32.mrf.mxu2 }
 0x5bf   : > { %v5804_v28 = vadd.f32 %v5803_v33, %v5475_v44  ;;  %v6132_v47 = vpop.f32.mrf.mxu3 }
 0x5c0   : > { %v5477_v40 = vpop.f32.mrf.mxu1 }
 0x5c1   : > { %v6133_v60 = vadd.f32 %v6132_v47, %v5804_v28  ;;  %v5478_v53 = vadd.f32 %v5477_v40, %v12566_v54  ;;  %v12568_v40 = vld [vmem:[#allocation129_spill] sm:$0xff]  ;;  %v12569_v54 = vld [vmem:[#allocation122_spill] sm:$0xff] }
 0x5c2   : > { %v6464_v13 = vpop.f32.mrf.mxu0 }
 0x5c3   : > { %v6462_v7 = vadd.f32 %v6461_v9, %v6133_v60  ;;  %5516 = vmatmul.bf16.gmra.mxu1 %v9466_v8  ;;  %5845 = vmatmul.bf16.gmra.mxu2 %v8372_v62  ;;  %v12567_v8 = vld [vmem:[#allocation121_spill] sm:$0xff]  ;;  %v8373_v62 = vld [vmem:[%s8588_s22 + $0x8c] sm:$0xff] }
 0x5c4   : > { %6174 = vmatmul.bf16.gmra.mxu3 %v9468_v31 }
 0x5c5   : > { %6503 = vmatmul.bf16.gmra.mxu0 %v9539_v38  ;;  %v7862_v52 = vpack.c.bf16 %v6462_v7, %v6460_v45 }
 0x5c6   : > { %v5806_v21 = vpop.f32.mrf.mxu2 }
 0x5c7   : > { %7863 = vst [vmem:[%s11513_s27] sm:$0xff] %v7862_v52   ;;  %v6135_v49 = vpop.f32.mrf.mxu3  ;;  %v5807_v30 = vadd.f32 %v5806_v21, %v5478_v53 }
 0x5c8   : > { %v5479_v6 = vpop.f32.mrf.mxu1 }
 0x5c9   : > { %v5480_v26 = vadd.f32 %v5479_v6, %v12567_v8  ;;  %v6136_v31 = vadd.f32 %v6135_v49, %v5807_v30 }
 0x5ca   : > { %v6466_v9 = vpop.f32.mrf.mxu0 }
 0x5cb   : > { %v6465_v60 = vadd.f32 %v6464_v13, %v6136_v31  ;;  %v12570_v13 = vld [vmem:[#allocation123_spill] sm:$0xff] }
 0x5ce   : > { %v5808_v44 = vpop.f32.mrf.mxu2 }
 0x5cf   : > { %v5809_v33 = vadd.f32 %v5808_v44, %v5480_v26  ;;  %v6137_v41 = vpop.f32.mrf.mxu3 }
 0x5d0   : > { %v5482_v7 = vpop.f32.mrf.mxu1 }
 0x5d1   : > { %v6138_v28 = vadd.f32 %v6137_v41, %v5809_v33  ;;  %v5483_v53 = vadd.f32 %v5482_v7, %v12569_v54 }
 0x5d2   : > { %v6469_v47 = vpop.f32.mrf.mxu0 }
 0x5d3   : > { %v6467_v45 = vadd.f32 %v6466_v9, %v6138_v28  ;;  %5521 = vmatmul.bf16.gmra.mxu1 %v9501_v39  ;;  %5850 = vmatmul.bf16.gmra.mxu2 %v8373_v62 }
 0x5d4   : > { %6179 = vmatmul.bf16.gmra.mxu3 %v9503_v4 }
 0x5d5   : > { %6508 = vmatmul.bf16.gmra.mxu0 %v12568_v40  ;;  %v7867_v52 = vpack.c.bf16 %v6467_v45, %v6465_v60  ;;  %v8374_v45 = vld [vmem:[%s8588_s22 + $0x94] sm:$0xff] }
 0x5d6   : > { %v5811_v21 = vpop.f32.mrf.mxu2 }
 0x5d7   : > { %8179 = vst [vmem:[%s11513_s27 + $0x8] sm:$0xff] %v7867_v52   ;;  %v6140_v6 = vpop.f32.mrf.mxu3  ;;  %v5812_v8 = vadd.f32 %v5811_v21, %v5483_v53 }
 0x5d8   : > { %v5484_v49 = vpop.f32.mrf.mxu1 }
 0x5d9   : > { %v5485_v9 = vadd.f32 %v5484_v49, %v12570_v13  ;;  %v6141_v39 = vadd.f32 %v6140_v6, %v5812_v8  ;;  %v12571_v6 = vld [vmem:[#allocation124_spill] sm:$0xff] }
 0x5da   : > { %v6471_v30 = vpop.f32.mrf.mxu0 }
 0x5db   : > { %v6470_v28 = vadd.f32 %v6469_v47, %v6141_v39  ;;  %v12572_v47 = vld [vmem:[#allocation125_spill] sm:$0xff] }
 0x5de   : > { %v5813_v26 = vpop.f32.mrf.mxu2 }
 0x5df   : > { %v5814_v44 = vadd.f32 %v5813_v26, %v5485_v9  ;;  %v6142_v31 = vpop.f32.mrf.mxu3 }
 0x5e0   : > { %v5487_v4 = vpop.f32.mrf.mxu1 }
 0x5e1   : > { %v6143_v33 = vadd.f32 %v6142_v31, %v5814_v44  ;;  %v5488_v49 = vadd.f32 %v5487_v4, %v12571_v6 }
 0x5e2   : > { %v6474_v41 = vpop.f32.mrf.mxu0 }
 0x5e3   : > { %v6472_v60 = vadd.f32 %v6471_v30, %v6143_v33  ;;  %5526 = vmatmul.bf16.gmra.mxu1 %v9539_v38  ;;  %5855 = vmatmul.bf16.gmra.mxu2 %v8374_v45  ;;  %v8375_v33 = vld [vmem:[%s8588_s22 + $0xa0] sm:$0xff] }
 0x5e4   : > { %6184 = vmatmul.bf16.gmra.mxu3 %v9541_v20 }
 0x5e5   : > { %6513 = vmatmul.bf16.gmra.mxu0 %v9624_v22  ;;  %v7872_v7 = vpack.c.bf16 %v6472_v60, %v6470_v28 }
 0x5e6   : > { %v5816_v62 = vpop.f32.mrf.mxu2 }
 0x5e7   : > { %8180 = vst [vmem:[%s11513_s27 + $0x10] sm:$0xff] %v7872_v7   ;;  %v6145_v52 = vpop.f32.mrf.mxu3  ;;  %v5817_v53 = vadd.f32 %v5816_v62, %v5488_v49  ;;  %v12573_v7 = vld [vmem:[#allocation126_spill] sm:$0xff] }
 0x5e8   : > { %v5489_v21 = vpop.f32.mrf.mxu1 }
 0x5e9   : > { %v5490_v30 = vadd.f32 %v5489_v21, %v12572_v47  ;;  %v6146_v38 = vadd.f32 %v6145_v52, %v5817_v53 }
 0x5ea   : > { %v6476_v54 = vpop.f32.mrf.mxu0 }
 0x5eb   : > { %v6475_v44 = vadd.f32 %v6474_v41, %v6146_v38  ;;  %v12574_v41 = vld [vmem:[#allocation127_spill] sm:$0xff] }
 0x5ee   : > { %v5818_v8 = vpop.f32.mrf.mxu2 }
 0x5ef   : > { %v5819_v13 = vadd.f32 %v5818_v8, %v5490_v30  ;;  %v6147_v9 = vpop.f32.mrf.mxu3 }
 0x5f0   : > { %v5492_v20 = vpop.f32.mrf.mxu1 }
 0x5f1   : > { %v6148_v26 = vadd.f32 %v6147_v9, %v5819_v13  ;;  %v5493_v62 = vadd.f32 %v5492_v20, %v12573_v7  ;;  %v8376_v13 = vld [vmem:[%s8588_s22 + $0xa8] sm:$0xff] }
 0x5f2   : > { %v6479_v39 = vpop.f32.mrf.mxu0 }
 0x5f3   : > { %v6477_v31 = vadd.f32 %v6476_v54, %v6148_v26  ;;  %5531 = vmatmul.bf16.gmra.mxu1 %v12568_v40  ;;  %5860 = vmatmul.bf16.gmra.mxu2 %v8375_v33 }
 0x5f4   : > { %6189 = vmatmul.bf16.gmra.mxu3 %v9576_v48 }
 0x5f5   : > { %6518 = vmatmul.bf16.gmra.mxu0 %v9659_v43  ;;  %v7877_v4 = vpack.c.bf16 %v6477_v31, %v6475_v44  ;;  %v12575_v31 = vld [vmem:[#allocation128_spill] sm:$0xff] }
 0x5f6   : > { %v5821_v28 = vpop.f32.mrf.mxu2 }
 0x5f7   : > { %8181 = vst [vmem:[%s11513_s27 + $0x18] sm:$0xff] %v7877_v4   ;;  %v6150_v60 = vpop.f32.mrf.mxu3  ;;  %v5822_v21 = vadd.f32 %v5821_v28, %v5493_v62 }
 0x5f8   : > { %v5494_v45 = vpop.f32.mrf.mxu1 }
 0x5f9   : > { %v5495_v6 = vadd.f32 %v5494_v45, %v12574_v41  ;;  %v6151_v40 = vadd.f32 %v6150_v60, %v5822_v21 }
 0x5fa   : > { %v6481_v52 = vpop.f32.mrf.mxu0 }
 0x5fb   : > { %v6480_v8 = vadd.f32 %v6479_v39, %v6151_v40  ;;  %v12576_v39 = vld [vmem:[#allocation130_spill] sm:$0xff] }
 0x5fe   : > { %v5823_v49 = vpop.f32.mrf.mxu2 }
 0x5ff   : > { %v5824_v54 = vadd.f32 %v5823_v49, %v5495_v6  ;;  %v6152_v53 = vpop.f32.mrf.mxu3  ;;  %v8377_v49 = vld [vmem:[%s8588_s22 + $0xb4] sm:$0xff] }
 0x600   : > { %v5497_v48 = vpop.f32.mrf.mxu1 }
 0x601   : > { %v6153_v47 = vadd.f32 %v6152_v53, %v5824_v54  ;;  %v5498_v33 = vadd.f32 %v5497_v48, %v12575_v31 }
 0x602   : > { %v6484_v30 = vpop.f32.mrf.mxu0 }
 0x603   : > { %v6482_v38 = vadd.f32 %v6481_v52, %v6153_v47  ;;  %5536 = vmatmul.bf16.gmra.mxu1 %v9624_v22  ;;  %5865 = vmatmul.bf16.gmra.mxu2 %v8376_v13 }
 0x604   : > { %6194 = vmatmul.bf16.gmra.mxu3 %v9626_v35 }
 0x605   : > { %6523 = vmatmul.bf16.gmra.mxu0 %v9697_v11  ;;  %v7882_v9 = vpack.c.bf16 %v6482_v38, %v6480_v8 }
 0x606   : > { %v5826_v20 = vpop.f32.mrf.mxu2 }
 0x607   : > { %8182 = vst [vmem:[%s11513_s27 + $0x20] sm:$0xff] %v7882_v9   ;;  %v6155_v26 = vpop.f32.mrf.mxu3  ;;  %v5827_v28 = vadd.f32 %v5826_v20, %v5498_v33 }
 0x608   : > { %v5499_v44 = vpop.f32.mrf.mxu1 }
 0x609   : > { %v5500_v60 = vadd.f32 %v5499_v44, %v12576_v39  ;;  %v6156_v22 = vadd.f32 %v6155_v26, %v5827_v28  ;;  %v8378_v28 = vld [vmem:[%s8588_s22 + $0xbc] sm:$0xff] }
 0x60a   : > { %v6486_v4 = vpop.f32.mrf.mxu0 }
 0x60b   : > { %v6485_v41 = vadd.f32 %v6484_v30, %v6156_v22  ;;  %v12577_v30 = vld [vmem:[#allocation131_spill] sm:$0xff]  ;;  %v12578_v22 = vld [vmem:[#allocation132_spill] sm:$0xff] }
 0x60e   : > { %v5828_v45 = vpop.f32.mrf.mxu2 }
 0x60f   : > { %v5829_v7 = vadd.f32 %v5828_v45, %v5500_v60  ;;  %v6157_v62 = vpop.f32.mrf.mxu3 }
 0x610   : > { %v5502_v35 = vpop.f32.mrf.mxu1 }
 0x611   : > { %v6158_v52 = vadd.f32 %v6157_v62, %v5829_v7  ;;  %v5503_v47 = vadd.f32 %v5502_v35, %v9618_v2 }
 0x612   : > { %v6489_v21 = vpop.f32.mrf.mxu0 }
 0x613   : > { %v6487_v6 = vadd.f32 %v6486_v4, %v6158_v52  ;;  %5541 = vmatmul.bf16.gmra.mxu1 %v9659_v43  ;;  %5870 = vmatmul.bf16.gmra.mxu2 %v8377_v49  ;;  %v12579_v52 = vld [vmem:[#allocation133_spill] sm:$0xff] }
 0x614   : > { %6199 = vmatmul.bf16.gmra.mxu3 %v9661_v42 }
 0x615   : > { %6528 = vmatmul.bf16.gmra.mxu0 %v9732_v37  ;;  %v7887_v40 = vpack.c.bf16 %v6487_v6, %v6485_v41 }
 0x616   : > { %v5831_v54 = vpop.f32.mrf.mxu2 }
 0x617   : > { %8183 = vst [vmem:[%s11513_s27 + $0x28] sm:$0xff] %v7887_v40   ;;  %v6160_v53 = vpop.f32.mrf.mxu3  ;;  %v5832_v38 = vadd.f32 %v5831_v54, %v5503_v47  ;;  %v8379_v47 = vld [vmem:[%s8588_s22 + $0xc8] sm:$0xff] }
 0x618   : > { %v5504_v48 = vpop.f32.mrf.mxu1 }
 0x619   : > { %v5505_v13 = vadd.f32 %v5504_v48, %v12577_v30  ;;  %v6161_v43 = vadd.f32 %v6160_v53, %v5832_v38 }
 0x61a   : > { %v6491_v8 = vpop.f32.mrf.mxu0 }
 0x61b   : > { %v6490_v33 = vadd.f32 %v6489_v21, %v6161_v43 }
 0x61e   : > { %v5833_v9 = vpop.f32.mrf.mxu2 }
 0x61f   : > { %v5834_v20 = vadd.f32 %v5833_v9, %v5505_v13  ;;  %v6162_v26 = vpop.f32.mrf.mxu3  ;;  %v12580_v9 = vld [vmem:[#allocation134_spill] sm:$0xff] }
 0x620   : > { %v5507_v42 = vpop.f32.mrf.mxu1 }
 0x621   : > { %v6163_v44 = vadd.f32 %v6162_v26, %v5834_v20  ;;  %v5508_v7 = vadd.f32 %v5507_v42, %v12578_v22  ;;  %v12581_v42 = vld [vmem:[#allocation135_spill] sm:$0xff] }
 0x622   : > { %v6494_v31 = vpop.f32.mrf.mxu0  ;;  %v12582_v22 = vld [vmem:[#allocation139_spill] sm:$0xff] }
 0x623   : > { %v6492_v4 = vadd.f32 %v6491_v8, %v6163_v44  ;;  %5546 = vmatmul.bf16.gmra.mxu1 %v9697_v11  ;;  %5875 = vmatmul.bf16.gmra.mxu2 %v8378_v28 }
 0x624   : > { %6204 = vmatmul.bf16.gmra.mxu3 %v9699_v36 }
 0x625   : > { %6533 = vmatmul.bf16.gmra.mxu0 %v9770_v10  ;;  %v7892_v2 = vpack.c.bf16 %v6492_v4, %v6490_v33 }
 0x626   : > { %v5836_v39 = vpop.f32.mrf.mxu2 }
 0x627   : > { %8184 = vst [vmem:[%s11513_s27 + $0x30] sm:$0xff] %v7892_v2   ;;  %v6165_v60 = vpop.f32.mrf.mxu3  ;;  %v5837_v35 = vadd.f32 %v5836_v39, %v5508_v7  ;;  %v12583_v7 = vld [vmem:[#allocation145_spill] sm:$0xff] }
 0x628   : > { %v5509_v45 = vpop.f32.mrf.mxu1 }
 0x629   : > { %v5510_v21 = vadd.f32 %v5509_v45, %v12579_v52  ;;  %v6166_v11 = vadd.f32 %v6165_v60, %v5837_v35  ;;  %v8380_v45 = vld [vmem:[%s8588_s22 + $0xd0] sm:$0xff] }
 0x62a   : > { %v6496_v62 = vpop.f32.mrf.mxu0 }
 0x62b   : > { %v6495_v53 = vadd.f32 %v6494_v31, %v6166_v11 }
 0x62e   : > { %v5838_v41 = vpop.f32.mrf.mxu2 }
 0x62f   : > { %v5839_v6 = vadd.f32 %v5838_v41, %v5510_v21  ;;  %v6167_v49 = vpop.f32.mrf.mxu3  ;;  %v12584_v41 = vld [vmem:[#allocation136_spill] sm:$0xff] }
 0x630   : > { %v5512_v36 = vpop.f32.mrf.mxu1 }
 0x631   : > { %v6168_v40 = vadd.f32 %v6167_v49, %v5839_v6  ;;  %v5513_v43 = vadd.f32 %v5512_v36, %v12580_v9  ;;  %v12585_v36 = vld [vmem:[#allocation137_spill] sm:$0xff] }
 0x632   : > { %v6499_v54 = vpop.f32.mrf.mxu0  ;;  %v8381_v9 = vld [vmem:[%s8588_s22 + $0xdc] sm:$0xff] }
 0x633   : > { %v6497_v48 = vadd.f32 %v6496_v62, %v6168_v40  ;;  %5551 = vmatmul.bf16.gmra.mxu1 %v9732_v37  ;;  %5880 = vmatmul.bf16.gmra.mxu2 %v8379_v47 }
 0x634   : > { %6209 = vmatmul.bf16.gmra.mxu3 %v9734_v24 }
 0x635   : > { %6538 = vmatmul.bf16.gmra.mxu0 %v9805_v1  ;;  %v7897_v8 = vpack.c.bf16 %v6497_v48, %v6495_v53 }
 0x636   : > { %v5841_v38 = vpop.f32.mrf.mxu2 }
 0x637   : > { %8185 = vst [vmem:[%s11513_s27 + $0x38] sm:$0xff] %v7897_v8   ;;  %v6170_v30 = vpop.f32.mrf.mxu3  ;;  %v5842_v26 = vadd.f32 %v5841_v38, %v5513_v43  ;;  %v12586_v43 = vld [vmem:[#allocation142_spill] sm:$0xff] }
 0x638   : > { %v5514_v13 = vpop.f32.mrf.mxu1 }
 0x639   : > { %v5515_v44 = vadd.f32 %v5514_v13, %v12581_v42  ;;  %v6171_v37 = vadd.f32 %v6170_v30, %v5842_v26 }
 0x63a   : > { %v6501_v20 = vpop.f32.mrf.mxu0 }
 0x63b   : > { %v6500_v39 = vadd.f32 %v6499_v54, %v6171_v37  ;;  %v12588_v37 = vld [vmem:[#allocation138_spill] sm:$0xff] }
 0x63e   : > { %v5843_v31 = vpop.f32.mrf.mxu2 }
 0x63f   : > { %v5844_v33 = vadd.f32 %v5843_v31, %v5515_v44  ;;  %v6172_v4 = vpop.f32.mrf.mxu3 }
 0x640   : > { %v5517_v24 = vpop.f32.mrf.mxu1 }
 0x641   : > { %v6173_v28 = vadd.f32 %v6172_v4, %v5844_v33  ;;  %v5518_v11 = vadd.f32 %v5517_v24, %v12584_v41  ;;  %v8382_v41 = vld [vmem:[%s8588_s22 + $0xe4] sm:$0xff] }
 0x642   : > { %v6504_v2 = vpop.f32.mrf.mxu0 }
 0x643   : > { %v6502_v60 = vadd.f32 %v6501_v20, %v6173_v28  ;;  %5556 = vmatmul.bf16.gmra.mxu1 %v9770_v10  ;;  %5885 = vmatmul.bf16.gmra.mxu2 %v8380_v45  ;;  %v12587_v20 = vld [vmem:[#allocation95_spill] sm:$0xff]  ;;  %v12589_v28 = vld [vmem:[#allocation140_spill] sm:$0xff] }
 0x644   : > { %6214 = vmatmul.bf16.gmra.mxu3 %v12582_v22 }
 0x645   : > { %6543 = vmatmul.bf16.gmra.mxu0 %v12583_v7  ;;  %v7902_v62 = vpack.c.bf16 %v6502_v60, %v6500_v39 }
 0x646   : > { %v5846_v35 = vpop.f32.mrf.mxu2 }
 0x647   : > { %8186 = vst [vmem:[%s11513_s27 + $0x40] sm:$0xff] %v7902_v62   ;;  %v6175_v52 = vpop.f32.mrf.mxu3  ;;  %v5847_v49 = vadd.f32 %v5846_v35, %v5518_v11  ;;  %v12590_v11 = vld [vmem:[#allocation146_spill] sm:$0xff] }
 0x648   : > { %v5519_v21 = vpop.f32.mrf.mxu1 }
 0x649   : > { %v5520_v40 = vadd.f32 %v5519_v21, %v12585_v36  ;;  %v6176_v10 = vadd.f32 %v6175_v52, %v5847_v49 }
 0x64a   : > { %v6506_v6 = vpop.f32.mrf.mxu0 }
 0x64b   : > { %v6505_v30 = vadd.f32 %v6504_v2, %v6176_v10  ;;  %v12592_v10 = vld [vmem:[#allocation141_spill] sm:$0xff] }
 0x64e   : > { %v5848_v54 = vpop.f32.mrf.mxu2 }
 0x64f   : > { %v5849_v53 = vadd.f32 %v5848_v54, %v5520_v40  ;;  %v6177_v48 = vpop.f32.mrf.mxu3 }
 0x650   : > { %v5522_v47 = vpop.f32.mrf.mxu1 }
 0x651   : > { %v6178_v8 = vadd.f32 %v6177_v48, %v5849_v53  ;;  %v5523_v33 = vadd.f32 %v5522_v47, %v12588_v37  ;;  %v8383_v37 = vld [vmem:[%s8588_s22 + $0xf0] sm:$0xff] }
 0x652   : > { %v6509_v38 = vpop.f32.mrf.mxu0 }
 0x653   : > { %v6507_v13 = vadd.f32 %v6506_v6, %v6178_v8  ;;  %5561 = vmatmul.bf16.gmra.mxu1 %v9805_v1  ;;  %5890 = vmatmul.bf16.gmra.mxu2 %v8381_v9  ;;  %v12591_v6 = vld [vmem:[#allocation105_spill] sm:$0xff]  ;;  %v12593_v8 = vld [vmem:[#allocation143_spill] sm:$0xff] }
 0x654   : > { %6219 = vmatmul.bf16.gmra.mxu3 %v12586_v43 }
 0x655   : > { %6548 = vmatmul.bf16.gmra.mxu0 %v12587_v20  ;;  %v7907_v26 = vpack.c.bf16 %v6507_v13, %v6505_v30 }
 0x656   : > { %v5851_v42 = vpop.f32.mrf.mxu2 }
 0x657   : > { %8187 = vst [vmem:[%s11513_s27 + $0x48] sm:$0xff] %v7907_v26   ;;  %v6180_v44 = vpop.f32.mrf.mxu3  ;;  %v5852_v24 = vadd.f32 %v5851_v42, %v5523_v33  ;;  %v12594_v33 = vld [vmem:[#allocation149_spill] sm:$0xff] }
 0x658   : > { %v5524_v31 = vpop.f32.mrf.mxu1 }
 0x659   : > { %v5525_v2 = vadd.f32 %v5524_v31, %v12589_v28  ;;  %v6181_v1 = vadd.f32 %v6180_v44, %v5852_v24 }
 0x65a   : > { %v6511_v4 = vpop.f32.mrf.mxu0 }
 0x65b   : > { %v6510_v52 = vadd.f32 %v6509_v38, %v6181_v1  ;;  %v12596_v1 = vld [vmem:[#allocation144_spill] sm:$0xff] }
 0x65e   : > { %v5853_v39 = vpop.f32.mrf.mxu2 }
 0x65f   : > { %v5854_v60 = vadd.f32 %v5853_v39, %v5525_v2  ;;  %v6182_v45 = vpop.f32.mrf.mxu3 }
 0x660   : > { %v5527_v22 = vpop.f32.mrf.mxu1 }
 0x661   : > { %v6183_v62 = vadd.f32 %v6182_v45, %v5854_v60  ;;  %v5528_v53 = vadd.f32 %v5527_v22, %v12592_v10  ;;  %v8384_v10 = vld [vmem:[%s8588_s22 + $0xf8] sm:$0xff] }
 0x662   : > { %v6514_v35 = vpop.f32.mrf.mxu0 }
 0x663   : > { %v6512_v21 = vadd.f32 %v6511_v4, %v6183_v62  ;;  %5566 = vmatmul.bf16.gmra.mxu1 %v12583_v7  ;;  %5895 = vmatmul.bf16.gmra.mxu2 %v8382_v41  ;;  %v12595_v4 = vld [vmem:[#allocation114_spill] sm:$0xff]  ;;  %v12597_v62 = vld [vmem:[#allocation147_spill] sm:$0xff] }
 0x664   : > { %6224 = vmatmul.bf16.gmra.mxu3 %v12590_v11 }
 0x665   : > { %6553 = vmatmul.bf16.gmra.mxu0 %v12591_v6  ;;  %v7912_v49 = vpack.c.bf16 %v6512_v21, %v6510_v52 }
 0x666   : > { %v5856_v36 = vpop.f32.mrf.mxu2 }
 0x667   : > { %8188 = vst [vmem:[%s11513_s27 + $0x50] sm:$0xff] %v7912_v49   ;;  %v6185_v40 = vpop.f32.mrf.mxu3  ;;  %v5857_v47 = vadd.f32 %v5856_v36, %v5528_v53  ;;  %v12598_v53 = vld [vmem:[#allocation151_spill] sm:$0xff] }
 0x668   : > { %v5529_v54 = vpop.f32.mrf.mxu1 }
 0x669   : > { %v5530_v38 = vadd.f32 %v5529_v54, %v12593_v8  ;;  %v6186_v7 = vadd.f32 %v6185_v40, %v5857_v47 }
 0x66a   : > { %v6516_v48 = vpop.f32.mrf.mxu0 }
 0x66b   : > { %v6515_v44 = vadd.f32 %v6514_v35, %v6186_v7  ;;  %v12600_v7 = vld [vmem:[#allocation148_spill] sm:$0xff] }
 0x66e   : > { %v5858_v30 = vpop.f32.mrf.mxu2 }
 0x66f   : > { %v5859_v13 = vadd.f32 %v5858_v30, %v5530_v38  ;;  %v6187_v9 = vpop.f32.mrf.mxu3 }
 0x670   : > { %v5532_v43 = vpop.f32.mrf.mxu1 }
 0x671   : > { %v6188_v26 = vadd.f32 %v6187_v9, %v5859_v13  ;;  %v5533_v60 = vadd.f32 %v5532_v43, %v12596_v1  ;;  %v8385_v1 = vld [vmem:[%s8588_s22 + $0x104] sm:$0xff] }
 0x672   : > { %v6519_v42 = vpop.f32.mrf.mxu0 }
 0x673   : > { %v6517_v31 = vadd.f32 %v6516_v48, %v6188_v26  ;;  %5571 = vmatmul.bf16.gmra.mxu1 %v12587_v20  ;;  %5900 = vmatmul.bf16.gmra.mxu2 %v8383_v37  ;;  %v12599_v48 = vld [vmem:[#allocation8_spill] sm:$0xff]  ;;  %v12601_v26 = vld [vmem:[#allocation150_spill] sm:$0xff] }
 0x674   : > { %6229 = vmatmul.bf16.gmra.mxu3 %v12594_v33 }
 0x675   : > { %6558 = vmatmul.bf16.gmra.mxu0 %v12595_v4  ;;  %v7917_v24 = vpack.c.bf16 %v6517_v31, %v6515_v44 }
 0x676   : > { %v5861_v28 = vpop.f32.mrf.mxu2 }
 0x677   : > { %8189 = vst [vmem:[%s11513_s27 + $0x58] sm:$0xff] %v7917_v24   ;;  %v6190_v2 = vpop.f32.mrf.mxu3  ;;  %v5862_v22 = vadd.f32 %v5861_v28, %v5533_v60  ;;  %v12602_v60 = vld [vmem:[#allocation153_spill] sm:$0xff] }
 0x678   : > { %v5534_v39 = vpop.f32.mrf.mxu1 }
 0x679   : > { %v5535_v35 = vadd.f32 %v5534_v39, %v12597_v62  ;;  %v6191_v20 = vadd.f32 %v6190_v2, %v5862_v22 }
 0x67a   : > { %v6521_v45 = vpop.f32.mrf.mxu0 }
 0x67b   : > { %v6520_v40 = vadd.f32 %v6519_v42, %v6191_v20  ;;  %v12604_v20 = vld [vmem:[#allocation101_spill] sm:$0xff] }
 0x67e   : > { %v5863_v52 = vpop.f32.mrf.mxu2 }
 0x67f   : > { %v5864_v21 = vadd.f32 %v5863_v52, %v5535_v35  ;;  %v6192_v41 = vpop.f32.mrf.mxu3 }
 0x680   : > { %v5537_v11 = vpop.f32.mrf.mxu1 }
 0x681   : > { %v6193_v49 = vadd.f32 %v6192_v41, %v5864_v21  ;;  %v5538_v13 = vadd.f32 %v5537_v11, %v12600_v7  ;;  %v8386_v7 = vld [vmem:[%s8588_s22 + $0x10c] sm:$0xff] }
 0x682   : > { %v6524_v36 = vpop.f32.mrf.mxu0 }
 0x683   : > { %v6522_v54 = vadd.f32 %v6521_v45, %v6193_v49  ;;  %5576 = vmatmul.bf16.gmra.mxu1 %v12591_v6  ;;  %5905 = vmatmul.bf16.gmra.mxu2 %v8384_v10  ;;  %v12603_v45 = vld [vmem:[#allocation14_spill] sm:$0xff]  ;;  %v12605_v49 = vld [vmem:[#allocation152_spill] sm:$0xff] }
 0x684   : > { %6234 = vmatmul.bf16.gmra.mxu3 %v12598_v53 }
 0x685   : > { %6563 = vmatmul.bf16.gmra.mxu0 %v12599_v48  ;;  %v7922_v47 = vpack.c.bf16 %v6522_v54, %v6520_v40 }
 0x686   : > { %v5866_v8 = vpop.f32.mrf.mxu2 }
 0x687   : > { %8190 = vst [vmem:[%s11513_s27 + $0x60] sm:$0xff] %v7922_v47   ;;  %v6195_v38 = vpop.f32.mrf.mxu3  ;;  %v5867_v43 = vadd.f32 %v5866_v8, %v5538_v13  ;;  %v12606_v13 = vld [vmem:[#allocation155_spill] sm:$0xff] }
 0x688   : > { %v5539_v30 = vpop.f32.mrf.mxu1 }
 0x689   : > { %v5540_v42 = vadd.f32 %v5539_v30, %v12601_v26  ;;  %v6196_v6 = vadd.f32 %v6195_v38, %v5867_v43 }
 0x68a   : > { %v6526_v9 = vpop.f32.mrf.mxu0 }
 0x68b   : > { %v6525_v2 = vadd.f32 %v6524_v36, %v6196_v6  ;;  %v12608_v6 = vld [vmem:[#allocation110_spill] sm:$0xff] }
 0x68e   : > { %v5868_v44 = vpop.f32.mrf.mxu2 }
 0x68f   : > { %v5869_v31 = vadd.f32 %v5868_v44, %v5540_v42  ;;  %v6197_v37 = vpop.f32.mrf.mxu3 }
 0x690   : > { %v5542_v33 = vpop.f32.mrf.mxu1 }
 0x691   : > { %v6198_v24 = vadd.f32 %v6197_v37, %v5869_v31  ;;  %v5543_v21 = vadd.f32 %v5542_v33, %v12604_v20  ;;  %v8387_v20 = vld [vmem:[%s8588_s22 + $0x118] sm:$0xff] }
 0x692   : > { %v6529_v28 = vpop.f32.mrf.mxu0 }
 0x693   : > { %v6527_v39 = vadd.f32 %v6526_v9, %v6198_v24  ;;  %5581 = vmatmul.bf16.gmra.mxu1 %v12595_v4  ;;  %5910 = vmatmul.bf16.gmra.mxu2 %v8385_v1  ;;  %v12607_v9 = vld [vmem:[#allocation20_spill] sm:$0xff]  ;;  %v12609_v24 = vld [vmem:[#allocation154_spill] sm:$0xff] }
 0x694   : > { %6239 = vmatmul.bf16.gmra.mxu3 %v12602_v60 }
 0x695   : > { %6568 = vmatmul.bf16.gmra.mxu0 %v12603_v45  ;;  %v7927_v22 = vpack.c.bf16 %v6527_v39, %v6525_v2 }
 0x696   : > { %v5871_v62 = vpop.f32.mrf.mxu2 }
 0x697   : > { %8191 = vst [vmem:[%s11513_s27 + $0x68] sm:$0xff] %v7927_v22   ;;  %v6200_v35 = vpop.f32.mrf.mxu3  ;;  %v5872_v11 = vadd.f32 %v5871_v62, %v5543_v21  ;;  %v12610_v21 = vld [vmem:[#allocation157_spill] sm:$0xff] }
 0x698   : > { %v5544_v52 = vpop.f32.mrf.mxu1 }
 0x699   : > { %v5545_v36 = vadd.f32 %v5544_v52, %v12605_v49  ;;  %v6201_v4 = vadd.f32 %v6200_v35, %v5872_v11 }
 0x69a   : > { %v6531_v41 = vpop.f32.mrf.mxu0 }
 0x69b   : > { %v6530_v38 = vadd.f32 %v6529_v28, %v6201_v4  ;;  %v12612_v4 = vld [vmem:[#allocation5_spill] sm:$0xff] }
 0x69e   : > { %v5873_v40 = vpop.f32.mrf.mxu2 }
 0x69f   : > { %v5874_v54 = vadd.f32 %v5873_v40, %v5545_v36  ;;  %v6202_v10 = vpop.f32.mrf.mxu3 }
 0x6a0   : > { %v5547_v53 = vpop.f32.mrf.mxu1 }
 0x6a1   : > { %v6203_v47 = vadd.f32 %v6202_v10, %v5874_v54  ;;  %v5548_v31 = vadd.f32 %v5547_v53, %v12608_v6  ;;  %v8388_v6 = vld [vmem:[%s8588_s22 + $0x120] sm:$0xff] }
 0x6a2   : > { %v6534_v8 = vpop.f32.mrf.mxu0 }
 0x6a3   : > { %v6532_v30 = vadd.f32 %v6531_v41, %v6203_v47  ;;  %5586 = vmatmul.bf16.gmra.mxu1 %v12599_v48  ;;  %5915 = vmatmul.bf16.gmra.mxu2 %v8386_v7  ;;  %v12611_v41 = vld [vmem:[#allocation26_spill] sm:$0xff]  ;;  %v12613_v47 = vld [vmem:[#allocation156_spill] sm:$0xff] }
 0x6a4   : > { %6244 = vmatmul.bf16.gmra.mxu3 %v12606_v13 }
 0x6a5   : > { %6573 = vmatmul.bf16.gmra.mxu0 %v12607_v9  ;;  %v7932_v43 = vpack.c.bf16 %v6532_v30, %v6530_v38 }
 0x6a6   : > { %v5876_v26 = vpop.f32.mrf.mxu2 }
 0x6a7   : > { %8192 = vst [vmem:[%s11513_s27 + $0x70] sm:$0xff] %v7932_v43   ;;  %v6205_v42 = vpop.f32.mrf.mxu3  ;;  %v5877_v33 = vadd.f32 %v5876_v26, %v5548_v31  ;;  %v12614_v31 = vld [vmem:[#allocation159_spill] sm:$0xff] }
 0x6a8   : > { %v5549_v44 = vpop.f32.mrf.mxu1 }
 0x6a9   : > { %v5550_v28 = vadd.f32 %v5549_v44, %v12609_v24  ;;  %v6206_v48 = vadd.f32 %v6205_v42, %v5877_v33 }
 0x6aa   : > { %v6536_v37 = vpop.f32.mrf.mxu0 }
 0x6ab   : > { %v6535_v35 = vadd.f32 %v6534_v8, %v6206_v48  ;;  %v12616_v48 = vld [vmem:[#allocation11_spill] sm:$0xff] }
 0x6ae   : > { %v5878_v2 = vpop.f32.mrf.mxu2 }
 0x6af   : > { %v5879_v39 = vadd.f32 %v5878_v2, %v5550_v28  ;;  %v6207_v1 = vpop.f32.mrf.mxu3 }
 0x6b0   : > { %v5552_v60 = vpop.f32.mrf.mxu1 }
 0x6b1   : > { %v6208_v22 = vadd.f32 %v6207_v1, %v5879_v39  ;;  %v5553_v54 = vadd.f32 %v5552_v60, %v12612_v4  ;;  %v8389_v4 = vld [vmem:[%s8588_s22 + $0x12c] sm:$0xff] }
 0x6b2   : > { %v6539_v62 = vpop.f32.mrf.mxu0 }
 0x6b3   : > { %v6537_v52 = vadd.f32 %v6536_v37, %v6208_v22  ;;  %5591 = vmatmul.bf16.gmra.mxu1 %v12603_v45  ;;  %5920 = vmatmul.bf16.gmra.mxu2 %v8387_v20  ;;  %v12615_v37 = vld [vmem:[#allocation32_spill] sm:$0xff]  ;;  %v12617_v22 = vld [vmem:[#allocation158_spill] sm:$0xff] }
 0x6b4   : > { %6249 = vmatmul.bf16.gmra.mxu3 %v12610_v21 }
 0x6b5   : > { %6578 = vmatmul.bf16.gmra.mxu0 %v12611_v41  ;;  %v7937_v11 = vpack.c.bf16 %v6537_v52, %v6535_v35 }
 0x6b6   : > { %v5881_v49 = vpop.f32.mrf.mxu2 }
 0x6b7   : > { %8193 = vst [vmem:[%s11513_s27 + $0x78] sm:$0xff] %v7937_v11   ;;  %v6210_v36 = vpop.f32.mrf.mxu3  ;;  %v5882_v53 = vadd.f32 %v5881_v49, %v5553_v54  ;;  %v12618_v54 = vld [vmem:[#allocation161_spill] sm:$0xff] }
 0x6b8   : > { %v5554_v40 = vpop.f32.mrf.mxu1 }
 0x6b9   : > { %v5555_v8 = vadd.f32 %v5554_v40, %v12613_v47  ;;  %v6211_v45 = vadd.f32 %v6210_v36, %v5882_v53 }
 0x6ba   : > { %v6541_v10 = vpop.f32.mrf.mxu0 }
 0x6bb   : > { %v6540_v42 = vadd.f32 %v6539_v62, %v6211_v45  ;;  %v12620_v45 = vld [vmem:[#allocation17_spill] sm:$0xff] }
 0x6be   : > { %v5883_v38 = vpop.f32.mrf.mxu2 }
 0x6bf   : > { %v5884_v30 = vadd.f32 %v5883_v38, %v5555_v8  ;;  %v6212_v7 = vpop.f32.mrf.mxu3 }
 0x6c0   : > { %v5557_v13 = vpop.f32.mrf.mxu1 }
 0x6c1   : > { %v6213_v43 = vadd.f32 %v6212_v7, %v5884_v30  ;;  %v5558_v39 = vadd.f32 %v5557_v13, %v12616_v48  ;;  %v8390_v48 = vld [vmem:[%s8588_s22 + $0x134] sm:$0xff] }
 0x6c2   : > { %v6544_v26 = vpop.f32.mrf.mxu0 }
 0x6c3   : > { %v6542_v44 = vadd.f32 %v6541_v10, %v6213_v43  ;;  %5596 = vmatmul.bf16.gmra.mxu1 %v12607_v9  ;;  %5925 = vmatmul.bf16.gmra.mxu2 %v8388_v6  ;;  %v12619_v10 = vld [vmem:[#allocation38_spill] sm:$0xff]  ;;  %v12621_v43 = vld [vmem:[#allocation160_spill] sm:$0xff] }
 0x6c4   : > { %6254 = vmatmul.bf16.gmra.mxu3 %v12614_v31 }
 0x6c5   : > { %6583 = vmatmul.bf16.gmra.mxu0 %v12615_v37  ;;  %v7942_v33 = vpack.c.bf16 %v6542_v44, %v6540_v42 }
 0x6c6   : > { %v5886_v24 = vpop.f32.mrf.mxu2 }
 0x6c7   : > { %8194 = vst [vmem:[%s11513_s27 + $0x80] sm:$0xff] %v7942_v33   ;;  %v6215_v28 = vpop.f32.mrf.mxu3  ;;  %v5887_v60 = vadd.f32 %v5886_v24, %v5558_v39  ;;  %v12622_v39 = vld [vmem:[#allocation163_spill] sm:$0xff] }
 0x6c8   : > { %v5559_v2 = vpop.f32.mrf.mxu1 }
 0x6c9   : > { %v5560_v62 = vadd.f32 %v5559_v2, %v12617_v22  ;;  %v6216_v9 = vadd.f32 %v6215_v28, %v5887_v60 }
 0x6ca   : > { %v6546_v1 = vpop.f32.mrf.mxu0 }
 0x6cb   : > { %v6545_v36 = vadd.f32 %v6544_v26, %v6216_v9  ;;  %v12624_v9 = vld [vmem:[#allocation23_spill] sm:$0xff] }
 0x6ce   : > { %v5888_v35 = vpop.f32.mrf.mxu2 }
 0x6cf   : > { %v5889_v52 = vadd.f32 %v5888_v35, %v5560_v62  ;;  %v6217_v20 = vpop.f32.mrf.mxu3 }
 0x6d0   : > { %v5562_v21 = vpop.f32.mrf.mxu1 }
 0x6d1   : > { %v6218_v11 = vadd.f32 %v6217_v20, %v5889_v52  ;;  %v5563_v30 = vadd.f32 %v5562_v21, %v12620_v45  ;;  %v8391_v45 = vld [vmem:[%s8588_s22 + $0x140] sm:$0xff] }
 0x6d2   : > { %v6549_v49 = vpop.f32.mrf.mxu0 }
 0x6d3   : > { %v6547_v40 = vadd.f32 %v6546_v1, %v6218_v11  ;;  %5601 = vmatmul.bf16.gmra.mxu1 %v12611_v41  ;;  %5930 = vmatmul.bf16.gmra.mxu2 %v8389_v4  ;;  %v12623_v1 = vld [vmem:[#allocation44_spill] sm:$0xff]  ;;  %v12625_v11 = vld [vmem:[#allocation162_spill] sm:$0xff] }
 0x6d4   : > { %6259 = vmatmul.bf16.gmra.mxu3 %v12618_v54 }
 0x6d5   : > { %6588 = vmatmul.bf16.gmra.mxu0 %v12619_v10  ;;  %v7947_v53 = vpack.c.bf16 %v6547_v40, %v6545_v36 }
 0x6d6   : > { %v5891_v47 = vpop.f32.mrf.mxu2 }
 0x6d7   : > { %8195 = vst [vmem:[%s11513_s27 + $0x88] sm:$0xff] %v7947_v53   ;;  %v6220_v8 = vpop.f32.mrf.mxu3  ;;  %v5892_v13 = vadd.f32 %v5891_v47, %v5563_v30  ;;  %v12626_v30 = vld [vmem:[#allocation165_spill] sm:$0xff] }
 0x6d8   : > { %v5564_v38 = vpop.f32.mrf.mxu1 }
 0x6d9   : > { %v5565_v26 = vadd.f32 %v5564_v38, %v12621_v43  ;;  %v6221_v41 = vadd.f32 %v6220_v8, %v5892_v13 }
 0x6da   : > { %v6551_v7 = vpop.f32.mrf.mxu0 }
 0x6db   : > { %v6550_v28 = vadd.f32 %v6549_v49, %v6221_v41  ;;  %v12628_v41 = vld [vmem:[#allocation29_spill] sm:$0xff] }
 0x6de   : > { %v5893_v42 = vpop.f32.mrf.mxu2 }
 0x6df   : > { %v5894_v44 = vadd.f32 %v5893_v42, %v5565_v26  ;;  %v6222_v6 = vpop.f32.mrf.mxu3 }
 0x6e0   : > { %v5567_v31 = vpop.f32.mrf.mxu1 }
 0x6e1   : > { %v6223_v33 = vadd.f32 %v6222_v6, %v5894_v44  ;;  %v5568_v52 = vadd.f32 %v5567_v31, %v12624_v9  ;;  %v8392_v9 = vld [vmem:[%s8588_s22 + $0x148] sm:$0xff] }
 0x6e2   : > { %v6554_v24 = vpop.f32.mrf.mxu0 }
 0x6e3   : > { %v6552_v2 = vadd.f32 %v6551_v7, %v6223_v33  ;;  %5606 = vmatmul.bf16.gmra.mxu1 %v12615_v37  ;;  %5935 = vmatmul.bf16.gmra.mxu2 %v8390_v48  ;;  %v12627_v7 = vld [vmem:[#allocation50_spill] sm:$0xff]  ;;  %v12629_v33 = vld [vmem:[#allocation164_spill] sm:$0xff] }
 0x6e4   : > { %6264 = vmatmul.bf16.gmra.mxu3 %v12622_v39 }
 0x6e5   : > { %6593 = vmatmul.bf16.gmra.mxu0 %v12623_v1  ;;  %v7952_v60 = vpack.c.bf16 %v6552_v2, %v6550_v28 }
 0x6e6   : > { %v5896_v22 = vpop.f32.mrf.mxu2 }
 0x6e7   : > { %8196 = vst [vmem:[%s11513_s27 + $0x90] sm:$0xff] %v7952_v60   ;;  %v6225_v62 = vpop.f32.mrf.mxu3  ;;  %v5897_v21 = vadd.f32 %v5896_v22, %v5568_v52  ;;  %v12630_v52 = vld [vmem:[#allocation167_spill] sm:$0xff] }
 0x6e8   : > { %v5569_v35 = vpop.f32.mrf.mxu1 }
 0x6e9   : > { %v5570_v49 = vadd.f32 %v5569_v35, %v12625_v11  ;;  %v6226_v37 = vadd.f32 %v6225_v62, %v5897_v21 }
 0x6ea   : > { %v6556_v20 = vpop.f32.mrf.mxu0 }
 0x6eb   : > { %v6555_v8 = vadd.f32 %v6554_v24, %v6226_v37  ;;  %v12632_v37 = vld [vmem:[#allocation35_spill] sm:$0xff] }
 0x6ee   : > { %v5898_v36 = vpop.f32.mrf.mxu2 }
 0x6ef   : > { %v5899_v40 = vadd.f32 %v5898_v36, %v5570_v49  ;;  %v6227_v4 = vpop.f32.mrf.mxu3 }
 0x6f0   : > { %v5572_v54 = vpop.f32.mrf.mxu1 }
 0x6f1   : > { %v6228_v53 = vadd.f32 %v6227_v4, %v5899_v40  ;;  %v5573_v44 = vadd.f32 %v5572_v54, %v12628_v41  ;;  %v8393_v41 = vld [vmem:[%s8588_s22 + $0x154] sm:$0xff] }
 0x6f2   : > { %v6559_v47 = vpop.f32.mrf.mxu0 }
 0x6f3   : > { %v6557_v38 = vadd.f32 %v6556_v20, %v6228_v53  ;;  %5611 = vmatmul.bf16.gmra.mxu1 %v12619_v10  ;;  %5940 = vmatmul.bf16.gmra.mxu2 %v8391_v45  ;;  %v12631_v20 = vld [vmem:[#allocation56_spill] sm:$0xff]  ;;  %v12633_v53 = vld [vmem:[#allocation166_spill] sm:$0xff] }
 0x6f4   : > { %6269 = vmatmul.bf16.gmra.mxu3 %v12626_v30 }
 0x6f5   : > { %6598 = vmatmul.bf16.gmra.mxu0 %v12627_v7  ;;  %v7957_v13 = vpack.c.bf16 %v6557_v38, %v6555_v8 }
 0x6f6   : > { %v5901_v43 = vpop.f32.mrf.mxu2 }
 0x6f7   : > { %8197 = vst [vmem:[%s11513_s27 + $0x98] sm:$0xff] %v7957_v13   ;;  %v6230_v26 = vpop.f32.mrf.mxu3  ;;  %v5902_v31 = vadd.f32 %v5901_v43, %v5573_v44  ;;  %v12634_v44 = vld [vmem:[#allocation169_spill] sm:$0xff] }
 0x6f8   : > { %v5574_v42 = vpop.f32.mrf.mxu1 }
 0x6f9   : > { %v5575_v24 = vadd.f32 %v5574_v42, %v12629_v33  ;;  %v6231_v10 = vadd.f32 %v6230_v26, %v5902_v31 }
 0x6fa   : > { %v6561_v6 = vpop.f32.mrf.mxu0 }
 0x6fb   : > { %v6560_v62 = vadd.f32 %v6559_v47, %v6231_v10  ;;  %v12636_v10 = vld [vmem:[#allocation41_spill] sm:$0xff] }
 0x6fe   : > { %v5903_v28 = vpop.f32.mrf.mxu2 }
 0x6ff   : > { %v5904_v2 = vadd.f32 %v5903_v28, %v5575_v24  ;;  %v6232_v48 = vpop.f32.mrf.mxu3 }
 0x700   : > { %v5577_v39 = vpop.f32.mrf.mxu1 }
 0x701   : > { %v6233_v60 = vadd.f32 %v6232_v48, %v5904_v2  ;;  %v5578_v40 = vadd.f32 %v5577_v39, %v12632_v37  ;;  %v8394_v37 = vld [vmem:[%s8588_s22 + $0x15c] sm:$0xff] }
 0x702   : > { %v6564_v22 = vpop.f32.mrf.mxu0 }
 0x703   : > { %v6562_v35 = vadd.f32 %v6561_v6, %v6233_v60  ;;  %5616 = vmatmul.bf16.gmra.mxu1 %v12623_v1  ;;  %5945 = vmatmul.bf16.gmra.mxu2 %v8392_v9  ;;  %v12635_v6 = vld [vmem:[#allocation62_spill] sm:$0xff]  ;;  %v12637_v60 = vld [vmem:[#allocation168_spill] sm:$0xff] }
 0x704   : > { %6274 = vmatmul.bf16.gmra.mxu3 %v12630_v52 }
 0x705   : > { %6603 = vmatmul.bf16.gmra.mxu0 %v12631_v20  ;;  %v7962_v21 = vpack.c.bf16 %v6562_v35, %v6560_v62 }
 0x706   : > { %v5906_v11 = vpop.f32.mrf.mxu2 }
 0x707   : > { %8198 = vst [vmem:[%s11513_s27 + $0xa0] sm:$0xff] %v7962_v21   ;;  %v6235_v49 = vpop.f32.mrf.mxu3  ;;  %v5907_v54 = vadd.f32 %v5906_v11, %v5578_v40  ;;  %v12638_v40 = vld [vmem:[#allocation171_spill] sm:$0xff] }
 0x708   : > { %v5579_v36 = vpop.f32.mrf.mxu1 }
 0x709   : > { %v5580_v47 = vadd.f32 %v5579_v36, %v12633_v53  ;;  %v6236_v1 = vadd.f32 %v6235_v49, %v5907_v54 }
 0x70a   : > { %v6566_v4 = vpop.f32.mrf.mxu0 }
 0x70b   : > { %v6565_v26 = vadd.f32 %v6564_v22, %v6236_v1  ;;  %v12640_v1 = vld [vmem:[#allocation47_spill] sm:$0xff] }
 0x70e   : > { %v5908_v8 = vpop.f32.mrf.mxu2 }
 0x70f   : > { %v5909_v38 = vadd.f32 %v5908_v8, %v5580_v47  ;;  %v6237_v45 = vpop.f32.mrf.mxu3 }
 0x710   : > { %v5582_v30 = vpop.f32.mrf.mxu1 }
 0x711   : > { %v6238_v13 = vadd.f32 %v6237_v45, %v5909_v38  ;;  %v5583_v2 = vadd.f32 %v5582_v30, %v12636_v10  ;;  %v8395_v10 = vld [vmem:[%s8588_s22 + $0x168] sm:$0xff] }
 0x712   : > { %v6569_v43 = vpop.f32.mrf.mxu0 }
 0x713   : > { %v6567_v42 = vadd.f32 %v6566_v4, %v6238_v13  ;;  %5621 = vmatmul.bf16.gmra.mxu1 %v12627_v7  ;;  %5950 = vmatmul.bf16.gmra.mxu2 %v8393_v41  ;;  %v12639_v4 = vld [vmem:[#allocation70_spill] sm:$0xff] }
 0x714   : > { %6279 = vmatmul.bf16.gmra.mxu3 %v12634_v44  ;;  %v12641_v13 = vld [vmem:[#allocation170_spill] sm:$0xff] }
 0x715   : > { %6608 = vmatmul.bf16.gmra.mxu0 %v12635_v6  ;;  %v7967_v31 = vpack.c.bf16 %v6567_v42, %v6565_v26 }
 0x716   : > { %v5911_v33 = vpop.f32.mrf.mxu2 }
 0x717   : > { %8199 = vst [vmem:[%s11513_s27 + $0xa8] sm:$0xff] %v7967_v31   ;;  %v6240_v24 = vpop.f32.mrf.mxu3  ;;  %v5912_v39 = vadd.f32 %v5911_v33, %v5583_v2  ;;  %v12642_v2 = vld [vmem:[#allocation173_spill] sm:$0xff] }
 0x718   : > { %v5584_v28 = vpop.f32.mrf.mxu1 }
 0x719   : > { %v5585_v22 = vadd.f32 %v5584_v28, %v12637_v60  ;;  %v6241_v7 = vadd.f32 %v6240_v24, %v5912_v39 }
 0x71a   : > { %v6571_v48 = vpop.f32.mrf.mxu0 }
 0x71b   : > { %v6570_v49 = vadd.f32 %v6569_v43, %v6241_v7  ;;  %v12644_v7 = vld [vmem:[#allocation53_spill] sm:$0xff] }
 0x71e   : > { %v5913_v62 = vpop.f32.mrf.mxu2 }
 0x71f   : > { %v5914_v35 = vadd.f32 %v5913_v62, %v5585_v22  ;;  %v6242_v9 = vpop.f32.mrf.mxu3 }
 0x720   : > { %v5587_v52 = vpop.f32.mrf.mxu1 }
 0x721   : > { %v6243_v21 = vadd.f32 %v6242_v9, %v5914_v35  ;;  %v5588_v38 = vadd.f32 %v5587_v52, %v12640_v1  ;;  %v8396_v1 = vld [vmem:[%s8588_s22 + $0x170] sm:$0xff] }
 0x722   : > { %v6574_v11 = vpop.f32.mrf.mxu0 }
 0x723   : > { %v6572_v36 = vadd.f32 %v6571_v48, %v6243_v21  ;;  %5626 = vmatmul.bf16.gmra.mxu1 %v12631_v20  ;;  %5955 = vmatmul.bf16.gmra.mxu2 %v8394_v37  ;;  %v12643_v48 = vld [vmem:[#allocation78_spill] sm:$0xff]  ;;  %v12645_v21 = vld [vmem:[#allocation172_spill] sm:$0xff] }
 0x724   : > { %6284 = vmatmul.bf16.gmra.mxu3 %v12638_v40 }
 0x725   : > { %6613 = vmatmul.bf16.gmra.mxu0 %v12639_v4  ;;  %v7972_v54 = vpack.c.bf16 %v6572_v36, %v6570_v49 }
 0x726   : > { %v5916_v53 = vpop.f32.mrf.mxu2 }
 0x727   : > { %8200 = vst [vmem:[%s11513_s27 + $0xb0] sm:$0xff] %v7972_v54   ;;  %v6245_v47 = vpop.f32.mrf.mxu3  ;;  %v5917_v30 = vadd.f32 %v5916_v53, %v5588_v38  ;;  %v12646_v38 = vld [vmem:[#allocation175_spill] sm:$0xff] }
 0x728   : > { %v5589_v8 = vpop.f32.mrf.mxu1 }
 0x729   : > { %v5590_v43 = vadd.f32 %v5589_v8, %v12641_v13  ;;  %v6246_v20 = vadd.f32 %v6245_v47, %v5917_v30 }
 0x72a   : > { %v6576_v45 = vpop.f32.mrf.mxu0 }
 0x72b   : > { %v6575_v24 = vadd.f32 %v6574_v11, %v6246_v20  ;;  %v12648_v20 = vld [vmem:[#allocation59_spill] sm:$0xff] }
 0x72e   : > { %v5918_v26 = vpop.f32.mrf.mxu2 }
 0x72f   : > { %v5919_v42 = vadd.f32 %v5918_v26, %v5590_v43  ;;  %v6247_v41 = vpop.f32.mrf.mxu3 }
 0x730   : > { %v5592_v44 = vpop.f32.mrf.mxu1 }
 0x731   : > { %v6248_v31 = vadd.f32 %v6247_v41, %v5919_v42  ;;  %v5593_v35 = vadd.f32 %v5592_v44, %v12644_v7  ;;  %v8397_v7 = vld [vmem:[%s8588_s22 + $0x17c] sm:$0xff] }
 0x732   : > { %v6579_v33 = vpop.f32.mrf.mxu0 }
 0x733   : > { %v6577_v28 = vadd.f32 %v6576_v45, %v6248_v31  ;;  %5631 = vmatmul.bf16.gmra.mxu1 %v12635_v6  ;;  %5960 = vmatmul.bf16.gmra.mxu2 %v8395_v10  ;;  %v12647_v45 = vld [vmem:[#allocation86_spill] sm:$0xff] }
 0x734   : > { %6289 = vmatmul.bf16.gmra.mxu3 %v12642_v2  ;;  %v12649_v31 = vld [vmem:[#allocation174_spill] sm:$0xff] }
 0x735   : > { %6618 = vmatmul.bf16.gmra.mxu0 %v12643_v48  ;;  %v7977_v39 = vpack.c.bf16 %v6577_v28, %v6575_v24 }
 0x736   : > { %v5921_v60 = vpop.f32.mrf.mxu2 }
 0x737   : > { %8201 = vst [vmem:[%s11513_s27 + $0xb8] sm:$0xff] %v7977_v39   ;;  %v6250_v22 = vpop.f32.mrf.mxu3  ;;  %v5922_v52 = vadd.f32 %v5921_v60, %v5593_v35  ;;  %v12650_v35 = vld [vmem:[#allocation177_spill] sm:$0xff] }
 0x738   : > { %v5594_v62 = vpop.f32.mrf.mxu1 }
 0x739   : > { %v5595_v11 = vadd.f32 %v5594_v62, %v12645_v21  ;;  %v6251_v6 = vadd.f32 %v6250_v22, %v5922_v52 }
 0x73a   : > { %v6581_v9 = vpop.f32.mrf.mxu0 }
 0x73b   : > { %v6580_v47 = vadd.f32 %v6579_v33, %v6251_v6  ;;  %v12652_v6 = vld [vmem:[#allocation66_spill] sm:$0xff] }
 0x73e   : > { %v5923_v49 = vpop.f32.mrf.mxu2 }
 0x73f   : > { %v5924_v36 = vadd.f32 %v5923_v49, %v5595_v11  ;;  %v6252_v37 = vpop.f32.mrf.mxu3 }
 0x740   : > { %v5597_v40 = vpop.f32.mrf.mxu1 }
 0x741   : > { %v6253_v54 = vadd.f32 %v6252_v37, %v5924_v36  ;;  %v5598_v42 = vadd.f32 %v5597_v40, %v12648_v20  ;;  %v8398_v20 = vld [vmem:[%s8588_s22 + $0x184] sm:$0xff] }
 0x742   : > { %v6584_v53 = vpop.f32.mrf.mxu0 }
 0x743   : > { %v6582_v8 = vadd.f32 %v6581_v9, %v6253_v54  ;;  %5636 = vmatmul.bf16.gmra.mxu1 %v12639_v4  ;;  %5965 = vmatmul.bf16.gmra.mxu2 %v8396_v1  ;;  %v12651_v9 = vld [vmem:[#allocation94_spill] sm:$0xff]  ;;  %v12653_v54 = vld [vmem:[#allocation176_spill] sm:$0xff] }
 0x744   : > { %6294 = vmatmul.bf16.gmra.mxu3 %v12646_v38 }
 0x745   : > { %6623 = vmatmul.bf16.gmra.mxu0 %v12647_v45  ;;  %v7982_v30 = vpack.c.bf16 %v6582_v8, %v6580_v47 }
 0x746   : > { %v5926_v13 = vpop.f32.mrf.mxu2 }
 0x747   : > { %8202 = vst [vmem:[%s11513_s27 + $0xc0] sm:$0xff] %v7982_v30   ;;  %v6255_v43 = vpop.f32.mrf.mxu3  ;;  %v5927_v44 = vadd.f32 %v5926_v13, %v5598_v42  ;;  %v12654_v42 = vld [vmem:[#allocation179_spill] sm:$0xff] }
 0x748   : > { %v5599_v26 = vpop.f32.mrf.mxu1 }
 0x749   : > { %v5600_v33 = vadd.f32 %v5599_v26, %v12649_v31  ;;  %v6256_v4 = vadd.f32 %v6255_v43, %v5927_v44 }
 0x74a   : > { %v6586_v41 = vpop.f32.mrf.mxu0 }
 0x74b   : > { %v6585_v22 = vadd.f32 %v6584_v53, %v6256_v4  ;;  %v12656_v4 = vld [vmem:[#allocation74_spill] sm:$0xff] }
 0x74e   : > { %v5928_v24 = vpop.f32.mrf.mxu2 }
 0x74f   : > { %v5929_v28 = vadd.f32 %v5928_v24, %v5600_v33  ;;  %v6257_v10 = vpop.f32.mrf.mxu3 }
 0x750   : > { %v5602_v2 = vpop.f32.mrf.mxu1 }
 0x751   : > { %v6258_v39 = vadd.f32 %v6257_v10, %v5929_v28  ;;  %v5603_v36 = vadd.f32 %v5602_v2, %v12652_v6  ;;  %v8399_v6 = vld [vmem:[%s8588_s22 + $0x190] sm:$0xff] }
 0x752   : > { %v6589_v60 = vpop.f32.mrf.mxu0 }
 0x753   : > { %v6587_v62 = vadd.f32 %v6586_v41, %v6258_v39  ;;  %5641 = vmatmul.bf16.gmra.mxu1 %v12643_v48  ;;  %5970 = vmatmul.bf16.gmra.mxu2 %v8397_v7  ;;  %v12655_v41 = vld [vmem:[#allocation104_spill] sm:$0xff]  ;;  %v12657_v39 = vld [vmem:[#allocation178_spill] sm:$0xff] }
 0x754   : > { %6299 = vmatmul.bf16.gmra.mxu3 %v12650_v35 }
 0x755   : > { %6628 = vmatmul.bf16.gmra.mxu0 %v12651_v9  ;;  %v7987_v52 = vpack.c.bf16 %v6587_v62, %v6585_v22 }
 0x756   : > { %v5931_v21 = vpop.f32.mrf.mxu2 }
 0x757   : > { %8203 = vst [vmem:[%s11513_s27 + $0xc8] sm:$0xff] %v7987_v52   ;;  %v6260_v11 = vpop.f32.mrf.mxu3  ;;  %v5932_v40 = vadd.f32 %v5931_v21, %v5603_v36  ;;  %v12658_v36 = vld [vmem:[#allocation181_spill] sm:$0xff] }
 0x758   : > { %v5604_v49 = vpop.f32.mrf.mxu1 }
 0x759   : > { %v5605_v53 = vadd.f32 %v5604_v49, %v12653_v54  ;;  %v6261_v48 = vadd.f32 %v6260_v11, %v5932_v40 }
 0x75a   : > { %v6591_v37 = vpop.f32.mrf.mxu0 }
 0x75b   : > { %v6590_v43 = vadd.f32 %v6589_v60, %v6261_v48  ;;  %v12660_v48 = vld [vmem:[#allocation82_spill] sm:$0xff] }
 0x75e   : > { %v5933_v47 = vpop.f32.mrf.mxu2 }
 0x75f   : > { %v5934_v8 = vadd.f32 %v5933_v47, %v5605_v53  ;;  %v6262_v1 = vpop.f32.mrf.mxu3 }
 0x760   : > { %v5607_v38 = vpop.f32.mrf.mxu1 }
 0x761   : > { %v6263_v30 = vadd.f32 %v6262_v1, %v5934_v8  ;;  %v5608_v28 = vadd.f32 %v5607_v38, %v12656_v4  ;;  %v8400_v4 = vld [vmem:[%s8588_s22 + $0x198] sm:$0xff] }
 0x762   : > { %v6594_v13 = vpop.f32.mrf.mxu0 }
 0x763   : > { %v6592_v26 = vadd.f32 %v6591_v37, %v6263_v30  ;;  %5646 = vmatmul.bf16.gmra.mxu1 %v12647_v45  ;;  %5975 = vmatmul.bf16.gmra.mxu2 %v8398_v20  ;;  %v12659_v37 = vld [vmem:[#allocation113_spill] sm:$0xff]  ;;  %v12661_v30 = vld [vmem:[#allocation180_spill] sm:$0xff] }
 0x764   : > { %6304 = vmatmul.bf16.gmra.mxu3 %v12654_v42 }
 0x765   : > { %6633 = vmatmul.bf16.gmra.mxu0 %v12655_v41  ;;  %v7992_v44 = vpack.c.bf16 %v6592_v26, %v6590_v43 }
 0x766   : > { %v5936_v31 = vpop.f32.mrf.mxu2 }
 0x767   : > { %8204 = vst [vmem:[%s11513_s27 + $0xd0] sm:$0xff] %v7992_v44   ;;  %v6265_v33 = vpop.f32.mrf.mxu3  ;;  %v5937_v2 = vadd.f32 %v5936_v31, %v5608_v28  ;;  %v12662_v28 = vld [vmem:[#allocation183_spill] sm:$0xff] }
 0x768   : > { %v5609_v24 = vpop.f32.mrf.mxu1 }
 0x769   : > { %v5610_v60 = vadd.f32 %v5609_v24, %v12657_v39  ;;  %v6266_v45 = vadd.f32 %v6265_v33, %v5937_v2 }
 0x76a   : > { %v6596_v10 = vpop.f32.mrf.mxu0 }
 0x76b   : > { %v6595_v11 = vadd.f32 %v6594_v13, %v6266_v45  ;;  %v12664_v45 = vld [vmem:[#allocation90_spill] sm:$0xff] }
 0x76e   : > { %v5938_v22 = vpop.f32.mrf.mxu2 }
 0x76f   : > { %v5939_v62 = vadd.f32 %v5938_v22, %v5610_v60  ;;  %v6267_v7 = vpop.f32.mrf.mxu3 }
 0x770   : > { %v5612_v35 = vpop.f32.mrf.mxu1 }
 0x771   : > { %v6268_v52 = vadd.f32 %v6267_v7, %v5939_v62  ;;  %v5613_v8 = vadd.f32 %v5612_v35, %v12660_v48  ;;  %v8401_v48 = vld [vmem:[%s8588_s22 + $0x1a4] sm:$0xff] }
 0x772   : > { %v6599_v21 = vpop.f32.mrf.mxu0 }
 0x773   : > { %v6597_v49 = vadd.f32 %v6596_v10, %v6268_v52  ;;  %5651 = vmatmul.bf16.gmra.mxu1 %v12651_v9  ;;  %5980 = vmatmul.bf16.gmra.mxu2 %v8399_v6  ;;  %v12663_v10 = vld [vmem:[#allocation9_spill] sm:$0xff]  ;;  %v12665_v52 = vld [vmem:[#allocation182_spill] sm:$0xff] }
 0x774   : > { %6309 = vmatmul.bf16.gmra.mxu3 %v12658_v36 }
 0x775   : > { %6638 = vmatmul.bf16.gmra.mxu0 %v12659_v37  ;;  %v7997_v40 = vpack.c.bf16 %v6597_v49, %v6595_v11 }
 0x776   : > { %v5941_v54 = vpop.f32.mrf.mxu2 }
 0x777   : > { %8205 = vst [vmem:[%s11513_s27 + $0xd8] sm:$0xff] %v7997_v40   ;;  %v6270_v53 = vpop.f32.mrf.mxu3  ;;  %v5942_v38 = vadd.f32 %v5941_v54, %v5613_v8  ;;  %v12666_v8 = vld [vmem:[#allocation185_spill] sm:$0xff] }
 0x778   : > { %v5614_v47 = vpop.f32.mrf.mxu1 }
 0x779   : > { %v5615_v13 = vadd.f32 %v5614_v47, %v12661_v30  ;;  %v6271_v9 = vadd.f32 %v6270_v53, %v5942_v38 }
 0x77a   : > { %v6601_v1 = vpop.f32.mrf.mxu0 }
 0x77b   : > { %v6600_v33 = vadd.f32 %v6599_v21, %v6271_v9  ;;  %v12668_v9 = vld [vmem:[#allocation99_spill] sm:$0xff] }
 0x77e   : > { %v5943_v43 = vpop.f32.mrf.mxu2 }
 0x77f   : > { %v5944_v26 = vadd.f32 %v5943_v43, %v5615_v13  ;;  %v6272_v20 = vpop.f32.mrf.mxu3 }
 0x780   : > { %v5617_v42 = vpop.f32.mrf.mxu1 }
 0x781   : > { %v6273_v44 = vadd.f32 %v6272_v20, %v5944_v26  ;;  %v5618_v62 = vadd.f32 %v5617_v42, %v12664_v45  ;;  %v8402_v45 = vld [vmem:[%s8588_s22 + $0x1ac] sm:$0xff] }
 0x782   : > { %v6604_v31 = vpop.f32.mrf.mxu0 }
 0x783   : > { %v6602_v24 = vadd.f32 %v6601_v1, %v6273_v44  ;;  %5656 = vmatmul.bf16.gmra.mxu1 %v12655_v41  ;;  %5985 = vmatmul.bf16.gmra.mxu2 %v8400_v4  ;;  %v12667_v1 = vld [vmem:[#allocation15_spill] sm:$0xff]  ;;  %v12669_v44 = vld [vmem:[#allocation184_spill] sm:$0xff] }
 0x784   : > { %6314 = vmatmul.bf16.gmra.mxu3 %v12662_v28 }
 0x785   : > { %6643 = vmatmul.bf16.gmra.mxu0 %v12663_v10  ;;  %v8002_v2 = vpack.c.bf16 %v6602_v24, %v6600_v33 }
 0x786   : > { %v5946_v39 = vpop.f32.mrf.mxu2 }
 0x787   : > { %8206 = vst [vmem:[%s11513_s27 + $0xe0] sm:$0xff] %v8002_v2   ;;  %v6275_v60 = vpop.f32.mrf.mxu3  ;;  %v5947_v35 = vadd.f32 %v5946_v39, %v5618_v62  ;;  %v12670_v62 = vld [vmem:[#allocation187_spill] sm:$0xff] }
 0x788   : > { %v5619_v22 = vpop.f32.mrf.mxu1 }
 0x789   : > { %v5620_v21 = vadd.f32 %v5619_v22, %v12665_v52  ;;  %v6276_v41 = vadd.f32 %v6275_v60, %v5947_v35 }
 0x78a   : > { %v6606_v7 = vpop.f32.mrf.mxu0 }
 0x78b   : > { %v6605_v53 = vadd.f32 %v6604_v31, %v6276_v41  ;;  %v12672_v41 = vld [vmem:[#allocation109_spill] sm:$0xff] }
 0x78e   : > { %v5948_v11 = vpop.f32.mrf.mxu2 }
 0x78f   : > { %v5949_v49 = vadd.f32 %v5948_v11, %v5620_v21  ;;  %v6277_v6 = vpop.f32.mrf.mxu3 }
 0x790   : > { %v5622_v36 = vpop.f32.mrf.mxu1 }
 0x791   : > { %v6278_v40 = vadd.f32 %v6277_v6, %v5949_v49  ;;  %v5623_v26 = vadd.f32 %v5622_v36, %v12668_v9  ;;  %v8403_v9 = vld [vmem:[%s8588_s22 + $0x1b8] sm:$0xff] }
 0x792   : > { %v6609_v54 = vpop.f32.mrf.mxu0 }
 0x793   : > { %v6607_v47 = vadd.f32 %v6606_v7, %v6278_v40  ;;  %5661 = vmatmul.bf16.gmra.mxu1 %v12659_v37  ;;  %5990 = vmatmul.bf16.gmra.mxu2 %v8401_v48  ;;  %v12671_v7 = vld [vmem:[#allocation21_spill] sm:$0xff]  ;;  %v12673_v40 = vld [vmem:[#allocation186_spill] sm:$0xff] }
 0x794   : > { %6319 = vmatmul.bf16.gmra.mxu3 %v12666_v8 }
 0x795   : > { %6648 = vmatmul.bf16.gmra.mxu0 %v12667_v1  ;;  %v8007_v38 = vpack.c.bf16 %v6607_v47, %v6605_v53 }
 0x796   : > { %v5951_v30 = vpop.f32.mrf.mxu2 }
 0x797   : > { %8207 = vst [vmem:[%s11513_s27 + $0xe8] sm:$0xff] %v8007_v38   ;;  %v6280_v13 = vpop.f32.mrf.mxu3  ;;  %v5952_v42 = vadd.f32 %v5951_v30, %v5623_v26  ;;  %v12674_v26 = vld [vmem:[#allocation189_spill] sm:$0xff] }
 0x798   : > { %v5624_v43 = vpop.f32.mrf.mxu1 }
 0x799   : > { %v5625_v31 = vadd.f32 %v5624_v43, %v12669_v44  ;;  %v6281_v37 = vadd.f32 %v6280_v13, %v5952_v42 }
 0x79a   : > { %v6611_v20 = vpop.f32.mrf.mxu0 }
 0x79b   : > { %v6610_v60 = vadd.f32 %v6609_v54, %v6281_v37  ;;  %v12676_v37 = vld [vmem:[#allocation6_spill] sm:$0xff] }
 0x79e   : > { %v5953_v33 = vpop.f32.mrf.mxu2 }
 0x79f   : > { %v5954_v24 = vadd.f32 %v5953_v33, %v5625_v31  ;;  %v6282_v4 = vpop.f32.mrf.mxu3 }
 0x7a0   : > { %v5627_v28 = vpop.f32.mrf.mxu1 }
 0x7a1   : > { %v6283_v2 = vadd.f32 %v6282_v4, %v5954_v24  ;;  %v5628_v49 = vadd.f32 %v5627_v28, %v12672_v41  ;;  %v8404_v41 = vld [vmem:[%s8588_s22 + $0x1c0] sm:$0xff] }
 0x7a2   : > { %v6614_v39 = vpop.f32.mrf.mxu0 }
 0x7a3   : > { %v6612_v22 = vadd.f32 %v6611_v20, %v6283_v2  ;;  %5666 = vmatmul.bf16.gmra.mxu1 %v12663_v10  ;;  %5995 = vmatmul.bf16.gmra.mxu2 %v8402_v45  ;;  %v12675_v20 = vld [vmem:[#allocation27_spill] sm:$0xff]  ;;  %v12677_v2 = vld [vmem:[#allocation188_spill] sm:$0xff] }
 0x7a4   : > { %6324 = vmatmul.bf16.gmra.mxu3 %v12670_v62 }
 0x7a5   : > { %6653 = vmatmul.bf16.gmra.mxu0 %v12671_v7  ;;  %v8012_v35 = vpack.c.bf16 %v6612_v22, %v6610_v60 }
 0x7a6   : > { %v5956_v52 = vpop.f32.mrf.mxu2 }
 0x7a7   : > { %8208 = vst [vmem:[%s11513_s27 + $0xf0] sm:$0xff] %v8012_v35   ;;  %v6285_v21 = vpop.f32.mrf.mxu3  ;;  %v5957_v36 = vadd.f32 %v5956_v52, %v5628_v49  ;;  %v12678_v49 = vld [vmem:[#allocation191_spill] sm:$0xff] }
 0x7a8   : > { %v5629_v11 = vpop.f32.mrf.mxu1 }
 0x7a9   : > { %v5630_v54 = vadd.f32 %v5629_v11, %v12673_v40  ;;  %v6286_v10 = vadd.f32 %v6285_v21, %v5957_v36 }
 0x7aa   : > { %v6616_v6 = vpop.f32.mrf.mxu0 }
 0x7ab   : > { %v6615_v13 = vadd.f32 %v6614_v39, %v6286_v10  ;;  %v12680_v10 = vld [vmem:[#allocation12_spill] sm:$0xff] }
 0x7ae   : > { %v5958_v53 = vpop.f32.mrf.mxu2 }
 0x7af   : > { %v5959_v47 = vadd.f32 %v5958_v53, %v5630_v54  ;;  %v6287_v48 = vpop.f32.mrf.mxu3 }
 0x7b0   : > { %v5632_v8 = vpop.f32.mrf.mxu1 }
 0x7b1   : > { %v6288_v38 = vadd.f32 %v6287_v48, %v5959_v47  ;;  %v5633_v24 = vadd.f32 %v5632_v8, %v12676_v37  ;;  %v8405_v37 = vld [vmem:[%s8588_s22 + $0x1cc] sm:$0xff] }
 0x7b2   : > { %v6619_v30 = vpop.f32.mrf.mxu0 }
 0x7b3   : > { %v6617_v43 = vadd.f32 %v6616_v6, %v6288_v38  ;;  %5671 = vmatmul.bf16.gmra.mxu1 %v12667_v1  ;;  %6000 = vmatmul.bf16.gmra.mxu2 %v8403_v9  ;;  %v12679_v6 = vld [vmem:[#allocation33_spill] sm:$0xff]  ;;  %v12681_v38 = vld [vmem:[#allocation190_spill] sm:$0xff] }
 0x7b4   : > { %6329 = vmatmul.bf16.gmra.mxu3 %v12674_v26 }
 0x7b5   : > { %6658 = vmatmul.bf16.gmra.mxu0 %v12675_v20  ;;  %v8017_v42 = vpack.c.bf16 %v6617_v43, %v6615_v13 }
 0x7b6   : > { %v5961_v44 = vpop.f32.mrf.mxu2 }
 0x7b7   : > { %8209 = vst [vmem:[%s11513_s27 + $0xf8] sm:$0xff] %v8017_v42   ;;  %v6290_v31 = vpop.f32.mrf.mxu3  ;;  %v5962_v28 = vadd.f32 %v5961_v44, %v5633_v24  ;;  %v12682_v24 = vld [vmem:[#allocation193_spill] sm:$0xff] }
 0x7b8   : > { %v5634_v33 = vpop.f32.mrf.mxu1 }
 0x7b9   : > { %v5635_v39 = vadd.f32 %v5634_v33, %v12677_v2  ;;  %v6291_v1 = vadd.f32 %v6290_v31, %v5962_v28 }
 0x7ba   : > { %v6621_v4 = vpop.f32.mrf.mxu0 }
 0x7bb   : > { %v6620_v21 = vadd.f32 %v6619_v30, %v6291_v1  ;;  %v12684_v1 = vld [vmem:[#allocation18_spill] sm:$0xff] }
 0x7be   : > { %v5963_v60 = vpop.f32.mrf.mxu2 }
 0x7bf   : > { %v5964_v22 = vadd.f32 %v5963_v60, %v5635_v39  ;;  %v6292_v45 = vpop.f32.mrf.mxu3 }
 0x7c0   : > { %v5637_v62 = vpop.f32.mrf.mxu1 }
 0x7c1   : > { %v6293_v35 = vadd.f32 %v6292_v45, %v5964_v22  ;;  %v5638_v47 = vadd.f32 %v5637_v62, %v12680_v10  ;;  %v8406_v10 = vld [vmem:[%s8588_s22 + $0x1d4] sm:$0xff] }
 0x7c2   : > { %v6624_v52 = vpop.f32.mrf.mxu0 }
 0x7c3   : > { %v6622_v11 = vadd.f32 %v6621_v4, %v6293_v35  ;;  %5676 = vmatmul.bf16.gmra.mxu1 %v12671_v7  ;;  %6005 = vmatmul.bf16.gmra.mxu2 %v8404_v41  ;;  %v12683_v4 = vld [vmem:[#allocation39_spill] sm:$0xff]  ;;  %v12685_v35 = vld [vmem:[#allocation192_spill] sm:$0xff] }
 0x7c4   : > { %6334 = vmatmul.bf16.gmra.mxu3 %v12678_v49 }
 0x7c5   : > { %6663 = vmatmul.bf16.gmra.mxu0 %v12679_v6  ;;  %v8022_v36 = vpack.c.bf16 %v6622_v11, %v6620_v21 }
 0x7c6   : > { %v5966_v40 = vpop.f32.mrf.mxu2 }
 0x7c7   : > { %8210 = vst [vmem:[%s11513_s27 + $0x100] sm:$0xff] %v8022_v36   ;;  %v6295_v54 = vpop.f32.mrf.mxu3  ;;  %v5967_v8 = vadd.f32 %v5966_v40, %v5638_v47  ;;  %v12686_v47 = vld [vmem:[#allocation195_spill] sm:$0xff] }
 0x7c8   : > { %v5639_v53 = vpop.f32.mrf.mxu1 }
 0x7c9   : > { %v5640_v30 = vadd.f32 %v5639_v53, %v12681_v38  ;;  %v6296_v7 = vadd.f32 %v6295_v54, %v5967_v8 }
 0x7ca   : > { %v6626_v48 = vpop.f32.mrf.mxu0 }
 0x7cb   : > { %v6625_v31 = vadd.f32 %v6624_v52, %v6296_v7  ;;  %v12688_v7 = vld [vmem:[#allocation24_spill] sm:$0xff] }
 0x7ce   : > { %v5968_v13 = vpop.f32.mrf.mxu2 }
 0x7cf   : > { %v5969_v43 = vadd.f32 %v5968_v13, %v5640_v30  ;;  %v6297_v9 = vpop.f32.mrf.mxu3 }
 0x7d0   : > { %v5642_v26 = vpop.f32.mrf.mxu1 }
 0x7d1   : > { %v6298_v42 = vadd.f32 %v6297_v9, %v5969_v43  ;;  %v5643_v22 = vadd.f32 %v5642_v26, %v12684_v1  ;;  %v8407_v1 = vld [vmem:[%s8588_s22 + $0x1e0] sm:$0xff] }
 0x7d2   : > { %v6629_v44 = vpop.f32.mrf.mxu0 }
 0x7d3   : > { %v6627_v33 = vadd.f32 %v6626_v48, %v6298_v42  ;;  %5681 = vmatmul.bf16.gmra.mxu1 %v12675_v20  ;;  %6010 = vmatmul.bf16.gmra.mxu2 %v8405_v37  ;;  %v12687_v48 = vld [vmem:[#allocation45_spill] sm:$0xff]  ;;  %v12689_v42 = vld [vmem:[#allocation194_spill] sm:$0xff] }
 0x7d4   : > { %6339 = vmatmul.bf16.gmra.mxu3 %v12682_v24 }
 0x7d5   : > { %6668 = vmatmul.bf16.gmra.mxu0 %v12683_v4  ;;  %v8027_v28 = vpack.c.bf16 %v6627_v33, %v6625_v31 }
 0x7d6   : > { %v5971_v2 = vpop.f32.mrf.mxu2 }
 0x7d7   : > { %8211 = vst [vmem:[%s11513_s27 + $0x108] sm:$0xff] %v8027_v28   ;;  %v6300_v39 = vpop.f32.mrf.mxu3  ;;  %v5972_v62 = vadd.f32 %v5971_v2, %v5643_v22  ;;  %v12690_v22 = vld [vmem:[#allocation197_spill] sm:$0xff] }
 0x7d8   : > { %v5644_v60 = vpop.f32.mrf.mxu1 }
 0x7d9   : > { %v5645_v52 = vadd.f32 %v5644_v60, %v12685_v35  ;;  %v6301_v20 = vadd.f32 %v6300_v39, %v5972_v62 }
 0x7da   : > { %v6631_v45 = vpop.f32.mrf.mxu0 }
 0x7db   : > { %v6630_v54 = vadd.f32 %v6629_v44, %v6301_v20  ;;  %v12692_v20 = vld [vmem:[#allocation30_spill] sm:$0xff] }
 0x7de   : > { %v5973_v21 = vpop.f32.mrf.mxu2 }
 0x7df   : > { %v5974_v11 = vadd.f32 %v5973_v21, %v5645_v52  ;;  %v6302_v41 = vpop.f32.mrf.mxu3 }
 0x7e0   : > { %v5647_v49 = vpop.f32.mrf.mxu1 }
 0x7e1   : > { %v6303_v36 = vadd.f32 %v6302_v41, %v5974_v11  ;;  %v5648_v43 = vadd.f32 %v5647_v49, %v12688_v7  ;;  %v8408_v7 = vld [vmem:[%s8588_s22 + $0x1e8] sm:$0xff] }
 0x7e2   : > { %v6634_v40 = vpop.f32.mrf.mxu0 }
 0x7e3   : > { %v6632_v53 = vadd.f32 %v6631_v45, %v6303_v36  ;;  %5686 = vmatmul.bf16.gmra.mxu1 %v12679_v6  ;;  %6015 = vmatmul.bf16.gmra.mxu2 %v8406_v10  ;;  %v12691_v45 = vld [vmem:[#allocation51_spill] sm:$0xff]  ;;  %v12693_v36 = vld [vmem:[#allocation196_spill] sm:$0xff] }
 0x7e4   : > { %6344 = vmatmul.bf16.gmra.mxu3 %v12686_v47 }
 0x7e5   : > { %6673 = vmatmul.bf16.gmra.mxu0 %v12687_v48  ;;  %v8032_v8 = vpack.c.bf16 %v6632_v53, %v6630_v54 }
 0x7e6   : > { %v5976_v38 = vpop.f32.mrf.mxu2 }
 0x7e7   : > { %8212 = vst [vmem:[%s11513_s27 + $0x110] sm:$0xff] %v8032_v8   ;;  %v6305_v30 = vpop.f32.mrf.mxu3  ;;  %v5977_v26 = vadd.f32 %v5976_v38, %v5648_v43  ;;  %v12694_v43 = vld [vmem:[#allocation199_spill] sm:$0xff] }
 0x7e8   : > { %v5649_v13 = vpop.f32.mrf.mxu1 }
 0x7e9   : > { %v5650_v44 = vadd.f32 %v5649_v13, %v12689_v42  ;;  %v6306_v6 = vadd.f32 %v6305_v30, %v5977_v26 }
 0x7ea   : > { %v6636_v9 = vpop.f32.mrf.mxu0 }
 0x7eb   : > { %v6635_v39 = vadd.f32 %v6634_v40, %v6306_v6  ;;  %v12696_v6 = vld [vmem:[#allocation36_spill] sm:$0xff] }
 0x7ee   : > { %v5978_v31 = vpop.f32.mrf.mxu2 }
 0x7ef   : > { %v5979_v33 = vadd.f32 %v5978_v31, %v5650_v44  ;;  %v6307_v37 = vpop.f32.mrf.mxu3 }
 0x7f0   : > { %v5652_v24 = vpop.f32.mrf.mxu1 }
 0x7f1   : > { %v6308_v28 = vadd.f32 %v6307_v37, %v5979_v33  ;;  %v5653_v11 = vadd.f32 %v5652_v24, %v12692_v20  ;;  %v8409_v20 = vld [vmem:[%s8588_s22 + $0x1f4] sm:$0xff] }
 0x7f2   : > { %v6639_v2 = vpop.f32.mrf.mxu0 }
 0x7f3   : > { %v6637_v60 = vadd.f32 %v6636_v9, %v6308_v28  ;;  %5691 = vmatmul.bf16.gmra.mxu1 %v12683_v4  ;;  %6020 = vmatmul.bf16.gmra.mxu2 %v8407_v1  ;;  %v12695_v9 = vld [vmem:[#allocation57_spill] sm:$0xff]  ;;  %v12697_v28 = vld [vmem:[#allocation198_spill] sm:$0xff] }
 0x7f4   : > { %6349 = vmatmul.bf16.gmra.mxu3 %v12690_v22 }
 0x7f5   : > { %6678 = vmatmul.bf16.gmra.mxu0 %v12691_v45  ;;  %v8037_v62 = vpack.c.bf16 %v6637_v60, %v6635_v39 }
 0x7f6   : > { %v5981_v35 = vpop.f32.mrf.mxu2 }
 0x7f7   : > { %8213 = vst [vmem:[%s11513_s27 + $0x118] sm:$0xff] %v8037_v62   ;;  %v6310_v52 = vpop.f32.mrf.mxu3  ;;  %v5982_v49 = vadd.f32 %v5981_v35, %v5653_v11  ;;  %v12698_v11 = vld [vmem:[#allocation201_spill] sm:$0xff] }
 0x7f8   : > { %v5654_v21 = vpop.f32.mrf.mxu1 }
 0x7f9   : > { %v5655_v40 = vadd.f32 %v5654_v21, %v12693_v36  ;;  %v6311_v4 = vadd.f32 %v6310_v52, %v5982_v49 }
 0x7fa   : > { %v6641_v41 = vpop.f32.mrf.mxu0 }
 0x7fb   : > { %v6640_v30 = vadd.f32 %v6639_v2, %v6311_v4  ;;  %v12700_v4 = vld [vmem:[#allocation42_spill] sm:$0xff] }
 0x7fe   : > { %v5983_v54 = vpop.f32.mrf.mxu2 }
 0x7ff   : > { %v5984_v53 = vadd.f32 %v5983_v54, %v5655_v40  ;;  %v6312_v10 = vpop.f32.mrf.mxu3 }
 0x800   : > { %v5657_v47 = vpop.f32.mrf.mxu1 }
 0x801   : > { %v6313_v8 = vadd.f32 %v6312_v10, %v5984_v53  ;;  %v5658_v33 = vadd.f32 %v5657_v47, %v12696_v6  ;;  %v8410_v6 = vld [vmem:[%s8588_s22 + $0x1fc] sm:$0xff] }
 0x802   : > { %v6644_v38 = vpop.f32.mrf.mxu0 }
 0x803   : > { %v6642_v13 = vadd.f32 %v6641_v41, %v6313_v8  ;;  %5696 = vmatmul.bf16.gmra.mxu1 %v12687_v48  ;;  %6025 = vmatmul.bf16.gmra.mxu2 %v8408_v7  ;;  %v12699_v41 = vld [vmem:[#allocation63_spill] sm:$0xff]  ;;  %v12701_v8 = vld [vmem:[#allocation200_spill] sm:$0xff] }
 0x804   : > { %6354 = vmatmul.bf16.gmra.mxu3 %v12694_v43 }
 0x805   : > { %6683 = vmatmul.bf16.gmra.mxu0 %v12695_v9  ;;  %v8042_v26 = vpack.c.bf16 %v6642_v13, %v6640_v30 }
 0x806   : > { %v5986_v42 = vpop.f32.mrf.mxu2 }
 0x807   : > { %8214 = vst [vmem:[%s11513_s27 + $0x120] sm:$0xff] %v8042_v26   ;;  %v6315_v44 = vpop.f32.mrf.mxu3  ;;  %v5987_v24 = vadd.f32 %v5986_v42, %v5658_v33  ;;  %v12702_v33 = vld [vmem:[#allocation203_spill] sm:$0xff] }
 0x808   : > { %v5659_v31 = vpop.f32.mrf.mxu1 }
 0x809   : > { %v5660_v2 = vadd.f32 %v5659_v31, %v12697_v28  ;;  %v6316_v48 = vadd.f32 %v6315_v44, %v5987_v24 }
 0x80a   : > { %v6646_v37 = vpop.f32.mrf.mxu0 }
 0x80b   : > { %v6645_v52 = vadd.f32 %v6644_v38, %v6316_v48  ;;  %v12704_v48 = vld [vmem:[#allocation48_spill] sm:$0xff] }
 0x80e   : > { %v5988_v39 = vpop.f32.mrf.mxu2 }
 0x80f   : > { %v5989_v60 = vadd.f32 %v5988_v39, %v5660_v2  ;;  %v6317_v1 = vpop.f32.mrf.mxu3 }
 0x810   : > { %v5662_v22 = vpop.f32.mrf.mxu1 }
 0x811   : > { %v6318_v62 = vadd.f32 %v6317_v1, %v5989_v60  ;;  %v5663_v53 = vadd.f32 %v5662_v22, %v12700_v4  ;;  %v8411_v4 = vld [vmem:[%s8588_s22 + $0x208] sm:$0xff] }
 0x812   : > { %v6649_v35 = vpop.f32.mrf.mxu0 }
 0x813   : > { %v6647_v21 = vadd.f32 %v6646_v37, %v6318_v62  ;;  %5701 = vmatmul.bf16.gmra.mxu1 %v12691_v45  ;;  %6030 = vmatmul.bf16.gmra.mxu2 %v8409_v20  ;;  %v12703_v37 = vld [vmem:[#allocation71_spill] sm:$0xff]  ;;  %v12705_v62 = vld [vmem:[#allocation202_spill] sm:$0xff] }
 0x814   : > { %6359 = vmatmul.bf16.gmra.mxu3 %v12698_v11 }
 0x815   : > { %6688 = vmatmul.bf16.gmra.mxu0 %v12699_v41  ;;  %v8047_v49 = vpack.c.bf16 %v6647_v21, %v6645_v52 }
 0x816   : > { %v5991_v36 = vpop.f32.mrf.mxu2 }
 0x817   : > { %8215 = vst [vmem:[%s11513_s27 + $0x128] sm:$0xff] %v8047_v49   ;;  %v6320_v40 = vpop.f32.mrf.mxu3  ;;  %v5992_v47 = vadd.f32 %v5991_v36, %v5663_v53  ;;  %v12706_v53 = vld [vmem:[#allocation205_spill] sm:$0xff] }
 0x818   : > { %v5664_v54 = vpop.f32.mrf.mxu1 }
 0x819   : > { %v5665_v38 = vadd.f32 %v5664_v54, %v12701_v8  ;;  %v6321_v45 = vadd.f32 %v6320_v40, %v5992_v47 }
 0x81a   : > { %v6651_v10 = vpop.f32.mrf.mxu0 }
 0x81b   : > { %v6650_v44 = vadd.f32 %v6649_v35, %v6321_v45  ;;  %v12708_v45 = vld [vmem:[#allocation54_spill] sm:$0xff] }
 0x81e   : > { %v5993_v30 = vpop.f32.mrf.mxu2 }
 0x81f   : > { %v5994_v13 = vadd.f32 %v5993_v30, %v5665_v38  ;;  %v6322_v7 = vpop.f32.mrf.mxu3 }
 0x820   : > { %v5667_v43 = vpop.f32.mrf.mxu1 }
 0x821   : > { %v6323_v26 = vadd.f32 %v6322_v7, %v5994_v13  ;;  %v5668_v60 = vadd.f32 %v5667_v43, %v12704_v48  ;;  %v8412_v48 = vld [vmem:[%s8588_s22 + $0x210] sm:$0xff] }
 0x822   : > { %v6654_v42 = vpop.f32.mrf.mxu0 }
 0x823   : > { %v6652_v31 = vadd.f32 %v6651_v10, %v6323_v26  ;;  %5706 = vmatmul.bf16.gmra.mxu1 %v12695_v9  ;;  %6035 = vmatmul.bf16.gmra.mxu2 %v8410_v6  ;;  %v12707_v10 = vld [vmem:[#allocation79_spill] sm:$0xff]  ;;  %v12709_v26 = vld [vmem:[#allocation204_spill] sm:$0xff] }
 0x824   : > { %6364 = vmatmul.bf16.gmra.mxu3 %v12702_v33 }
 0x825   : > { %6693 = vmatmul.bf16.gmra.mxu0 %v12703_v37  ;;  %v8052_v24 = vpack.c.bf16 %v6652_v31, %v6650_v44 }
 0x826   : > { %v5996_v28 = vpop.f32.mrf.mxu2 }
 0x827   : > { %8216 = vst [vmem:[%s11513_s27 + $0x130] sm:$0xff] %v8052_v24   ;;  %v6325_v2 = vpop.f32.mrf.mxu3  ;;  %v5997_v22 = vadd.f32 %v5996_v28, %v5668_v60  ;;  %v12710_v60 = vld [vmem:[#allocation207_spill] sm:$0xff] }
 0x828   : > { %v5669_v39 = vpop.f32.mrf.mxu1 }
 0x829   : > { %v5670_v35 = vadd.f32 %v5669_v39, %v12705_v62  ;;  %v6326_v9 = vadd.f32 %v6325_v2, %v5997_v22 }
 0x82a   : > { %v6656_v1 = vpop.f32.mrf.mxu0 }
 0x82b   : > { %v6655_v40 = vadd.f32 %v6654_v42, %v6326_v9  ;;  %v12712_v9 = vld [vmem:[#allocation60_spill] sm:$0xff] }
 0x82e   : > { %v5998_v52 = vpop.f32.mrf.mxu2 }
 0x82f   : > { %v5999_v21 = vadd.f32 %v5998_v52, %v5670_v35  ;;  %v6327_v20 = vpop.f32.mrf.mxu3 }
 0x830   : > { %v5672_v11 = vpop.f32.mrf.mxu1 }
 0x831   : > { %v6328_v49 = vadd.f32 %v6327_v20, %v5999_v21  ;;  %v5673_v13 = vadd.f32 %v5672_v11, %v12708_v45  ;;  %v8413_v45 = vld [vmem:[%s8588_s22 + $0x21c] sm:$0xff] }
 0x832   : > { %v6659_v36 = vpop.f32.mrf.mxu0 }
 0x833   : > { %v6657_v54 = vadd.f32 %v6656_v1, %v6328_v49  ;;  %5711 = vmatmul.bf16.gmra.mxu1 %v12699_v41  ;;  %6040 = vmatmul.bf16.gmra.mxu2 %v8411_v4  ;;  %v12711_v1 = vld [vmem:[#allocation87_spill] sm:$0xff]  ;;  %v12713_v49 = vld [vmem:[#allocation206_spill] sm:$0xff] }
 0x834   : > { %6369 = vmatmul.bf16.gmra.mxu3 %v12706_v53 }
 0x835   : > { %6698 = vmatmul.bf16.gmra.mxu0 %v12707_v10  ;;  %v8057_v47 = vpack.c.bf16 %v6657_v54, %v6655_v40 }
 0x836   : > { %v6001_v8 = vpop.f32.mrf.mxu2 }
 0x837   : > { %8217 = vst [vmem:[%s11513_s27 + $0x138] sm:$0xff] %v8057_v47   ;;  %v6330_v38 = vpop.f32.mrf.mxu3  ;;  %v6002_v43 = vadd.f32 %v6001_v8, %v5673_v13  ;;  %v12714_v13 = vld [vmem:[#allocation209_spill] sm:$0xff] }
 0x838   : > { %v5674_v30 = vpop.f32.mrf.mxu1 }
 0x839   : > { %v5675_v42 = vadd.f32 %v5674_v30, %v12709_v26  ;;  %v6331_v41 = vadd.f32 %v6330_v38, %v6002_v43 }
 0x83a   : > { %v6661_v7 = vpop.f32.mrf.mxu0 }
 0x83b   : > { %v6660_v2 = vadd.f32 %v6659_v36, %v6331_v41  ;;  %v12716_v41 = vld [vmem:[#allocation68_spill] sm:$0xff] }
 0x83e   : > { %v6003_v44 = vpop.f32.mrf.mxu2 }
 0x83f   : > { %v6004_v31 = vadd.f32 %v6003_v44, %v5675_v42  ;;  %v6332_v6 = vpop.f32.mrf.mxu3 }
 0x840   : > { %v5677_v33 = vpop.f32.mrf.mxu1 }
 0x841   : > { %v6333_v24 = vadd.f32 %v6332_v6, %v6004_v31  ;;  %v5678_v21 = vadd.f32 %v5677_v33, %v12712_v9  ;;  %v8414_v9 = vld [vmem:[%s8588_s22 + $0x224] sm:$0xff] }
 0x842   : > { %v6664_v28 = vpop.f32.mrf.mxu0 }
 0x843   : > { %v6662_v39 = vadd.f32 %v6661_v7, %v6333_v24  ;;  %5716 = vmatmul.bf16.gmra.mxu1 %v12703_v37  ;;  %6045 = vmatmul.bf16.gmra.mxu2 %v8412_v48  ;;  %v12715_v7 = vld [vmem:[#allocation96_spill] sm:$0xff] }
 0x844   : > { %6374 = vmatmul.bf16.gmra.mxu3 %v12710_v60  ;;  %v12717_v24 = vld [vmem:[#allocation208_spill] sm:$0xff] }
 0x845   : > { %6703 = vmatmul.bf16.gmra.mxu0 %v12711_v1  ;;  %v8062_v22 = vpack.c.bf16 %v6662_v39, %v6660_v2 }
 0x846   : > { %v6006_v62 = vpop.f32.mrf.mxu2 }
 0x847   : > { %8218 = vst [vmem:[%s11513_s27 + $0x140] sm:$0xff] %v8062_v22   ;;  %v6335_v35 = vpop.f32.mrf.mxu3  ;;  %v6007_v11 = vadd.f32 %v6006_v62, %v5678_v21  ;;  %v12718_v21 = vld [vmem:[#allocation106_spill] sm:$0xff] }
 0x848   : > { %v5679_v52 = vpop.f32.mrf.mxu1 }
 0x849   : > { %v5680_v36 = vadd.f32 %v5679_v52, %v12713_v49  ;;  %v6336_v37 = vadd.f32 %v6335_v35, %v6007_v11 }
 0x84a   : > { %v6666_v20 = vpop.f32.mrf.mxu0 }
 0x84b   : > { %v6665_v38 = vadd.f32 %v6664_v28, %v6336_v37 }
 0x84e   : > { %v6008_v40 = vpop.f32.mrf.mxu2 }
 0x84f   : > { %v6009_v54 = vadd.f32 %v6008_v40, %v5680_v36  ;;  %v6337_v4 = vpop.f32.mrf.mxu3  ;;  %v12719_v40 = vld [vmem:[#allocation76_spill] sm:$0xff] }
 0x850   : > { %v5682_v53 = vpop.f32.mrf.mxu1 }
 0x851   : > { %v6338_v47 = vadd.f32 %v6337_v4, %v6009_v54  ;;  %v5683_v31 = vadd.f32 %v5682_v53, %v12716_v41  ;;  %v12720_v53 = vld [vmem:[#allocation210_spill] sm:$0xff]  ;;  %v12722_v41 = vld [vmem:[#allocation115_spill] sm:$0xff] }
 0x852   : > { %v6669_v8 = vpop.f32.mrf.mxu0 }
 0x853   : > { %v6667_v30 = vadd.f32 %v6666_v20, %v6338_v47  ;;  %5721 = vmatmul.bf16.gmra.mxu1 %v12707_v10  ;;  %6050 = vmatmul.bf16.gmra.mxu2 %v8413_v45 }
 0x854   : > { %6379 = vmatmul.bf16.gmra.mxu3 %v12714_v13 }
 0x855   : > { %6708 = vmatmul.bf16.gmra.mxu0 %v12715_v7  ;;  %v8067_v43 = vpack.c.bf16 %v6667_v30, %v6665_v38 }
 0x856   : > { %v6011_v26 = vpop.f32.mrf.mxu2 }
 0x857   : > { %8219 = vst [vmem:[%s11513_s27 + $0x148] sm:$0xff] %v8067_v43   ;;  %v6340_v42 = vpop.f32.mrf.mxu3  ;;  %v6012_v33 = vadd.f32 %v6011_v26, %v5683_v31 }
 0x858   : > { %v5684_v44 = vpop.f32.mrf.mxu1 }
 0x859   : > { %v5685_v28 = vadd.f32 %v5684_v44, %v12717_v24  ;;  %v6341_v10 = vadd.f32 %v6340_v42, %v6012_v33  ;;  %v8415_v42 = vld [vmem:[%s8588_s22 + $0x230] sm:$0xff]  ;;  %v12721_v44 = vld [vmem:[#allocation212_spill] sm:$0xff] }
 0x85a   : > { %v6671_v6 = vpop.f32.mrf.mxu0 }
 0x85b   : > { %v6670_v35 = vadd.f32 %v6669_v8, %v6341_v10 }
 0x85e   : > { %v6013_v2 = vpop.f32.mrf.mxu2 }
 0x85f   : > { %v6014_v39 = vadd.f32 %v6013_v2, %v5685_v28  ;;  %v6342_v48 = vpop.f32.mrf.mxu3  ;;  %v12723_v28 = vld [vmem:[#allocation84_spill] sm:$0xff] }
 0x860   : > { %v5687_v60 = vpop.f32.mrf.mxu1 }
 0x861   : > { %v6343_v22 = vadd.f32 %v6342_v48, %v6014_v39  ;;  %v5688_v37 = vadd.f32 %v5687_v60, %v12719_v40  ;;  %v12724_v48 = vld [vmem:[#allocation211_spill] sm:$0xff]  ;;  %v12725_v40 = vld [vmem:[#allocation214_spill] sm:$0xff] }
 0x862   : > { %v6674_v62 = vpop.f32.mrf.mxu0 }
 0x863   : > { %v6672_v52 = vadd.f32 %v6671_v6, %v6343_v22  ;;  %5726 = vmatmul.bf16.gmra.mxu1 %v12711_v1  ;;  %6055 = vmatmul.bf16.gmra.mxu2 %v8414_v9 }
 0x864   : > { %6384 = vmatmul.bf16.gmra.mxu3 %v11061_v3 }
 0x865   : > { %6713 = vmatmul.bf16.gmra.mxu0 %v12718_v21  ;;  %v8072_v20 = vpack.c.bf16 %v6672_v52, %v6670_v35 }
 0x866   : > { %v6016_v11 = vpop.f32.mrf.mxu2 }
 0x867   : > { %8220 = vst [vmem:[%s11513_s27 + $0x150] sm:$0xff] %v8072_v20   ;;  %v6345_v49 = vpop.f32.mrf.mxu3  ;;  %v6017_v4 = vadd.f32 %v6016_v11, %v5688_v37  ;;  %v12726_v37 = vld [vmem:[#allocation10_spill] sm:$0xff] }
 0x868   : > { %v5689_v36 = vpop.f32.mrf.mxu1 }
 0x869   : > { %v5690_v47 = vadd.f32 %v5689_v36, %v12720_v53  ;;  %v6346_v1 = vadd.f32 %v6345_v49, %v6017_v4  ;;  %v8416_v36 = vld [vmem:[%s8588_s22 + $0x238] sm:$0xff] }
 0x86a   : > { %v6676_v54 = vpop.f32.mrf.mxu0 }
 0x86b   : > { %v6675_v43 = vadd.f32 %v6674_v62, %v6346_v1 }
 0x86e   : > { %v6018_v8 = vpop.f32.mrf.mxu2 }
 0x86f   : > { %v6019_v38 = vadd.f32 %v6018_v8, %v5690_v47  ;;  %v6347_v30 = vpop.f32.mrf.mxu3  ;;  %v12727_v8 = vld [vmem:[#allocation92_spill] sm:$0xff] }
 0x870   : > { %v5692_v3 = vpop.f32.mrf.mxu1 }
 0x871   : > { %v6348_v45 = vadd.f32 %v6347_v30, %v6019_v38  ;;  %v5693_v2 = vadd.f32 %v5692_v3, %v12723_v28  ;;  %v12728_v3 = vld [vmem:[#allocation213_spill] sm:$0xff]  ;;  %v12729_v28 = vld [vmem:[#allocation216_spill] sm:$0xff] }
 0x872   : > { %v6679_v13 = vpop.f32.mrf.mxu0 }
 0x873   : > { %v6677_v26 = vadd.f32 %v6676_v54, %v6348_v45  ;;  %5731 = vmatmul.bf16.gmra.mxu1 %v12715_v7  ;;  %6060 = vmatmul.bf16.gmra.mxu2 %v8415_v42 }
 0x874   : > { %6389 = vmatmul.bf16.gmra.mxu3 %v12721_v44 }
 0x875   : > { %6718 = vmatmul.bf16.gmra.mxu0 %v12722_v41  ;;  %v8077_v31 = vpack.c.bf16 %v6677_v26, %v6675_v43 }
 0x876   : > { %v6021_v6 = vpop.f32.mrf.mxu2 }
 0x877   : > { %8221 = vst [vmem:[%s11513_s27 + $0x158] sm:$0xff] %v8077_v31   ;;  %v6350_v33 = vpop.f32.mrf.mxu3  ;;  %v6022_v39 = vadd.f32 %v6021_v6, %v5693_v2  ;;  %v12730_v2 = vld [vmem:[#allocation16_spill] sm:$0xff] }
 0x878   : > { %v5694_v24 = vpop.f32.mrf.mxu1 }
 0x879   : > { %v5695_v60 = vadd.f32 %v5694_v24, %v12724_v48  ;;  %v6351_v7 = vadd.f32 %v6350_v33, %v6022_v39  ;;  %v8417_v24 = vld [vmem:[%s8588_s22 + $0x244] sm:$0xff] }
 0x87a   : > { %v6681_v10 = vpop.f32.mrf.mxu0 }
 0x87b   : > { %v6680_v11 = vadd.f32 %v6679_v13, %v6351_v7 }
 0x87e   : > { %v6023_v22 = vpop.f32.mrf.mxu2 }
 0x87f   : > { %v6024_v62 = vadd.f32 %v6023_v22, %v5695_v60  ;;  %v6352_v35 = vpop.f32.mrf.mxu3  ;;  %v12731_v22 = vld [vmem:[#allocation102_spill] sm:$0xff] }
 0x880   : > { %v5697_v52 = vpop.f32.mrf.mxu1 }
 0x881   : > { %v6353_v9 = vadd.f32 %v6352_v35, %v6024_v62  ;;  %v5698_v1 = vadd.f32 %v5697_v52, %v12727_v8  ;;  %v12732_v52 = vld [vmem:[#allocation215_spill] sm:$0xff]  ;;  %v12733_v8 = vld [vmem:[#allocation218_spill] sm:$0xff] }
 0x882   : > { %v6684_v20 = vpop.f32.mrf.mxu0 }
 0x883   : > { %v6682_v49 = vadd.f32 %v6681_v10, %v6353_v9  ;;  %5736 = vmatmul.bf16.gmra.mxu1 %v12718_v21  ;;  %6065 = vmatmul.bf16.gmra.mxu2 %v8416_v36 }
 0x884   : > { %6394 = vmatmul.bf16.gmra.mxu3 %v12725_v40 }
 0x885   : > { %6723 = vmatmul.bf16.gmra.mxu0 %v12726_v37  ;;  %v8082_v54 = vpack.c.bf16 %v6682_v49, %v6680_v11 }
 0x886   : > { %v6026_v4 = vpop.f32.mrf.mxu2 }
 0x887   : > { %8222 = vst [vmem:[%s11513_s27 + $0x160] sm:$0xff] %v8082_v54   ;;  %v6355_v53 = vpop.f32.mrf.mxu3  ;;  %v6027_v30 = vadd.f32 %v6026_v4, %v5698_v1  ;;  %v12734_v1 = vld [vmem:[#allocation22_spill] sm:$0xff] }
 0x888   : > { %v5699_v47 = vpop.f32.mrf.mxu1 }
 0x889   : > { %v5700_v45 = vadd.f32 %v5699_v47, %v12728_v3  ;;  %v6356_v21 = vadd.f32 %v6355_v53, %v6027_v30  ;;  %v8418_v47 = vld [vmem:[%s8588_s22 + $0x24c] sm:$0xff] }
 0x88a   : > { %v6686_v38 = vpop.f32.mrf.mxu0 }
 0x88b   : > { %v6685_v6 = vadd.f32 %v6684_v20, %v6356_v21 }
 0x88e   : > { %v6028_v13 = vpop.f32.mrf.mxu2 }
 0x88f   : > { %v6029_v43 = vadd.f32 %v6028_v13, %v5700_v45  ;;  %v6357_v26 = vpop.f32.mrf.mxu3  ;;  %v12735_v13 = vld [vmem:[#allocation111_spill] sm:$0xff] }
 0x890   : > { %v5702_v42 = vpop.f32.mrf.mxu1 }
 0x891   : > { %v6358_v44 = vadd.f32 %v6357_v26, %v6029_v43  ;;  %v5703_v7 = vadd.f32 %v5702_v42, %v12731_v22  ;;  %v12736_v42 = vld [vmem:[#allocation217_spill] sm:$0xff]  ;;  %v12737_v22 = vld [vmem:[#allocation220_spill] sm:$0xff] }
 0x892   : > { %v6689_v31 = vpop.f32.mrf.mxu0 }
 0x893   : > { %v6687_v33 = vadd.f32 %v6686_v38, %v6358_v44  ;;  %5741 = vmatmul.bf16.gmra.mxu1 %v12722_v41  ;;  %6070 = vmatmul.bf16.gmra.mxu2 %v8417_v24 }
 0x894   : > { %6399 = vmatmul.bf16.gmra.mxu3 %v12729_v28 }
 0x895   : > { %6728 = vmatmul.bf16.gmra.mxu0 %v12730_v2  ;;  %v8087_v10 = vpack.c.bf16 %v6687_v33, %v6685_v6 }
 0x896   : > { %v6031_v39 = vpop.f32.mrf.mxu2 }
 0x897   : > { %8223 = vst [vmem:[%s11513_s27 + $0x168] sm:$0xff] %v8087_v10   ;;  %v6360_v48 = vpop.f32.mrf.mxu3  ;;  %v6032_v35 = vadd.f32 %v6031_v39, %v5703_v7  ;;  %v12738_v7 = vld [vmem:[#allocation28_spill] sm:$0xff] }
 0x898   : > { %v5704_v60 = vpop.f32.mrf.mxu1 }
 0x899   : > { %v5705_v9 = vadd.f32 %v5704_v60, %v12732_v52  ;;  %v6361_v41 = vadd.f32 %v6360_v48, %v6032_v35  ;;  %v8419_v60 = vld [vmem:[%s8588_s22 + $0x258] sm:$0xff] }
 0x89a   : > { %v6691_v62 = vpop.f32.mrf.mxu0 }
 0x89b   : > { %v6690_v4 = vadd.f32 %v6689_v31, %v6361_v41 }
 0x89e   : > { %v6033_v20 = vpop.f32.mrf.mxu2 }
 0x89f   : > { %v6034_v11 = vadd.f32 %v6033_v20, %v5705_v9  ;;  %v6362_v49 = vpop.f32.mrf.mxu3  ;;  %v12739_v20 = vld [vmem:[#allocation7_spill] sm:$0xff] }
 0x8a0   : > { %v5707_v36 = vpop.f32.mrf.mxu1 }
 0x8a1   : > { %v6363_v40 = vadd.f32 %v6362_v49, %v6034_v11  ;;  %v5708_v21 = vadd.f32 %v5707_v36, %v12735_v13  ;;  %v12740_v36 = vld [vmem:[#allocation219_spill] sm:$0xff] }
 0x8a2   : > { %v6694_v54 = vpop.f32.mrf.mxu0 }
 0x8a3   : > { %v6692_v53 = vadd.f32 %v6691_v62, %v6363_v40  ;;  %5746 = vmatmul.bf16.gmra.mxu1 %v12726_v37  ;;  %6075 = vmatmul.bf16.gmra.mxu2 %v8418_v47 }
 0x8a4   : > { %6404 = vmatmul.bf16.gmra.mxu3 %v12733_v8 }
 0x8a5   : > { %6733 = vmatmul.bf16.gmra.mxu0 %v12734_v1  ;;  %v8092_v38 = vpack.c.bf16 %v6692_v53, %v6690_v4 }
 0x8a6   : > { %v6036_v30 = vpop.f32.mrf.mxu2 }
 0x8a7   : > { %8224 = vst [vmem:[%s11513_s27 + $0x170] sm:$0xff] %v8092_v38   ;;  %v6365_v3 = vpop.f32.mrf.mxu3  ;;  %v6037_v26 = vadd.f32 %v6036_v30, %v5708_v21 }
 0x8a8   : > { %v5709_v45 = vpop.f32.mrf.mxu1 }
 0x8a9   : > { %v5710_v44 = vadd.f32 %v5709_v45, %v12736_v42  ;;  %v6366_v37 = vadd.f32 %v6365_v3, %v6037_v26  ;;  %v8420_v45 = vld [vmem:[%s8588_s22 + $0x260] sm:$0xff] }
 0x8aa   : > { %v6696_v43 = vpop.f32.mrf.mxu0  ;;  %v12741_v42 = vld [vmem:[#allocation13_spill] sm:$0xff] }
 0x8ab   : > { %v6695_v39 = vadd.f32 %v6694_v54, %v6366_v37 }
 0x8ae   : > { %v6038_v31 = vpop.f32.mrf.mxu2 }
 0x8af   : > { %v6039_v6 = vadd.f32 %v6038_v31, %v5710_v44  ;;  %v6367_v33 = vpop.f32.mrf.mxu3 }
 0x8b0   : > { %v5712_v24 = vpop.f32.mrf.mxu1 }
 0x8b1   : > { %v6368_v28 = vadd.f32 %v6367_v33, %v6039_v6  ;;  %v5713_v41 = vadd.f32 %v5712_v24, %v12739_v20  ;;  %v12742_v6 = vld [vmem:[#allocation221_spill] sm:$0xff] }
 0x8b2   : > { %v6699_v10 = vpop.f32.mrf.mxu0 }
 0x8b3   : > { %v6697_v48 = vadd.f32 %v6696_v43, %v6368_v28  ;;  %5751 = vmatmul.bf16.gmra.mxu1 %v12730_v2  ;;  %6080 = vmatmul.bf16.gmra.mxu2 %v8419_v60 }
 0x8b4   : > { %6409 = vmatmul.bf16.gmra.mxu3 %v12737_v22 }
 0x8b5   : > { %6738 = vmatmul.bf16.gmra.mxu0 %v12738_v7  ;;  %v8097_v62 = vpack.c.bf16 %v6697_v48, %v6695_v39 }
 0x8b6   : > { %v6041_v35 = vpop.f32.mrf.mxu2 }
 0x8b7   : > { %8225 = vst [vmem:[%s11513_s27 + $0x178] sm:$0xff] %v8097_v62   ;;  %v6370_v52 = vpop.f32.mrf.mxu3  ;;  %v6042_v49 = vadd.f32 %v6041_v35, %v5713_v41  ;;  %v8421_v62 = vld [vmem:[%s8588_s22 + $0x26c] sm:$0xff] }
 0x8b8   : > { %v5714_v9 = vpop.f32.mrf.mxu1  ;;  %v12743_v41 = vld [vmem:[#allocation19_spill] sm:$0xff] }
 0x8b9   : > { %v5715_v40 = vadd.f32 %v5714_v9, %v12740_v36  ;;  %v6371_v2 = vadd.f32 %v6370_v52, %v6042_v49 }
 0x8ba   : > { %v6701_v11 = vpop.f32.mrf.mxu0 }
 0x8bb   : > { %v6700_v30 = vadd.f32 %v6699_v10, %v6371_v2 }
 0x8be   : > { %v6043_v54 = vpop.f32.mrf.mxu2 }
 0x8bf   : > { %v6044_v4 = vadd.f32 %v6043_v54, %v5715_v40  ;;  %v6372_v53 = vpop.f32.mrf.mxu3  ;;  %v12744_v40 = vld [vmem:[#allocation222_spill] sm:$0xff] }
 0x8c0   : > { %v5717_v47 = vpop.f32.mrf.mxu1 }
 0x8c1   : > { %v6373_v8 = vadd.f32 %v6372_v53, %v6044_v4  ;;  %v5718_v44 = vadd.f32 %v5717_v47, %v12741_v42 }
 0x8c2   : > { %v6704_v38 = vpop.f32.mrf.mxu0 }
 0x8c3   : > { %v6702_v3 = vadd.f32 %v6701_v11, %v6373_v8  ;;  %5756 = vmatmul.bf16.gmra.mxu1 %v12734_v1  ;;  %6085 = vmatmul.bf16.gmra.mxu2 %v8420_v45 }
 0x8c4   : > { %6414 = vmatmul.bf16.gmra.mxu3 %v11293_v58 }
 0x8c5   : > { %6743 = vmatmul.bf16.gmra.mxu0 %v11353_v61  ;;  %v8102_v13 = vpack.c.bf16 %v6702_v3, %v6700_v30 }
 0x8c6   : > { %v6046_v21 = vpop.f32.mrf.mxu2 }
 0x8c7   : > { %8226 = vst [vmem:[%s11513_s27 + $0x180] sm:$0xff] %v8102_v13   ;;  %v6375_v43 = vpop.f32.mrf.mxu3  ;;  %v6047_v37 = vadd.f32 %v6046_v21, %v5718_v44  ;;  %v8423_v13 = vld [vmem:[%s8588_s22 + $0x274] sm:$0xff]  ;;  %v8425_v44 = vld [vmem:[%s8588_s22 + $0x288] sm:$0xf] }
 0x8c8   : > { %v5719_v26 = vpop.f32.mrf.mxu1 }
 0x8c9   : > { %v5720_v33 = vadd.f32 %v5719_v26, %v12742_v6  ;;  %v6376_v1 = vadd.f32 %v6375_v43, %v6047_v37  ;;  %v8424_v43 = vld [vmem:[%s8588_s22 + $0x280] sm:$0xf] }
 0x8ca   : > { %v6706_v31 = vpop.f32.mrf.mxu0  ;;  %v7151_v26 = vrot.slane %v8424_v43, 9 }
 0x8cb   : > { %v6705_v60 = vadd.f32 %v6704_v38, %v6376_v1  ;;  %v8422_v38 = vld [vmem:[%s8588_s22 + $0x284] sm:$0xf] }
 0x8cc   : > { %v2353_v30 = vrot.slane %v8422_v38, 5  ;;  %v8428_v38 = vld [vmem:[%s8588_s22 + $0x290] sm:$0x1] }
 0x8ce   : > { %v6048_v24 = vpop.f32.mrf.mxu2  ;;  %v2355_v42 = vrot.slane %v2353_v30, 4 }
 0x8cf   : > { %v6049_v28 = vadd.f32 %v6048_v24, %v5720_v33  ;;  %v6377_v10 = vpop.f32.mrf.mxu3  ;;  %v12745_v24 = vld [vmem:[#allocation25_spill] sm:$0xff] }
 0x8d0   : > { %v5722_v58 = vpop.f32.mrf.mxu1 }
 0x8d1   : > { %v6378_v39 = vadd.f32 %v6377_v10, %v6049_v28  ;;  %v5723_v11 = vadd.f32 %v5722_v58, %v12743_v41  ;;  %v2354_v28 = vsel %vm8933_vm5, %v7151_v26, %v2353_v30  ;;  %v2362_v30 = vrot.slane %v8428_v38, 5 }
 0x8d2   : > { %v6709_v48 = vpop.f32.mrf.mxu0  ;;  %v3210_v58 = vunpack.c.l.b16 %v2354_v28 }
 0x8d3   : > { %v6707_v22 = vadd.f32 %v6706_v31, %v6378_v39  ;;  %5761 = vmatmul.bf16.gmra.mxu1 %v12738_v7  ;;  %6090 = vmatmul.bf16.gmra.mxu2 %v8421_v62  ;;  %v2356_v31 = vrot.slane %v8425_v44, 5 }
 0x8d4   : > { %6419 = vmatmul.bf16.gmra.mxu3 %v11329_v55 }
 0x8d5   : > { %6748 = vmatmul.bf16.gmra.mxu0 %v11380_v17  ;;  %v8107_v35 = vpack.c.bf16 %v6707_v22, %v6705_v60 }
 0x8d6   : > { %v6051_v52 = vpop.f32.mrf.mxu2 }
 0x8d7   : > { %8227 = vst [vmem:[%s11513_s27 + $0x188] sm:$0xff] %v8107_v35   ;;  %v6380_v9 = vpop.f32.mrf.mxu3  ;;  %v6052_v36 = vadd.f32 %v6051_v52, %v5723_v11 }
 0x8d8   : > { %v5724_v20 = vpop.f32.mrf.mxu1 }
 0x8d9   : > { %v5725_v54 = vadd.f32 %v5724_v20, %v12744_v40  ;;  %v6381_v2 = vadd.f32 %v6380_v9, %v6052_v36 }
 0x8da   : > { %v6711_v49 = vpop.f32.mrf.mxu0 }
 0x8db   : > { %v6710_v3 = vadd.f32 %v6709_v48, %v6381_v2  ;;  %v12746_v48 = vld [vmem:[#allocation223_spill] sm:$0xff] }
 0x8dc   : > { %v11881_v2 = vld [vmem:[%s8588_s22 + $0x294] sm:$0xf] }
 0x8de   : > { %v6053_v7 = vpop.f32.mrf.mxu2 }
 0x8df   : > { %v6054_v4 = vadd.f32 %v6053_v7, %v5725_v54  ;;  %v6382_v55 = vpop.f32.mrf.mxu3  ;;  %v8427_v7 = vld [vmem:[%s8588_s22 + $0x280] sm:$0xff] }
 0x8e0   : > { %v5727_v53 = vpop.f32.mrf.mxu1 }
 0x8e1   : > { %v6383_v47 = vadd.f32 %v6382_v55, %v6054_v4  ;;  %v5728_v1 = vadd.f32 %v5727_v53, %v12745_v24  ;;  %v308_v4 = vld [vmem:[%s8588_s22 + $0x298] sm:$0xf]  ;;  %v2358_v53 = vrot.slane %v2356_v31, 4 }
 0x8e2   : > { %v6714_v8 = vpop.f32.mrf.mxu0 }
 0x8e3   : > { %v6712_v45 = vadd.f32 %v6711_v49, %v6383_v47  ;;  %5766 = vmatmul.bf16.gmra.mxu1 %v11353_v61  ;;  %6095 = vmatmul.bf16.gmra.mxu2 %v8423_v13  ;;  %v8426_v49 = vld [vmem:[%s8588_s22 + $0x28c] sm:$0xf]  ;;  %v2374_v13 = vshll.u32 %v308_v4, 16 }
 0x8e4   : > { %6424 = vmatmul.bf16.gmra.mxu3 %v11356_v46  ;;  %v2357_v46 = vsel %vm8933_vm5, %v2355_v42, %v2356_v31  ;;  %v2359_v36 = vrot.slane %v8426_v49, 5 }
 0x8e5   : > { %6753 = vmatmul.bf16.gmra.mxu0 %v11404_v32  ;;  %v8112_v21 = vpack.c.bf16 %v6712_v45, %v6710_v3  ;;  %v3211_v39 = vunpack.c.l.b16 %v2357_v46  ;;  %v2368_v45 = vshll.u32 %v11881_v2, 16  ;;  %v2376_v24 = vrot.slane %v2374_v13, 5  ;;  %v11896_v46 = vld [vmem:[%s8588_s22 + $0x29c] sm:$0xf] }
 0x8e6   : > { %v6056_v37 = vpop.f32.mrf.mxu2  ;;  %v2361_v47 = vrot.slane %v2359_v36, 4  ;;  %v2360_v44 = vsel %vm8933_vm5, %v2358_v53, %v2359_v36  ;;  %v8429_v53 = vld [vmem:[%s8588_s22 + $0x288] sm:$0xff] }
 0x8e7   : > { %8228 = vst [vmem:[%s11513_s27 + $0x190] sm:$0xff] %v8112_v21   ;;  %v6385_v6 = vpop.f32.mrf.mxu3  ;;  %v6057_v10 = vadd.f32 %v6056_v37, %v5728_v1  ;;  %v11875_v20 = vpack.c.b16 %v3211_v39, %v3210_v58  ;;  %v2378_v21 = vshrl.u32 %v308_v4, 16 }
 0x8e8   : > { %v5729_v33 = vpop.f32.mrf.mxu1  ;;  %v2363_v31 = vsel %vm8933_vm5, %v2361_v47, %v2362_v30  ;;  %v7152_v30 = vrot.slane %v11881_v2, 9 }
 0x8e9   : > { %v5730_v60 = vadd.f32 %v5729_v33, %v12746_v48  ;;  %v6386_v62 = vadd.f32 %v6385_v6, %v6057_v10  ;;  %v2370_v6 = vrot.slane %v2368_v45, 5  ;;  %v2380_v1 = vrot.slane %v2378_v21, 4  ;;  %v12748_v10 = vld [vmem:[#allocation34_spill] sm:$0xff]  ;;  %v310_v45 = vld [vmem:[%s8588_s22 + $0x2a0] sm:$0xf] }
 0x8ea   : > { %v6716_v61 = vpop.f32.mrf.mxu0  ;;  %v3213_v28 = vunpack.c.l.b16 %v2363_v31 }
 0x8eb   : > { %v6715_v40 = vadd.f32 %v6714_v8, %v6386_v62  ;;  %v2365_v8 = vshrl.u32 %v11881_v2, 16  ;;  %v2388_v2 = vshrl.u32 %v11896_v46, 16 }
 0x8ed   : > { %v2367_v37 = vrot.slane %v2365_v8, 4 }
 0x8ee   : > { %v6058_v22 = vpop.f32.mrf.mxu2 }
 0x8ef   : > { %v6059_v35 = vadd.f32 %v6058_v22, %v5730_v60  ;;  %v6387_v52 = vpop.f32.mrf.mxu3  ;;  %v2371_v48 = vor.u32 %v2370_v6, %v2367_v37 }
 0x8f0   : > { %v5732_v9 = vpop.f32.mrf.mxu1 }
 0x8f1   : > { %v6388_v41 = vadd.f32 %v6387_v52, %v6059_v35  ;;  %v2381_v35 = vor.u32 %v2380_v1, %v2376_v24  ;;  %v2384_v52 = vshll.u32 %v11896_v46, 16  ;;  %v2390_v1 = vrot.slane %v2388_v2, 4 }
 0x8f2   : > { %v6719_v11 = vpop.f32.mrf.mxu0 }
 0x8f3   : > { %v6717_v54 = vadd.f32 %v6716_v61, %v6388_v41  ;;  %5771 = vmatmul.bf16.gmra.mxu1 %v11380_v17  ;;  %6100 = vmatmul.bf16.gmra.mxu2 %v8427_v7  ;;  %v3212_v61 = vunpack.c.l.b16 %v2360_v44  ;;  %v2382_v47 = vrot.slane %v2381_v35, 4  ;;  %v2386_v38 = vrot.slane %v2384_v52, 5 }
 0x8f4   : > { %6429 = vmatmul.bf16.gmra.mxu3 %v11383_v56  ;;  %v12747_v56 = vld [vmem:[#allocation31_spill] sm:$0xff] }
 0x8f5   : > { %6758 = vmatmul.bf16.gmra.mxu0 %v11875_v20  ;;  %v8117_v55 = vpack.c.bf16 %v6717_v54, %v6715_v40  ;;  %v5733_v26 = vadd.f32 %v5732_v9, %v12747_v56  ;;  %v11900_v41 = vpack.c.b16 %v3213_v28, %v3212_v61  ;;  %v2415_v40 = vrot.slane %v308_v4, 5 }
 0x8f6   : > { %v6061_v3 = vpop.f32.mrf.mxu2  ;;  %v2372_v54 = vrot.slane %v2371_v48, 4  ;;  %v2418_v4 = vrot.slane %v11896_v46, 5  ;;  %v2387_v13 = vsel %vm8928_vm4, %v2382_v47, %v2386_v38  ;;  %v2398_v56 = vshrl.u32 %v310_v45, 16  ;;  %v311_v46 = vld [vmem:[%s8588_s22 + $0x2a4] sm:$0x1] }
 0x8f7   : > { %8229 = vst [vmem:[%s11513_s27 + $0x198] sm:$0xff] %v8117_v55   ;;  %v6390_v17 = vpop.f32.mrf.mxu3  ;;  %v6062_v33 = vadd.f32 %v6061_v3, %v5733_v26  ;;  %v2417_v8 = vrot.slane %v2415_v40, 4  ;;  %v3227_v6 = vunpack.c.l.b16 %v2387_v13  ;;  %v2391_v52 = vor.u32 %v2390_v1, %v2386_v38 }
 0x8f8   : > { %v5734_v43 = vpop.f32.mrf.mxu1  ;;  %v2400_v28 = vrot.slane %v2398_v56, 4  ;;  %v2424_v38 = vrot.slane %v311_v46, 5 }
 0x8f9   : > { %v5735_v58 = vadd.f32 %v5734_v43, %v12748_v10  ;;  %v6391_v60 = vadd.f32 %v6390_v17, %v6062_v33  ;;  %v2394_v43 = vshll.u32 %v310_v45, 16  ;;  %v2419_v44 = vsel %vm8933_vm5, %v2417_v8, %v2418_v4 }
 0x8fa   : > { %v6721_v42 = vpop.f32.mrf.mxu0  ;;  %v2420_v8 = vrot.slane %v2418_v4, 4 }
 0x8fb   : > { %v6720_v7 = vadd.f32 %v6719_v11, %v6391_v60  ;;  %v2396_v61 = vrot.slane %v2394_v43, 5  ;;  %v7784_v60 = vld [vmem:[%s8588_s22 + $0x294] sm:$0xff]  ;;  %s7858_s22 = sshll.u32 %s8532_s13, 9  ;;  %s7036_s13 = scalar_lea.sflag [#allocation3], %s134_s25 }
 0x8fc   : > { %s7047_s30 = scalar_lea.hbm %s12001_s2, %s7858_s22 }
 0x8fd   : > { %s7050_s4 = sshll.u32 %s7047_s30, 4  ;;  %s7051_s4 = int_to_ptr.hbm [resolvable:$true] %s7050_s4 }
 0x8fe   : > { %v6063_v39 = vpop.f32.mrf.mxu2  ;;  %s8444_s5 = sshra.s32 %s7051_s4, 4  ;;  %s8445_s5 = int_to_ptr.hbm [resolvable:$true] %s8444_s5 }
 0x8ff   : > { %v6064_v22 = vadd.f32 %v6063_v39, %v5735_v58  ;;  %v6392_v62 = vpop.f32.mrf.mxu3  ;;  %s8446_s6 = scalar_lea.hbm %s8445_s5, 512  ;;  %p8451_p0 = scmp.lt.s32.totalorder %s8445_s5, %s12001_s2 }
 0x900   : > { %v5737_v9 = vpop.f32.mrf.mxu1  ;;  %p8447_p11 = scmp.ne.s32.totalorder %s8445_s5, %s8446_s6  ;;  %p8452_p1 = scmp.lt.s32.totalorder %s8450_s14, %s8446_s6 }
 0x901   : > { %v6393_v49 = vadd.f32 %v6392_v62, %v6064_v22  ;;  %v5738_v26 = vadd.f32 %v5737_v9, %v11376_v34  ;;  %v2401_v9 = vor.u32 %v2400_v28, %v2396_v61 }
 0x902   : > { %v6724_v36 = vpop.f32.mrf.mxu0  ;;  %p8448_p12 = pnand %p8447_p11, %p8549_p5  ;;  %p8453_p2 = por %p8452_p1, %p8451_p0 }
 0x903   : > { %v6722_v55 = vadd.f32 %v6721_v42, %v6393_v49  ;;  %5776 = vmatmul.bf16.gmra.mxu1 %v11404_v32  ;;  %6105 = vmatmul.bf16.gmra.mxu2 %v8429_v53  ;;  %v2377_v32 = vsel %vm8928_vm4, %v2372_v54, %v2376_v24  ;;  %v3235_v24 = vunpack.c.l.b16 %v2419_v44  ;;  %v2404_v49 = vshll.u32 %v311_v46, 16 }
 0x904   : > { %6434 = vmatmul.bf16.gmra.mxu3 %v11407_v5  ;;  %v2416_v5 = vsel %vm8933_vm5, %v7152_v30, %v2415_v40  ;;  %v3226_v37 = vunpack.c.l.b16 %v2377_v32  ;;  %v2402_v47 = vrot.slane %v2401_v9, 4  ;;  %p8449_p13 = pneg %p8448_p12 }
 0x905   : > { %6763 = vmatmul.bf16.gmra.mxu0 %v11900_v41  ;;  %v8122_v3 = vpack.c.bf16 %v6722_v55, %v6720_v7  ;;  %v3234_v33 = vunpack.c.l.b16 %v2416_v5  ;;  %v2421_v7 = vrot.slane %v310_v45, 5  ;;  %v2406_v30 = vrot.slane %v2404_v49, 5 }
 0x906   : > { %v6066_v17 = vpop.f32.mrf.mxu2  ;;  %v3230_v22 = vpack.c.b16 %v3227_v6, %v3226_v37  ;;  %p8454_p3 = pnand %p8453_p2, %p8449_p13 }
 0x907   : > { %8230 = vst [vmem:[%s11513_s27 + $0x1a0] sm:$0xff] %v8122_v3   ;;  %v6395_v11 = vpop.f32.mrf.mxu3  ;;  %v6067_v31 = vadd.f32 %v6066_v17, %v5738_v26  ;;  %v3238_v35 = vpack.c.b16 %v3235_v24, %v3234_v33  ;;  %v2423_v17 = vrot.slane %v2421_v7, 4  ;;  %v2422_v5 = vsel %vm8933_vm5, %v2420_v8, %v2421_v7 }
 0x908   : > { %v5739_v21 = vpop.f32.mrf.mxu1  ;;  %v3236_v26 = vunpack.c.l.b16 %v2422_v5 }
 0x909   : > { %v5740_v10 = vadd.f32 %v5739_v21, %v11388_v59  ;;  %v6396_v39 = vadd.f32 %v6395_v11, %v6067_v31  ;;  %v2392_v59 = vrot.slane %v2391_v52, 4  ;;  %v2407_v21 = vsel %vm8928_vm4, %v2402_v47, %v2406_v30 }
 0x90a   : > { %v6726_v42 = vpop.f32.mrf.mxu0  ;;  %v2425_v4 = vsel %vm8933_vm5, %v2423_v17, %v2424_v38  ;;  %v3229_v56 = vunpack.c.l.b16 %v2407_v21 }
 0x90b   : > { %v6725_v55 = vadd.f32 %v6724_v36, %v6396_v39  ;;  %v2397_v36 = vsel %vm8928_vm4, %v2392_v59, %v2396_v61 }
 0x90c   : > { %v3228_v43 = vunpack.c.l.b16 %v2397_v36 }
 0x90e   : > { %v6068_v58 = vpop.f32.mrf.mxu2  ;;  %v3231_v24 = vpack.c.b16 %v3229_v56, %v3228_v43  ;;  %v12749_v43 = vld [vmem:[#allocation37_spill] sm:$0xff] }
 0x90f   : > { %v6069_v48 = vadd.f32 %v6068_v58, %v5740_v10  ;;  %v6397_v34 = vpop.f32.mrf.mxu3 }
 0x910   : > { %v5742_v62 = vpop.f32.mrf.mxu1 }
 0x911   : > { %v6398_v40 = vadd.f32 %v6397_v34, %v6069_v48 }
 0x912   : > { %v6729_v54 = vpop.f32.mrf.mxu0 }
 0x913   : > { %v6727_v53 = vadd.f32 %v6726_v42, %v6398_v40  ;;  %5781 = vmatmul.bf16.gmra.mxu1 %v11875_v20  ;;  %6110 = vmatmul.bf16.gmra.mxu2 %v7784_v60  ;;  %v5743_v20 = vadd.f32 %v5742_v62, %v11401_v57  ;;  %v3237_v42 = vunpack.c.l.b16 %v2425_v4 }
 0x914   : > { %6439 = vmatmul.bf16.gmra.mxu3 %v3230_v22 }
 0x915   : > { %6768 = vmatmul.bf16.gmra.mxu0 %v3238_v35  ;;  %v8127_v3 = vpack.c.bf16 %v6727_v53, %v6725_v55  ;;  %v3239_v1 = vpack.c.b16 %v3237_v42, %v3236_v26 }
 0x916   : > { %v6071_v11 = vpop.f32.mrf.mxu2 }
 0x917   : > { %8231 = vst [vmem:[%s11513_s27 + $0x1a8] sm:$0xff] %v8127_v3   ;;  %v6400_v32 = vpop.f32.mrf.mxu3  ;;  %v6072_v2 = vadd.f32 %v6071_v11, %v5743_v20 }
 0x918   : > { %v5744_v13 = vpop.f32.mrf.mxu1 }
 0x919   : > { %v5745_v44 = vadd.f32 %v5744_v13, %v11411_v16  ;;  %v6401_v37 = vadd.f32 %v6400_v32, %v6072_v2 }
 0x91a   : > { %v6731_v45 = vpop.f32.mrf.mxu0 }
 0x91b   : > { %v6730_v25 = vadd.f32 %v6729_v54, %v6401_v37 }
 0x91e   : > { %v6073_v31 = vpop.f32.mrf.mxu2 }
 0x91f   : > { %v6074_v57 = vadd.f32 %v6073_v31, %v5745_v44  ;;  %v6402_v6 = vpop.f32.mrf.mxu3 }
 0x920   : > { %v5747_v33 = vpop.f32.mrf.mxu1 }
 0x921   : > { %v6403_v61 = vadd.f32 %v6402_v6, %v6074_v57  ;;  %v5748_v48 = vadd.f32 %v5747_v33, %v11415_v63 }
 0x922   : > { %v6734_v28 = vpop.f32.mrf.mxu0 }
 0x923   : > { %v6732_v10 = vadd.f32 %v6731_v45, %v6403_v61  ;;  %5786 = vmatmul.bf16.gmra.mxu1 %v11900_v41  ;;  %6115 = vmatmul.bf16.gmra.mxu2 %v7785_v50 }
 0x924   : > { %6444 = vmatmul.bf16.gmra.mxu3 %v3231_v24 }
 0x925   : > { %6773 = vmatmul.bf16.gmra.mxu0 %v3239_v1  ;;  %v8132_v46 = vpack.c.bf16 %v6732_v10, %v6730_v25 }
 0x926   : > { %v6076_v16 = vpop.f32.mrf.mxu2 }
 0x927   : > { %8232 = vst [vmem:[%s11513_s27 + $0x1b0] sm:$0xff] %v8132_v46   ;;  %v6405_v58 = vpop.f32.mrf.mxu3  ;;  %v6077_v60 = vadd.f32 %v6076_v16, %v5748_v48  ;;  %v12751_v46 = vld [vmem:[#allocation43_spill] sm:$0xff]  ;;  %v12752_v48 = vld [vmem:[#allocation46_spill] sm:$0xff] }
 0x928   : > { %v5749_v39 = vpop.f32.mrf.mxu1 }
 0x929   : > { %v5750_v22 = vadd.f32 %v5749_v39, %v11420_v27  ;;  %v6406_v35 = vadd.f32 %v6405_v58, %v6077_v60 }
 0x92a   : > { %v6736_v34 = vpop.f32.mrf.mxu0 }
 0x92b   : > { %v6735_v54 = vadd.f32 %v6734_v28, %v6406_v35 }
 0x92e   : > { %v6078_v62 = vpop.f32.mrf.mxu2 }
 0x92f   : > { %v6079_v52 = vadd.f32 %v6078_v62, %v5750_v22  ;;  %v6407_v9 = vpop.f32.mrf.mxu3 }
 0x930   : > { %v5752_v41 = vpop.f32.mrf.mxu1 }
 0x931   : > { %v6408_v49 = vadd.f32 %v6407_v9, %v6079_v52  ;;  %v5753_v63 = vadd.f32 %v5752_v41, %v11425_v18 }
 0x932   : > { %v6739_v40 = vpop.f32.mrf.mxu0 }
 0x933   : > { %v6737_v7 = vadd.f32 %v6736_v34, %v6408_v49 }
 0x935   : > { %v8137_v55 = vpack.c.bf16 %v6737_v7, %v6735_v54 }
 0x936   : > { %v6081_v53 = vpop.f32.mrf.mxu2 }
 0x937   : > { %8233 = vst [vmem:[%s11513_s27 + $0x1b8] sm:$0xff] %v8137_v55   ;;  %v6410_v59 = vpop.f32.mrf.mxu3  ;;  %v6082_v3 = vadd.f32 %v6081_v53, %v5753_v63 }
 0x938   : > { %v5754_v47 = vpop.f32.mrf.mxu1 }
 0x939   : > { %v5755_v27 = vadd.f32 %v5754_v47, %v11430_v12  ;;  %v6411_v17 = vadd.f32 %v6410_v59, %v6082_v3  ;;  %v12750_v12 = vld [vmem:[#allocation40_spill] sm:$0xff]  ;;  %v12753_v59 = vld [vmem:[#allocation49_spill] sm:$0xff] }
 0x93a   : > { %v6741_v30 = vpop.f32.mrf.mxu0  ;;  %v12754_v3 = vld [vmem:[#allocation52_spill] sm:$0xff] }
 0x93b   : > { %v6740_v20 = vadd.f32 %v6739_v40, %v6411_v17 }
 0x93e   : > { %v6083_v8 = vpop.f32.mrf.mxu2 }
 0x93f   : > { %v6084_v38 = vadd.f32 %v6083_v8, %v5755_v27  ;;  %v6412_v11 = vpop.f32.mrf.mxu3 }
 0x940   : > { %v5757_v32 = vpop.f32.mrf.mxu1 }
 0x941   : > { %v6413_v13 = vadd.f32 %v6412_v11, %v6084_v38  ;;  %v5758_v18 = vadd.f32 %v5757_v32, %v12749_v43 }
 0x942   : > { %v6744_v36 = vpop.f32.mrf.mxu0 }
 0x943   : > { %v6742_v45 = vadd.f32 %v6741_v30, %v6413_v13 }
 0x945   : > { %v8142_v21 = vpack.c.bf16 %v6742_v45, %v6740_v20 }
 0x946   : > { %v6086_v5 = vpop.f32.mrf.mxu2 }
 0x947   : > { %8234 = vst [vmem:[%s11513_s27 + $0x1c0] sm:$0xff] %v8142_v21   ;;  %v6415_v4 = vpop.f32.mrf.mxu3  ;;  %v6087_v26 = vadd.f32 %v6086_v5, %v5758_v18 }
 0x948   : > { %v5759_v2 = vpop.f32.mrf.mxu1 }
 0x949   : > { %v5760_v42 = vadd.f32 %v5759_v2, %v12750_v12  ;;  %v6416_v31 = vadd.f32 %v6415_v4, %v6087_v26 }
 0x94a   : > { %v6746_v56 = vpop.f32.mrf.mxu0 }
 0x94b   : > { %v6745_v24 = vadd.f32 %v6744_v36, %v6416_v31 }
 0x94e   : > { %v6088_v44 = vpop.f32.mrf.mxu2 }
 0x94f   : > { %v6089_v37 = vadd.f32 %v6088_v44, %v5760_v42  ;;  %v6417_v57 = vpop.f32.mrf.mxu3 }
 0x950   : > { %v5762_v6 = vpop.f32.mrf.mxu1 }
 0x951   : > { %v6418_v50 = vadd.f32 %v6417_v57, %v6089_v37  ;;  %v5763_v16 = vadd.f32 %v5762_v6, %v12751_v46 }
 0x952   : > { %v6749_v33 = vpop.f32.mrf.mxu0 }
 0x953   : > { %v6747_v1 = vadd.f32 %v6746_v56, %v6418_v50 }
 0x955   : > { %v8147_v61 = vpack.c.bf16 %v6747_v1, %v6745_v24 }
 0x956   : > { %v6091_v28 = vpop.f32.mrf.mxu2 }
 0x957   : > { %8235 = vst [vmem:[%s11513_s27 + $0x1c8] sm:$0xff] %v8147_v61   ;;  %v6420_v25 = vpop.f32.mrf.mxu3  ;;  %v6092_v39 = vadd.f32 %v6091_v28, %v5763_v16 }
 0x958   : > { %v5764_v10 = vpop.f32.mrf.mxu1 }
 0x959   : > { %v5765_v34 = vadd.f32 %v5764_v10, %v12752_v48  ;;  %v6421_v22 = vadd.f32 %v6420_v25, %v6092_v39 }
 0x95a   : > { %v6751_v58 = vpop.f32.mrf.mxu0 }
 0x95b   : > { %v6750_v49 = vadd.f32 %v6749_v33, %v6421_v22 }
 0x95e   : > { %v6093_v60 = vpop.f32.mrf.mxu2 }
 0x95f   : > { %v6094_v62 = vadd.f32 %v6093_v60, %v5765_v34  ;;  %v6422_v35 = vpop.f32.mrf.mxu3 }
 0x960   : > { %v5767_v52 = vpop.f32.mrf.mxu1 }
 0x961   : > { %v6423_v9 = vadd.f32 %v6422_v35, %v6094_v62  ;;  %v5768_v47 = vadd.f32 %v5767_v52, %v12753_v59 }
 0x962   : > { %v6754_v41 = vpop.f32.mrf.mxu0 }
 0x963   : > { %v6752_v40 = vadd.f32 %v6751_v58, %v6423_v9 }
 0x965   : > { %v8152_v54 = vpack.c.bf16 %v6752_v40, %v6750_v49 }
 0x966   : > { %v6096_v7 = vpop.f32.mrf.mxu2 }
 0x967   : > { %8236 = vst [vmem:[%s11513_s27 + $0x1d0] sm:$0xff] %v8152_v54   ;;  %v6425_v55 = vpop.f32.mrf.mxu3  ;;  %v6097_v30 = vadd.f32 %v6096_v7, %v5768_v47 }
 0x968   : > { %v5769_v53 = vpop.f32.mrf.mxu1 }
 0x969   : > { %v5770_v27 = vadd.f32 %v5769_v53, %v12754_v3  ;;  %v6426_v17 = vadd.f32 %v6425_v55, %v6097_v30 }
 0x96a   : > { %v6756_v63 = vpop.f32.mrf.mxu0 }
 0x96b   : > { %v6755_v20 = vadd.f32 %v6754_v41, %v6426_v17 }
 0x96e   : > { %v6098_v8 = vpop.f32.mrf.mxu2 }
 0x96f   : > { %v6099_v38 = vadd.f32 %v6098_v8, %v5770_v27  ;;  %v6427_v11 = vpop.f32.mrf.mxu3 }
 0x970   : > { %v5772_v32 = vpop.f32.mrf.mxu1 }
 0x971   : > { %v6428_v13 = vadd.f32 %v6427_v11, %v6099_v38  ;;  %v5773_v43 = vadd.f32 %v5772_v32, %v11465_v51  ;;  %v12755_v11 = vld [vmem:[#allocation65_spill] sm:$0xff] }
 0x972   : > { %v6759_v36 = vpop.f32.mrf.mxu0 }
 0x973   : > { %v6757_v45 = vadd.f32 %v6756_v63, %v6428_v13 }
 0x975   : > { %v8157_v21 = vpack.c.bf16 %v6757_v45, %v6755_v20 }
 0x976   : > { %v6101_v5 = vpop.f32.mrf.mxu2 }
 0x977   : > { %8237 = vst [vmem:[%s11513_s27 + $0x1d8] sm:$0xff] %v8157_v21   ;;  %v6430_v4 = vpop.f32.mrf.mxu3  ;;  %v6102_v56 = vadd.f32 %v6101_v5, %v5773_v43 }
 0x978   : > { %v5774_v2 = vpop.f32.mrf.mxu1 }
 0x979   : > { %v5775_v26 = vadd.f32 %v5774_v2, %v11470_v14  ;;  %v6431_v42 = vadd.f32 %v6430_v4, %v6102_v56 }
 0x97a   : > { %v6761_v18 = vpop.f32.mrf.mxu0 }
 0x97b   : > { %v6760_v50 = vadd.f32 %v6759_v36, %v6431_v42 }
 0x97e   : > { %v6103_v12 = vpop.f32.mrf.mxu2 }
 0x97f   : > { %v6104_v44 = vadd.f32 %v6103_v12, %v5775_v26  ;;  %v6432_v31 = vpop.f32.mrf.mxu3 }
 0x980   : > { %v5777_v37 = vpop.f32.mrf.mxu1 }
 0x981   : > { %v6433_v57 = vadd.f32 %v6432_v31, %v6104_v44  ;;  %v5778_v51 = vadd.f32 %v5777_v37, %v11475_v29 }
 0x982   : > { %v6764_v6 = vpop.f32.mrf.mxu0 }
 0x983   : > { %v6762_v33 = vadd.f32 %v6761_v18, %v6433_v57 }
 0x985   : > { %v8162_v24 = vpack.c.bf16 %v6762_v33, %v6760_v50 }
 0x986   : > { %v6106_v1 = vpop.f32.mrf.mxu2 }
 0x987   : > { %8238 = vst [vmem:[%s11513_s27 + $0x1e0] sm:$0xff] %v8162_v24   ;;  %v6435_v61 = vpop.f32.mrf.mxu3  ;;  %v6107_v10 = vadd.f32 %v6106_v1, %v5778_v51 }
 0x988   : > { %v5779_v28 = vpop.f32.mrf.mxu1 }
 0x989   : > { %v5780_v14 = vadd.f32 %v5779_v28, %v11480_v0  ;;  %v6436_v16 = vadd.f32 %v6435_v61, %v6107_v10 }
 0x98a   : > { %v6766_v25 = vpop.f32.mrf.mxu0 }
 0x98b   : > { %v6765_v60 = vadd.f32 %v6764_v6, %v6436_v16 }
 0x98e   : > { %v6108_v46 = vpop.f32.mrf.mxu2 }
 0x98f   : > { %v6109_v58 = vadd.f32 %v6108_v46, %v5780_v14  ;;  %v6437_v39 = vpop.f32.mrf.mxu3 }
 0x990   : > { %v5782_v48 = vpop.f32.mrf.mxu1 }
 0x991   : > { %v6438_v34 = vadd.f32 %v6437_v39, %v6109_v58  ;;  %v5783_v29 = vadd.f32 %v5782_v48, %v11485_v19 }
 0x992   : > { %v6769_v62 = vpop.f32.mrf.mxu0 }
 0x993   : > { %v6767_v22 = vadd.f32 %v6766_v25, %v6438_v34 }
 0x995   : > { %v8167_v35 = vpack.c.bf16 %v6767_v22, %v6765_v60 }
 0x996   : > { %v6111_v52 = vpop.f32.mrf.mxu2 }
 0x997   : > { %8239 = vst [vmem:[%s11513_s27 + $0x1e8] sm:$0xff] %v8167_v35   ;;  %v6440_v9 = vpop.f32.mrf.mxu3  ;;  %v6112_v49 = vadd.f32 %v6111_v52, %v5783_v29 }
 0x998   : > { %v5784_v41 = vpop.f32.mrf.mxu1 }
 0x999   : > { %v5785_v0 = vadd.f32 %v5784_v41, %v11490_v15  ;;  %v6441_v7 = vadd.f32 %v6440_v9, %v6112_v49 }
 0x99a   : > { %v6771_v40 = vpop.f32.mrf.mxu0 }
 0x99b   : > { %v6770_v63 = vadd.f32 %v6769_v62, %v6441_v7 }
 0x99e   : > { %v6113_v54 = vpop.f32.mrf.mxu2 }
 0x99f   : > { %v6114_v55 = vadd.f32 %v6113_v54, %v5785_v0  ;;  %v6442_v53 = vpop.f32.mrf.mxu3 }
 0x9a0   : > { %v5787_v59 = vpop.f32.mrf.mxu1 }
 0x9a1   : > { %v6443_v47 = vadd.f32 %v6442_v53, %v6114_v55  ;;  %v5788_v19 = vadd.f32 %v5787_v59, %v11495_v23 }
 0x9a2   : > { %v6774_v17 = vpop.f32.mrf.mxu0 }
 0x9a3   : > { %v6772_v30 = vadd.f32 %v6771_v40, %v6443_v47 }
 0x9a5   : > { %v8172_v3 = vpack.c.bf16 %v6772_v30, %v6770_v63 }
 0x9a6   : > { %v6116_v27 = vpop.f32.mrf.mxu2 }
 0x9a7   : > { %8240 = vst [vmem:[%s11513_s27 + $0x1f0] sm:$0xff] %v8172_v3   ;;  %v6445_v8 = vpop.f32.mrf.mxu3  ;;  %v6117_v15 = vadd.f32 %v6116_v27, %v5788_v19 }
 0x9a8   : > { %v5789_v38 = vpop.f32.mrf.mxu1 }
 0x9a9   : > { %v5790_v32 = vadd.f32 %v5789_v38, %v12755_v11  ;;  %v6446_v36 = vadd.f32 %v6445_v8, %v6117_v15 }
 0x9aa   : > { %v6776_v23 = vpop.f32.mrf.mxu0 }
 0x9ab   : > { %v6775_v5 = vadd.f32 %v6774_v17, %v6446_v36 }
 0x9ae   : > { %v6118_v13 = vpop.f32.mrf.mxu2 }
 0x9af   : > { %v6119_v20 = vadd.f32 %v6118_v13, %v5790_v32  ;;  %v6447_v45 = vpop.f32.mrf.mxu3 }
 0x9b1   : > { %v6448_v21 = vadd.f32 %v6447_v45, %v6119_v20 }
 0x9b3   : > { %v6777_v4 = vadd.f32 %v6776_v23, %v6448_v21 }
 0x9b5   : > { %v8177_v2 = vpack.c.bf16 %v6777_v4, %v6775_v5 }
 0x9b7   : > { %8241 = vst [vmem:[%s11513_s27 + $0x1f8] sm:$0xff] %v8177_v2  }
 0x9b8   : > { %8457 = shalt.err (!%p8454_p3)
}
 0x9b9   : > { %s8494_s21 = smov 64   ;;  %s8495_s23 = smov 4  }
 0x9ba   : > { %8267 = dma.vmem_to_hbm [thread:$0]  (%p8549_p5), %s7049_s3, 8192, %s7051_s4, %s7036_s13, %s8494_s21, %s8494_s21, %s8495_s23  }
 0x9bb PF: > { %p8273_p4 = scmp.ge.s32.totalorder %s8492_s12, 2  ;;  %s7065_s24 = sand.u32 1, %s8480_s9  }
 0x9bc   : > { %s7066_s25 = scalar_lea.sflag [#allocation3], %s7065_s24 }
 0x9bd   : > { %p8270_p7 = pnand %p8273_p4, %p8553_p6 }
 0x9bf   : > { %p8271_p8 = pneg %p8270_p7 }
 0x9c1   : > { %8475 = dma.done.wait (%p8271_p8), %s7066_s25, 8192  }
 0x9c2   : > { %8477 = vsyncadd (%p8271_p8), %s7066_s25, 4294959104  ;;  %p12_p9 = scmp.ge.s32.totalorder %s8536_s15, 4   ;;  %s12756_s9 = smov %s8484_s10 }
 0x9c3   : > { %s12757_s10 = smov %s8488_s11  ;;  %s12758_s11 = smov %s8547_s18 }
 0x9c4   : > { %s12759_s12 = smov %s8536_s15  ;;  %14 = sbr.rel (!%p12_p9) target bundleno = 3 (0x3), region = 63 }
 0x9c9   :  { %7072 = vsyncpa [#allocation3], 1 }
 0x9ca   :  { %7074 = vsyncpa [#allocation3 + $0x1], 1 }

</bundles_post_ra>
